<compile_context>
chip_gen: v6e
topology: v6e:2x2x1
jax: 0.10.0
libtpu: 0.0.40
codegen_flags: <defaults>
</compile_context>

<pallas_src>
import functools
import math

import jax
import jax.numpy as jnp
from jax import lax
from jax.experimental import pallas as pl
from jax.experimental.pallas import tpu as pltpu


PER_LAYER_TENSORS = 26  # number of weight arrays passed per decoder layer


# ---------------------------------------------------------------------------
# Fused whole-model kernel (one grid step processes a batch-block of BB rows)
# ---------------------------------------------------------------------------

def fused_model_kernel(num_layers, num_heads, x_ref, bank_ref, *refs):
    out_ref = refs[-1]
    wrefs = refs[:-1]
    it = iter(wrefs)

    def nxt():
        return next(it)

    BB, S, D = x_ref.shape          # batch-block, query seq, model dim
    _, Sb, _ = bank_ref.shape       # memory seq
    H = num_heads
    dh = D // H
    scale = 1.0 / math.sqrt(dh)
    bf16 = jnp.bfloat16

    def linear(x16, w_ref, b_ref):
        # x16: bf16 [N, din]; w: bf16 [din, dout]; b: f32 [1, dout] -> f32 [N, dout]
        return (jnp.dot(x16, w_ref[...], preferred_element_type=jnp.float32)
                + b_ref[...])

    def attention(q_in, kv_in, Sq, Sk, wq, bq, wk, bk, wv, bv, wo, bo):
        # q_in: f32 [BB*Sq, D], kv_in: f32 [BB*Sk, D]
        # Full-width projections (lane-dense [D,D] weights, bf16 MXU inputs).
        q = linear(q_in.astype(bf16), wq, bq) * scale          # [BB*Sq, D]
        k = linear(kv_in.astype(bf16), wk, bk)                  # [BB*Sk, D]
        v = linear(kv_in.astype(bf16), wv, bv)                  # [BB*Sk, D]
        q16, k16, v16 = q.astype(bf16), k.astype(bf16), v.astype(bf16)

        ctx_rows = []
        for b in range(BB):                                     # static batch loop
            qb = q16[b * Sq:(b + 1) * Sq, :]                    # [Sq, D]
            kb = k16[b * Sk:(b + 1) * Sk, :]                    # [Sk, D]
            vb = v16[b * Sk:(b + 1) * Sk, :]
            heads = []
            for h in range(H):                                  # logical head split
                lo, hi = h * dh, (h + 1) * dh
                qh = qb[:, lo:hi]                               # [Sq, dh] bf16
                kh = kb[:, lo:hi]                               # [Sk, dh] bf16
                vh = vb[:, lo:hi]                               # [Sk, dh] bf16
                # scores = q @ k^T, bf16 operands, f32 accumulation
                s = lax.dot_general(qh, kh, (((1,), (1,)), ((), ())),
                                    preferred_element_type=jnp.float32)
                m = jnp.max(s, axis=-1, keepdims=True)
                p = jnp.exp(s - m)
                denom = jnp.sum(p, axis=-1, keepdims=True)
                p = p * pl.reciprocal(denom, approx=True)
                heads.append(jnp.dot(p.astype(bf16), vh,
                                     preferred_element_type=jnp.float32))  # [Sq, dh]
            ctx_rows.append(jnp.concatenate(heads, axis=-1))    # [Sq, D]
        ctx = jnp.concatenate(ctx_rows, axis=0)                 # [BB*Sq, D]
        # Single full-width output projection merges the heads.
        return linear(ctx.astype(bf16), wo, bo)

    def add_ln(x, r, g, b):
        # residual add + LayerNorm over last dim, f32 (eps = 1e-5)
        y = x + r
        mu = jnp.mean(y, axis=-1, keepdims=True)
        var = jnp.mean(jnp.square(y - mu), axis=-1, keepdims=True)
        return (y - mu) * lax.rsqrt(var + 1e-5) * g[...] + b[...]

    def ffn(x, w1, b1, w2, b2):
        h = jnp.maximum(linear(x.astype(bf16), w1, b1), 0.0)
        return linear(h.astype(bf16), w2, b2)

    # Flatten batch into the row dim for all per-row ops (projections/FFN/LN).
    x = x_ref[...].reshape(BB * S, D).astype(jnp.float32)
    bank = bank_ref[...].reshape(BB * Sb, D).astype(jnp.float32)

    for _ in range(num_layers):
        (sa_wq, sa_bq, sa_wk, sa_bk, sa_wv, sa_bv, sa_wo, sa_bo,
         ca_wq, ca_bq, ca_wk, ca_bk, ca_wv, ca_bv, ca_wo, ca_bo,
         w1, b1, w2, b2,
         ln1_g, ln1_b, ln2_g, ln2_b, ln3_g, ln3_b) = [
             nxt() for _ in range(PER_LAYER_TENSORS)]

        sa = attention(x, x, S, S,
                       sa_wq, sa_bq, sa_wk, sa_bk, sa_wv, sa_bv, sa_wo, sa_bo)
        x = add_ln(x, sa, ln1_g, ln1_b)
        ca = attention(x, bank, S, Sb,
                       ca_wq, ca_bq, ca_wk, ca_bk, ca_wv, ca_bv, ca_wo, ca_bo)
        x = add_ln(x, ca, ln2_g, ln2_b)
        ff = ffn(x, w1, b1, w2, b2)
        x = add_ln(x, ff, ln3_g, ln3_b)

    # Final Linear(D, 1) as VPU multiply + lane reduction -> lane-dense [BB, S].
    dec_w = nxt()                                   # [1, D] f32
    dec_b = nxt()                                   # [1, 1] f32
    x3 = x.reshape(BB, S, D)
    r = jnp.sum(x3 * dec_w[...], axis=-1)           # [BB, S]
    out_ref[...] = (r + dec_b[...]).astype(out_ref.dtype)


# ---------------------------------------------------------------------------
# Host-side wrapper: one pallas_call for the entire model
# ---------------------------------------------------------------------------

def _flatten_layer(lp):
    sa, ca = lp['self_attn'], lp['cross_attn']
    return [
        sa['wq'], sa['bq'], sa['wk'], sa['bk'], sa['wv'], sa['bv'], sa['wo'], sa['bo'],
        ca['wq'], ca['bq'], ca['wk'], ca['bk'], ca['wv'], ca['bv'], ca['wo'], ca['bo'],
        lp['w1'], lp['b1'], lp['w2'], lp['b2'],
        lp['ln1_g'], lp['ln1_b'], lp['ln2_g'], lp['ln2_b'], lp['ln3_g'], lp['ln3_b'],
    ]


def flatten_params(params):
    flat = []
    for lp in params['layers']:
        flat += _flatten_layer(lp)
    flat += [params['dec_w'], params['dec_b']]
    return flat


def st_transformer_decoder(x, bank, params, num_layers, num_heads, batch_grid=1):
    """batch_grid=1: batch fully folded into the kernel (best for single-TC
    v5e/v6e). On v7x pass batch_grid=2 so the "parallel" grid axis splits the
    batch across both TensorCores."""
    B, S, D = x.shape
    Sb = bank.shape[1]
    assert B % batch_grid == 0
    BB = B // batch_grid
    flat = flatten_params(params)

    def _nbytes(a):
        return a.size * a.dtype.itemsize

    # Explicit scoped-VMEM budget: resident weights + I/O blocks + headroom
    # for activations / compiler temporaries (defaults are 16/32 MiB, not the
    # physical 128/64 MiB).
    resident = _nbytes(x) + _nbytes(bank) + sum(_nbytes(w) for w in flat) + B * S * 4
    vmem_limit = min(int(3 * resident) + (16 << 20), 96 << 20)

    kernel = functools.partial(fused_model_kernel, num_layers, num_heads)
    out = pl.pallas_call(
        kernel,
        out_shape=jax.ShapeDtypeStruct((batch_grid, BB, S), jnp.float32),
        grid=(batch_grid,),
        in_specs=(
            [pl.BlockSpec((BB, S, D), lambda g: (g, 0, 0)),
             pl.BlockSpec((BB, Sb, D), lambda g: (g, 0, 0))]
            # Grid-invariant weight refs: whole-array VMEM residents (not
            # pipelined / double-buffered per grid step).
            + [pl.BlockSpec(memory_space=pltpu.MemorySpace.VMEM) for _ in flat]
        ),
        out_specs=pl.BlockSpec((pl.Squeezed(), BB, S), lambda g: (g, 0, 0)),
        compiler_params=pltpu.CompilerParams(
            dimension_semantics=("parallel",),
            vmem_limit_bytes=vmem_limit),
    )(x, bank, *flat)
    # Match the PyTorch module's [B, S, 1] output (free XLA reshape).
    return out.reshape(B, S, 1)


# ---------------------------------------------------------------------------
# Deterministic parameter init (lane-dense [din,dout] bf16 weights, f32 biases)
# NOTE: layout is [din, dout] applied as x @ W; porting real nn.Linear weights
# (stored [out, in]) requires a transpose at load time.
# ---------------------------------------------------------------------------

def _dense(key, din, dout, w_dtype):
    k1, k2 = jax.random.split(key)
    w = (jax.random.normal(k1, (din, dout), jnp.float32)
         * (1.0 / math.sqrt(din))).astype(w_dtype)
    b = jax.random.normal(k2, (1, dout), jnp.float32) * 0.02
    return w, b


def _attn_params(key, d, w_dtype):
    ks = jax.random.split(key, 4)
    wq, bq = _dense(ks[0], d, d, w_dtype)
    wk, bk = _dense(ks[1], d, d, w_dtype)
    wv, bv = _dense(ks[2], d, d, w_dtype)
    wo, bo = _dense(ks[3], d, d, w_dtype)
    return dict(wq=wq, bq=bq, wk=wk, bk=bk, wv=wv, bv=bv, wo=wo, bo=bo)


def init_params(key, model_dim, num_layers, num_heads, ffn_dim,
                w_dtype=jnp.bfloat16):
    del num_heads  # heads are split logically inside the kernel
    params = {'layers': []}
    keys = jax.random.split(key, num_layers + 1)
    ones = jnp.ones((1, model_dim), jnp.float32)
    zeros = jnp.zeros((1, model_dim), jnp.float32)
    for li in range(num_layers):
        ks = jax.random.split(keys[li], 4)
        w1, b1 = _dense(ks[2], model_dim, ffn_dim, w_dtype)
        w2, b2 = _dense(ks[3], ffn_dim, model_dim, w_dtype)
        layer = dict(
            self_attn=_attn_params(ks[0], model_dim, w_dtype),
            cross_attn=_attn_params(ks[1], model_dim, w_dtype),
            w1=w1, b1=b1, w2=w2, b2=b2,
            ln1_g=ones, ln1_b=zeros,
            ln2_g=ones, ln2_b=zeros,
            ln3_g=ones, ln3_b=zeros,
        )
        params['layers'].append(layer)
    kd1, kd2 = jax.random.split(keys[-1])
    params['dec_w'] = (jax.random.normal(kd1, (1, model_dim), jnp.float32)
                       * (1.0 / math.sqrt(model_dim)))
    params['dec_b'] = jax.random.normal(kd2, (1, 1), jnp.float32) * 0.02
    return params


# ---------------------------------------------------------------------------
# Main
# ---------------------------------------------------------------------------

if __name__ == "__main__":
    MODEL_DIM = 32
    NUM_LAYERS = 2
    NUM_HEADS = 4
    FFN_DIM = 4 * MODEL_DIM
    B, S, S_BANK = 2, 8, 16
    assert MODEL_DIM % NUM_HEADS == 0

    key = jax.random.PRNGKey(0)
    k_param, k_x, k_bank = jax.random.split(key, 3)

    params = init_params(k_param, MODEL_DIM, NUM_LAYERS, NUM_HEADS, FFN_DIM)
    x = jax.random.normal(k_x, (B, S, MODEL_DIM), jnp.float32)
    bank = jax.random.normal(k_bank, (B, S_BANK, MODEL_DIM), jnp.float32)

    out = st_transformer_decoder(x, bank, params, NUM_LAYERS, NUM_HEADS)
    out = jax.block_until_ready(out)
    assert out.shape == (B, S, 1), out.shape
    print("KERNEL_OK")
</pallas_src>

<mosaic_0001>
module attributes {stable_mosaic.version = 11 : i64} {
  func.func @fused_model_kernel(%arg0: i32, %arg1: memref<2x8x32xf32, #tpu.memory_space<vmem>>, %arg2: memref<2x16x32xf32, #tpu.memory_space<vmem>>, %arg3: memref<32x32xbf16, #tpu.memory_space<vmem>>, %arg4: memref<1x32xf32, #tpu.memory_space<vmem>>, %arg5: memref<32x32xbf16, #tpu.memory_space<vmem>>, %arg6: memref<1x32xf32, #tpu.memory_space<vmem>>, %arg7: memref<32x32xbf16, #tpu.memory_space<vmem>>, %arg8: memref<1x32xf32, #tpu.memory_space<vmem>>, %arg9: memref<32x32xbf16, #tpu.memory_space<vmem>>, %arg10: memref<1x32xf32, #tpu.memory_space<vmem>>, %arg11: memref<32x32xbf16, #tpu.memory_space<vmem>>, %arg12: memref<1x32xf32, #tpu.memory_space<vmem>>, %arg13: memref<32x32xbf16, #tpu.memory_space<vmem>>, %arg14: memref<1x32xf32, #tpu.memory_space<vmem>>, %arg15: memref<32x32xbf16, #tpu.memory_space<vmem>>, %arg16: memref<1x32xf32, #tpu.memory_space<vmem>>, %arg17: memref<32x32xbf16, #tpu.memory_space<vmem>>, %arg18: memref<1x32xf32, #tpu.memory_space<vmem>>, %arg19: memref<32x128xbf16, #tpu.memory_space<vmem>>, %arg20: memref<1x128xf32, #tpu.memory_space<vmem>>, %arg21: memref<128x32xbf16, #tpu.memory_space<vmem>>, %arg22: memref<1x32xf32, #tpu.memory_space<vmem>>, %arg23: memref<1x32xf32, #tpu.memory_space<vmem>>, %arg24: memref<1x32xf32, #tpu.memory_space<vmem>>, %arg25: memref<1x32xf32, #tpu.memory_space<vmem>>, %arg26: memref<1x32xf32, #tpu.memory_space<vmem>>, %arg27: memref<1x32xf32, #tpu.memory_space<vmem>>, %arg28: memref<1x32xf32, #tpu.memory_space<vmem>>, %arg29: memref<32x32xbf16, #tpu.memory_space<vmem>>, %arg30: memref<1x32xf32, #tpu.memory_space<vmem>>, %arg31: memref<32x32xbf16, #tpu.memory_space<vmem>>, %arg32: memref<1x32xf32, #tpu.memory_space<vmem>>, %arg33: memref<32x32xbf16, #tpu.memory_space<vmem>>, %arg34: memref<1x32xf32, #tpu.memory_space<vmem>>, %arg35: memref<32x32xbf16, #tpu.memory_space<vmem>>, %arg36: memref<1x32xf32, #tpu.memory_space<vmem>>, %arg37: memref<32x32xbf16, #tpu.memory_space<vmem>>, %arg38: memref<1x32xf32, #tpu.memory_space<vmem>>, %arg39: memref<32x32xbf16, #tpu.memory_space<vmem>>, %arg40: memref<1x32xf32, #tpu.memory_space<vmem>>, %arg41: memref<32x32xbf16, #tpu.memory_space<vmem>>, %arg42: memref<1x32xf32, #tpu.memory_space<vmem>>, %arg43: memref<32x32xbf16, #tpu.memory_space<vmem>>, %arg44: memref<1x32xf32, #tpu.memory_space<vmem>>, %arg45: memref<32x128xbf16, #tpu.memory_space<vmem>>, %arg46: memref<1x128xf32, #tpu.memory_space<vmem>>, %arg47: memref<128x32xbf16, #tpu.memory_space<vmem>>, %arg48: memref<1x32xf32, #tpu.memory_space<vmem>>, %arg49: memref<1x32xf32, #tpu.memory_space<vmem>>, %arg50: memref<1x32xf32, #tpu.memory_space<vmem>>, %arg51: memref<1x32xf32, #tpu.memory_space<vmem>>, %arg52: memref<1x32xf32, #tpu.memory_space<vmem>>, %arg53: memref<1x32xf32, #tpu.memory_space<vmem>>, %arg54: memref<1x32xf32, #tpu.memory_space<vmem>>, %arg55: memref<1x32xf32, #tpu.memory_space<vmem>>, %arg56: memref<1x1xf32, #tpu.memory_space<vmem>>, %arg57: memref<1x2x8xf32, #tpu.memory_space<vmem>>) attributes {dimension_semantics = [#tpu.dimension_semantics<parallel>], iteration_bounds = array<i64: 1>, scalar_prefetch = 0 : i64, scratch_operands = 0 : i64, tpu.core_type = #tpu.core_type<tc>, window_params = [{transform_indices = @transform_0, window_bounds = array<i64: 2, 8, 32>}, {transform_indices = @transform_1, window_bounds = array<i64: 2, 16, 32>}, {pipeline_mode = #tpu.pipeline_mode<synchronous>, transform_indices = @transform_2, window_bounds = array<i64: 32, 32>}, {pipeline_mode = #tpu.pipeline_mode<synchronous>, transform_indices = @transform_3, window_bounds = array<i64: 1, 32>}, {pipeline_mode = #tpu.pipeline_mode<synchronous>, transform_indices = @transform_4, window_bounds = array<i64: 32, 32>}, {pipeline_mode = #tpu.pipeline_mode<synchronous>, transform_indices = @transform_5, window_bounds = array<i64: 1, 32>}, {pipeline_mode = #tpu.pipeline_mode<synchronous>, transform_indices = @transform_6, window_bounds = array<i64: 32, 32>}, {pipeline_mode = #tpu.pipeline_mode<synchronous>, transform_indices = @transform_7, window_bounds = array<i64: 1, 32>}, {pipeline_mode = #tpu.pipeline_mode<synchronous>, transform_indices = @transform_8, window_bounds = array<i64: 32, 32>}, {pipeline_mode = #tpu.pipeline_mode<synchronous>, transform_indices = @transform_9, window_bounds = array<i64: 1, 32>}, {pipeline_mode = #tpu.pipeline_mode<synchronous>, transform_indices = @transform_10, window_bounds = array<i64: 32, 32>}, {pipeline_mode = #tpu.pipeline_mode<synchronous>, transform_indices = @transform_11, window_bounds = array<i64: 1, 32>}, {pipeline_mode = #tpu.pipeline_mode<synchronous>, transform_indices = @transform_12, window_bounds = array<i64: 32, 32>}, {pipeline_mode = #tpu.pipeline_mode<synchronous>, transform_indices = @transform_13, window_bounds = array<i64: 1, 32>}, {pipeline_mode = #tpu.pipeline_mode<synchronous>, transform_indices = @transform_14, window_bounds = array<i64: 32, 32>}, {pipeline_mode = #tpu.pipeline_mode<synchronous>, transform_indices = @transform_15, window_bounds = array<i64: 1, 32>}, {pipeline_mode = #tpu.pipeline_mode<synchronous>, transform_indices = @transform_16, window_bounds = array<i64: 32, 32>}, {pipeline_mode = #tpu.pipeline_mode<synchronous>, transform_indices = @transform_17, window_bounds = array<i64: 1, 32>}, {pipeline_mode = #tpu.pipeline_mode<synchronous>, transform_indices = @transform_18, window_bounds = array<i64: 32, 128>}, {pipeline_mode = #tpu.pipeline_mode<synchronous>, transform_indices = @transform_19, window_bounds = array<i64: 1, 128>}, {pipeline_mode = #tpu.pipeline_mode<synchronous>, transform_indices = @transform_20, window_bounds = array<i64: 128, 32>}, {pipeline_mode = #tpu.pipeline_mode<synchronous>, transform_indices = @transform_21, window_bounds = array<i64: 1, 32>}, {pipeline_mode = #tpu.pipeline_mode<synchronous>, transform_indices = @transform_22, window_bounds = array<i64: 1, 32>}, {pipeline_mode = #tpu.pipeline_mode<synchronous>, transform_indices = @transform_23, window_bounds = array<i64: 1, 32>}, {pipeline_mode = #tpu.pipeline_mode<synchronous>, transform_indices = @transform_24, window_bounds = array<i64: 1, 32>}, {pipeline_mode = #tpu.pipeline_mode<synchronous>, transform_indices = @transform_25, window_bounds = array<i64: 1, 32>}, {pipeline_mode = #tpu.pipeline_mode<synchronous>, transform_indices = @transform_26, window_bounds = array<i64: 1, 32>}, {pipeline_mode = #tpu.pipeline_mode<synchronous>, transform_indices = @transform_27, window_bounds = array<i64: 1, 32>}, {pipeline_mode = #tpu.pipeline_mode<synchronous>, transform_indices = @transform_28, window_bounds = array<i64: 32, 32>}, {pipeline_mode = #tpu.pipeline_mode<synchronous>, transform_indices = @transform_29, window_bounds = array<i64: 1, 32>}, {pipeline_mode = #tpu.pipeline_mode<synchronous>, transform_indices = @transform_30, window_bounds = array<i64: 32, 32>}, {pipeline_mode = #tpu.pipeline_mode<synchronous>, transform_indices = @transform_31, window_bounds = array<i64: 1, 32>}, {pipeline_mode = #tpu.pipeline_mode<synchronous>, transform_indices = @transform_32, window_bounds = array<i64: 32, 32>}, {pipeline_mode = #tpu.pipeline_mode<synchronous>, transform_indices = @transform_33, window_bounds = array<i64: 1, 32>}, {pipeline_mode = #tpu.pipeline_mode<synchronous>, transform_indices = @transform_34, window_bounds = array<i64: 32, 32>}, {pipeline_mode = #tpu.pipeline_mode<synchronous>, transform_indices = @transform_35, window_bounds = array<i64: 1, 32>}, {pipeline_mode = #tpu.pipeline_mode<synchronous>, transform_indices = @transform_36, window_bounds = array<i64: 32, 32>}, {pipeline_mode = #tpu.pipeline_mode<synchronous>, transform_indices = @transform_37, window_bounds = array<i64: 1, 32>}, {pipeline_mode = #tpu.pipeline_mode<synchronous>, transform_indices = @transform_38, window_bounds = array<i64: 32, 32>}, {pipeline_mode = #tpu.pipeline_mode<synchronous>, transform_indices = @transform_39, window_bounds = array<i64: 1, 32>}, {pipeline_mode = #tpu.pipeline_mode<synchronous>, transform_indices = @transform_40, window_bounds = array<i64: 32, 32>}, {pipeline_mode = #tpu.pipeline_mode<synchronous>, transform_indices = @transform_41, window_bounds = array<i64: 1, 32>}, {pipeline_mode = #tpu.pipeline_mode<synchronous>, transform_indices = @transform_42, window_bounds = array<i64: 32, 32>}, {pipeline_mode = #tpu.pipeline_mode<synchronous>, transform_indices = @transform_43, window_bounds = array<i64: 1, 32>}, {pipeline_mode = #tpu.pipeline_mode<synchronous>, transform_indices = @transform_44, window_bounds = array<i64: 32, 128>}, {pipeline_mode = #tpu.pipeline_mode<synchronous>, transform_indices = @transform_45, window_bounds = array<i64: 1, 128>}, {pipeline_mode = #tpu.pipeline_mode<synchronous>, transform_indices = @transform_46, window_bounds = array<i64: 128, 32>}, {pipeline_mode = #tpu.pipeline_mode<synchronous>, transform_indices = @transform_47, window_bounds = array<i64: 1, 32>}, {pipeline_mode = #tpu.pipeline_mode<synchronous>, transform_indices = @transform_48, window_bounds = array<i64: 1, 32>}, {pipeline_mode = #tpu.pipeline_mode<synchronous>, transform_indices = @transform_49, window_bounds = array<i64: 1, 32>}, {pipeline_mode = #tpu.pipeline_mode<synchronous>, transform_indices = @transform_50, window_bounds = array<i64: 1, 32>}, {pipeline_mode = #tpu.pipeline_mode<synchronous>, transform_indices = @transform_51, window_bounds = array<i64: 1, 32>}, {pipeline_mode = #tpu.pipeline_mode<synchronous>, transform_indices = @transform_52, window_bounds = array<i64: 1, 32>}, {pipeline_mode = #tpu.pipeline_mode<synchronous>, transform_indices = @transform_53, window_bounds = array<i64: 1, 32>}, {pipeline_mode = #tpu.pipeline_mode<synchronous>, transform_indices = @transform_54, window_bounds = array<i64: 1, 32>}, {pipeline_mode = #tpu.pipeline_mode<synchronous>, transform_indices = @transform_55, window_bounds = array<i64: 1, 1>}, {transform_indices = @transform_56, window_bounds = array<i64: 1, 2, 8>}]} {
    %c0 = arith.constant 0 : index
    %c0_0 = arith.constant 0 : index
    %c0_1 = arith.constant 0 : index
    %0 = vector.load %arg1[%c0, %c0_0, %c0_1] : memref<2x8x32xf32, #tpu.memory_space<vmem>>, vector<2x8x32xf32>
    %1 = vector.shape_cast %0 : vector<2x8x32xf32> to vector<16x32xf32>
    %c0_2 = arith.constant 0 : index
    %c0_3 = arith.constant 0 : index
    %c0_4 = arith.constant 0 : index
    %2 = vector.load %arg2[%c0_2, %c0_3, %c0_4] : memref<2x16x32xf32, #tpu.memory_space<vmem>>, vector<2x16x32xf32>
    %3 = vector.shape_cast %2 : vector<2x16x32xf32> to vector<32x32xf32>
    %4 = arith.truncf %1 : vector<16x32xf32> to vector<16x32xbf16>
    %c0_5 = arith.constant 0 : index
    %c0_6 = arith.constant 0 : index
    %5 = vector.load %arg3[%c0_5, %c0_6] : memref<32x32xbf16, #tpu.memory_space<vmem>>, vector<32x32xbf16>
    %cst = arith.constant dense<0.000000e+00> : vector<16x32xf32>
    %6 = tpu.matmul %4, %5, %cst {dimension_numbers = #tpu.dot_dimension_numbers<[1], [0], [0], [1], [0, 0, 1, 1], [], []>} : vector<16x32xbf16>, vector<32x32xbf16>, vector<16x32xf32> -> vector<16x32xf32>
    %c0_7 = arith.constant 0 : index
    %c0_8 = arith.constant 0 : index
    %7 = vector.load %arg4[%c0_7, %c0_8] : memref<1x32xf32, #tpu.memory_space<vmem>>, vector<1x32xf32>
    %8 = vector.broadcast %7 : vector<1x32xf32> to vector<16x32xf32>
    %9 = arith.addf %6, %8 : vector<16x32xf32>
    %cst_9 = arith.constant 0.353553385 : f32
    %10 = vector.broadcast %cst_9 : f32 to vector<16x32xf32>
    %11 = arith.mulf %9, %10 : vector<16x32xf32>
    %12 = arith.truncf %1 : vector<16x32xf32> to vector<16x32xbf16>
    %c0_10 = arith.constant 0 : index
    %c0_11 = arith.constant 0 : index
    %13 = vector.load %arg5[%c0_10, %c0_11] : memref<32x32xbf16, #tpu.memory_space<vmem>>, vector<32x32xbf16>
    %cst_12 = arith.constant dense<0.000000e+00> : vector<16x32xf32>
    %14 = tpu.matmul %12, %13, %cst_12 {dimension_numbers = #tpu.dot_dimension_numbers<[1], [0], [0], [1], [0, 0, 1, 1], [], []>} : vector<16x32xbf16>, vector<32x32xbf16>, vector<16x32xf32> -> vector<16x32xf32>
    %c0_13 = arith.constant 0 : index
    %c0_14 = arith.constant 0 : index
    %15 = vector.load %arg6[%c0_13, %c0_14] : memref<1x32xf32, #tpu.memory_space<vmem>>, vector<1x32xf32>
    %16 = vector.broadcast %15 : vector<1x32xf32> to vector<16x32xf32>
    %17 = arith.addf %14, %16 : vector<16x32xf32>
    %18 = arith.truncf %1 : vector<16x32xf32> to vector<16x32xbf16>
    %c0_15 = arith.constant 0 : index
    %c0_16 = arith.constant 0 : index
    %19 = vector.load %arg7[%c0_15, %c0_16] : memref<32x32xbf16, #tpu.memory_space<vmem>>, vector<32x32xbf16>
    %cst_17 = arith.constant dense<0.000000e+00> : vector<16x32xf32>
    %20 = tpu.matmul %18, %19, %cst_17 {dimension_numbers = #tpu.dot_dimension_numbers<[1], [0], [0], [1], [0, 0, 1, 1], [], []>} : vector<16x32xbf16>, vector<32x32xbf16>, vector<16x32xf32> -> vector<16x32xf32>
    %c0_18 = arith.constant 0 : index
    %c0_19 = arith.constant 0 : index
    %21 = vector.load %arg8[%c0_18, %c0_19] : memref<1x32xf32, #tpu.memory_space<vmem>>, vector<1x32xf32>
    %22 = vector.broadcast %21 : vector<1x32xf32> to vector<16x32xf32>
    %23 = arith.addf %20, %22 : vector<16x32xf32>
    %24 = arith.truncf %11 : vector<16x32xf32> to vector<16x32xbf16>
    %25 = arith.truncf %17 : vector<16x32xf32> to vector<16x32xbf16>
    %26 = arith.truncf %23 : vector<16x32xf32> to vector<16x32xbf16>
    %27 = vector.extract_strided_slice %24 {offsets = [0, 0], sizes = [8, 32], strides = [1, 1]} : vector<16x32xbf16> to vector<8x32xbf16>
    %28 = vector.extract_strided_slice %25 {offsets = [0, 0], sizes = [8, 32], strides = [1, 1]} : vector<16x32xbf16> to vector<8x32xbf16>
    %29 = vector.extract_strided_slice %26 {offsets = [0, 0], sizes = [8, 32], strides = [1, 1]} : vector<16x32xbf16> to vector<8x32xbf16>
    %30 = vector.extract_strided_slice %27 {offsets = [0, 0], sizes = [8, 8], strides = [1, 1]} : vector<8x32xbf16> to vector<8x8xbf16>
    %31 = vector.extract_strided_slice %28 {offsets = [0, 0], sizes = [8, 8], strides = [1, 1]} : vector<8x32xbf16> to vector<8x8xbf16>
    %32 = vector.extract_strided_slice %29 {offsets = [0, 0], sizes = [8, 8], strides = [1, 1]} : vector<8x32xbf16> to vector<8x8xbf16>
    %cst_20 = arith.constant dense<0.000000e+00> : vector<8x8xf32>
    %33 = tpu.matmul %30, %31, %cst_20 {dimension_numbers = #tpu.dot_dimension_numbers<[1], [1], [0], [0], [0, 0, 1, 0], [], []>} : vector<8x8xbf16>, vector<8x8xbf16>, vector<8x8xf32> -> vector<8x8xf32>
    %cst_21 = arith.constant dense<0xFF800000> : vector<8xf32>
    %34 = vector.multi_reduction <maximumf>, %33, %cst_21 [1] : vector<8x8xf32> to vector<8xf32>
    %35 = vector.shape_cast %34 : vector<8xf32> to vector<8x1xf32>
    %36 = vector.broadcast %35 : vector<8x1xf32> to vector<8x8xf32>
    %37 = arith.subf %33, %36 : vector<8x8xf32>
    %38 = math.exp %37 : vector<8x8xf32>
    %cst_22 = arith.constant dense<0.000000e+00> : vector<8xf32>
    %39 = vector.multi_reduction <add>, %38, %cst_22 [1] : vector<8x8xf32> to vector<8xf32>
    %40 = vector.shape_cast %39 : vector<8xf32> to vector<8x1xf32>
    %41 = tpu.reciprocal %40 {approx = true} : vector<8x1xf32> -> vector<8x1xf32>
    %42 = vector.broadcast %41 : vector<8x1xf32> to vector<8x8xf32>
    %43 = arith.mulf %38, %42 : vector<8x8xf32>
    %44 = arith.truncf %43 : vector<8x8xf32> to vector<8x8xbf16>
    %cst_23 = arith.constant dense<0.000000e+00> : vector<8x8xf32>
    %45 = tpu.matmul %44, %32, %cst_23 {dimension_numbers = #tpu.dot_dimension_numbers<[1], [0], [0], [1], [0, 0, 1, 1], [], []>} : vector<8x8xbf16>, vector<8x8xbf16>, vector<8x8xf32> -> vector<8x8xf32>
    %46 = vector.extract_strided_slice %27 {offsets = [0, 8], sizes = [8, 8], strides = [1, 1]} : vector<8x32xbf16> to vector<8x8xbf16>
    %47 = vector.extract_strided_slice %28 {offsets = [0, 8], sizes = [8, 8], strides = [1, 1]} : vector<8x32xbf16> to vector<8x8xbf16>
    %48 = vector.extract_strided_slice %29 {offsets = [0, 8], sizes = [8, 8], strides = [1, 1]} : vector<8x32xbf16> to vector<8x8xbf16>
    %cst_24 = arith.constant dense<0.000000e+00> : vector<8x8xf32>
    %49 = tpu.matmul %46, %47, %cst_24 {dimension_numbers = #tpu.dot_dimension_numbers<[1], [1], [0], [0], [0, 0, 1, 0], [], []>} : vector<8x8xbf16>, vector<8x8xbf16>, vector<8x8xf32> -> vector<8x8xf32>
    %cst_25 = arith.constant dense<0xFF800000> : vector<8xf32>
    %50 = vector.multi_reduction <maximumf>, %49, %cst_25 [1] : vector<8x8xf32> to vector<8xf32>
    %51 = vector.shape_cast %50 : vector<8xf32> to vector<8x1xf32>
    %52 = vector.broadcast %51 : vector<8x1xf32> to vector<8x8xf32>
    %53 = arith.subf %49, %52 : vector<8x8xf32>
    %54 = math.exp %53 : vector<8x8xf32>
    %cst_26 = arith.constant dense<0.000000e+00> : vector<8xf32>
    %55 = vector.multi_reduction <add>, %54, %cst_26 [1] : vector<8x8xf32> to vector<8xf32>
    %56 = vector.shape_cast %55 : vector<8xf32> to vector<8x1xf32>
    %57 = tpu.reciprocal %56 {approx = true} : vector<8x1xf32> -> vector<8x1xf32>
    %58 = vector.broadcast %57 : vector<8x1xf32> to vector<8x8xf32>
    %59 = arith.mulf %54, %58 : vector<8x8xf32>
    %60 = arith.truncf %59 : vector<8x8xf32> to vector<8x8xbf16>
    %cst_27 = arith.constant dense<0.000000e+00> : vector<8x8xf32>
    %61 = tpu.matmul %60, %48, %cst_27 {dimension_numbers = #tpu.dot_dimension_numbers<[1], [0], [0], [1], [0, 0, 1, 1], [], []>} : vector<8x8xbf16>, vector<8x8xbf16>, vector<8x8xf32> -> vector<8x8xf32>
    %62 = vector.extract_strided_slice %27 {offsets = [0, 16], sizes = [8, 8], strides = [1, 1]} : vector<8x32xbf16> to vector<8x8xbf16>
    %63 = vector.extract_strided_slice %28 {offsets = [0, 16], sizes = [8, 8], strides = [1, 1]} : vector<8x32xbf16> to vector<8x8xbf16>
    %64 = vector.extract_strided_slice %29 {offsets = [0, 16], sizes = [8, 8], strides = [1, 1]} : vector<8x32xbf16> to vector<8x8xbf16>
    %cst_28 = arith.constant dense<0.000000e+00> : vector<8x8xf32>
    %65 = tpu.matmul %62, %63, %cst_28 {dimension_numbers = #tpu.dot_dimension_numbers<[1], [1], [0], [0], [0, 0, 1, 0], [], []>} : vector<8x8xbf16>, vector<8x8xbf16>, vector<8x8xf32> -> vector<8x8xf32>
    %cst_29 = arith.constant dense<0xFF800000> : vector<8xf32>
    %66 = vector.multi_reduction <maximumf>, %65, %cst_29 [1] : vector<8x8xf32> to vector<8xf32>
    %67 = vector.shape_cast %66 : vector<8xf32> to vector<8x1xf32>
    %68 = vector.broadcast %67 : vector<8x1xf32> to vector<8x8xf32>
    %69 = arith.subf %65, %68 : vector<8x8xf32>
    %70 = math.exp %69 : vector<8x8xf32>
    %cst_30 = arith.constant dense<0.000000e+00> : vector<8xf32>
    %71 = vector.multi_reduction <add>, %70, %cst_30 [1] : vector<8x8xf32> to vector<8xf32>
    %72 = vector.shape_cast %71 : vector<8xf32> to vector<8x1xf32>
    %73 = tpu.reciprocal %72 {approx = true} : vector<8x1xf32> -> vector<8x1xf32>
    %74 = vector.broadcast %73 : vector<8x1xf32> to vector<8x8xf32>
    %75 = arith.mulf %70, %74 : vector<8x8xf32>
    %76 = arith.truncf %75 : vector<8x8xf32> to vector<8x8xbf16>
    %cst_31 = arith.constant dense<0.000000e+00> : vector<8x8xf32>
    %77 = tpu.matmul %76, %64, %cst_31 {dimension_numbers = #tpu.dot_dimension_numbers<[1], [0], [0], [1], [0, 0, 1, 1], [], []>} : vector<8x8xbf16>, vector<8x8xbf16>, vector<8x8xf32> -> vector<8x8xf32>
    %78 = vector.extract_strided_slice %27 {offsets = [0, 24], sizes = [8, 8], strides = [1, 1]} : vector<8x32xbf16> to vector<8x8xbf16>
    %79 = vector.extract_strided_slice %28 {offsets = [0, 24], sizes = [8, 8], strides = [1, 1]} : vector<8x32xbf16> to vector<8x8xbf16>
    %80 = vector.extract_strided_slice %29 {offsets = [0, 24], sizes = [8, 8], strides = [1, 1]} : vector<8x32xbf16> to vector<8x8xbf16>
    %cst_32 = arith.constant dense<0.000000e+00> : vector<8x8xf32>
    %81 = tpu.matmul %78, %79, %cst_32 {dimension_numbers = #tpu.dot_dimension_numbers<[1], [1], [0], [0], [0, 0, 1, 0], [], []>} : vector<8x8xbf16>, vector<8x8xbf16>, vector<8x8xf32> -> vector<8x8xf32>
    %cst_33 = arith.constant dense<0xFF800000> : vector<8xf32>
    %82 = vector.multi_reduction <maximumf>, %81, %cst_33 [1] : vector<8x8xf32> to vector<8xf32>
    %83 = vector.shape_cast %82 : vector<8xf32> to vector<8x1xf32>
    %84 = vector.broadcast %83 : vector<8x1xf32> to vector<8x8xf32>
    %85 = arith.subf %81, %84 : vector<8x8xf32>
    %86 = math.exp %85 : vector<8x8xf32>
    %cst_34 = arith.constant dense<0.000000e+00> : vector<8xf32>
    %87 = vector.multi_reduction <add>, %86, %cst_34 [1] : vector<8x8xf32> to vector<8xf32>
    %88 = vector.shape_cast %87 : vector<8xf32> to vector<8x1xf32>
    %89 = tpu.reciprocal %88 {approx = true} : vector<8x1xf32> -> vector<8x1xf32>
    %90 = vector.broadcast %89 : vector<8x1xf32> to vector<8x8xf32>
    %91 = arith.mulf %86, %90 : vector<8x8xf32>
    %92 = arith.truncf %91 : vector<8x8xf32> to vector<8x8xbf16>
    %cst_35 = arith.constant dense<0.000000e+00> : vector<8x8xf32>
    %93 = tpu.matmul %92, %80, %cst_35 {dimension_numbers = #tpu.dot_dimension_numbers<[1], [0], [0], [1], [0, 0, 1, 1], [], []>} : vector<8x8xbf16>, vector<8x8xbf16>, vector<8x8xf32> -> vector<8x8xf32>
    %94 = tpu.concatenate %45, %61, %77, %93 in 1 : vector<8x8xf32>, vector<8x8xf32>, vector<8x8xf32>, vector<8x8xf32> -> vector<8x32xf32>
    %95 = vector.extract_strided_slice %24 {offsets = [8, 0], sizes = [8, 32], strides = [1, 1]} : vector<16x32xbf16> to vector<8x32xbf16>
    %96 = vector.extract_strided_slice %25 {offsets = [8, 0], sizes = [8, 32], strides = [1, 1]} : vector<16x32xbf16> to vector<8x32xbf16>
    %97 = vector.extract_strided_slice %26 {offsets = [8, 0], sizes = [8, 32], strides = [1, 1]} : vector<16x32xbf16> to vector<8x32xbf16>
    %98 = vector.extract_strided_slice %95 {offsets = [0, 0], sizes = [8, 8], strides = [1, 1]} : vector<8x32xbf16> to vector<8x8xbf16>
    %99 = vector.extract_strided_slice %96 {offsets = [0, 0], sizes = [8, 8], strides = [1, 1]} : vector<8x32xbf16> to vector<8x8xbf16>
    %100 = vector.extract_strided_slice %97 {offsets = [0, 0], sizes = [8, 8], strides = [1, 1]} : vector<8x32xbf16> to vector<8x8xbf16>
    %cst_36 = arith.constant dense<0.000000e+00> : vector<8x8xf32>
    %101 = tpu.matmul %98, %99, %cst_36 {dimension_numbers = #tpu.dot_dimension_numbers<[1], [1], [0], [0], [0, 0, 1, 0], [], []>} : vector<8x8xbf16>, vector<8x8xbf16>, vector<8x8xf32> -> vector<8x8xf32>
    %cst_37 = arith.constant dense<0xFF800000> : vector<8xf32>
    %102 = vector.multi_reduction <maximumf>, %101, %cst_37 [1] : vector<8x8xf32> to vector<8xf32>
    %103 = vector.shape_cast %102 : vector<8xf32> to vector<8x1xf32>
    %104 = vector.broadcast %103 : vector<8x1xf32> to vector<8x8xf32>
    %105 = arith.subf %101, %104 : vector<8x8xf32>
    %106 = math.exp %105 : vector<8x8xf32>
    %cst_38 = arith.constant dense<0.000000e+00> : vector<8xf32>
    %107 = vector.multi_reduction <add>, %106, %cst_38 [1] : vector<8x8xf32> to vector<8xf32>
    %108 = vector.shape_cast %107 : vector<8xf32> to vector<8x1xf32>
    %109 = tpu.reciprocal %108 {approx = true} : vector<8x1xf32> -> vector<8x1xf32>
    %110 = vector.broadcast %109 : vector<8x1xf32> to vector<8x8xf32>
    %111 = arith.mulf %106, %110 : vector<8x8xf32>
    %112 = arith.truncf %111 : vector<8x8xf32> to vector<8x8xbf16>
    %cst_39 = arith.constant dense<0.000000e+00> : vector<8x8xf32>
    %113 = tpu.matmul %112, %100, %cst_39 {dimension_numbers = #tpu.dot_dimension_numbers<[1], [0], [0], [1], [0, 0, 1, 1], [], []>} : vector<8x8xbf16>, vector<8x8xbf16>, vector<8x8xf32> -> vector<8x8xf32>
    %114 = vector.extract_strided_slice %95 {offsets = [0, 8], sizes = [8, 8], strides = [1, 1]} : vector<8x32xbf16> to vector<8x8xbf16>
    %115 = vector.extract_strided_slice %96 {offsets = [0, 8], sizes = [8, 8], strides = [1, 1]} : vector<8x32xbf16> to vector<8x8xbf16>
    %116 = vector.extract_strided_slice %97 {offsets = [0, 8], sizes = [8, 8], strides = [1, 1]} : vector<8x32xbf16> to vector<8x8xbf16>
    %cst_40 = arith.constant dense<0.000000e+00> : vector<8x8xf32>
    %117 = tpu.matmul %114, %115, %cst_40 {dimension_numbers = #tpu.dot_dimension_numbers<[1], [1], [0], [0], [0, 0, 1, 0], [], []>} : vector<8x8xbf16>, vector<8x8xbf16>, vector<8x8xf32> -> vector<8x8xf32>
    %cst_41 = arith.constant dense<0xFF800000> : vector<8xf32>
    %118 = vector.multi_reduction <maximumf>, %117, %cst_41 [1] : vector<8x8xf32> to vector<8xf32>
    %119 = vector.shape_cast %118 : vector<8xf32> to vector<8x1xf32>
    %120 = vector.broadcast %119 : vector<8x1xf32> to vector<8x8xf32>
    %121 = arith.subf %117, %120 : vector<8x8xf32>
    %122 = math.exp %121 : vector<8x8xf32>
    %cst_42 = arith.constant dense<0.000000e+00> : vector<8xf32>
    %123 = vector.multi_reduction <add>, %122, %cst_42 [1] : vector<8x8xf32> to vector<8xf32>
    %124 = vector.shape_cast %123 : vector<8xf32> to vector<8x1xf32>
    %125 = tpu.reciprocal %124 {approx = true} : vector<8x1xf32> -> vector<8x1xf32>
    %126 = vector.broadcast %125 : vector<8x1xf32> to vector<8x8xf32>
    %127 = arith.mulf %122, %126 : vector<8x8xf32>
    %128 = arith.truncf %127 : vector<8x8xf32> to vector<8x8xbf16>
    %cst_43 = arith.constant dense<0.000000e+00> : vector<8x8xf32>
    %129 = tpu.matmul %128, %116, %cst_43 {dimension_numbers = #tpu.dot_dimension_numbers<[1], [0], [0], [1], [0, 0, 1, 1], [], []>} : vector<8x8xbf16>, vector<8x8xbf16>, vector<8x8xf32> -> vector<8x8xf32>
    %130 = vector.extract_strided_slice %95 {offsets = [0, 16], sizes = [8, 8], strides = [1, 1]} : vector<8x32xbf16> to vector<8x8xbf16>
    %131 = vector.extract_strided_slice %96 {offsets = [0, 16], sizes = [8, 8], strides = [1, 1]} : vector<8x32xbf16> to vector<8x8xbf16>
    %132 = vector.extract_strided_slice %97 {offsets = [0, 16], sizes = [8, 8], strides = [1, 1]} : vector<8x32xbf16> to vector<8x8xbf16>
    %cst_44 = arith.constant dense<0.000000e+00> : vector<8x8xf32>
    %133 = tpu.matmul %130, %131, %cst_44 {dimension_numbers = #tpu.dot_dimension_numbers<[1], [1], [0], [0], [0, 0, 1, 0], [], []>} : vector<8x8xbf16>, vector<8x8xbf16>, vector<8x8xf32> -> vector<8x8xf32>
    %cst_45 = arith.constant dense<0xFF800000> : vector<8xf32>
    %134 = vector.multi_reduction <maximumf>, %133, %cst_45 [1] : vector<8x8xf32> to vector<8xf32>
    %135 = vector.shape_cast %134 : vector<8xf32> to vector<8x1xf32>
    %136 = vector.broadcast %135 : vector<8x1xf32> to vector<8x8xf32>
    %137 = arith.subf %133, %136 : vector<8x8xf32>
    %138 = math.exp %137 : vector<8x8xf32>
    %cst_46 = arith.constant dense<0.000000e+00> : vector<8xf32>
    %139 = vector.multi_reduction <add>, %138, %cst_46 [1] : vector<8x8xf32> to vector<8xf32>
    %140 = vector.shape_cast %139 : vector<8xf32> to vector<8x1xf32>
    %141 = tpu.reciprocal %140 {approx = true} : vector<8x1xf32> -> vector<8x1xf32>
    %142 = vector.broadcast %141 : vector<8x1xf32> to vector<8x8xf32>
    %143 = arith.mulf %138, %142 : vector<8x8xf32>
    %144 = arith.truncf %143 : vector<8x8xf32> to vector<8x8xbf16>
    %cst_47 = arith.constant dense<0.000000e+00> : vector<8x8xf32>
    %145 = tpu.matmul %144, %132, %cst_47 {dimension_numbers = #tpu.dot_dimension_numbers<[1], [0], [0], [1], [0, 0, 1, 1], [], []>} : vector<8x8xbf16>, vector<8x8xbf16>, vector<8x8xf32> -> vector<8x8xf32>
    %146 = vector.extract_strided_slice %95 {offsets = [0, 24], sizes = [8, 8], strides = [1, 1]} : vector<8x32xbf16> to vector<8x8xbf16>
    %147 = vector.extract_strided_slice %96 {offsets = [0, 24], sizes = [8, 8], strides = [1, 1]} : vector<8x32xbf16> to vector<8x8xbf16>
    %148 = vector.extract_strided_slice %97 {offsets = [0, 24], sizes = [8, 8], strides = [1, 1]} : vector<8x32xbf16> to vector<8x8xbf16>
    %cst_48 = arith.constant dense<0.000000e+00> : vector<8x8xf32>
    %149 = tpu.matmul %146, %147, %cst_48 {dimension_numbers = #tpu.dot_dimension_numbers<[1], [1], [0], [0], [0, 0, 1, 0], [], []>} : vector<8x8xbf16>, vector<8x8xbf16>, vector<8x8xf32> -> vector<8x8xf32>
    %cst_49 = arith.constant dense<0xFF800000> : vector<8xf32>
    %150 = vector.multi_reduction <maximumf>, %149, %cst_49 [1] : vector<8x8xf32> to vector<8xf32>
    %151 = vector.shape_cast %150 : vector<8xf32> to vector<8x1xf32>
    %152 = vector.broadcast %151 : vector<8x1xf32> to vector<8x8xf32>
    %153 = arith.subf %149, %152 : vector<8x8xf32>
    %154 = math.exp %153 : vector<8x8xf32>
    %cst_50 = arith.constant dense<0.000000e+00> : vector<8xf32>
    %155 = vector.multi_reduction <add>, %154, %cst_50 [1] : vector<8x8xf32> to vector<8xf32>
    %156 = vector.shape_cast %155 : vector<8xf32> to vector<8x1xf32>
    %157 = tpu.reciprocal %156 {approx = true} : vector<8x1xf32> -> vector<8x1xf32>
    %158 = vector.broadcast %157 : vector<8x1xf32> to vector<8x8xf32>
    %159 = arith.mulf %154, %158 : vector<8x8xf32>
    %160 = arith.truncf %159 : vector<8x8xf32> to vector<8x8xbf16>
    %cst_51 = arith.constant dense<0.000000e+00> : vector<8x8xf32>
    %161 = tpu.matmul %160, %148, %cst_51 {dimension_numbers = #tpu.dot_dimension_numbers<[1], [0], [0], [1], [0, 0, 1, 1], [], []>} : vector<8x8xbf16>, vector<8x8xbf16>, vector<8x8xf32> -> vector<8x8xf32>
    %162 = tpu.concatenate %113, %129, %145, %161 in 1 : vector<8x8xf32>, vector<8x8xf32>, vector<8x8xf32>, vector<8x8xf32> -> vector<8x32xf32>
    %163 = tpu.concatenate %94, %162 in 0 : vector<8x32xf32>, vector<8x32xf32> -> vector<16x32xf32>
    %164 = arith.truncf %163 : vector<16x32xf32> to vector<16x32xbf16>
    %c0_52 = arith.constant 0 : index
    %c0_53 = arith.constant 0 : index
    %165 = vector.load %arg9[%c0_52, %c0_53] : memref<32x32xbf16, #tpu.memory_space<vmem>>, vector<32x32xbf16>
    %cst_54 = arith.constant dense<0.000000e+00> : vector<16x32xf32>
    %166 = tpu.matmul %164, %165, %cst_54 {dimension_numbers = #tpu.dot_dimension_numbers<[1], [0], [0], [1], [0, 0, 1, 1], [], []>} : vector<16x32xbf16>, vector<32x32xbf16>, vector<16x32xf32> -> vector<16x32xf32>
    %c0_55 = arith.constant 0 : index
    %c0_56 = arith.constant 0 : index
    %167 = vector.load %arg10[%c0_55, %c0_56] : memref<1x32xf32, #tpu.memory_space<vmem>>, vector<1x32xf32>
    %168 = vector.broadcast %167 : vector<1x32xf32> to vector<16x32xf32>
    %169 = arith.addf %166, %168 : vector<16x32xf32>
    %170 = arith.addf %1, %169 : vector<16x32xf32>
    %cst_57 = arith.constant dense<0.000000e+00> : vector<16xf32>
    %171 = vector.multi_reduction <add>, %170, %cst_57 [1] : vector<16x32xf32> to vector<16xf32>
    %172 = vector.shape_cast %171 : vector<16xf32> to vector<16x1xf32>
    %cst_58 = arith.constant 3.200000e+01 : f32
    %173 = vector.broadcast %cst_58 : f32 to vector<16x1xf32>
    %174 = arith.divf %172, %173 : vector<16x1xf32>
    %175 = vector.broadcast %174 : vector<16x1xf32> to vector<16x32xf32>
    %176 = arith.subf %170, %175 : vector<16x32xf32>
    %177 = arith.mulf %176, %176 : vector<16x32xf32>
    %cst_59 = arith.constant dense<0.000000e+00> : vector<16xf32>
    %178 = vector.multi_reduction <add>, %177, %cst_59 [1] : vector<16x32xf32> to vector<16xf32>
    %179 = vector.shape_cast %178 : vector<16xf32> to vector<16x1xf32>
    %cst_60 = arith.constant 3.200000e+01 : f32
    %180 = vector.broadcast %cst_60 : f32 to vector<16x1xf32>
    %181 = arith.divf %179, %180 : vector<16x1xf32>
    %182 = vector.broadcast %174 : vector<16x1xf32> to vector<16x32xf32>
    %183 = arith.subf %170, %182 : vector<16x32xf32>
    %cst_61 = arith.constant 9.99999974E-6 : f32
    %184 = vector.broadcast %cst_61 : f32 to vector<16x1xf32>
    %185 = arith.addf %181, %184 : vector<16x1xf32>
    %186 = math.rsqrt %185 : vector<16x1xf32>
    %187 = vector.broadcast %186 : vector<16x1xf32> to vector<16x32xf32>
    %188 = arith.mulf %183, %187 : vector<16x32xf32>
    %c0_62 = arith.constant 0 : index
    %c0_63 = arith.constant 0 : index
    %189 = vector.load %arg23[%c0_62, %c0_63] : memref<1x32xf32, #tpu.memory_space<vmem>>, vector<1x32xf32>
    %190 = vector.broadcast %189 : vector<1x32xf32> to vector<16x32xf32>
    %191 = arith.mulf %188, %190 : vector<16x32xf32>
    %c0_64 = arith.constant 0 : index
    %c0_65 = arith.constant 0 : index
    %192 = vector.load %arg24[%c0_64, %c0_65] : memref<1x32xf32, #tpu.memory_space<vmem>>, vector<1x32xf32>
    %193 = vector.broadcast %192 : vector<1x32xf32> to vector<16x32xf32>
    %194 = arith.addf %191, %193 : vector<16x32xf32>
    %195 = arith.truncf %194 : vector<16x32xf32> to vector<16x32xbf16>
    %c0_66 = arith.constant 0 : index
    %c0_67 = arith.constant 0 : index
    %196 = vector.load %arg11[%c0_66, %c0_67] : memref<32x32xbf16, #tpu.memory_space<vmem>>, vector<32x32xbf16>
    %cst_68 = arith.constant dense<0.000000e+00> : vector<16x32xf32>
    %197 = tpu.matmul %195, %196, %cst_68 {dimension_numbers = #tpu.dot_dimension_numbers<[1], [0], [0], [1], [0, 0, 1, 1], [], []>} : vector<16x32xbf16>, vector<32x32xbf16>, vector<16x32xf32> -> vector<16x32xf32>
    %c0_69 = arith.constant 0 : index
    %c0_70 = arith.constant 0 : index
    %198 = vector.load %arg12[%c0_69, %c0_70] : memref<1x32xf32, #tpu.memory_space<vmem>>, vector<1x32xf32>
    %199 = vector.broadcast %198 : vector<1x32xf32> to vector<16x32xf32>
    %200 = arith.addf %197, %199 : vector<16x32xf32>
    %cst_71 = arith.constant 0.353553385 : f32
    %201 = vector.broadcast %cst_71 : f32 to vector<16x32xf32>
    %202 = arith.mulf %200, %201 : vector<16x32xf32>
    %203 = arith.truncf %3 : vector<32x32xf32> to vector<32x32xbf16>
    %c0_72 = arith.constant 0 : index
    %c0_73 = arith.constant 0 : index
    %204 = vector.load %arg13[%c0_72, %c0_73] : memref<32x32xbf16, #tpu.memory_space<vmem>>, vector<32x32xbf16>
    %cst_74 = arith.constant dense<0.000000e+00> : vector<32x32xf32>
    %205 = tpu.matmul %203, %204, %cst_74 {dimension_numbers = #tpu.dot_dimension_numbers<[1], [0], [0], [1], [0, 0, 1, 1], [], []>} : vector<32x32xbf16>, vector<32x32xbf16>, vector<32x32xf32> -> vector<32x32xf32>
    %c0_75 = arith.constant 0 : index
    %c0_76 = arith.constant 0 : index
    %206 = vector.load %arg14[%c0_75, %c0_76] : memref<1x32xf32, #tpu.memory_space<vmem>>, vector<1x32xf32>
    %207 = vector.broadcast %206 : vector<1x32xf32> to vector<32x32xf32>
    %208 = arith.addf %205, %207 : vector<32x32xf32>
    %209 = arith.truncf %3 : vector<32x32xf32> to vector<32x32xbf16>
    %c0_77 = arith.constant 0 : index
    %c0_78 = arith.constant 0 : index
    %210 = vector.load %arg15[%c0_77, %c0_78] : memref<32x32xbf16, #tpu.memory_space<vmem>>, vector<32x32xbf16>
    %cst_79 = arith.constant dense<0.000000e+00> : vector<32x32xf32>
    %211 = tpu.matmul %209, %210, %cst_79 {dimension_numbers = #tpu.dot_dimension_numbers<[1], [0], [0], [1], [0, 0, 1, 1], [], []>} : vector<32x32xbf16>, vector<32x32xbf16>, vector<32x32xf32> -> vector<32x32xf32>
    %c0_80 = arith.constant 0 : index
    %c0_81 = arith.constant 0 : index
    %212 = vector.load %arg16[%c0_80, %c0_81] : memref<1x32xf32, #tpu.memory_space<vmem>>, vector<1x32xf32>
    %213 = vector.broadcast %212 : vector<1x32xf32> to vector<32x32xf32>
    %214 = arith.addf %211, %213 : vector<32x32xf32>
    %215 = arith.truncf %202 : vector<16x32xf32> to vector<16x32xbf16>
    %216 = arith.truncf %208 : vector<32x32xf32> to vector<32x32xbf16>
    %217 = arith.truncf %214 : vector<32x32xf32> to vector<32x32xbf16>
    %218 = vector.extract_strided_slice %215 {offsets = [0, 0], sizes = [8, 32], strides = [1, 1]} : vector<16x32xbf16> to vector<8x32xbf16>
    %219 = vector.extract_strided_slice %216 {offsets = [0, 0], sizes = [16, 32], strides = [1, 1]} : vector<32x32xbf16> to vector<16x32xbf16>
    %220 = vector.extract_strided_slice %217 {offsets = [0, 0], sizes = [16, 32], strides = [1, 1]} : vector<32x32xbf16> to vector<16x32xbf16>
    %221 = vector.extract_strided_slice %218 {offsets = [0, 0], sizes = [8, 8], strides = [1, 1]} : vector<8x32xbf16> to vector<8x8xbf16>
    %222 = vector.extract_strided_slice %219 {offsets = [0, 0], sizes = [16, 8], strides = [1, 1]} : vector<16x32xbf16> to vector<16x8xbf16>
    %223 = vector.extract_strided_slice %220 {offsets = [0, 0], sizes = [16, 8], strides = [1, 1]} : vector<16x32xbf16> to vector<16x8xbf16>
    %cst_82 = arith.constant dense<0.000000e+00> : vector<8x16xf32>
    %224 = tpu.matmul %221, %222, %cst_82 {dimension_numbers = #tpu.dot_dimension_numbers<[1], [1], [0], [0], [0, 0, 1, 0], [], []>} : vector<8x8xbf16>, vector<16x8xbf16>, vector<8x16xf32> -> vector<8x16xf32>
    %cst_83 = arith.constant dense<0xFF800000> : vector<8xf32>
    %225 = vector.multi_reduction <maximumf>, %224, %cst_83 [1] : vector<8x16xf32> to vector<8xf32>
    %226 = vector.shape_cast %225 : vector<8xf32> to vector<8x1xf32>
    %227 = vector.broadcast %226 : vector<8x1xf32> to vector<8x16xf32>
    %228 = arith.subf %224, %227 : vector<8x16xf32>
    %229 = math.exp %228 : vector<8x16xf32>
    %cst_84 = arith.constant dense<0.000000e+00> : vector<8xf32>
    %230 = vector.multi_reduction <add>, %229, %cst_84 [1] : vector<8x16xf32> to vector<8xf32>
    %231 = vector.shape_cast %230 : vector<8xf32> to vector<8x1xf32>
    %232 = tpu.reciprocal %231 {approx = true} : vector<8x1xf32> -> vector<8x1xf32>
    %233 = vector.broadcast %232 : vector<8x1xf32> to vector<8x16xf32>
    %234 = arith.mulf %229, %233 : vector<8x16xf32>
    %235 = arith.truncf %234 : vector<8x16xf32> to vector<8x16xbf16>
    %cst_85 = arith.constant dense<0.000000e+00> : vector<8x8xf32>
    %236 = tpu.matmul %235, %223, %cst_85 {dimension_numbers = #tpu.dot_dimension_numbers<[1], [0], [0], [1], [0, 0, 1, 1], [], []>} : vector<8x16xbf16>, vector<16x8xbf16>, vector<8x8xf32> -> vector<8x8xf32>
    %237 = vector.extract_strided_slice %218 {offsets = [0, 8], sizes = [8, 8], strides = [1, 1]} : vector<8x32xbf16> to vector<8x8xbf16>
    %238 = vector.extract_strided_slice %219 {offsets = [0, 8], sizes = [16, 8], strides = [1, 1]} : vector<16x32xbf16> to vector<16x8xbf16>
    %239 = vector.extract_strided_slice %220 {offsets = [0, 8], sizes = [16, 8], strides = [1, 1]} : vector<16x32xbf16> to vector<16x8xbf16>
    %cst_86 = arith.constant dense<0.000000e+00> : vector<8x16xf32>
    %240 = tpu.matmul %237, %238, %cst_86 {dimension_numbers = #tpu.dot_dimension_numbers<[1], [1], [0], [0], [0, 0, 1, 0], [], []>} : vector<8x8xbf16>, vector<16x8xbf16>, vector<8x16xf32> -> vector<8x16xf32>
    %cst_87 = arith.constant dense<0xFF800000> : vector<8xf32>
    %241 = vector.multi_reduction <maximumf>, %240, %cst_87 [1] : vector<8x16xf32> to vector<8xf32>
    %242 = vector.shape_cast %241 : vector<8xf32> to vector<8x1xf32>
    %243 = vector.broadcast %242 : vector<8x1xf32> to vector<8x16xf32>
    %244 = arith.subf %240, %243 : vector<8x16xf32>
    %245 = math.exp %244 : vector<8x16xf32>
    %cst_88 = arith.constant dense<0.000000e+00> : vector<8xf32>
    %246 = vector.multi_reduction <add>, %245, %cst_88 [1] : vector<8x16xf32> to vector<8xf32>
    %247 = vector.shape_cast %246 : vector<8xf32> to vector<8x1xf32>
    %248 = tpu.reciprocal %247 {approx = true} : vector<8x1xf32> -> vector<8x1xf32>
    %249 = vector.broadcast %248 : vector<8x1xf32> to vector<8x16xf32>
    %250 = arith.mulf %245, %249 : vector<8x16xf32>
    %251 = arith.truncf %250 : vector<8x16xf32> to vector<8x16xbf16>
    %cst_89 = arith.constant dense<0.000000e+00> : vector<8x8xf32>
    %252 = tpu.matmul %251, %239, %cst_89 {dimension_numbers = #tpu.dot_dimension_numbers<[1], [0], [0], [1], [0, 0, 1, 1], [], []>} : vector<8x16xbf16>, vector<16x8xbf16>, vector<8x8xf32> -> vector<8x8xf32>
    %253 = vector.extract_strided_slice %218 {offsets = [0, 16], sizes = [8, 8], strides = [1, 1]} : vector<8x32xbf16> to vector<8x8xbf16>
    %254 = vector.extract_strided_slice %219 {offsets = [0, 16], sizes = [16, 8], strides = [1, 1]} : vector<16x32xbf16> to vector<16x8xbf16>
    %255 = vector.extract_strided_slice %220 {offsets = [0, 16], sizes = [16, 8], strides = [1, 1]} : vector<16x32xbf16> to vector<16x8xbf16>
    %cst_90 = arith.constant dense<0.000000e+00> : vector<8x16xf32>
    %256 = tpu.matmul %253, %254, %cst_90 {dimension_numbers = #tpu.dot_dimension_numbers<[1], [1], [0], [0], [0, 0, 1, 0], [], []>} : vector<8x8xbf16>, vector<16x8xbf16>, vector<8x16xf32> -> vector<8x16xf32>
    %cst_91 = arith.constant dense<0xFF800000> : vector<8xf32>
    %257 = vector.multi_reduction <maximumf>, %256, %cst_91 [1] : vector<8x16xf32> to vector<8xf32>
    %258 = vector.shape_cast %257 : vector<8xf32> to vector<8x1xf32>
    %259 = vector.broadcast %258 : vector<8x1xf32> to vector<8x16xf32>
    %260 = arith.subf %256, %259 : vector<8x16xf32>
    %261 = math.exp %260 : vector<8x16xf32>
    %cst_92 = arith.constant dense<0.000000e+00> : vector<8xf32>
    %262 = vector.multi_reduction <add>, %261, %cst_92 [1] : vector<8x16xf32> to vector<8xf32>
    %263 = vector.shape_cast %262 : vector<8xf32> to vector<8x1xf32>
    %264 = tpu.reciprocal %263 {approx = true} : vector<8x1xf32> -> vector<8x1xf32>
    %265 = vector.broadcast %264 : vector<8x1xf32> to vector<8x16xf32>
    %266 = arith.mulf %261, %265 : vector<8x16xf32>
    %267 = arith.truncf %266 : vector<8x16xf32> to vector<8x16xbf16>
    %cst_93 = arith.constant dense<0.000000e+00> : vector<8x8xf32>
    %268 = tpu.matmul %267, %255, %cst_93 {dimension_numbers = #tpu.dot_dimension_numbers<[1], [0], [0], [1], [0, 0, 1, 1], [], []>} : vector<8x16xbf16>, vector<16x8xbf16>, vector<8x8xf32> -> vector<8x8xf32>
    %269 = vector.extract_strided_slice %218 {offsets = [0, 24], sizes = [8, 8], strides = [1, 1]} : vector<8x32xbf16> to vector<8x8xbf16>
    %270 = vector.extract_strided_slice %219 {offsets = [0, 24], sizes = [16, 8], strides = [1, 1]} : vector<16x32xbf16> to vector<16x8xbf16>
    %271 = vector.extract_strided_slice %220 {offsets = [0, 24], sizes = [16, 8], strides = [1, 1]} : vector<16x32xbf16> to vector<16x8xbf16>
    %cst_94 = arith.constant dense<0.000000e+00> : vector<8x16xf32>
    %272 = tpu.matmul %269, %270, %cst_94 {dimension_numbers = #tpu.dot_dimension_numbers<[1], [1], [0], [0], [0, 0, 1, 0], [], []>} : vector<8x8xbf16>, vector<16x8xbf16>, vector<8x16xf32> -> vector<8x16xf32>
    %cst_95 = arith.constant dense<0xFF800000> : vector<8xf32>
    %273 = vector.multi_reduction <maximumf>, %272, %cst_95 [1] : vector<8x16xf32> to vector<8xf32>
    %274 = vector.shape_cast %273 : vector<8xf32> to vector<8x1xf32>
    %275 = vector.broadcast %274 : vector<8x1xf32> to vector<8x16xf32>
    %276 = arith.subf %272, %275 : vector<8x16xf32>
    %277 = math.exp %276 : vector<8x16xf32>
    %cst_96 = arith.constant dense<0.000000e+00> : vector<8xf32>
    %278 = vector.multi_reduction <add>, %277, %cst_96 [1] : vector<8x16xf32> to vector<8xf32>
    %279 = vector.shape_cast %278 : vector<8xf32> to vector<8x1xf32>
    %280 = tpu.reciprocal %279 {approx = true} : vector<8x1xf32> -> vector<8x1xf32>
    %281 = vector.broadcast %280 : vector<8x1xf32> to vector<8x16xf32>
    %282 = arith.mulf %277, %281 : vector<8x16xf32>
    %283 = arith.truncf %282 : vector<8x16xf32> to vector<8x16xbf16>
    %cst_97 = arith.constant dense<0.000000e+00> : vector<8x8xf32>
    %284 = tpu.matmul %283, %271, %cst_97 {dimension_numbers = #tpu.dot_dimension_numbers<[1], [0], [0], [1], [0, 0, 1, 1], [], []>} : vector<8x16xbf16>, vector<16x8xbf16>, vector<8x8xf32> -> vector<8x8xf32>
    %285 = tpu.concatenate %236, %252, %268, %284 in 1 : vector<8x8xf32>, vector<8x8xf32>, vector<8x8xf32>, vector<8x8xf32> -> vector<8x32xf32>
    %286 = vector.extract_strided_slice %215 {offsets = [8, 0], sizes = [8, 32], strides = [1, 1]} : vector<16x32xbf16> to vector<8x32xbf16>
    %287 = vector.extract_strided_slice %216 {offsets = [16, 0], sizes = [16, 32], strides = [1, 1]} : vector<32x32xbf16> to vector<16x32xbf16>
    %288 = vector.extract_strided_slice %217 {offsets = [16, 0], sizes = [16, 32], strides = [1, 1]} : vector<32x32xbf16> to vector<16x32xbf16>
    %289 = vector.extract_strided_slice %286 {offsets = [0, 0], sizes = [8, 8], strides = [1, 1]} : vector<8x32xbf16> to vector<8x8xbf16>
    %290 = vector.extract_strided_slice %287 {offsets = [0, 0], sizes = [16, 8], strides = [1, 1]} : vector<16x32xbf16> to vector<16x8xbf16>
    %291 = vector.extract_strided_slice %288 {offsets = [0, 0], sizes = [16, 8], strides = [1, 1]} : vector<16x32xbf16> to vector<16x8xbf16>
    %cst_98 = arith.constant dense<0.000000e+00> : vector<8x16xf32>
    %292 = tpu.matmul %289, %290, %cst_98 {dimension_numbers = #tpu.dot_dimension_numbers<[1], [1], [0], [0], [0, 0, 1, 0], [], []>} : vector<8x8xbf16>, vector<16x8xbf16>, vector<8x16xf32> -> vector<8x16xf32>
    %cst_99 = arith.constant dense<0xFF800000> : vector<8xf32>
    %293 = vector.multi_reduction <maximumf>, %292, %cst_99 [1] : vector<8x16xf32> to vector<8xf32>
    %294 = vector.shape_cast %293 : vector<8xf32> to vector<8x1xf32>
    %295 = vector.broadcast %294 : vector<8x1xf32> to vector<8x16xf32>
    %296 = arith.subf %292, %295 : vector<8x16xf32>
    %297 = math.exp %296 : vector<8x16xf32>
    %cst_100 = arith.constant dense<0.000000e+00> : vector<8xf32>
    %298 = vector.multi_reduction <add>, %297, %cst_100 [1] : vector<8x16xf32> to vector<8xf32>
    %299 = vector.shape_cast %298 : vector<8xf32> to vector<8x1xf32>
    %300 = tpu.reciprocal %299 {approx = true} : vector<8x1xf32> -> vector<8x1xf32>
    %301 = vector.broadcast %300 : vector<8x1xf32> to vector<8x16xf32>
    %302 = arith.mulf %297, %301 : vector<8x16xf32>
    %303 = arith.truncf %302 : vector<8x16xf32> to vector<8x16xbf16>
    %cst_101 = arith.constant dense<0.000000e+00> : vector<8x8xf32>
    %304 = tpu.matmul %303, %291, %cst_101 {dimension_numbers = #tpu.dot_dimension_numbers<[1], [0], [0], [1], [0, 0, 1, 1], [], []>} : vector<8x16xbf16>, vector<16x8xbf16>, vector<8x8xf32> -> vector<8x8xf32>
    %305 = vector.extract_strided_slice %286 {offsets = [0, 8], sizes = [8, 8], strides = [1, 1]} : vector<8x32xbf16> to vector<8x8xbf16>
    %306 = vector.extract_strided_slice %287 {offsets = [0, 8], sizes = [16, 8], strides = [1, 1]} : vector<16x32xbf16> to vector<16x8xbf16>
    %307 = vector.extract_strided_slice %288 {offsets = [0, 8], sizes = [16, 8], strides = [1, 1]} : vector<16x32xbf16> to vector<16x8xbf16>
    %cst_102 = arith.constant dense<0.000000e+00> : vector<8x16xf32>
    %308 = tpu.matmul %305, %306, %cst_102 {dimension_numbers = #tpu.dot_dimension_numbers<[1], [1], [0], [0], [0, 0, 1, 0], [], []>} : vector<8x8xbf16>, vector<16x8xbf16>, vector<8x16xf32> -> vector<8x16xf32>
    %cst_103 = arith.constant dense<0xFF800000> : vector<8xf32>
    %309 = vector.multi_reduction <maximumf>, %308, %cst_103 [1] : vector<8x16xf32> to vector<8xf32>
    %310 = vector.shape_cast %309 : vector<8xf32> to vector<8x1xf32>
    %311 = vector.broadcast %310 : vector<8x1xf32> to vector<8x16xf32>
    %312 = arith.subf %308, %311 : vector<8x16xf32>
    %313 = math.exp %312 : vector<8x16xf32>
    %cst_104 = arith.constant dense<0.000000e+00> : vector<8xf32>
    %314 = vector.multi_reduction <add>, %313, %cst_104 [1] : vector<8x16xf32> to vector<8xf32>
    %315 = vector.shape_cast %314 : vector<8xf32> to vector<8x1xf32>
    %316 = tpu.reciprocal %315 {approx = true} : vector<8x1xf32> -> vector<8x1xf32>
    %317 = vector.broadcast %316 : vector<8x1xf32> to vector<8x16xf32>
    %318 = arith.mulf %313, %317 : vector<8x16xf32>
    %319 = arith.truncf %318 : vector<8x16xf32> to vector<8x16xbf16>
    %cst_105 = arith.constant dense<0.000000e+00> : vector<8x8xf32>
    %320 = tpu.matmul %319, %307, %cst_105 {dimension_numbers = #tpu.dot_dimension_numbers<[1], [0], [0], [1], [0, 0, 1, 1], [], []>} : vector<8x16xbf16>, vector<16x8xbf16>, vector<8x8xf32> -> vector<8x8xf32>
    %321 = vector.extract_strided_slice %286 {offsets = [0, 16], sizes = [8, 8], strides = [1, 1]} : vector<8x32xbf16> to vector<8x8xbf16>
    %322 = vector.extract_strided_slice %287 {offsets = [0, 16], sizes = [16, 8], strides = [1, 1]} : vector<16x32xbf16> to vector<16x8xbf16>
    %323 = vector.extract_strided_slice %288 {offsets = [0, 16], sizes = [16, 8], strides = [1, 1]} : vector<16x32xbf16> to vector<16x8xbf16>
    %cst_106 = arith.constant dense<0.000000e+00> : vector<8x16xf32>
    %324 = tpu.matmul %321, %322, %cst_106 {dimension_numbers = #tpu.dot_dimension_numbers<[1], [1], [0], [0], [0, 0, 1, 0], [], []>} : vector<8x8xbf16>, vector<16x8xbf16>, vector<8x16xf32> -> vector<8x16xf32>
    %cst_107 = arith.constant dense<0xFF800000> : vector<8xf32>
    %325 = vector.multi_reduction <maximumf>, %324, %cst_107 [1] : vector<8x16xf32> to vector<8xf32>
    %326 = vector.shape_cast %325 : vector<8xf32> to vector<8x1xf32>
    %327 = vector.broadcast %326 : vector<8x1xf32> to vector<8x16xf32>
    %328 = arith.subf %324, %327 : vector<8x16xf32>
    %329 = math.exp %328 : vector<8x16xf32>
    %cst_108 = arith.constant dense<0.000000e+00> : vector<8xf32>
    %330 = vector.multi_reduction <add>, %329, %cst_108 [1] : vector<8x16xf32> to vector<8xf32>
    %331 = vector.shape_cast %330 : vector<8xf32> to vector<8x1xf32>
    %332 = tpu.reciprocal %331 {approx = true} : vector<8x1xf32> -> vector<8x1xf32>
    %333 = vector.broadcast %332 : vector<8x1xf32> to vector<8x16xf32>
    %334 = arith.mulf %329, %333 : vector<8x16xf32>
    %335 = arith.truncf %334 : vector<8x16xf32> to vector<8x16xbf16>
    %cst_109 = arith.constant dense<0.000000e+00> : vector<8x8xf32>
    %336 = tpu.matmul %335, %323, %cst_109 {dimension_numbers = #tpu.dot_dimension_numbers<[1], [0], [0], [1], [0, 0, 1, 1], [], []>} : vector<8x16xbf16>, vector<16x8xbf16>, vector<8x8xf32> -> vector<8x8xf32>
    %337 = vector.extract_strided_slice %286 {offsets = [0, 24], sizes = [8, 8], strides = [1, 1]} : vector<8x32xbf16> to vector<8x8xbf16>
    %338 = vector.extract_strided_slice %287 {offsets = [0, 24], sizes = [16, 8], strides = [1, 1]} : vector<16x32xbf16> to vector<16x8xbf16>
    %339 = vector.extract_strided_slice %288 {offsets = [0, 24], sizes = [16, 8], strides = [1, 1]} : vector<16x32xbf16> to vector<16x8xbf16>
    %cst_110 = arith.constant dense<0.000000e+00> : vector<8x16xf32>
    %340 = tpu.matmul %337, %338, %cst_110 {dimension_numbers = #tpu.dot_dimension_numbers<[1], [1], [0], [0], [0, 0, 1, 0], [], []>} : vector<8x8xbf16>, vector<16x8xbf16>, vector<8x16xf32> -> vector<8x16xf32>
    %cst_111 = arith.constant dense<0xFF800000> : vector<8xf32>
    %341 = vector.multi_reduction <maximumf>, %340, %cst_111 [1] : vector<8x16xf32> to vector<8xf32>
    %342 = vector.shape_cast %341 : vector<8xf32> to vector<8x1xf32>
    %343 = vector.broadcast %342 : vector<8x1xf32> to vector<8x16xf32>
    %344 = arith.subf %340, %343 : vector<8x16xf32>
    %345 = math.exp %344 : vector<8x16xf32>
    %cst_112 = arith.constant dense<0.000000e+00> : vector<8xf32>
    %346 = vector.multi_reduction <add>, %345, %cst_112 [1] : vector<8x16xf32> to vector<8xf32>
    %347 = vector.shape_cast %346 : vector<8xf32> to vector<8x1xf32>
    %348 = tpu.reciprocal %347 {approx = true} : vector<8x1xf32> -> vector<8x1xf32>
    %349 = vector.broadcast %348 : vector<8x1xf32> to vector<8x16xf32>
    %350 = arith.mulf %345, %349 : vector<8x16xf32>
    %351 = arith.truncf %350 : vector<8x16xf32> to vector<8x16xbf16>
    %cst_113 = arith.constant dense<0.000000e+00> : vector<8x8xf32>
    %352 = tpu.matmul %351, %339, %cst_113 {dimension_numbers = #tpu.dot_dimension_numbers<[1], [0], [0], [1], [0, 0, 1, 1], [], []>} : vector<8x16xbf16>, vector<16x8xbf16>, vector<8x8xf32> -> vector<8x8xf32>
    %353 = tpu.concatenate %304, %320, %336, %352 in 1 : vector<8x8xf32>, vector<8x8xf32>, vector<8x8xf32>, vector<8x8xf32> -> vector<8x32xf32>
    %354 = tpu.concatenate %285, %353 in 0 : vector<8x32xf32>, vector<8x32xf32> -> vector<16x32xf32>
    %355 = arith.truncf %354 : vector<16x32xf32> to vector<16x32xbf16>
    %c0_114 = arith.constant 0 : index
    %c0_115 = arith.constant 0 : index
    %356 = vector.load %arg17[%c0_114, %c0_115] : memref<32x32xbf16, #tpu.memory_space<vmem>>, vector<32x32xbf16>
    %cst_116 = arith.constant dense<0.000000e+00> : vector<16x32xf32>
    %357 = tpu.matmul %355, %356, %cst_116 {dimension_numbers = #tpu.dot_dimension_numbers<[1], [0], [0], [1], [0, 0, 1, 1], [], []>} : vector<16x32xbf16>, vector<32x32xbf16>, vector<16x32xf32> -> vector<16x32xf32>
    %c0_117 = arith.constant 0 : index
    %c0_118 = arith.constant 0 : index
    %358 = vector.load %arg18[%c0_117, %c0_118] : memref<1x32xf32, #tpu.memory_space<vmem>>, vector<1x32xf32>
    %359 = vector.broadcast %358 : vector<1x32xf32> to vector<16x32xf32>
    %360 = arith.addf %357, %359 : vector<16x32xf32>
    %361 = arith.addf %194, %360 : vector<16x32xf32>
    %cst_119 = arith.constant dense<0.000000e+00> : vector<16xf32>
    %362 = vector.multi_reduction <add>, %361, %cst_119 [1] : vector<16x32xf32> to vector<16xf32>
    %363 = vector.shape_cast %362 : vector<16xf32> to vector<16x1xf32>
    %cst_120 = arith.constant 3.200000e+01 : f32
    %364 = vector.broadcast %cst_120 : f32 to vector<16x1xf32>
    %365 = arith.divf %363, %364 : vector<16x1xf32>
    %366 = vector.broadcast %365 : vector<16x1xf32> to vector<16x32xf32>
    %367 = arith.subf %361, %366 : vector<16x32xf32>
    %368 = arith.mulf %367, %367 : vector<16x32xf32>
    %cst_121 = arith.constant dense<0.000000e+00> : vector<16xf32>
    %369 = vector.multi_reduction <add>, %368, %cst_121 [1] : vector<16x32xf32> to vector<16xf32>
    %370 = vector.shape_cast %369 : vector<16xf32> to vector<16x1xf32>
    %cst_122 = arith.constant 3.200000e+01 : f32
    %371 = vector.broadcast %cst_122 : f32 to vector<16x1xf32>
    %372 = arith.divf %370, %371 : vector<16x1xf32>
    %373 = vector.broadcast %365 : vector<16x1xf32> to vector<16x32xf32>
    %374 = arith.subf %361, %373 : vector<16x32xf32>
    %cst_123 = arith.constant 9.99999974E-6 : f32
    %375 = vector.broadcast %cst_123 : f32 to vector<16x1xf32>
    %376 = arith.addf %372, %375 : vector<16x1xf32>
    %377 = math.rsqrt %376 : vector<16x1xf32>
    %378 = vector.broadcast %377 : vector<16x1xf32> to vector<16x32xf32>
    %379 = arith.mulf %374, %378 : vector<16x32xf32>
    %c0_124 = arith.constant 0 : index
    %c0_125 = arith.constant 0 : index
    %380 = vector.load %arg25[%c0_124, %c0_125] : memref<1x32xf32, #tpu.memory_space<vmem>>, vector<1x32xf32>
    %381 = vector.broadcast %380 : vector<1x32xf32> to vector<16x32xf32>
    %382 = arith.mulf %379, %381 : vector<16x32xf32>
    %c0_126 = arith.constant 0 : index
    %c0_127 = arith.constant 0 : index
    %383 = vector.load %arg26[%c0_126, %c0_127] : memref<1x32xf32, #tpu.memory_space<vmem>>, vector<1x32xf32>
    %384 = vector.broadcast %383 : vector<1x32xf32> to vector<16x32xf32>
    %385 = arith.addf %382, %384 : vector<16x32xf32>
    %386 = arith.truncf %385 : vector<16x32xf32> to vector<16x32xbf16>
    %c0_128 = arith.constant 0 : index
    %c0_129 = arith.constant 0 : index
    %387 = vector.load %arg19[%c0_128, %c0_129] : memref<32x128xbf16, #tpu.memory_space<vmem>>, vector<32x128xbf16>
    %cst_130 = arith.constant dense<0.000000e+00> : vector<16x128xf32>
    %388 = tpu.matmul %386, %387, %cst_130 {dimension_numbers = #tpu.dot_dimension_numbers<[1], [0], [0], [1], [0, 0, 1, 1], [], []>} : vector<16x32xbf16>, vector<32x128xbf16>, vector<16x128xf32> -> vector<16x128xf32>
    %c0_131 = arith.constant 0 : index
    %c0_132 = arith.constant 0 : index
    %389 = vector.load %arg20[%c0_131, %c0_132] : memref<1x128xf32, #tpu.memory_space<vmem>>, vector<1x128xf32>
    %390 = vector.broadcast %389 : vector<1x128xf32> to vector<16x128xf32>
    %391 = arith.addf %388, %390 : vector<16x128xf32>
    %cst_133 = arith.constant 0.000000e+00 : f32
    %392 = vector.broadcast %cst_133 : f32 to vector<16x128xf32>
    %393 = arith.maximumf %391, %392 : vector<16x128xf32>
    %394 = arith.truncf %393 : vector<16x128xf32> to vector<16x128xbf16>
    %c0_134 = arith.constant 0 : index
    %c0_135 = arith.constant 0 : index
    %395 = vector.load %arg21[%c0_134, %c0_135] : memref<128x32xbf16, #tpu.memory_space<vmem>>, vector<128x32xbf16>
    %cst_136 = arith.constant dense<0.000000e+00> : vector<16x32xf32>
    %396 = tpu.matmul %394, %395, %cst_136 {dimension_numbers = #tpu.dot_dimension_numbers<[1], [0], [0], [1], [0, 0, 1, 1], [], []>} : vector<16x128xbf16>, vector<128x32xbf16>, vector<16x32xf32> -> vector<16x32xf32>
    %c0_137 = arith.constant 0 : index
    %c0_138 = arith.constant 0 : index
    %397 = vector.load %arg22[%c0_137, %c0_138] : memref<1x32xf32, #tpu.memory_space<vmem>>, vector<1x32xf32>
    %398 = vector.broadcast %397 : vector<1x32xf32> to vector<16x32xf32>
    %399 = arith.addf %396, %398 : vector<16x32xf32>
    %400 = arith.addf %385, %399 : vector<16x32xf32>
    %cst_139 = arith.constant dense<0.000000e+00> : vector<16xf32>
    %401 = vector.multi_reduction <add>, %400, %cst_139 [1] : vector<16x32xf32> to vector<16xf32>
    %402 = vector.shape_cast %401 : vector<16xf32> to vector<16x1xf32>
    %cst_140 = arith.constant 3.200000e+01 : f32
    %403 = vector.broadcast %cst_140 : f32 to vector<16x1xf32>
    %404 = arith.divf %402, %403 : vector<16x1xf32>
    %405 = vector.broadcast %404 : vector<16x1xf32> to vector<16x32xf32>
    %406 = arith.subf %400, %405 : vector<16x32xf32>
    %407 = arith.mulf %406, %406 : vector<16x32xf32>
    %cst_141 = arith.constant dense<0.000000e+00> : vector<16xf32>
    %408 = vector.multi_reduction <add>, %407, %cst_141 [1] : vector<16x32xf32> to vector<16xf32>
    %409 = vector.shape_cast %408 : vector<16xf32> to vector<16x1xf32>
    %cst_142 = arith.constant 3.200000e+01 : f32
    %410 = vector.broadcast %cst_142 : f32 to vector<16x1xf32>
    %411 = arith.divf %409, %410 : vector<16x1xf32>
    %412 = vector.broadcast %404 : vector<16x1xf32> to vector<16x32xf32>
    %413 = arith.subf %400, %412 : vector<16x32xf32>
    %cst_143 = arith.constant 9.99999974E-6 : f32
    %414 = vector.broadcast %cst_143 : f32 to vector<16x1xf32>
    %415 = arith.addf %411, %414 : vector<16x1xf32>
    %416 = math.rsqrt %415 : vector<16x1xf32>
    %417 = vector.broadcast %416 : vector<16x1xf32> to vector<16x32xf32>
    %418 = arith.mulf %413, %417 : vector<16x32xf32>
    %c0_144 = arith.constant 0 : index
    %c0_145 = arith.constant 0 : index
    %419 = vector.load %arg27[%c0_144, %c0_145] : memref<1x32xf32, #tpu.memory_space<vmem>>, vector<1x32xf32>
    %420 = vector.broadcast %419 : vector<1x32xf32> to vector<16x32xf32>
    %421 = arith.mulf %418, %420 : vector<16x32xf32>
    %c0_146 = arith.constant 0 : index
    %c0_147 = arith.constant 0 : index
    %422 = vector.load %arg28[%c0_146, %c0_147] : memref<1x32xf32, #tpu.memory_space<vmem>>, vector<1x32xf32>
    %423 = vector.broadcast %422 : vector<1x32xf32> to vector<16x32xf32>
    %424 = arith.addf %421, %423 : vector<16x32xf32>
    %425 = arith.truncf %424 : vector<16x32xf32> to vector<16x32xbf16>
    %c0_148 = arith.constant 0 : index
    %c0_149 = arith.constant 0 : index
    %426 = vector.load %arg29[%c0_148, %c0_149] : memref<32x32xbf16, #tpu.memory_space<vmem>>, vector<32x32xbf16>
    %cst_150 = arith.constant dense<0.000000e+00> : vector<16x32xf32>
    %427 = tpu.matmul %425, %426, %cst_150 {dimension_numbers = #tpu.dot_dimension_numbers<[1], [0], [0], [1], [0, 0, 1, 1], [], []>} : vector<16x32xbf16>, vector<32x32xbf16>, vector<16x32xf32> -> vector<16x32xf32>
    %c0_151 = arith.constant 0 : index
    %c0_152 = arith.constant 0 : index
    %428 = vector.load %arg30[%c0_151, %c0_152] : memref<1x32xf32, #tpu.memory_space<vmem>>, vector<1x32xf32>
    %429 = vector.broadcast %428 : vector<1x32xf32> to vector<16x32xf32>
    %430 = arith.addf %427, %429 : vector<16x32xf32>
    %cst_153 = arith.constant 0.353553385 : f32
    %431 = vector.broadcast %cst_153 : f32 to vector<16x32xf32>
    %432 = arith.mulf %430, %431 : vector<16x32xf32>
    %433 = arith.truncf %424 : vector<16x32xf32> to vector<16x32xbf16>
    %c0_154 = arith.constant 0 : index
    %c0_155 = arith.constant 0 : index
    %434 = vector.load %arg31[%c0_154, %c0_155] : memref<32x32xbf16, #tpu.memory_space<vmem>>, vector<32x32xbf16>
    %cst_156 = arith.constant dense<0.000000e+00> : vector<16x32xf32>
    %435 = tpu.matmul %433, %434, %cst_156 {dimension_numbers = #tpu.dot_dimension_numbers<[1], [0], [0], [1], [0, 0, 1, 1], [], []>} : vector<16x32xbf16>, vector<32x32xbf16>, vector<16x32xf32> -> vector<16x32xf32>
    %c0_157 = arith.constant 0 : index
    %c0_158 = arith.constant 0 : index
    %436 = vector.load %arg32[%c0_157, %c0_158] : memref<1x32xf32, #tpu.memory_space<vmem>>, vector<1x32xf32>
    %437 = vector.broadcast %436 : vector<1x32xf32> to vector<16x32xf32>
    %438 = arith.addf %435, %437 : vector<16x32xf32>
    %439 = arith.truncf %424 : vector<16x32xf32> to vector<16x32xbf16>
    %c0_159 = arith.constant 0 : index
    %c0_160 = arith.constant 0 : index
    %440 = vector.load %arg33[%c0_159, %c0_160] : memref<32x32xbf16, #tpu.memory_space<vmem>>, vector<32x32xbf16>
    %cst_161 = arith.constant dense<0.000000e+00> : vector<16x32xf32>
    %441 = tpu.matmul %439, %440, %cst_161 {dimension_numbers = #tpu.dot_dimension_numbers<[1], [0], [0], [1], [0, 0, 1, 1], [], []>} : vector<16x32xbf16>, vector<32x32xbf16>, vector<16x32xf32> -> vector<16x32xf32>
    %c0_162 = arith.constant 0 : index
    %c0_163 = arith.constant 0 : index
    %442 = vector.load %arg34[%c0_162, %c0_163] : memref<1x32xf32, #tpu.memory_space<vmem>>, vector<1x32xf32>
    %443 = vector.broadcast %442 : vector<1x32xf32> to vector<16x32xf32>
    %444 = arith.addf %441, %443 : vector<16x32xf32>
    %445 = arith.truncf %432 : vector<16x32xf32> to vector<16x32xbf16>
    %446 = arith.truncf %438 : vector<16x32xf32> to vector<16x32xbf16>
    %447 = arith.truncf %444 : vector<16x32xf32> to vector<16x32xbf16>
    %448 = vector.extract_strided_slice %445 {offsets = [0, 0], sizes = [8, 32], strides = [1, 1]} : vector<16x32xbf16> to vector<8x32xbf16>
    %449 = vector.extract_strided_slice %446 {offsets = [0, 0], sizes = [8, 32], strides = [1, 1]} : vector<16x32xbf16> to vector<8x32xbf16>
    %450 = vector.extract_strided_slice %447 {offsets = [0, 0], sizes = [8, 32], strides = [1, 1]} : vector<16x32xbf16> to vector<8x32xbf16>
    %451 = vector.extract_strided_slice %448 {offsets = [0, 0], sizes = [8, 8], strides = [1, 1]} : vector<8x32xbf16> to vector<8x8xbf16>
    %452 = vector.extract_strided_slice %449 {offsets = [0, 0], sizes = [8, 8], strides = [1, 1]} : vector<8x32xbf16> to vector<8x8xbf16>
    %453 = vector.extract_strided_slice %450 {offsets = [0, 0], sizes = [8, 8], strides = [1, 1]} : vector<8x32xbf16> to vector<8x8xbf16>
    %cst_164 = arith.constant dense<0.000000e+00> : vector<8x8xf32>
    %454 = tpu.matmul %451, %452, %cst_164 {dimension_numbers = #tpu.dot_dimension_numbers<[1], [1], [0], [0], [0, 0, 1, 0], [], []>} : vector<8x8xbf16>, vector<8x8xbf16>, vector<8x8xf32> -> vector<8x8xf32>
    %cst_165 = arith.constant dense<0xFF800000> : vector<8xf32>
    %455 = vector.multi_reduction <maximumf>, %454, %cst_165 [1] : vector<8x8xf32> to vector<8xf32>
    %456 = vector.shape_cast %455 : vector<8xf32> to vector<8x1xf32>
    %457 = vector.broadcast %456 : vector<8x1xf32> to vector<8x8xf32>
    %458 = arith.subf %454, %457 : vector<8x8xf32>
    %459 = math.exp %458 : vector<8x8xf32>
    %cst_166 = arith.constant dense<0.000000e+00> : vector<8xf32>
    %460 = vector.multi_reduction <add>, %459, %cst_166 [1] : vector<8x8xf32> to vector<8xf32>
    %461 = vector.shape_cast %460 : vector<8xf32> to vector<8x1xf32>
    %462 = tpu.reciprocal %461 {approx = true} : vector<8x1xf32> -> vector<8x1xf32>
    %463 = vector.broadcast %462 : vector<8x1xf32> to vector<8x8xf32>
    %464 = arith.mulf %459, %463 : vector<8x8xf32>
    %465 = arith.truncf %464 : vector<8x8xf32> to vector<8x8xbf16>
    %cst_167 = arith.constant dense<0.000000e+00> : vector<8x8xf32>
    %466 = tpu.matmul %465, %453, %cst_167 {dimension_numbers = #tpu.dot_dimension_numbers<[1], [0], [0], [1], [0, 0, 1, 1], [], []>} : vector<8x8xbf16>, vector<8x8xbf16>, vector<8x8xf32> -> vector<8x8xf32>
    %467 = vector.extract_strided_slice %448 {offsets = [0, 8], sizes = [8, 8], strides = [1, 1]} : vector<8x32xbf16> to vector<8x8xbf16>
    %468 = vector.extract_strided_slice %449 {offsets = [0, 8], sizes = [8, 8], strides = [1, 1]} : vector<8x32xbf16> to vector<8x8xbf16>
    %469 = vector.extract_strided_slice %450 {offsets = [0, 8], sizes = [8, 8], strides = [1, 1]} : vector<8x32xbf16> to vector<8x8xbf16>
    %cst_168 = arith.constant dense<0.000000e+00> : vector<8x8xf32>
    %470 = tpu.matmul %467, %468, %cst_168 {dimension_numbers = #tpu.dot_dimension_numbers<[1], [1], [0], [0], [0, 0, 1, 0], [], []>} : vector<8x8xbf16>, vector<8x8xbf16>, vector<8x8xf32> -> vector<8x8xf32>
    %cst_169 = arith.constant dense<0xFF800000> : vector<8xf32>
    %471 = vector.multi_reduction <maximumf>, %470, %cst_169 [1] : vector<8x8xf32> to vector<8xf32>
    %472 = vector.shape_cast %471 : vector<8xf32> to vector<8x1xf32>
    %473 = vector.broadcast %472 : vector<8x1xf32> to vector<8x8xf32>
    %474 = arith.subf %470, %473 : vector<8x8xf32>
    %475 = math.exp %474 : vector<8x8xf32>
    %cst_170 = arith.constant dense<0.000000e+00> : vector<8xf32>
    %476 = vector.multi_reduction <add>, %475, %cst_170 [1] : vector<8x8xf32> to vector<8xf32>
    %477 = vector.shape_cast %476 : vector<8xf32> to vector<8x1xf32>
    %478 = tpu.reciprocal %477 {approx = true} : vector<8x1xf32> -> vector<8x1xf32>
    %479 = vector.broadcast %478 : vector<8x1xf32> to vector<8x8xf32>
    %480 = arith.mulf %475, %479 : vector<8x8xf32>
    %481 = arith.truncf %480 : vector<8x8xf32> to vector<8x8xbf16>
    %cst_171 = arith.constant dense<0.000000e+00> : vector<8x8xf32>
    %482 = tpu.matmul %481, %469, %cst_171 {dimension_numbers = #tpu.dot_dimension_numbers<[1], [0], [0], [1], [0, 0, 1, 1], [], []>} : vector<8x8xbf16>, vector<8x8xbf16>, vector<8x8xf32> -> vector<8x8xf32>
    %483 = vector.extract_strided_slice %448 {offsets = [0, 16], sizes = [8, 8], strides = [1, 1]} : vector<8x32xbf16> to vector<8x8xbf16>
    %484 = vector.extract_strided_slice %449 {offsets = [0, 16], sizes = [8, 8], strides = [1, 1]} : vector<8x32xbf16> to vector<8x8xbf16>
    %485 = vector.extract_strided_slice %450 {offsets = [0, 16], sizes = [8, 8], strides = [1, 1]} : vector<8x32xbf16> to vector<8x8xbf16>
    %cst_172 = arith.constant dense<0.000000e+00> : vector<8x8xf32>
    %486 = tpu.matmul %483, %484, %cst_172 {dimension_numbers = #tpu.dot_dimension_numbers<[1], [1], [0], [0], [0, 0, 1, 0], [], []>} : vector<8x8xbf16>, vector<8x8xbf16>, vector<8x8xf32> -> vector<8x8xf32>
    %cst_173 = arith.constant dense<0xFF800000> : vector<8xf32>
    %487 = vector.multi_reduction <maximumf>, %486, %cst_173 [1] : vector<8x8xf32> to vector<8xf32>
    %488 = vector.shape_cast %487 : vector<8xf32> to vector<8x1xf32>
    %489 = vector.broadcast %488 : vector<8x1xf32> to vector<8x8xf32>
    %490 = arith.subf %486, %489 : vector<8x8xf32>
    %491 = math.exp %490 : vector<8x8xf32>
    %cst_174 = arith.constant dense<0.000000e+00> : vector<8xf32>
    %492 = vector.multi_reduction <add>, %491, %cst_174 [1] : vector<8x8xf32> to vector<8xf32>
    %493 = vector.shape_cast %492 : vector<8xf32> to vector<8x1xf32>
    %494 = tpu.reciprocal %493 {approx = true} : vector<8x1xf32> -> vector<8x1xf32>
    %495 = vector.broadcast %494 : vector<8x1xf32> to vector<8x8xf32>
    %496 = arith.mulf %491, %495 : vector<8x8xf32>
    %497 = arith.truncf %496 : vector<8x8xf32> to vector<8x8xbf16>
    %cst_175 = arith.constant dense<0.000000e+00> : vector<8x8xf32>
    %498 = tpu.matmul %497, %485, %cst_175 {dimension_numbers = #tpu.dot_dimension_numbers<[1], [0], [0], [1], [0, 0, 1, 1], [], []>} : vector<8x8xbf16>, vector<8x8xbf16>, vector<8x8xf32> -> vector<8x8xf32>
    %499 = vector.extract_strided_slice %448 {offsets = [0, 24], sizes = [8, 8], strides = [1, 1]} : vector<8x32xbf16> to vector<8x8xbf16>
    %500 = vector.extract_strided_slice %449 {offsets = [0, 24], sizes = [8, 8], strides = [1, 1]} : vector<8x32xbf16> to vector<8x8xbf16>
    %501 = vector.extract_strided_slice %450 {offsets = [0, 24], sizes = [8, 8], strides = [1, 1]} : vector<8x32xbf16> to vector<8x8xbf16>
    %cst_176 = arith.constant dense<0.000000e+00> : vector<8x8xf32>
    %502 = tpu.matmul %499, %500, %cst_176 {dimension_numbers = #tpu.dot_dimension_numbers<[1], [1], [0], [0], [0, 0, 1, 0], [], []>} : vector<8x8xbf16>, vector<8x8xbf16>, vector<8x8xf32> -> vector<8x8xf32>
    %cst_177 = arith.constant dense<0xFF800000> : vector<8xf32>
    %503 = vector.multi_reduction <maximumf>, %502, %cst_177 [1] : vector<8x8xf32> to vector<8xf32>
    %504 = vector.shape_cast %503 : vector<8xf32> to vector<8x1xf32>
    %505 = vector.broadcast %504 : vector<8x1xf32> to vector<8x8xf32>
    %506 = arith.subf %502, %505 : vector<8x8xf32>
    %507 = math.exp %506 : vector<8x8xf32>
    %cst_178 = arith.constant dense<0.000000e+00> : vector<8xf32>
    %508 = vector.multi_reduction <add>, %507, %cst_178 [1] : vector<8x8xf32> to vector<8xf32>
    %509 = vector.shape_cast %508 : vector<8xf32> to vector<8x1xf32>
    %510 = tpu.reciprocal %509 {approx = true} : vector<8x1xf32> -> vector<8x1xf32>
    %511 = vector.broadcast %510 : vector<8x1xf32> to vector<8x8xf32>
    %512 = arith.mulf %507, %511 : vector<8x8xf32>
    %513 = arith.truncf %512 : vector<8x8xf32> to vector<8x8xbf16>
    %cst_179 = arith.constant dense<0.000000e+00> : vector<8x8xf32>
    %514 = tpu.matmul %513, %501, %cst_179 {dimension_numbers = #tpu.dot_dimension_numbers<[1], [0], [0], [1], [0, 0, 1, 1], [], []>} : vector<8x8xbf16>, vector<8x8xbf16>, vector<8x8xf32> -> vector<8x8xf32>
    %515 = tpu.concatenate %466, %482, %498, %514 in 1 : vector<8x8xf32>, vector<8x8xf32>, vector<8x8xf32>, vector<8x8xf32> -> vector<8x32xf32>
    %516 = vector.extract_strided_slice %445 {offsets = [8, 0], sizes = [8, 32], strides = [1, 1]} : vector<16x32xbf16> to vector<8x32xbf16>
    %517 = vector.extract_strided_slice %446 {offsets = [8, 0], sizes = [8, 32], strides = [1, 1]} : vector<16x32xbf16> to vector<8x32xbf16>
    %518 = vector.extract_strided_slice %447 {offsets = [8, 0], sizes = [8, 32], strides = [1, 1]} : vector<16x32xbf16> to vector<8x32xbf16>
    %519 = vector.extract_strided_slice %516 {offsets = [0, 0], sizes = [8, 8], strides = [1, 1]} : vector<8x32xbf16> to vector<8x8xbf16>
    %520 = vector.extract_strided_slice %517 {offsets = [0, 0], sizes = [8, 8], strides = [1, 1]} : vector<8x32xbf16> to vector<8x8xbf16>
    %521 = vector.extract_strided_slice %518 {offsets = [0, 0], sizes = [8, 8], strides = [1, 1]} : vector<8x32xbf16> to vector<8x8xbf16>
    %cst_180 = arith.constant dense<0.000000e+00> : vector<8x8xf32>
    %522 = tpu.matmul %519, %520, %cst_180 {dimension_numbers = #tpu.dot_dimension_numbers<[1], [1], [0], [0], [0, 0, 1, 0], [], []>} : vector<8x8xbf16>, vector<8x8xbf16>, vector<8x8xf32> -> vector<8x8xf32>
    %cst_181 = arith.constant dense<0xFF800000> : vector<8xf32>
    %523 = vector.multi_reduction <maximumf>, %522, %cst_181 [1] : vector<8x8xf32> to vector<8xf32>
    %524 = vector.shape_cast %523 : vector<8xf32> to vector<8x1xf32>
    %525 = vector.broadcast %524 : vector<8x1xf32> to vector<8x8xf32>
    %526 = arith.subf %522, %525 : vector<8x8xf32>
    %527 = math.exp %526 : vector<8x8xf32>
    %cst_182 = arith.constant dense<0.000000e+00> : vector<8xf32>
    %528 = vector.multi_reduction <add>, %527, %cst_182 [1] : vector<8x8xf32> to vector<8xf32>
    %529 = vector.shape_cast %528 : vector<8xf32> to vector<8x1xf32>
    %530 = tpu.reciprocal %529 {approx = true} : vector<8x1xf32> -> vector<8x1xf32>
    %531 = vector.broadcast %530 : vector<8x1xf32> to vector<8x8xf32>
    %532 = arith.mulf %527, %531 : vector<8x8xf32>
    %533 = arith.truncf %532 : vector<8x8xf32> to vector<8x8xbf16>
    %cst_183 = arith.constant dense<0.000000e+00> : vector<8x8xf32>
    %534 = tpu.matmul %533, %521, %cst_183 {dimension_numbers = #tpu.dot_dimension_numbers<[1], [0], [0], [1], [0, 0, 1, 1], [], []>} : vector<8x8xbf16>, vector<8x8xbf16>, vector<8x8xf32> -> vector<8x8xf32>
    %535 = vector.extract_strided_slice %516 {offsets = [0, 8], sizes = [8, 8], strides = [1, 1]} : vector<8x32xbf16> to vector<8x8xbf16>
    %536 = vector.extract_strided_slice %517 {offsets = [0, 8], sizes = [8, 8], strides = [1, 1]} : vector<8x32xbf16> to vector<8x8xbf16>
    %537 = vector.extract_strided_slice %518 {offsets = [0, 8], sizes = [8, 8], strides = [1, 1]} : vector<8x32xbf16> to vector<8x8xbf16>
    %cst_184 = arith.constant dense<0.000000e+00> : vector<8x8xf32>
    %538 = tpu.matmul %535, %536, %cst_184 {dimension_numbers = #tpu.dot_dimension_numbers<[1], [1], [0], [0], [0, 0, 1, 0], [], []>} : vector<8x8xbf16>, vector<8x8xbf16>, vector<8x8xf32> -> vector<8x8xf32>
    %cst_185 = arith.constant dense<0xFF800000> : vector<8xf32>
    %539 = vector.multi_reduction <maximumf>, %538, %cst_185 [1] : vector<8x8xf32> to vector<8xf32>
    %540 = vector.shape_cast %539 : vector<8xf32> to vector<8x1xf32>
    %541 = vector.broadcast %540 : vector<8x1xf32> to vector<8x8xf32>
    %542 = arith.subf %538, %541 : vector<8x8xf32>
    %543 = math.exp %542 : vector<8x8xf32>
    %cst_186 = arith.constant dense<0.000000e+00> : vector<8xf32>
    %544 = vector.multi_reduction <add>, %543, %cst_186 [1] : vector<8x8xf32> to vector<8xf32>
    %545 = vector.shape_cast %544 : vector<8xf32> to vector<8x1xf32>
    %546 = tpu.reciprocal %545 {approx = true} : vector<8x1xf32> -> vector<8x1xf32>
    %547 = vector.broadcast %546 : vector<8x1xf32> to vector<8x8xf32>
    %548 = arith.mulf %543, %547 : vector<8x8xf32>
    %549 = arith.truncf %548 : vector<8x8xf32> to vector<8x8xbf16>
    %cst_187 = arith.constant dense<0.000000e+00> : vector<8x8xf32>
    %550 = tpu.matmul %549, %537, %cst_187 {dimension_numbers = #tpu.dot_dimension_numbers<[1], [0], [0], [1], [0, 0, 1, 1], [], []>} : vector<8x8xbf16>, vector<8x8xbf16>, vector<8x8xf32> -> vector<8x8xf32>
    %551 = vector.extract_strided_slice %516 {offsets = [0, 16], sizes = [8, 8], strides = [1, 1]} : vector<8x32xbf16> to vector<8x8xbf16>
    %552 = vector.extract_strided_slice %517 {offsets = [0, 16], sizes = [8, 8], strides = [1, 1]} : vector<8x32xbf16> to vector<8x8xbf16>
    %553 = vector.extract_strided_slice %518 {offsets = [0, 16], sizes = [8, 8], strides = [1, 1]} : vector<8x32xbf16> to vector<8x8xbf16>
    %cst_188 = arith.constant dense<0.000000e+00> : vector<8x8xf32>
    %554 = tpu.matmul %551, %552, %cst_188 {dimension_numbers = #tpu.dot_dimension_numbers<[1], [1], [0], [0], [0, 0, 1, 0], [], []>} : vector<8x8xbf16>, vector<8x8xbf16>, vector<8x8xf32> -> vector<8x8xf32>
    %cst_189 = arith.constant dense<0xFF800000> : vector<8xf32>
    %555 = vector.multi_reduction <maximumf>, %554, %cst_189 [1] : vector<8x8xf32> to vector<8xf32>
    %556 = vector.shape_cast %555 : vector<8xf32> to vector<8x1xf32>
    %557 = vector.broadcast %556 : vector<8x1xf32> to vector<8x8xf32>
    %558 = arith.subf %554, %557 : vector<8x8xf32>
    %559 = math.exp %558 : vector<8x8xf32>
    %cst_190 = arith.constant dense<0.000000e+00> : vector<8xf32>
    %560 = vector.multi_reduction <add>, %559, %cst_190 [1] : vector<8x8xf32> to vector<8xf32>
    %561 = vector.shape_cast %560 : vector<8xf32> to vector<8x1xf32>
    %562 = tpu.reciprocal %561 {approx = true} : vector<8x1xf32> -> vector<8x1xf32>
    %563 = vector.broadcast %562 : vector<8x1xf32> to vector<8x8xf32>
    %564 = arith.mulf %559, %563 : vector<8x8xf32>
    %565 = arith.truncf %564 : vector<8x8xf32> to vector<8x8xbf16>
    %cst_191 = arith.constant dense<0.000000e+00> : vector<8x8xf32>
    %566 = tpu.matmul %565, %553, %cst_191 {dimension_numbers = #tpu.dot_dimension_numbers<[1], [0], [0], [1], [0, 0, 1, 1], [], []>} : vector<8x8xbf16>, vector<8x8xbf16>, vector<8x8xf32> -> vector<8x8xf32>
    %567 = vector.extract_strided_slice %516 {offsets = [0, 24], sizes = [8, 8], strides = [1, 1]} : vector<8x32xbf16> to vector<8x8xbf16>
    %568 = vector.extract_strided_slice %517 {offsets = [0, 24], sizes = [8, 8], strides = [1, 1]} : vector<8x32xbf16> to vector<8x8xbf16>
    %569 = vector.extract_strided_slice %518 {offsets = [0, 24], sizes = [8, 8], strides = [1, 1]} : vector<8x32xbf16> to vector<8x8xbf16>
    %cst_192 = arith.constant dense<0.000000e+00> : vector<8x8xf32>
    %570 = tpu.matmul %567, %568, %cst_192 {dimension_numbers = #tpu.dot_dimension_numbers<[1], [1], [0], [0], [0, 0, 1, 0], [], []>} : vector<8x8xbf16>, vector<8x8xbf16>, vector<8x8xf32> -> vector<8x8xf32>
    %cst_193 = arith.constant dense<0xFF800000> : vector<8xf32>
    %571 = vector.multi_reduction <maximumf>, %570, %cst_193 [1] : vector<8x8xf32> to vector<8xf32>
    %572 = vector.shape_cast %571 : vector<8xf32> to vector<8x1xf32>
    %573 = vector.broadcast %572 : vector<8x1xf32> to vector<8x8xf32>
    %574 = arith.subf %570, %573 : vector<8x8xf32>
    %575 = math.exp %574 : vector<8x8xf32>
    %cst_194 = arith.constant dense<0.000000e+00> : vector<8xf32>
    %576 = vector.multi_reduction <add>, %575, %cst_194 [1] : vector<8x8xf32> to vector<8xf32>
    %577 = vector.shape_cast %576 : vector<8xf32> to vector<8x1xf32>
    %578 = tpu.reciprocal %577 {approx = true} : vector<8x1xf32> -> vector<8x1xf32>
    %579 = vector.broadcast %578 : vector<8x1xf32> to vector<8x8xf32>
    %580 = arith.mulf %575, %579 : vector<8x8xf32>
    %581 = arith.truncf %580 : vector<8x8xf32> to vector<8x8xbf16>
    %cst_195 = arith.constant dense<0.000000e+00> : vector<8x8xf32>
    %582 = tpu.matmul %581, %569, %cst_195 {dimension_numbers = #tpu.dot_dimension_numbers<[1], [0], [0], [1], [0, 0, 1, 1], [], []>} : vector<8x8xbf16>, vector<8x8xbf16>, vector<8x8xf32> -> vector<8x8xf32>
    %583 = tpu.concatenate %534, %550, %566, %582 in 1 : vector<8x8xf32>, vector<8x8xf32>, vector<8x8xf32>, vector<8x8xf32> -> vector<8x32xf32>
    %584 = tpu.concatenate %515, %583 in 0 : vector<8x32xf32>, vector<8x32xf32> -> vector<16x32xf32>
    %585 = arith.truncf %584 : vector<16x32xf32> to vector<16x32xbf16>
    %c0_196 = arith.constant 0 : index
    %c0_197 = arith.constant 0 : index
    %586 = vector.load %arg35[%c0_196, %c0_197] : memref<32x32xbf16, #tpu.memory_space<vmem>>, vector<32x32xbf16>
    %cst_198 = arith.constant dense<0.000000e+00> : vector<16x32xf32>
    %587 = tpu.matmul %585, %586, %cst_198 {dimension_numbers = #tpu.dot_dimension_numbers<[1], [0], [0], [1], [0, 0, 1, 1], [], []>} : vector<16x32xbf16>, vector<32x32xbf16>, vector<16x32xf32> -> vector<16x32xf32>
    %c0_199 = arith.constant 0 : index
    %c0_200 = arith.constant 0 : index
    %588 = vector.load %arg36[%c0_199, %c0_200] : memref<1x32xf32, #tpu.memory_space<vmem>>, vector<1x32xf32>
    %589 = vector.broadcast %588 : vector<1x32xf32> to vector<16x32xf32>
    %590 = arith.addf %587, %589 : vector<16x32xf32>
    %591 = arith.addf %424, %590 : vector<16x32xf32>
    %cst_201 = arith.constant dense<0.000000e+00> : vector<16xf32>
    %592 = vector.multi_reduction <add>, %591, %cst_201 [1] : vector<16x32xf32> to vector<16xf32>
    %593 = vector.shape_cast %592 : vector<16xf32> to vector<16x1xf32>
    %cst_202 = arith.constant 3.200000e+01 : f32
    %594 = vector.broadcast %cst_202 : f32 to vector<16x1xf32>
    %595 = arith.divf %593, %594 : vector<16x1xf32>
    %596 = vector.broadcast %595 : vector<16x1xf32> to vector<16x32xf32>
    %597 = arith.subf %591, %596 : vector<16x32xf32>
    %598 = arith.mulf %597, %597 : vector<16x32xf32>
    %cst_203 = arith.constant dense<0.000000e+00> : vector<16xf32>
    %599 = vector.multi_reduction <add>, %598, %cst_203 [1] : vector<16x32xf32> to vector<16xf32>
    %600 = vector.shape_cast %599 : vector<16xf32> to vector<16x1xf32>
    %cst_204 = arith.constant 3.200000e+01 : f32
    %601 = vector.broadcast %cst_204 : f32 to vector<16x1xf32>
    %602 = arith.divf %600, %601 : vector<16x1xf32>
    %603 = vector.broadcast %595 : vector<16x1xf32> to vector<16x32xf32>
    %604 = arith.subf %591, %603 : vector<16x32xf32>
    %cst_205 = arith.constant 9.99999974E-6 : f32
    %605 = vector.broadcast %cst_205 : f32 to vector<16x1xf32>
    %606 = arith.addf %602, %605 : vector<16x1xf32>
    %607 = math.rsqrt %606 : vector<16x1xf32>
    %608 = vector.broadcast %607 : vector<16x1xf32> to vector<16x32xf32>
    %609 = arith.mulf %604, %608 : vector<16x32xf32>
    %c0_206 = arith.constant 0 : index
    %c0_207 = arith.constant 0 : index
    %610 = vector.load %arg49[%c0_206, %c0_207] : memref<1x32xf32, #tpu.memory_space<vmem>>, vector<1x32xf32>
    %611 = vector.broadcast %610 : vector<1x32xf32> to vector<16x32xf32>
    %612 = arith.mulf %609, %611 : vector<16x32xf32>
    %c0_208 = arith.constant 0 : index
    %c0_209 = arith.constant 0 : index
    %613 = vector.load %arg50[%c0_208, %c0_209] : memref<1x32xf32, #tpu.memory_space<vmem>>, vector<1x32xf32>
    %614 = vector.broadcast %613 : vector<1x32xf32> to vector<16x32xf32>
    %615 = arith.addf %612, %614 : vector<16x32xf32>
    %616 = arith.truncf %615 : vector<16x32xf32> to vector<16x32xbf16>
    %c0_210 = arith.constant 0 : index
    %c0_211 = arith.constant 0 : index
    %617 = vector.load %arg37[%c0_210, %c0_211] : memref<32x32xbf16, #tpu.memory_space<vmem>>, vector<32x32xbf16>
    %cst_212 = arith.constant dense<0.000000e+00> : vector<16x32xf32>
    %618 = tpu.matmul %616, %617, %cst_212 {dimension_numbers = #tpu.dot_dimension_numbers<[1], [0], [0], [1], [0, 0, 1, 1], [], []>} : vector<16x32xbf16>, vector<32x32xbf16>, vector<16x32xf32> -> vector<16x32xf32>
    %c0_213 = arith.constant 0 : index
    %c0_214 = arith.constant 0 : index
    %619 = vector.load %arg38[%c0_213, %c0_214] : memref<1x32xf32, #tpu.memory_space<vmem>>, vector<1x32xf32>
    %620 = vector.broadcast %619 : vector<1x32xf32> to vector<16x32xf32>
    %621 = arith.addf %618, %620 : vector<16x32xf32>
    %cst_215 = arith.constant 0.353553385 : f32
    %622 = vector.broadcast %cst_215 : f32 to vector<16x32xf32>
    %623 = arith.mulf %621, %622 : vector<16x32xf32>
    %624 = arith.truncf %3 : vector<32x32xf32> to vector<32x32xbf16>
    %c0_216 = arith.constant 0 : index
    %c0_217 = arith.constant 0 : index
    %625 = vector.load %arg39[%c0_216, %c0_217] : memref<32x32xbf16, #tpu.memory_space<vmem>>, vector<32x32xbf16>
    %cst_218 = arith.constant dense<0.000000e+00> : vector<32x32xf32>
    %626 = tpu.matmul %624, %625, %cst_218 {dimension_numbers = #tpu.dot_dimension_numbers<[1], [0], [0], [1], [0, 0, 1, 1], [], []>} : vector<32x32xbf16>, vector<32x32xbf16>, vector<32x32xf32> -> vector<32x32xf32>
    %c0_219 = arith.constant 0 : index
    %c0_220 = arith.constant 0 : index
    %627 = vector.load %arg40[%c0_219, %c0_220] : memref<1x32xf32, #tpu.memory_space<vmem>>, vector<1x32xf32>
    %628 = vector.broadcast %627 : vector<1x32xf32> to vector<32x32xf32>
    %629 = arith.addf %626, %628 : vector<32x32xf32>
    %630 = arith.truncf %3 : vector<32x32xf32> to vector<32x32xbf16>
    %c0_221 = arith.constant 0 : index
    %c0_222 = arith.constant 0 : index
    %631 = vector.load %arg41[%c0_221, %c0_222] : memref<32x32xbf16, #tpu.memory_space<vmem>>, vector<32x32xbf16>
    %cst_223 = arith.constant dense<0.000000e+00> : vector<32x32xf32>
    %632 = tpu.matmul %630, %631, %cst_223 {dimension_numbers = #tpu.dot_dimension_numbers<[1], [0], [0], [1], [0, 0, 1, 1], [], []>} : vector<32x32xbf16>, vector<32x32xbf16>, vector<32x32xf32> -> vector<32x32xf32>
    %c0_224 = arith.constant 0 : index
    %c0_225 = arith.constant 0 : index
    %633 = vector.load %arg42[%c0_224, %c0_225] : memref<1x32xf32, #tpu.memory_space<vmem>>, vector<1x32xf32>
    %634 = vector.broadcast %633 : vector<1x32xf32> to vector<32x32xf32>
    %635 = arith.addf %632, %634 : vector<32x32xf32>
    %636 = arith.truncf %623 : vector<16x32xf32> to vector<16x32xbf16>
    %637 = arith.truncf %629 : vector<32x32xf32> to vector<32x32xbf16>
    %638 = arith.truncf %635 : vector<32x32xf32> to vector<32x32xbf16>
    %639 = vector.extract_strided_slice %636 {offsets = [0, 0], sizes = [8, 32], strides = [1, 1]} : vector<16x32xbf16> to vector<8x32xbf16>
    %640 = vector.extract_strided_slice %637 {offsets = [0, 0], sizes = [16, 32], strides = [1, 1]} : vector<32x32xbf16> to vector<16x32xbf16>
    %641 = vector.extract_strided_slice %638 {offsets = [0, 0], sizes = [16, 32], strides = [1, 1]} : vector<32x32xbf16> to vector<16x32xbf16>
    %642 = vector.extract_strided_slice %639 {offsets = [0, 0], sizes = [8, 8], strides = [1, 1]} : vector<8x32xbf16> to vector<8x8xbf16>
    %643 = vector.extract_strided_slice %640 {offsets = [0, 0], sizes = [16, 8], strides = [1, 1]} : vector<16x32xbf16> to vector<16x8xbf16>
    %644 = vector.extract_strided_slice %641 {offsets = [0, 0], sizes = [16, 8], strides = [1, 1]} : vector<16x32xbf16> to vector<16x8xbf16>
    %cst_226 = arith.constant dense<0.000000e+00> : vector<8x16xf32>
    %645 = tpu.matmul %642, %643, %cst_226 {dimension_numbers = #tpu.dot_dimension_numbers<[1], [1], [0], [0], [0, 0, 1, 0], [], []>} : vector<8x8xbf16>, vector<16x8xbf16>, vector<8x16xf32> -> vector<8x16xf32>
    %cst_227 = arith.constant dense<0xFF800000> : vector<8xf32>
    %646 = vector.multi_reduction <maximumf>, %645, %cst_227 [1] : vector<8x16xf32> to vector<8xf32>
    %647 = vector.shape_cast %646 : vector<8xf32> to vector<8x1xf32>
    %648 = vector.broadcast %647 : vector<8x1xf32> to vector<8x16xf32>
    %649 = arith.subf %645, %648 : vector<8x16xf32>
    %650 = math.exp %649 : vector<8x16xf32>
    %cst_228 = arith.constant dense<0.000000e+00> : vector<8xf32>
    %651 = vector.multi_reduction <add>, %650, %cst_228 [1] : vector<8x16xf32> to vector<8xf32>
    %652 = vector.shape_cast %651 : vector<8xf32> to vector<8x1xf32>
    %653 = tpu.reciprocal %652 {approx = true} : vector<8x1xf32> -> vector<8x1xf32>
    %654 = vector.broadcast %653 : vector<8x1xf32> to vector<8x16xf32>
    %655 = arith.mulf %650, %654 : vector<8x16xf32>
    %656 = arith.truncf %655 : vector<8x16xf32> to vector<8x16xbf16>
    %cst_229 = arith.constant dense<0.000000e+00> : vector<8x8xf32>
    %657 = tpu.matmul %656, %644, %cst_229 {dimension_numbers = #tpu.dot_dimension_numbers<[1], [0], [0], [1], [0, 0, 1, 1], [], []>} : vector<8x16xbf16>, vector<16x8xbf16>, vector<8x8xf32> -> vector<8x8xf32>
    %658 = vector.extract_strided_slice %639 {offsets = [0, 8], sizes = [8, 8], strides = [1, 1]} : vector<8x32xbf16> to vector<8x8xbf16>
    %659 = vector.extract_strided_slice %640 {offsets = [0, 8], sizes = [16, 8], strides = [1, 1]} : vector<16x32xbf16> to vector<16x8xbf16>
    %660 = vector.extract_strided_slice %641 {offsets = [0, 8], sizes = [16, 8], strides = [1, 1]} : vector<16x32xbf16> to vector<16x8xbf16>
    %cst_230 = arith.constant dense<0.000000e+00> : vector<8x16xf32>
    %661 = tpu.matmul %658, %659, %cst_230 {dimension_numbers = #tpu.dot_dimension_numbers<[1], [1], [0], [0], [0, 0, 1, 0], [], []>} : vector<8x8xbf16>, vector<16x8xbf16>, vector<8x16xf32> -> vector<8x16xf32>
    %cst_231 = arith.constant dense<0xFF800000> : vector<8xf32>
    %662 = vector.multi_reduction <maximumf>, %661, %cst_231 [1] : vector<8x16xf32> to vector<8xf32>
    %663 = vector.shape_cast %662 : vector<8xf32> to vector<8x1xf32>
    %664 = vector.broadcast %663 : vector<8x1xf32> to vector<8x16xf32>
    %665 = arith.subf %661, %664 : vector<8x16xf32>
    %666 = math.exp %665 : vector<8x16xf32>
    %cst_232 = arith.constant dense<0.000000e+00> : vector<8xf32>
    %667 = vector.multi_reduction <add>, %666, %cst_232 [1] : vector<8x16xf32> to vector<8xf32>
    %668 = vector.shape_cast %667 : vector<8xf32> to vector<8x1xf32>
    %669 = tpu.reciprocal %668 {approx = true} : vector<8x1xf32> -> vector<8x1xf32>
    %670 = vector.broadcast %669 : vector<8x1xf32> to vector<8x16xf32>
    %671 = arith.mulf %666, %670 : vector<8x16xf32>
    %672 = arith.truncf %671 : vector<8x16xf32> to vector<8x16xbf16>
    %cst_233 = arith.constant dense<0.000000e+00> : vector<8x8xf32>
    %673 = tpu.matmul %672, %660, %cst_233 {dimension_numbers = #tpu.dot_dimension_numbers<[1], [0], [0], [1], [0, 0, 1, 1], [], []>} : vector<8x16xbf16>, vector<16x8xbf16>, vector<8x8xf32> -> vector<8x8xf32>
    %674 = vector.extract_strided_slice %639 {offsets = [0, 16], sizes = [8, 8], strides = [1, 1]} : vector<8x32xbf16> to vector<8x8xbf16>
    %675 = vector.extract_strided_slice %640 {offsets = [0, 16], sizes = [16, 8], strides = [1, 1]} : vector<16x32xbf16> to vector<16x8xbf16>
    %676 = vector.extract_strided_slice %641 {offsets = [0, 16], sizes = [16, 8], strides = [1, 1]} : vector<16x32xbf16> to vector<16x8xbf16>
    %cst_234 = arith.constant dense<0.000000e+00> : vector<8x16xf32>
    %677 = tpu.matmul %674, %675, %cst_234 {dimension_numbers = #tpu.dot_dimension_numbers<[1], [1], [0], [0], [0, 0, 1, 0], [], []>} : vector<8x8xbf16>, vector<16x8xbf16>, vector<8x16xf32> -> vector<8x16xf32>
    %cst_235 = arith.constant dense<0xFF800000> : vector<8xf32>
    %678 = vector.multi_reduction <maximumf>, %677, %cst_235 [1] : vector<8x16xf32> to vector<8xf32>
    %679 = vector.shape_cast %678 : vector<8xf32> to vector<8x1xf32>
    %680 = vector.broadcast %679 : vector<8x1xf32> to vector<8x16xf32>
    %681 = arith.subf %677, %680 : vector<8x16xf32>
    %682 = math.exp %681 : vector<8x16xf32>
    %cst_236 = arith.constant dense<0.000000e+00> : vector<8xf32>
    %683 = vector.multi_reduction <add>, %682, %cst_236 [1] : vector<8x16xf32> to vector<8xf32>
    %684 = vector.shape_cast %683 : vector<8xf32> to vector<8x1xf32>
    %685 = tpu.reciprocal %684 {approx = true} : vector<8x1xf32> -> vector<8x1xf32>
    %686 = vector.broadcast %685 : vector<8x1xf32> to vector<8x16xf32>
    %687 = arith.mulf %682, %686 : vector<8x16xf32>
    %688 = arith.truncf %687 : vector<8x16xf32> to vector<8x16xbf16>
    %cst_237 = arith.constant dense<0.000000e+00> : vector<8x8xf32>
    %689 = tpu.matmul %688, %676, %cst_237 {dimension_numbers = #tpu.dot_dimension_numbers<[1], [0], [0], [1], [0, 0, 1, 1], [], []>} : vector<8x16xbf16>, vector<16x8xbf16>, vector<8x8xf32> -> vector<8x8xf32>
    %690 = vector.extract_strided_slice %639 {offsets = [0, 24], sizes = [8, 8], strides = [1, 1]} : vector<8x32xbf16> to vector<8x8xbf16>
    %691 = vector.extract_strided_slice %640 {offsets = [0, 24], sizes = [16, 8], strides = [1, 1]} : vector<16x32xbf16> to vector<16x8xbf16>
    %692 = vector.extract_strided_slice %641 {offsets = [0, 24], sizes = [16, 8], strides = [1, 1]} : vector<16x32xbf16> to vector<16x8xbf16>
    %cst_238 = arith.constant dense<0.000000e+00> : vector<8x16xf32>
    %693 = tpu.matmul %690, %691, %cst_238 {dimension_numbers = #tpu.dot_dimension_numbers<[1], [1], [0], [0], [0, 0, 1, 0], [], []>} : vector<8x8xbf16>, vector<16x8xbf16>, vector<8x16xf32> -> vector<8x16xf32>
    %cst_239 = arith.constant dense<0xFF800000> : vector<8xf32>
    %694 = vector.multi_reduction <maximumf>, %693, %cst_239 [1] : vector<8x16xf32> to vector<8xf32>
    %695 = vector.shape_cast %694 : vector<8xf32> to vector<8x1xf32>
    %696 = vector.broadcast %695 : vector<8x1xf32> to vector<8x16xf32>
    %697 = arith.subf %693, %696 : vector<8x16xf32>
    %698 = math.exp %697 : vector<8x16xf32>
    %cst_240 = arith.constant dense<0.000000e+00> : vector<8xf32>
    %699 = vector.multi_reduction <add>, %698, %cst_240 [1] : vector<8x16xf32> to vector<8xf32>
    %700 = vector.shape_cast %699 : vector<8xf32> to vector<8x1xf32>
    %701 = tpu.reciprocal %700 {approx = true} : vector<8x1xf32> -> vector<8x1xf32>
    %702 = vector.broadcast %701 : vector<8x1xf32> to vector<8x16xf32>
    %703 = arith.mulf %698, %702 : vector<8x16xf32>
    %704 = arith.truncf %703 : vector<8x16xf32> to vector<8x16xbf16>
    %cst_241 = arith.constant dense<0.000000e+00> : vector<8x8xf32>
    %705 = tpu.matmul %704, %692, %cst_241 {dimension_numbers = #tpu.dot_dimension_numbers<[1], [0], [0], [1], [0, 0, 1, 1], [], []>} : vector<8x16xbf16>, vector<16x8xbf16>, vector<8x8xf32> -> vector<8x8xf32>
    %706 = tpu.concatenate %657, %673, %689, %705 in 1 : vector<8x8xf32>, vector<8x8xf32>, vector<8x8xf32>, vector<8x8xf32> -> vector<8x32xf32>
    %707 = vector.extract_strided_slice %636 {offsets = [8, 0], sizes = [8, 32], strides = [1, 1]} : vector<16x32xbf16> to vector<8x32xbf16>
    %708 = vector.extract_strided_slice %637 {offsets = [16, 0], sizes = [16, 32], strides = [1, 1]} : vector<32x32xbf16> to vector<16x32xbf16>
    %709 = vector.extract_strided_slice %638 {offsets = [16, 0], sizes = [16, 32], strides = [1, 1]} : vector<32x32xbf16> to vector<16x32xbf16>
    %710 = vector.extract_strided_slice %707 {offsets = [0, 0], sizes = [8, 8], strides = [1, 1]} : vector<8x32xbf16> to vector<8x8xbf16>
    %711 = vector.extract_strided_slice %708 {offsets = [0, 0], sizes = [16, 8], strides = [1, 1]} : vector<16x32xbf16> to vector<16x8xbf16>
    %712 = vector.extract_strided_slice %709 {offsets = [0, 0], sizes = [16, 8], strides = [1, 1]} : vector<16x32xbf16> to vector<16x8xbf16>
    %cst_242 = arith.constant dense<0.000000e+00> : vector<8x16xf32>
    %713 = tpu.matmul %710, %711, %cst_242 {dimension_numbers = #tpu.dot_dimension_numbers<[1], [1], [0], [0], [0, 0, 1, 0], [], []>} : vector<8x8xbf16>, vector<16x8xbf16>, vector<8x16xf32> -> vector<8x16xf32>
    %cst_243 = arith.constant dense<0xFF800000> : vector<8xf32>
    %714 = vector.multi_reduction <maximumf>, %713, %cst_243 [1] : vector<8x16xf32> to vector<8xf32>
    %715 = vector.shape_cast %714 : vector<8xf32> to vector<8x1xf32>
    %716 = vector.broadcast %715 : vector<8x1xf32> to vector<8x16xf32>
    %717 = arith.subf %713, %716 : vector<8x16xf32>
    %718 = math.exp %717 : vector<8x16xf32>
    %cst_244 = arith.constant dense<0.000000e+00> : vector<8xf32>
    %719 = vector.multi_reduction <add>, %718, %cst_244 [1] : vector<8x16xf32> to vector<8xf32>
    %720 = vector.shape_cast %719 : vector<8xf32> to vector<8x1xf32>
    %721 = tpu.reciprocal %720 {approx = true} : vector<8x1xf32> -> vector<8x1xf32>
    %722 = vector.broadcast %721 : vector<8x1xf32> to vector<8x16xf32>
    %723 = arith.mulf %718, %722 : vector<8x16xf32>
    %724 = arith.truncf %723 : vector<8x16xf32> to vector<8x16xbf16>
    %cst_245 = arith.constant dense<0.000000e+00> : vector<8x8xf32>
    %725 = tpu.matmul %724, %712, %cst_245 {dimension_numbers = #tpu.dot_dimension_numbers<[1], [0], [0], [1], [0, 0, 1, 1], [], []>} : vector<8x16xbf16>, vector<16x8xbf16>, vector<8x8xf32> -> vector<8x8xf32>
    %726 = vector.extract_strided_slice %707 {offsets = [0, 8], sizes = [8, 8], strides = [1, 1]} : vector<8x32xbf16> to vector<8x8xbf16>
    %727 = vector.extract_strided_slice %708 {offsets = [0, 8], sizes = [16, 8], strides = [1, 1]} : vector<16x32xbf16> to vector<16x8xbf16>
    %728 = vector.extract_strided_slice %709 {offsets = [0, 8], sizes = [16, 8], strides = [1, 1]} : vector<16x32xbf16> to vector<16x8xbf16>
    %cst_246 = arith.constant dense<0.000000e+00> : vector<8x16xf32>
    %729 = tpu.matmul %726, %727, %cst_246 {dimension_numbers = #tpu.dot_dimension_numbers<[1], [1], [0], [0], [0, 0, 1, 0], [], []>} : vector<8x8xbf16>, vector<16x8xbf16>, vector<8x16xf32> -> vector<8x16xf32>
    %cst_247 = arith.constant dense<0xFF800000> : vector<8xf32>
    %730 = vector.multi_reduction <maximumf>, %729, %cst_247 [1] : vector<8x16xf32> to vector<8xf32>
    %731 = vector.shape_cast %730 : vector<8xf32> to vector<8x1xf32>
    %732 = vector.broadcast %731 : vector<8x1xf32> to vector<8x16xf32>
    %733 = arith.subf %729, %732 : vector<8x16xf32>
    %734 = math.exp %733 : vector<8x16xf32>
    %cst_248 = arith.constant dense<0.000000e+00> : vector<8xf32>
    %735 = vector.multi_reduction <add>, %734, %cst_248 [1] : vector<8x16xf32> to vector<8xf32>
    %736 = vector.shape_cast %735 : vector<8xf32> to vector<8x1xf32>
    %737 = tpu.reciprocal %736 {approx = true} : vector<8x1xf32> -> vector<8x1xf32>
    %738 = vector.broadcast %737 : vector<8x1xf32> to vector<8x16xf32>
    %739 = arith.mulf %734, %738 : vector<8x16xf32>
    %740 = arith.truncf %739 : vector<8x16xf32> to vector<8x16xbf16>
    %cst_249 = arith.constant dense<0.000000e+00> : vector<8x8xf32>
    %741 = tpu.matmul %740, %728, %cst_249 {dimension_numbers = #tpu.dot_dimension_numbers<[1], [0], [0], [1], [0, 0, 1, 1], [], []>} : vector<8x16xbf16>, vector<16x8xbf16>, vector<8x8xf32> -> vector<8x8xf32>
    %742 = vector.extract_strided_slice %707 {offsets = [0, 16], sizes = [8, 8], strides = [1, 1]} : vector<8x32xbf16> to vector<8x8xbf16>
    %743 = vector.extract_strided_slice %708 {offsets = [0, 16], sizes = [16, 8], strides = [1, 1]} : vector<16x32xbf16> to vector<16x8xbf16>
    %744 = vector.extract_strided_slice %709 {offsets = [0, 16], sizes = [16, 8], strides = [1, 1]} : vector<16x32xbf16> to vector<16x8xbf16>
    %cst_250 = arith.constant dense<0.000000e+00> : vector<8x16xf32>
    %745 = tpu.matmul %742, %743, %cst_250 {dimension_numbers = #tpu.dot_dimension_numbers<[1], [1], [0], [0], [0, 0, 1, 0], [], []>} : vector<8x8xbf16>, vector<16x8xbf16>, vector<8x16xf32> -> vector<8x16xf32>
    %cst_251 = arith.constant dense<0xFF800000> : vector<8xf32>
    %746 = vector.multi_reduction <maximumf>, %745, %cst_251 [1] : vector<8x16xf32> to vector<8xf32>
    %747 = vector.shape_cast %746 : vector<8xf32> to vector<8x1xf32>
    %748 = vector.broadcast %747 : vector<8x1xf32> to vector<8x16xf32>
    %749 = arith.subf %745, %748 : vector<8x16xf32>
    %750 = math.exp %749 : vector<8x16xf32>
    %cst_252 = arith.constant dense<0.000000e+00> : vector<8xf32>
    %751 = vector.multi_reduction <add>, %750, %cst_252 [1] : vector<8x16xf32> to vector<8xf32>
    %752 = vector.shape_cast %751 : vector<8xf32> to vector<8x1xf32>
    %753 = tpu.reciprocal %752 {approx = true} : vector<8x1xf32> -> vector<8x1xf32>
    %754 = vector.broadcast %753 : vector<8x1xf32> to vector<8x16xf32>
    %755 = arith.mulf %750, %754 : vector<8x16xf32>
    %756 = arith.truncf %755 : vector<8x16xf32> to vector<8x16xbf16>
    %cst_253 = arith.constant dense<0.000000e+00> : vector<8x8xf32>
    %757 = tpu.matmul %756, %744, %cst_253 {dimension_numbers = #tpu.dot_dimension_numbers<[1], [0], [0], [1], [0, 0, 1, 1], [], []>} : vector<8x16xbf16>, vector<16x8xbf16>, vector<8x8xf32> -> vector<8x8xf32>
    %758 = vector.extract_strided_slice %707 {offsets = [0, 24], sizes = [8, 8], strides = [1, 1]} : vector<8x32xbf16> to vector<8x8xbf16>
    %759 = vector.extract_strided_slice %708 {offsets = [0, 24], sizes = [16, 8], strides = [1, 1]} : vector<16x32xbf16> to vector<16x8xbf16>
    %760 = vector.extract_strided_slice %709 {offsets = [0, 24], sizes = [16, 8], strides = [1, 1]} : vector<16x32xbf16> to vector<16x8xbf16>
    %cst_254 = arith.constant dense<0.000000e+00> : vector<8x16xf32>
    %761 = tpu.matmul %758, %759, %cst_254 {dimension_numbers = #tpu.dot_dimension_numbers<[1], [1], [0], [0], [0, 0, 1, 0], [], []>} : vector<8x8xbf16>, vector<16x8xbf16>, vector<8x16xf32> -> vector<8x16xf32>
    %cst_255 = arith.constant dense<0xFF800000> : vector<8xf32>
    %762 = vector.multi_reduction <maximumf>, %761, %cst_255 [1] : vector<8x16xf32> to vector<8xf32>
    %763 = vector.shape_cast %762 : vector<8xf32> to vector<8x1xf32>
    %764 = vector.broadcast %763 : vector<8x1xf32> to vector<8x16xf32>
    %765 = arith.subf %761, %764 : vector<8x16xf32>
    %766 = math.exp %765 : vector<8x16xf32>
    %cst_256 = arith.constant dense<0.000000e+00> : vector<8xf32>
    %767 = vector.multi_reduction <add>, %766, %cst_256 [1] : vector<8x16xf32> to vector<8xf32>
    %768 = vector.shape_cast %767 : vector<8xf32> to vector<8x1xf32>
    %769 = tpu.reciprocal %768 {approx = true} : vector<8x1xf32> -> vector<8x1xf32>
    %770 = vector.broadcast %769 : vector<8x1xf32> to vector<8x16xf32>
    %771 = arith.mulf %766, %770 : vector<8x16xf32>
    %772 = arith.truncf %771 : vector<8x16xf32> to vector<8x16xbf16>
    %cst_257 = arith.constant dense<0.000000e+00> : vector<8x8xf32>
    %773 = tpu.matmul %772, %760, %cst_257 {dimension_numbers = #tpu.dot_dimension_numbers<[1], [0], [0], [1], [0, 0, 1, 1], [], []>} : vector<8x16xbf16>, vector<16x8xbf16>, vector<8x8xf32> -> vector<8x8xf32>
    %774 = tpu.concatenate %725, %741, %757, %773 in 1 : vector<8x8xf32>, vector<8x8xf32>, vector<8x8xf32>, vector<8x8xf32> -> vector<8x32xf32>
    %775 = tpu.concatenate %706, %774 in 0 : vector<8x32xf32>, vector<8x32xf32> -> vector<16x32xf32>
    %776 = arith.truncf %775 : vector<16x32xf32> to vector<16x32xbf16>
    %c0_258 = arith.constant 0 : index
    %c0_259 = arith.constant 0 : index
    %777 = vector.load %arg43[%c0_258, %c0_259] : memref<32x32xbf16, #tpu.memory_space<vmem>>, vector<32x32xbf16>
    %cst_260 = arith.constant dense<0.000000e+00> : vector<16x32xf32>
    %778 = tpu.matmul %776, %777, %cst_260 {dimension_numbers = #tpu.dot_dimension_numbers<[1], [0], [0], [1], [0, 0, 1, 1], [], []>} : vector<16x32xbf16>, vector<32x32xbf16>, vector<16x32xf32> -> vector<16x32xf32>
    %c0_261 = arith.constant 0 : index
    %c0_262 = arith.constant 0 : index
    %779 = vector.load %arg44[%c0_261, %c0_262] : memref<1x32xf32, #tpu.memory_space<vmem>>, vector<1x32xf32>
    %780 = vector.broadcast %779 : vector<1x32xf32> to vector<16x32xf32>
    %781 = arith.addf %778, %780 : vector<16x32xf32>
    %782 = arith.addf %615, %781 : vector<16x32xf32>
    %cst_263 = arith.constant dense<0.000000e+00> : vector<16xf32>
    %783 = vector.multi_reduction <add>, %782, %cst_263 [1] : vector<16x32xf32> to vector<16xf32>
    %784 = vector.shape_cast %783 : vector<16xf32> to vector<16x1xf32>
    %cst_264 = arith.constant 3.200000e+01 : f32
    %785 = vector.broadcast %cst_264 : f32 to vector<16x1xf32>
    %786 = arith.divf %784, %785 : vector<16x1xf32>
    %787 = vector.broadcast %786 : vector<16x1xf32> to vector<16x32xf32>
    %788 = arith.subf %782, %787 : vector<16x32xf32>
    %789 = arith.mulf %788, %788 : vector<16x32xf32>
    %cst_265 = arith.constant dense<0.000000e+00> : vector<16xf32>
    %790 = vector.multi_reduction <add>, %789, %cst_265 [1] : vector<16x32xf32> to vector<16xf32>
    %791 = vector.shape_cast %790 : vector<16xf32> to vector<16x1xf32>
    %cst_266 = arith.constant 3.200000e+01 : f32
    %792 = vector.broadcast %cst_266 : f32 to vector<16x1xf32>
    %793 = arith.divf %791, %792 : vector<16x1xf32>
    %794 = vector.broadcast %786 : vector<16x1xf32> to vector<16x32xf32>
    %795 = arith.subf %782, %794 : vector<16x32xf32>
    %cst_267 = arith.constant 9.99999974E-6 : f32
    %796 = vector.broadcast %cst_267 : f32 to vector<16x1xf32>
    %797 = arith.addf %793, %796 : vector<16x1xf32>
    %798 = math.rsqrt %797 : vector<16x1xf32>
    %799 = vector.broadcast %798 : vector<16x1xf32> to vector<16x32xf32>
    %800 = arith.mulf %795, %799 : vector<16x32xf32>
    %c0_268 = arith.constant 0 : index
    %c0_269 = arith.constant 0 : index
    %801 = vector.load %arg51[%c0_268, %c0_269] : memref<1x32xf32, #tpu.memory_space<vmem>>, vector<1x32xf32>
    %802 = vector.broadcast %801 : vector<1x32xf32> to vector<16x32xf32>
    %803 = arith.mulf %800, %802 : vector<16x32xf32>
    %c0_270 = arith.constant 0 : index
    %c0_271 = arith.constant 0 : index
    %804 = vector.load %arg52[%c0_270, %c0_271] : memref<1x32xf32, #tpu.memory_space<vmem>>, vector<1x32xf32>
    %805 = vector.broadcast %804 : vector<1x32xf32> to vector<16x32xf32>
    %806 = arith.addf %803, %805 : vector<16x32xf32>
    %807 = arith.truncf %806 : vector<16x32xf32> to vector<16x32xbf16>
    %c0_272 = arith.constant 0 : index
    %c0_273 = arith.constant 0 : index
    %808 = vector.load %arg45[%c0_272, %c0_273] : memref<32x128xbf16, #tpu.memory_space<vmem>>, vector<32x128xbf16>
    %cst_274 = arith.constant dense<0.000000e+00> : vector<16x128xf32>
    %809 = tpu.matmul %807, %808, %cst_274 {dimension_numbers = #tpu.dot_dimension_numbers<[1], [0], [0], [1], [0, 0, 1, 1], [], []>} : vector<16x32xbf16>, vector<32x128xbf16>, vector<16x128xf32> -> vector<16x128xf32>
    %c0_275 = arith.constant 0 : index
    %c0_276 = arith.constant 0 : index
    %810 = vector.load %arg46[%c0_275, %c0_276] : memref<1x128xf32, #tpu.memory_space<vmem>>, vector<1x128xf32>
    %811 = vector.broadcast %810 : vector<1x128xf32> to vector<16x128xf32>
    %812 = arith.addf %809, %811 : vector<16x128xf32>
    %cst_277 = arith.constant 0.000000e+00 : f32
    %813 = vector.broadcast %cst_277 : f32 to vector<16x128xf32>
    %814 = arith.maximumf %812, %813 : vector<16x128xf32>
    %815 = arith.truncf %814 : vector<16x128xf32> to vector<16x128xbf16>
    %c0_278 = arith.constant 0 : index
    %c0_279 = arith.constant 0 : index
    %816 = vector.load %arg47[%c0_278, %c0_279] : memref<128x32xbf16, #tpu.memory_space<vmem>>, vector<128x32xbf16>
    %cst_280 = arith.constant dense<0.000000e+00> : vector<16x32xf32>
    %817 = tpu.matmul %815, %816, %cst_280 {dimension_numbers = #tpu.dot_dimension_numbers<[1], [0], [0], [1], [0, 0, 1, 1], [], []>} : vector<16x128xbf16>, vector<128x32xbf16>, vector<16x32xf32> -> vector<16x32xf32>
    %c0_281 = arith.constant 0 : index
    %c0_282 = arith.constant 0 : index
    %818 = vector.load %arg48[%c0_281, %c0_282] : memref<1x32xf32, #tpu.memory_space<vmem>>, vector<1x32xf32>
    %819 = vector.broadcast %818 : vector<1x32xf32> to vector<16x32xf32>
    %820 = arith.addf %817, %819 : vector<16x32xf32>
    %821 = arith.addf %806, %820 : vector<16x32xf32>
    %cst_283 = arith.constant dense<0.000000e+00> : vector<16xf32>
    %822 = vector.multi_reduction <add>, %821, %cst_283 [1] : vector<16x32xf32> to vector<16xf32>
    %823 = vector.shape_cast %822 : vector<16xf32> to vector<16x1xf32>
    %cst_284 = arith.constant 3.200000e+01 : f32
    %824 = vector.broadcast %cst_284 : f32 to vector<16x1xf32>
    %825 = arith.divf %823, %824 : vector<16x1xf32>
    %826 = vector.broadcast %825 : vector<16x1xf32> to vector<16x32xf32>
    %827 = arith.subf %821, %826 : vector<16x32xf32>
    %828 = arith.mulf %827, %827 : vector<16x32xf32>
    %cst_285 = arith.constant dense<0.000000e+00> : vector<16xf32>
    %829 = vector.multi_reduction <add>, %828, %cst_285 [1] : vector<16x32xf32> to vector<16xf32>
    %830 = vector.shape_cast %829 : vector<16xf32> to vector<16x1xf32>
    %cst_286 = arith.constant 3.200000e+01 : f32
    %831 = vector.broadcast %cst_286 : f32 to vector<16x1xf32>
    %832 = arith.divf %830, %831 : vector<16x1xf32>
    %833 = vector.broadcast %825 : vector<16x1xf32> to vector<16x32xf32>
    %834 = arith.subf %821, %833 : vector<16x32xf32>
    %cst_287 = arith.constant 9.99999974E-6 : f32
    %835 = vector.broadcast %cst_287 : f32 to vector<16x1xf32>
    %836 = arith.addf %832, %835 : vector<16x1xf32>
    %837 = math.rsqrt %836 : vector<16x1xf32>
    %838 = vector.broadcast %837 : vector<16x1xf32> to vector<16x32xf32>
    %839 = arith.mulf %834, %838 : vector<16x32xf32>
    %c0_288 = arith.constant 0 : index
    %c0_289 = arith.constant 0 : index
    %840 = vector.load %arg53[%c0_288, %c0_289] : memref<1x32xf32, #tpu.memory_space<vmem>>, vector<1x32xf32>
    %841 = vector.broadcast %840 : vector<1x32xf32> to vector<16x32xf32>
    %842 = arith.mulf %839, %841 : vector<16x32xf32>
    %c0_290 = arith.constant 0 : index
    %c0_291 = arith.constant 0 : index
    %843 = vector.load %arg54[%c0_290, %c0_291] : memref<1x32xf32, #tpu.memory_space<vmem>>, vector<1x32xf32>
    %844 = vector.broadcast %843 : vector<1x32xf32> to vector<16x32xf32>
    %845 = arith.addf %842, %844 : vector<16x32xf32>
    %846 = vector.shape_cast %845 : vector<16x32xf32> to vector<2x8x32xf32>
    %c0_292 = arith.constant 0 : index
    %c0_293 = arith.constant 0 : index
    %847 = vector.load %arg55[%c0_292, %c0_293] : memref<1x32xf32, #tpu.memory_space<vmem>>, vector<1x32xf32>
    %848 = vector.shape_cast %847 : vector<1x32xf32> to vector<1x1x32xf32>
    %849 = vector.broadcast %848 : vector<1x1x32xf32> to vector<2x8x32xf32>
    %850 = arith.mulf %846, %849 : vector<2x8x32xf32>
    %cst_294 = arith.constant dense<0.000000e+00> : vector<2x8xf32>
    %851 = vector.multi_reduction <add>, %850, %cst_294 [2] : vector<2x8x32xf32> to vector<2x8xf32>
    %c0_295 = arith.constant 0 : index
    %c0_296 = arith.constant 0 : index
    %852 = vector.load %arg56[%c0_295, %c0_296] : memref<1x1xf32, #tpu.memory_space<vmem>>, vector<1x1xf32>
    %853 = vector.broadcast %852 : vector<1x1xf32> to vector<2x8xf32>
    %854 = arith.addf %851, %853 : vector<2x8xf32>
    %c0_297 = arith.constant 0 : index
    %c0_298 = arith.constant 0 : index
    %c0_299 = arith.constant 0 : index
    %855 = vector.load %arg57[%c0_297, %c0_298, %c0_299] : memref<1x2x8xf32, #tpu.memory_space<vmem>>, vector<1x2x8xf32>
    %856 = vector.shape_cast %855 : vector<1x2x8xf32> to vector<2x8xf32>
    %857 = vector.shape_cast %854 : vector<2x8xf32> to vector<1x2x8xf32>
    tpu.vector_store %arg57[%c0_297, %c0_298, %c0_299], %857 {strides = array<i32>} : memref<1x2x8xf32, #tpu.memory_space<vmem>>, vector<1x2x8xf32>,
    return
  }
  func.func @transform_0(%arg0: i32) -> (i32, i32, i32) {
    %c0_i32 = arith.constant 0 : i32
    %c0_i32_0 = arith.constant 0 : i32
    %c0_i32_1 = arith.constant 0 : i32
    return %arg0, %c0_i32, %c0_i32_0 : i32, i32, i32
  }
  func.func @transform_1(%arg0: i32) -> (i32, i32, i32) {
    %c0_i32 = arith.constant 0 : i32
    %c0_i32_0 = arith.constant 0 : i32
    %c0_i32_1 = arith.constant 0 : i32
    return %arg0, %c0_i32, %c0_i32_0 : i32, i32, i32
  }
  func.func @transform_2(%arg0: i32) -> (i32, i32) {
    %c0_i32 = arith.constant 0 : i32
    %c0_i32_0 = arith.constant 0 : i32
    %c0_i32_1 = arith.constant 0 : i32
    return %c0_i32, %c0_i32_0 : i32, i32
  }
  func.func @transform_3(%arg0: i32) -> (i32, i32) {
    %c0_i32 = arith.constant 0 : i32
    %c0_i32_0 = arith.constant 0 : i32
    %c0_i32_1 = arith.constant 0 : i32
    return %c0_i32, %c0_i32_0 : i32, i32
  }
  func.func @transform_4(%arg0: i32) -> (i32, i32) {
    %c0_i32 = arith.constant 0 : i32
    %c0_i32_0 = arith.constant 0 : i32
    %c0_i32_1 = arith.constant 0 : i32
    return %c0_i32, %c0_i32_0 : i32, i32
  }
  func.func @transform_5(%arg0: i32) -> (i32, i32) {
    %c0_i32 = arith.constant 0 : i32
    %c0_i32_0 = arith.constant 0 : i32
    %c0_i32_1 = arith.constant 0 : i32
    return %c0_i32, %c0_i32_0 : i32, i32
  }
  func.func @transform_6(%arg0: i32) -> (i32, i32) {
    %c0_i32 = arith.constant 0 : i32
    %c0_i32_0 = arith.constant 0 : i32
    %c0_i32_1 = arith.constant 0 : i32
    return %c0_i32, %c0_i32_0 : i32, i32
  }
  func.func @transform_7(%arg0: i32) -> (i32, i32) {
    %c0_i32 = arith.constant 0 : i32
    %c0_i32_0 = arith.constant 0 : i32
    %c0_i32_1 = arith.constant 0 : i32
    return %c0_i32, %c0_i32_0 : i32, i32
  }
  func.func @transform_8(%arg0: i32) -> (i32, i32) {
    %c0_i32 = arith.constant 0 : i32
    %c0_i32_0 = arith.constant 0 : i32
    %c0_i32_1 = arith.constant 0 : i32
    return %c0_i32, %c0_i32_0 : i32, i32
  }
  func.func @transform_9(%arg0: i32) -> (i32, i32) {
    %c0_i32 = arith.constant 0 : i32
    %c0_i32_0 = arith.constant 0 : i32
    %c0_i32_1 = arith.constant 0 : i32
    return %c0_i32, %c0_i32_0 : i32, i32
  }
  func.func @transform_10(%arg0: i32) -> (i32, i32) {
    %c0_i32 = arith.constant 0 : i32
    %c0_i32_0 = arith.constant 0 : i32
    %c0_i32_1 = arith.constant 0 : i32
    return %c0_i32, %c0_i32_0 : i32, i32
  }
  func.func @transform_11(%arg0: i32) -> (i32, i32) {
    %c0_i32 = arith.constant 0 : i32
    %c0_i32_0 = arith.constant 0 : i32
    %c0_i32_1 = arith.constant 0 : i32
    return %c0_i32, %c0_i32_0 : i32, i32
  }
  func.func @transform_12(%arg0: i32) -> (i32, i32) {
    %c0_i32 = arith.constant 0 : i32
    %c0_i32_0 = arith.constant 0 : i32
    %c0_i32_1 = arith.constant 0 : i32
    return %c0_i32, %c0_i32_0 : i32, i32
  }
  func.func @transform_13(%arg0: i32) -> (i32, i32) {
    %c0_i32 = arith.constant 0 : i32
    %c0_i32_0 = arith.constant 0 : i32
    %c0_i32_1 = arith.constant 0 : i32
    return %c0_i32, %c0_i32_0 : i32, i32
  }
  func.func @transform_14(%arg0: i32) -> (i32, i32) {
    %c0_i32 = arith.constant 0 : i32
    %c0_i32_0 = arith.constant 0 : i32
    %c0_i32_1 = arith.constant 0 : i32
    return %c0_i32, %c0_i32_0 : i32, i32
  }
  func.func @transform_15(%arg0: i32) -> (i32, i32) {
    %c0_i32 = arith.constant 0 : i32
    %c0_i32_0 = arith.constant 0 : i32
    %c0_i32_1 = arith.constant 0 : i32
    return %c0_i32, %c0_i32_0 : i32, i32
  }
  func.func @transform_16(%arg0: i32) -> (i32, i32) {
    %c0_i32 = arith.constant 0 : i32
    %c0_i32_0 = arith.constant 0 : i32
    %c0_i32_1 = arith.constant 0 : i32
    return %c0_i32, %c0_i32_0 : i32, i32
  }
  func.func @transform_17(%arg0: i32) -> (i32, i32) {
    %c0_i32 = arith.constant 0 : i32
    %c0_i32_0 = arith.constant 0 : i32
    %c0_i32_1 = arith.constant 0 : i32
    return %c0_i32, %c0_i32_0 : i32, i32
  }
  func.func @transform_18(%arg0: i32) -> (i32, i32) {
    %c0_i32 = arith.constant 0 : i32
    %c0_i32_0 = arith.constant 0 : i32
    %c0_i32_1 = arith.constant 0 : i32
    return %c0_i32, %c0_i32_0 : i32, i32
  }
  func.func @transform_19(%arg0: i32) -> (i32, i32) {
    %c0_i32 = arith.constant 0 : i32
    %c0_i32_0 = arith.constant 0 : i32
    %c0_i32_1 = arith.constant 0 : i32
    return %c0_i32, %c0_i32_0 : i32, i32
  }
  func.func @transform_20(%arg0: i32) -> (i32, i32) {
    %c0_i32 = arith.constant 0 : i32
    %c0_i32_0 = arith.constant 0 : i32
    %c0_i32_1 = arith.constant 0 : i32
    return %c0_i32, %c0_i32_0 : i32, i32
  }
  func.func @transform_21(%arg0: i32) -> (i32, i32) {
    %c0_i32 = arith.constant 0 : i32
    %c0_i32_0 = arith.constant 0 : i32
    %c0_i32_1 = arith.constant 0 : i32
    return %c0_i32, %c0_i32_0 : i32, i32
  }
  func.func @transform_22(%arg0: i32) -> (i32, i32) {
    %c0_i32 = arith.constant 0 : i32
    %c0_i32_0 = arith.constant 0 : i32
    %c0_i32_1 = arith.constant 0 : i32
    return %c0_i32, %c0_i32_0 : i32, i32
  }
  func.func @transform_23(%arg0: i32) -> (i32, i32) {
    %c0_i32 = arith.constant 0 : i32
    %c0_i32_0 = arith.constant 0 : i32
    %c0_i32_1 = arith.constant 0 : i32
    return %c0_i32, %c0_i32_0 : i32, i32
  }
  func.func @transform_24(%arg0: i32) -> (i32, i32) {
    %c0_i32 = arith.constant 0 : i32
    %c0_i32_0 = arith.constant 0 : i32
    %c0_i32_1 = arith.constant 0 : i32
    return %c0_i32, %c0_i32_0 : i32, i32
  }
  func.func @transform_25(%arg0: i32) -> (i32, i32) {
    %c0_i32 = arith.constant 0 : i32
    %c0_i32_0 = arith.constant 0 : i32
    %c0_i32_1 = arith.constant 0 : i32
    return %c0_i32, %c0_i32_0 : i32, i32
  }
  func.func @transform_26(%arg0: i32) -> (i32, i32) {
    %c0_i32 = arith.constant 0 : i32
    %c0_i32_0 = arith.constant 0 : i32
    %c0_i32_1 = arith.constant 0 : i32
    return %c0_i32, %c0_i32_0 : i32, i32
  }
  func.func @transform_27(%arg0: i32) -> (i32, i32) {
    %c0_i32 = arith.constant 0 : i32
    %c0_i32_0 = arith.constant 0 : i32
    %c0_i32_1 = arith.constant 0 : i32
    return %c0_i32, %c0_i32_0 : i32, i32
  }
  func.func @transform_28(%arg0: i32) -> (i32, i32) {
    %c0_i32 = arith.constant 0 : i32
    %c0_i32_0 = arith.constant 0 : i32
    %c0_i32_1 = arith.constant 0 : i32
    return %c0_i32, %c0_i32_0 : i32, i32
  }
  func.func @transform_29(%arg0: i32) -> (i32, i32) {
    %c0_i32 = arith.constant 0 : i32
    %c0_i32_0 = arith.constant 0 : i32
    %c0_i32_1 = arith.constant 0 : i32
    return %c0_i32, %c0_i32_0 : i32, i32
  }
  func.func @transform_30(%arg0: i32) -> (i32, i32) {
    %c0_i32 = arith.constant 0 : i32
    %c0_i32_0 = arith.constant 0 : i32
    %c0_i32_1 = arith.constant 0 : i32
    return %c0_i32, %c0_i32_0 : i32, i32
  }
  func.func @transform_31(%arg0: i32) -> (i32, i32) {
    %c0_i32 = arith.constant 0 : i32
    %c0_i32_0 = arith.constant 0 : i32
    %c0_i32_1 = arith.constant 0 : i32
    return %c0_i32, %c0_i32_0 : i32, i32
  }
  func.func @transform_32(%arg0: i32) -> (i32, i32) {
    %c0_i32 = arith.constant 0 : i32
    %c0_i32_0 = arith.constant 0 : i32
    %c0_i32_1 = arith.constant 0 : i32
    return %c0_i32, %c0_i32_0 : i32, i32
  }
  func.func @transform_33(%arg0: i32) -> (i32, i32) {
    %c0_i32 = arith.constant 0 : i32
    %c0_i32_0 = arith.constant 0 : i32
    %c0_i32_1 = arith.constant 0 : i32
    return %c0_i32, %c0_i32_0 : i32, i32
  }
  func.func @transform_34(%arg0: i32) -> (i32, i32) {
    %c0_i32 = arith.constant 0 : i32
    %c0_i32_0 = arith.constant 0 : i32
    %c0_i32_1 = arith.constant 0 : i32
    return %c0_i32, %c0_i32_0 : i32, i32
  }
  func.func @transform_35(%arg0: i32) -> (i32, i32) {
    %c0_i32 = arith.constant 0 : i32
    %c0_i32_0 = arith.constant 0 : i32
    %c0_i32_1 = arith.constant 0 : i32
    return %c0_i32, %c0_i32_0 : i32, i32
  }
  func.func @transform_36(%arg0: i32) -> (i32, i32) {
    %c0_i32 = arith.constant 0 : i32
    %c0_i32_0 = arith.constant 0 : i32
    %c0_i32_1 = arith.constant 0 : i32
    return %c0_i32, %c0_i32_0 : i32, i32
  }
  func.func @transform_37(%arg0: i32) -> (i32, i32) {
    %c0_i32 = arith.constant 0 : i32
    %c0_i32_0 = arith.constant 0 : i32
    %c0_i32_1 = arith.constant 0 : i32
    return %c0_i32, %c0_i32_0 : i32, i32
  }
  func.func @transform_38(%arg0: i32) -> (i32, i32) {
    %c0_i32 = arith.constant 0 : i32
    %c0_i32_0 = arith.constant 0 : i32
    %c0_i32_1 = arith.constant 0 : i32
    return %c0_i32, %c0_i32_0 : i32, i32
  }
  func.func @transform_39(%arg0: i32) -> (i32, i32) {
    %c0_i32 = arith.constant 0 : i32
    %c0_i32_0 = arith.constant 0 : i32
    %c0_i32_1 = arith.constant 0 : i32
    return %c0_i32, %c0_i32_0 : i32, i32
  }
  func.func @transform_40(%arg0: i32) -> (i32, i32) {
    %c0_i32 = arith.constant 0 : i32
    %c0_i32_0 = arith.constant 0 : i32
    %c0_i32_1 = arith.constant 0 : i32
    return %c0_i32, %c0_i32_0 : i32, i32
  }
  func.func @transform_41(%arg0: i32) -> (i32, i32) {
    %c0_i32 = arith.constant 0 : i32
    %c0_i32_0 = arith.constant 0 : i32
    %c0_i32_1 = arith.constant 0 : i32
    return %c0_i32, %c0_i32_0 : i32, i32
  }
  func.func @transform_42(%arg0: i32) -> (i32, i32) {
    %c0_i32 = arith.constant 0 : i32
    %c0_i32_0 = arith.constant 0 : i32
    %c0_i32_1 = arith.constant 0 : i32
    return %c0_i32, %c0_i32_0 : i32, i32
  }
  func.func @transform_43(%arg0: i32) -> (i32, i32) {
    %c0_i32 = arith.constant 0 : i32
    %c0_i32_0 = arith.constant 0 : i32
    %c0_i32_1 = arith.constant 0 : i32
    return %c0_i32, %c0_i32_0 : i32, i32
  }
  func.func @transform_44(%arg0: i32) -> (i32, i32) {
    %c0_i32 = arith.constant 0 : i32
    %c0_i32_0 = arith.constant 0 : i32
    %c0_i32_1 = arith.constant 0 : i32
    return %c0_i32, %c0_i32_0 : i32, i32
  }
  func.func @transform_45(%arg0: i32) -> (i32, i32) {
    %c0_i32 = arith.constant 0 : i32
    %c0_i32_0 = arith.constant 0 : i32
    %c0_i32_1 = arith.constant 0 : i32
    return %c0_i32, %c0_i32_0 : i32, i32
  }
  func.func @transform_46(%arg0: i32) -> (i32, i32) {
    %c0_i32 = arith.constant 0 : i32
    %c0_i32_0 = arith.constant 0 : i32
    %c0_i32_1 = arith.constant 0 : i32
    return %c0_i32, %c0_i32_0 : i32, i32
  }
  func.func @transform_47(%arg0: i32) -> (i32, i32) {
    %c0_i32 = arith.constant 0 : i32
    %c0_i32_0 = arith.constant 0 : i32
    %c0_i32_1 = arith.constant 0 : i32
    return %c0_i32, %c0_i32_0 : i32, i32
  }
  func.func @transform_48(%arg0: i32) -> (i32, i32) {
    %c0_i32 = arith.constant 0 : i32
    %c0_i32_0 = arith.constant 0 : i32
    %c0_i32_1 = arith.constant 0 : i32
    return %c0_i32, %c0_i32_0 : i32, i32
  }
  func.func @transform_49(%arg0: i32) -> (i32, i32) {
    %c0_i32 = arith.constant 0 : i32
    %c0_i32_0 = arith.constant 0 : i32
    %c0_i32_1 = arith.constant 0 : i32
    return %c0_i32, %c0_i32_0 : i32, i32
  }
  func.func @transform_50(%arg0: i32) -> (i32, i32) {
    %c0_i32 = arith.constant 0 : i32
    %c0_i32_0 = arith.constant 0 : i32
    %c0_i32_1 = arith.constant 0 : i32
    return %c0_i32, %c0_i32_0 : i32, i32
  }
  func.func @transform_51(%arg0: i32) -> (i32, i32) {
    %c0_i32 = arith.constant 0 : i32
    %c0_i32_0 = arith.constant 0 : i32
    %c0_i32_1 = arith.constant 0 : i32
    return %c0_i32, %c0_i32_0 : i32, i32
  }
  func.func @transform_52(%arg0: i32) -> (i32, i32) {
    %c0_i32 = arith.constant 0 : i32
    %c0_i32_0 = arith.constant 0 : i32
    %c0_i32_1 = arith.constant 0 : i32
    return %c0_i32, %c0_i32_0 : i32, i32
  }
  func.func @transform_53(%arg0: i32) -> (i32, i32) {
    %c0_i32 = arith.constant 0 : i32
    %c0_i32_0 = arith.constant 0 : i32
    %c0_i32_1 = arith.constant 0 : i32
    return %c0_i32, %c0_i32_0 : i32, i32
  }
  func.func @transform_54(%arg0: i32) -> (i32, i32) {
    %c0_i32 = arith.constant 0 : i32
    %c0_i32_0 = arith.constant 0 : i32
    %c0_i32_1 = arith.constant 0 : i32
    return %c0_i32, %c0_i32_0 : i32, i32
  }
  func.func @transform_55(%arg0: i32) -> (i32, i32) {
    %c0_i32 = arith.constant 0 : i32
    %c0_i32_0 = arith.constant 0 : i32
    %c0_i32_1 = arith.constant 0 : i32
    return %c0_i32, %c0_i32_0 : i32, i32
  }
  func.func @transform_56(%arg0: i32) -> (i32, i32, i32) {
    %c0_i32 = arith.constant 0 : i32
    %c0_i32_0 = arith.constant 0 : i32
    %c0_i32_1 = arith.constant 0 : i32
    return %arg0, %c0_i32, %c0_i32_0 : i32, i32, i32
  }
}

</mosaic_0001>

<bundles_post_ra>
// kernel: tpu_custom_call.1
= control target key start
LH: loop header
LB: loop body
LE: loop exit
PB: predicated region body
PF: predicated region fallthrough
CT: control target
= control target key end

     0   :  { %s8110_s6 = smov 1   ;;  %s8111_s10 = smov 2   ;;  %s9385_s0 = inlined_call_operand.smem [shape: u32[57], index: -1, kind: input, shape index: {}] }
   0x1   :  { %s8218_s5 = sld [smem:[%s9385_s0]]   ;;  %s8112_s14 = smov 3  }
   0x2   :  { %s8223_s9 = sld [smem:[%s9385_s0 + %s8110_s6]]   ;;  %s8113_s18 = smov 4  }
   0x3   :  { %s8228_s13 = sld [smem:[%s9385_s0 + %s8111_s10]]   ;;  %s8114_s22 = smov 5  }
   0x4   :  { %s8233_s17 = sld [smem:[%s9385_s0 + %s8112_s14]]   ;;  %s8115_s26 = smov 6  }
   0x5   :  { %s8238_s21 = sld [smem:[%s9385_s0 + %s8113_s18]]   ;;  %s8116_s30 = smov 7  }
   0x6   :  { %s8243_s25 = sld [smem:[%s9385_s0 + %s8114_s22]]   ;;  %s8117_s4 = smov 8  }
   0x7   :  { %9400 = sst [smem:[#allocation72_spill]] %s8218_s5  ;;  %s8118_s10 = smov 9  }
   0x8   :  { %9401 = sst [smem:[#allocation73_spill]] %s8223_s9  ;;  %s8119_s15 = smov 10  }
   0x9   :  { %9402 = sst [smem:[#allocation74_spill]] %s8228_s13  ;;  %s8120_s20 = smov 11  }
   0xa   :  { %9403 = sst [smem:[#allocation75_spill]] %s8233_s17  ;;  %s8122_s1 = smov 13  }
   0xb   :  { %9404 = sst [smem:[#allocation76_spill]] %s8238_s21  ;;  %s8123_s7 = smov 14  }
   0xc   :  { %s8248_s29 = sld [smem:[%s9385_s0 + %s8115_s26]]   ;;  %s8121_s26 = smov 12  }
   0xd   :  { %s8253_s3 = sld [smem:[%s9385_s0 + %s8116_s30]]   ;;  %s8125_s22 = smov 16  }
   0xe   :  { %s8258_s8 = sld [smem:[%s9385_s0 + %s8117_s4]]   ;;  %s8126_s28 = smov 17  }
   0xf   :  { %s8263_s14 = sld [smem:[%s9385_s0 + %s8118_s10]]   ;;  %s8165_s23 = smov 56  }
  0x10   :  { %s8268_s19 = sld [smem:[%s9385_s0 + %s8119_s15]]   ;;  %s8124_s15 = smov 15  }
  0x11   :  { %s8273_s24 = sld [smem:[%s9385_s0 + %s8120_s20]]  }
  0x12   :  { %9405 = sst [smem:[#allocation77_spill]] %s8248_s29 }
  0x13   :  { %9406 = sst [smem:[#allocation78_spill]] %s8253_s3 }
  0x14   :  { %9407 = sst [smem:[#allocation79_spill]] %s8258_s8 }
  0x15   :  { %s8278_s30 = sld [smem:[%s9385_s0 + %s8121_s26]]  }
  0x16   :  { %9408 = sst [smem:[#allocation80_spill]] %s8268_s19 }
  0x17   :  { %9409 = sst [smem:[#allocation81_spill]] %s8273_s24 }
  0x18   :  { %s8283_s6 = sld [smem:[%s9385_s0 + %s8122_s1]]  }
  0x19   :  { %s8288_s12 = sld [smem:[%s9385_s0 + %s8123_s7]]   ;;  %s8127_s7 = smov 18  }
  0x1a   :  { %s8293_s20 = sld [smem:[%s9385_s0 + %s8124_s15]]   ;;  %s8128_s15 = smov 19  }
  0x1b   :  { %9410 = sst [smem:[#allocation82_spill]] %s8278_s30 }
  0x1c   :  { %s8298_s27 = sld [smem:[%s9385_s0 + %s8125_s22]]   ;;  %s8129_s22 = smov 20  }
  0x1d   :  { %s8303_s4 = sld [smem:[%s9385_s0 + %s8126_s28]]   ;;  %s8130_s28 = smov 21  }
  0x1e   :  { %s8308_s19 = sld [smem:[%s9385_s0 + %s8127_s7]]   ;;  %s8131_s7 = smov 22  }
  0x1f   :  { %9411 = sst [smem:[#allocation83_spill]] %s8288_s12 }
  0x20   :  { %s8313_s9 = sld [smem:[%s9385_s0 + %s8128_s15]]   ;;  %s8132_s15 = smov 23  }
  0x21   :  { %s8318_s30 = sld [smem:[%s9385_s0 + %s8129_s22]]   ;;  %s8133_s22 = smov 24  }
  0x22   :  { %9412 = sst [smem:[#allocation84_spill]] %s8298_s27 }
  0x23   :  { %s8323_s8 = sld [smem:[%s9385_s0 + %s8130_s28]]   ;;  %s8134_s28 = smov 25  }
  0x24   :  { %9413 = sst [smem:[#allocation85_spill]] %s8308_s19 }
  0x25   :  { %s8328_s19 = sld [smem:[%s9385_s0 + %s8131_s7]]   ;;  %s8135_s7 = smov 26  }
  0x26   :  { %9414 = sst [smem:[#allocation86_spill]] %s8313_s9 }
  0x27   :  { %9415 = sst [smem:[#allocation87_spill]] %s8318_s30 }
  0x28   :  { %s8333_s29 = sld [smem:[%s9385_s0 + %s8132_s15]]   ;;  %s8136_s15 = smov 27  }
  0x29   :  { %s8338_s30 = sld [smem:[%s9385_s0 + %s8133_s22]]   ;;  %s8137_s22 = smov 28  }
  0x2a   :  { %s8343_s21 = sld [smem:[%s9385_s0 + %s8134_s28]]   ;;  %s8138_s28 = smov 29  }
  0x2b   :  { %9416 = sst [smem:[#allocation88_spill]] %s8328_s19 }
  0x2c   :  { %s8348_s5 = sld [smem:[%s9385_s0 + %s8135_s7]]   ;;  %s8139_s7 = smov 30  }
  0x2d   :  { %s8353_s13 = sld [smem:[%s9385_s0 + %s8136_s15]]   ;;  %s8140_s15 = smov 31  }
  0x2e   :  { %s8363_s19 = sld [smem:[%s9385_s0 + %s8138_s28]]   ;;  %s8142_s28 = smov 33  }
  0x2f   :  { %9417 = sst [smem:[#allocation89_spill]] %s8338_s30 }
  0x30   :  { %s8358_s30 = sld [smem:[%s9385_s0 + %s8137_s22]]   ;;  %s8141_s22 = smov 32  }
  0x31   :  { %s8373_s9 = sld [smem:[%s9385_s0 + %s8140_s15]]   ;;  %s8144_s15 = smov 35  }
  0x32   :  { %9418 = sst [smem:[#allocation90_spill]] %s8348_s5 }
  0x33   :  { %s8368_s5 = sld [smem:[%s9385_s0 + %s8139_s7]]   ;;  %s8143_s7 = smov 34  }
  0x34   :  { %9420 = sst [smem:[#allocation92_spill]] %s8363_s19 }
  0x35   :  { %s8383_s19 = sld [smem:[%s9385_s0 + %s8142_s28]]   ;;  %s8146_s28 = smov 37  }
  0x36   :  { %9419 = sst [smem:[#allocation91_spill]] %s8358_s30 }
  0x37   :  { %9421 = sst [smem:[#allocation93_spill]] %s8373_s9 }
  0x38   :  { %s8378_s30 = sld [smem:[%s9385_s0 + %s8141_s22]]   ;;  %s8145_s22 = smov 36  }
  0x39   :  { %s8388_s27 = sld [smem:[%s9385_s0 + %s8143_s7]]   ;;  %s8147_s7 = smov 38  }
  0x3a   :  { %s8393_s9 = sld [smem:[%s9385_s0 + %s8144_s15]]   ;;  %s8148_s15 = smov 39  }
  0x3b   :  { %9422 = sst [smem:[#allocation94_spill]] %s8383_s19 }
  0x3c   :  { %s8398_s12 = sld [smem:[%s9385_s0 + %s8145_s22]]   ;;  %s8149_s22 = smov 40  }
  0x3d   :  { %s8403_s19 = sld [smem:[%s9385_s0 + %s8146_s28]]   ;;  %s8150_s28 = smov 41  }
  0x3e   :  { %s8408_s24 = sld [smem:[%s9385_s0 + %s8147_s7]]   ;;  %s8151_s7 = smov 42  }
  0x3f   :  { %s8423_s3 = sld [smem:[%s9385_s0 + %s8150_s28]]   ;;  %s8154_s28 = smov 45  }
  0x40   :  { %9423 = sst [smem:[#allocation95_spill]] %s8393_s9 }
  0x41   :  { %s8413_s9 = sld [smem:[%s9385_s0 + %s8148_s15]]   ;;  %s8152_s15 = smov 43  }
  0x42   :  { %9424 = sst [smem:[#allocation96_spill]] %s8398_s12 }
  0x43   :  { %s8418_s12 = sld [smem:[%s9385_s0 + %s8149_s22]]   ;;  %s8153_s22 = smov 44  }
  0x44   :  { %9425 = sst [smem:[#allocation97_spill]] %s8408_s24 }
  0x45   :  { %9427 = sst [smem:[#allocation99_spill]] %s8423_s3 }
  0x46   :  { %s8428_s24 = sld [smem:[%s9385_s0 + %s8151_s7]]   ;;  %s8155_s7 = smov 46  }
  0x47   :  { %s8433_s17 = sld [smem:[%s9385_s0 + %s8152_s15]]   ;;  %s8156_s15 = smov 47  }
  0x48   :  { %s8443_s3 = sld [smem:[%s9385_s0 + %s8154_s28]]   ;;  %s8158_s28 = smov 49  }
  0x49   :  { %9426 = sst [smem:[#allocation98_spill]] %s8418_s12 }
  0x4a   :  { %s8438_s12 = sld [smem:[%s9385_s0 + %s8153_s22]]   ;;  %s8157_s22 = smov 48  }
  0x4c   :  { %9428 = sst [smem:[#allocation100_spill]] %s8428_s24 }
  0x4d   :  { %9429 = sst [smem:[#allocation101_spill]] %s8433_s17 }
  0x4e   :  { %9431 = sst [smem:[#allocation103_spill]] %s8443_s3 }
  0x4f   :  { %s8448_s24 = sld [smem:[%s9385_s0 + %s8155_s7]]   ;;  %s8159_s7 = smov 50  }
  0x50   :  { %9430 = sst [smem:[#allocation102_spill]] %s8438_s12 }
  0x51   :  { %s8453_s17 = sld [smem:[%s9385_s0 + %s8156_s15]]   ;;  %s8160_s15 = smov 51  }
  0x52   :  { %s8458_s12 = sld [smem:[%s9385_s0 + %s8157_s22]]   ;;  %s8161_s22 = smov 52  }
  0x53   :  { %s8463_s3 = sld [smem:[%s9385_s0 + %s8158_s28]]   ;;  %s8162_s28 = smov 53  }
  0x55   :  { %9432 = sst [smem:[#allocation104_spill]] %s8448_s24 }
  0x56   :  { %s8468_s24 = sld [smem:[%s9385_s0 + %s8159_s7]]   ;;  %s8163_s7 = smov 54  }
  0x57   :  { %9433 = sst [smem:[#allocation105_spill]] %s8453_s17 }
  0x58   :  { %9434 = sst [smem:[#allocation106_spill]] %s8458_s12 }
  0x59   :  { %9435 = sst [smem:[#allocation107_spill]] %s8463_s3 }
  0x5a   :  { %s8473_s17 = sld [smem:[%s9385_s0 + %s8160_s15]]   ;;  %s8164_s15 = smov 55  }
  0x5b   :  { %s8478_s12 = sld [smem:[%s9385_s0 + %s8161_s22]]  }
  0x5c   :  { %9436 = sst [smem:[#allocation108_spill]] %s8468_s24 }
  0x5d   :  { %s8483_s3 = sld [smem:[%s9385_s0 + %s8162_s28]]  }
  0x5e   :  { %s8488_s24 = sld [smem:[%s9385_s0 + %s8163_s7]]  }
  0x60   :  { %9437 = sst [smem:[#allocation109_spill]] %s8473_s17 }
  0x61   :  { %9438 = sst [smem:[#allocation110_spill]] %s8478_s12 }
  0x62   :  { %s6102_s17 = sld [smem:[%s9385_s0 + %s8164_s15]]  }
  0x63   :  { %s8496_s12 = sld [smem:[%s9385_s0 + %s8165_s23]]  }
  0x68   :  { %v118_v0 = vstv %s6102_s17 }
  0x69   :  { %119 = vst [vmem:[#allocation2] sm:$0x1] %v118_v0 }
  0x6a   :  { %120 = vsyncpa [#allocation4], 0 }
  0x6b   :  { %121 = vsyncpa [#allocation7], 0 }
  0x6c   :  { %122 = vsyncpa [#allocation10], 0 }
  0x6d   :  { %123 = vsyncpa [#allocation13], 0 }
  0x6e   :  { %124 = vsyncpa [#allocation16], 0 }
  0x6f   :  { %125 = vsyncpa [#allocation19], 0 }
  0x70   :  { %126 = vsyncpa [#allocation22], 0 }
  0x71   :  { %127 = vsyncpa [#allocation25], 0 }
  0x72   :  { %128 = vsyncpa [#allocation28], 0 }
  0x73   :  { %129 = vsyncpa [#allocation31], 0 }
  0x74   :  { %130 = vsyncpa [#allocation34], 0 }
  0x75   :  { %131 = vsyncpa [#allocation37], 0 }
  0x76   :  { %132 = vsyncpa [#allocation40], 0 }
  0x77   :  { %133 = vsyncpa [#allocation43], 0 }
  0x78   :  { %134 = vsyncpa [#allocation46], 0 }
  0x79   :  { %135 = vsyncpa [#allocation49], 0 }
  0x7a   :  { %136 = vsyncpa [#allocation52], 0 }
  0x7b   :  { %137 = vsyncpa [#allocation5], 0  ;;  %s8166_s0 = smov [#allocation6]   ;;  %s8167_s28 = smov [#allocation9]  }
  0x7c   :  { %s162_s17 = sshll.u32 %s8166_s0, 4  ;;  %s186_s1 = sshll.u32 %s8167_s28, 4  ;;  %s163_s17 = int_to_ptr.vmem [resolvable:$true] %s162_s17  ;;  %s187_s1 = int_to_ptr.vmem [resolvable:$true] %s186_s1 }
  0x7d   :  { %s7422_s2 = scalar_lea.vmem %s163_s17, 16  ;;  %s7426_s7 = scalar_lea.vmem %s163_s17, 32 }
  0x7e   :  { %p7423_p0 = scmp.ne.s32.totalorder %s163_s17, %s7422_s2  ;;  %p7427_p1 = scmp.lt.s32.totalorder %s163_s17, %s163_s17 }
  0x7f   :  { %p7428_p2 = scmp.lt.s32.totalorder %s7426_s7, %s7422_s2 }
  0x81   :  { %p7429_p3 = por %p7428_p2, %p7427_p1 }
  0x83   :  { %p7430_p4 = pnand %p7429_p3, %p7423_p0 }
  0x85   :  { %7433 = shalt.err (!%p7430_p4)
}
  0x86   :  { %165 = dma.hbm_to_vmem [thread:$0]  %s8243_s25, 16, %s163_s17, [#allocation7]  }
  0x87   :  { %s7442_s10 = scalar_lea.vmem %s187_s1, 16  ;;  %s7446_s11 = scalar_lea.vmem %s187_s1, 32 }
  0x88   :  { %p7443_p5 = scmp.ne.s32.totalorder %s187_s1, %s7442_s10  ;;  %p7447_p6 = scmp.lt.s32.totalorder %s187_s1, %s187_s1 }
  0x89   :  { %p7448_p7 = scmp.lt.s32.totalorder %s7446_s11, %s7442_s10 }
  0x8b   :  { %p7449_p8 = por %p7448_p7, %p7447_p6 }
  0x8d   :  { %p7450_p9 = pnand %p7449_p8, %p7443_p5 }
  0x8f   :  { %7453 = shalt.err (!%p7450_p9)
}
  0x90   :  { %189 = dma.hbm_to_vmem [thread:$0]  %s8263_s14, 16, %s187_s1, [#allocation10]  }
  0x91   :  { %s8168_s15 = smov [#allocation12]   ;;  %s8169_s18 = smov [#allocation15]  }
  0x92   :  { %s210_s16 = sshll.u32 %s8168_s15, 4  ;;  %s232_s23 = sshll.u32 %s8169_s18, 4  ;;  %s211_s16 = int_to_ptr.vmem [resolvable:$true] %s210_s16  ;;  %s233_s23 = int_to_ptr.vmem [resolvable:$true] %s232_s23 }
  0x93   :  { %s7462_s22 = scalar_lea.vmem %s211_s16, 16  ;;  %s7466_s26 = scalar_lea.vmem %s211_s16, 32 }
  0x94   :  { %p7463_p10 = scmp.ne.s32.totalorder %s211_s16, %s7462_s22  ;;  %p7467_p11 = scmp.lt.s32.totalorder %s211_s16, %s211_s16 }
  0x95   :  { %p7468_p12 = scmp.lt.s32.totalorder %s7466_s26, %s7462_s22 }
  0x97   :  { %p7469_p13 = por %p7468_p12, %p7467_p11 }
  0x99   :  { %p7470_p0 = pnand %p7469_p13, %p7463_p10 }
  0x9b   :  { %7473 = shalt.err (!%p7470_p0)
}
  0x9c   :  { %213 = dma.hbm_to_vmem [thread:$0]  %s8283_s6, 16, %s211_s16, [#allocation13]  }
  0x9d   :  { %s7482_s25 = scalar_lea.vmem %s233_s23, 16  ;;  %s7486_s0 = scalar_lea.vmem %s233_s23, 32 }
  0x9e   :  { %p7483_p1 = scmp.ne.s32.totalorder %s233_s23, %s7482_s25  ;;  %p7487_p2 = scmp.lt.s32.totalorder %s233_s23, %s233_s23 }
  0x9f   :  { %p7488_p3 = scmp.lt.s32.totalorder %s7486_s0, %s7482_s25 }
  0xa1   :  { %p7489_p4 = por %p7488_p3, %p7487_p2 }
  0xa3   :  { %p7490_p5 = pnand %p7489_p4, %p7483_p1 }
  0xa5   :  { %7493 = shalt.err (!%p7490_p5)
}
  0xa6   :  { %235 = dma.hbm_to_vmem [thread:$0]  %s8293_s20, 16, %s233_s23, [#allocation16]  }
  0xa7   :  { %s8170_s14 = smov [#allocation18]   ;;  %s8171_s28 = smov [#allocation21]  }
  0xa8   :  { %s254_s17 = sshll.u32 %s8170_s14, 4  ;;  %s278_s1 = sshll.u32 %s8171_s28, 4  ;;  %s255_s17 = int_to_ptr.vmem [resolvable:$true] %s254_s17  ;;  %s279_s1 = int_to_ptr.vmem [resolvable:$true] %s278_s1 }
  0xa9   :  { %s7502_s2 = scalar_lea.vmem %s255_s17, 16  ;;  %s7506_s7 = scalar_lea.vmem %s255_s17, 32 }
  0xaa   :  { %p7503_p6 = scmp.ne.s32.totalorder %s255_s17, %s7502_s2  ;;  %p7507_p7 = scmp.lt.s32.totalorder %s255_s17, %s255_s17 }
  0xab   :  { %p7508_p8 = scmp.lt.s32.totalorder %s7506_s7, %s7502_s2 }
  0xad   :  { %p7509_p9 = por %p7508_p8, %p7507_p7 }
  0xaf   :  { %p7510_p10 = pnand %p7509_p9, %p7503_p6 }
  0xb1   :  { %7513 = shalt.err (!%p7510_p10)
}
  0xb2   :  { %257 = dma.hbm_to_vmem [thread:$0]  %s8303_s4, 16, %s255_s17, [#allocation19]  }
  0xb3   :  { %s7522_s6 = scalar_lea.vmem %s279_s1, 16  ;;  %s7526_s10 = scalar_lea.vmem %s279_s1, 32 }
  0xb4   :  { %p7523_p11 = scmp.ne.s32.totalorder %s279_s1, %s7522_s6  ;;  %p7527_p12 = scmp.lt.s32.totalorder %s279_s1, %s279_s1 }
  0xb5   :  { %p7528_p13 = scmp.lt.s32.totalorder %s7526_s10, %s7522_s6 }
  0xb7   :  { %p7529_p0 = por %p7528_p13, %p7527_p12 }
  0xb9   :  { %p7530_p1 = pnand %p7529_p0, %p7523_p11 }
  0xbb   :  { %7533 = shalt.err (!%p7530_p1)
}
  0xbc   :  { %281 = dma.hbm_to_vmem [thread:$0]  %s8323_s8, 16, %s279_s1, [#allocation22]  }
  0xbd   :  { %s8172_s20 = smov [#allocation24]   ;;  %s8173_s15 = smov [#allocation27]  }
  0xbe   :  { %s298_s11 = sshll.u32 %s8172_s20, 4  ;;  %s318_s16 = sshll.u32 %s8173_s15, 4  ;;  %s299_s11 = int_to_ptr.vmem [resolvable:$true] %s298_s11  ;;  %s319_s16 = int_to_ptr.vmem [resolvable:$true] %s318_s16 }
  0xbf   :  { %s7542_s18 = scalar_lea.vmem %s299_s11, 16  ;;  %s7546_s23 = scalar_lea.vmem %s299_s11, 32 }
  0xc0   :  { %p7543_p2 = scmp.ne.s32.totalorder %s299_s11, %s7542_s18  ;;  %p7547_p3 = scmp.lt.s32.totalorder %s299_s11, %s299_s11 }
  0xc1   :  { %p7548_p4 = scmp.lt.s32.totalorder %s7546_s23, %s7542_s18 }
  0xc3   :  { %p7549_p5 = por %p7548_p4, %p7547_p3 }
  0xc5   :  { %p7550_p6 = pnand %p7549_p5, %p7543_p2 }
  0xc7   :  { %7553 = shalt.err (!%p7550_p6)
}
  0xc8   :  { %301 = dma.hbm_to_vmem [thread:$0]  %s8333_s29, 16, %s299_s11, [#allocation25]  }
  0xc9   :  { %s7562_s4 = scalar_lea.vmem %s319_s16, 16  ;;  %s7566_s22 = scalar_lea.vmem %s319_s16, 32 }
  0xca   :  { %p7563_p7 = scmp.ne.s32.totalorder %s319_s16, %s7562_s4  ;;  %p7567_p8 = scmp.lt.s32.totalorder %s319_s16, %s319_s16 }
  0xcb   :  { %p7568_p9 = scmp.lt.s32.totalorder %s7566_s22, %s7562_s4 }
  0xcd   :  { %p7569_p10 = por %p7568_p9, %p7567_p8 }
  0xcf   :  { %p7570_p11 = pnand %p7569_p10, %p7563_p7 }
  0xd1   :  { %7573 = shalt.err (!%p7570_p11)
}
  0xd2   :  { %321 = dma.hbm_to_vmem [thread:$0]  %s8343_s21, 16, %s319_s16, [#allocation28]  }
  0xd3   :  { %s8174_s8 = smov [#allocation30]  }
  0xd4   :  { %s338_s26 = sshll.u32 %s8174_s8, 4  ;;  %s339_s26 = int_to_ptr.vmem [resolvable:$true] %s338_s26 }
  0xd5   :  { %s7582_s25 = scalar_lea.vmem %s339_s26, 16  ;;  %s7586_s0 = scalar_lea.vmem %s339_s26, 32 }
  0xd6   :  { %p7583_p12 = scmp.ne.s32.totalorder %s339_s26, %s7582_s25  ;;  %p7587_p13 = scmp.lt.s32.totalorder %s339_s26, %s339_s26 }
  0xd7   :  { %p7588_p0 = scmp.lt.s32.totalorder %s7586_s0, %s7582_s25 }
  0xd9   :  { %p7589_p1 = por %p7588_p0, %p7587_p13 }
  0xdb   :  { %p7590_p2 = pnand %p7589_p1, %p7583_p12 }
  0xdd   :  { %7593 = shalt.err (!%p7590_p2)
}
  0xde   :  { %341 = dma.hbm_to_vmem [thread:$0]  %s8353_s13, 16, %s339_s26, [#allocation31]  }
  0xdf   :  { %s8175_s29 = smov [#allocation33]   ;;  %s8176_s17 = smov [#allocation36]  }
  0xe0   :  { %s359_s14 = sshll.u32 %s8175_s29, 4  ;;  %s381_s28 = sshll.u32 %s8176_s17, 4  ;;  %s360_s14 = int_to_ptr.vmem [resolvable:$true] %s359_s14  ;;  %s382_s28 = int_to_ptr.vmem [resolvable:$true] %s381_s28 }
  0xe1   :  { %s7602_s1 = scalar_lea.vmem %s360_s14, 256  ;;  %p7607_p4 = scmp.lt.s32.totalorder %s360_s14, %s360_s14 }
  0xe2   :  { %p7603_p3 = scmp.ne.s32.totalorder %s360_s14, %s7602_s1  ;;  %p7608_p5 = scmp.lt.s32.totalorder %s7602_s1, %s7602_s1 }
  0xe4   :  { %p7609_p6 = por %p7608_p5, %p7607_p4 }
  0xe6   :  { %p7610_p7 = pnand %p7609_p6, %p7603_p3 }
  0xe8   :  { %7613 = shalt.err (!%p7610_p7)
}
  0xe9   :  { %s8177_s21 = smov 64   ;;  %s8178_s2 = smov 4  }
  0xea   :  { %365 = dma.hbm_to_vmem [thread:$0]  %s8368_s5, 256, %s360_s14, [#allocation34], %s8177_s21, %s8177_s21, %s8178_s2  }
  0xeb   :  { %s7622_s13 = scalar_lea.vmem %s382_s28, 256  ;;  %p7627_p9 = scmp.lt.s32.totalorder %s382_s28, %s382_s28 }
  0xec   :  { %p7623_p8 = scmp.ne.s32.totalorder %s382_s28, %s7622_s13  ;;  %p7628_p10 = scmp.lt.s32.totalorder %s7622_s13, %s7622_s13 }
  0xee   :  { %p7629_p11 = por %p7628_p10, %p7627_p9 }
  0xf0   :  { %p7630_p12 = pnand %p7629_p11, %p7623_p8 }
  0xf2   :  { %7633 = shalt.err (!%p7630_p12)
}
  0xf3   :  { %387 = dma.hbm_to_vmem [thread:$0]  %s8378_s30, 256, %s382_s28, [#allocation37], %s8177_s21, %s8177_s21, %s8178_s2  }
  0xf4   :  { %s8179_s7 = smov [#allocation39]   ;;  %s8180_s10 = smov [#allocation42]  }
  0xf5   :  { %s403_s6 = sshll.u32 %s8179_s7, 4  ;;  %s428_s20 = sshll.u32 %s8180_s10, 4  ;;  %s404_s6 = int_to_ptr.vmem [resolvable:$true] %s403_s6  ;;  %s429_s20 = int_to_ptr.vmem [resolvable:$true] %s428_s20 }
  0xf6   :  { %s7642_s11 = scalar_lea.vmem %s404_s6, 256  ;;  %p7647_p0 = scmp.lt.s32.totalorder %s404_s6, %s404_s6 }
  0xf7   :  { %p7643_p13 = scmp.ne.s32.totalorder %s404_s6, %s7642_s11  ;;  %p7648_p1 = scmp.lt.s32.totalorder %s7642_s11, %s7642_s11 }
  0xf9   :  { %p7649_p2 = por %p7648_p1, %p7647_p0 }
  0xfb   :  { %p7650_p3 = pnand %p7649_p2, %p7643_p13 }
  0xfd   :  { %7653 = shalt.err (!%p7650_p3)
}
  0xfe   :  { %409 = dma.hbm_to_vmem [thread:$0]  %s8388_s27, 256, %s404_s6, [#allocation40], %s8177_s21, %s8177_s21, %s8178_s2  }
  0xff   :  { %s7662_s5 = scalar_lea.vmem %s429_s20, 16  ;;  %s7666_s30 = scalar_lea.vmem %s429_s20, 32 }
 0x100   :  { %p7663_p4 = scmp.ne.s32.totalorder %s429_s20, %s7662_s5  ;;  %p7667_p5 = scmp.lt.s32.totalorder %s429_s20, %s429_s20 }
 0x101   :  { %p7668_p6 = scmp.lt.s32.totalorder %s7666_s30, %s7662_s5 }
 0x103   :  { %p7669_p7 = por %p7668_p6, %p7667_p5 }
 0x105   :  { %p7670_p8 = pnand %p7669_p7, %p7663_p4 }
 0x107   :  { %7673 = shalt.err (!%p7670_p8)
}
 0x108   :  { %431 = dma.hbm_to_vmem [thread:$0]  %s8403_s19, 16, %s429_s20, [#allocation43]  }
 0x109   :  { %s8181_s15 = smov [#allocation45]   ;;  %s8182_s18 = smov [#allocation48]  }
 0x10a   :  { %s450_s16 = sshll.u32 %s8181_s15, 4  ;;  %s472_s23 = sshll.u32 %s8182_s18, 4  ;;  %s451_s16 = int_to_ptr.vmem [resolvable:$true] %s450_s16  ;;  %s473_s23 = int_to_ptr.vmem [resolvable:$true] %s472_s23 }
 0x10b   :  { %s7682_s4 = scalar_lea.vmem %s451_s16, 16  ;;  %s7686_s22 = scalar_lea.vmem %s451_s16, 32 }
 0x10c   :  { %p7683_p9 = scmp.ne.s32.totalorder %s451_s16, %s7682_s4  ;;  %p7687_p10 = scmp.lt.s32.totalorder %s451_s16, %s451_s16 }
 0x10d   :  { %p7688_p11 = scmp.lt.s32.totalorder %s7686_s22, %s7682_s4 }
 0x10f   :  { %p7689_p12 = por %p7688_p11, %p7687_p10 }
 0x111   :  { %p7690_p13 = pnand %p7689_p12, %p7683_p9 }
 0x113   :  { %7693 = shalt.err (!%p7690_p13)
}
 0x114   :  { %453 = dma.hbm_to_vmem [thread:$0]  %s8413_s9, 16, %s451_s16, [#allocation46]  }
 0x115   :  { %s7702_s27 = scalar_lea.vmem %s473_s23, 16  ;;  %s7706_s8 = scalar_lea.vmem %s473_s23, 32 }
 0x116   :  { %p7703_p0 = scmp.ne.s32.totalorder %s473_s23, %s7702_s27  ;;  %p7707_p1 = scmp.lt.s32.totalorder %s473_s23, %s473_s23 }
 0x117   :  { %p7708_p2 = scmp.lt.s32.totalorder %s7706_s8, %s7702_s27 }
 0x119   :  { %p7709_p3 = por %p7708_p2, %p7707_p1 }
 0x11b   :  { %p7710_p4 = pnand %p7709_p3, %p7703_p0 }
 0x11d   :  { %7713 = shalt.err (!%p7710_p4)
}
 0x11e   :  { %s9439_s19 = sld [smem:[#allocation99_spill]]  ;;  %s8183_s26 = smov [#allocation3]  }
 0x11f   :  { %s150_s25 = sshll.u32 %s8183_s26, 4  ;;  %s8184_s0 = smov [#allocation8]   ;;  %s151_s25 = int_to_ptr.vmem [resolvable:$true] %s150_s25 }
 0x120   :  { %s174_s29 = sshll.u32 %s8184_s0, 4  ;;  %s7722_s14 = scalar_lea.vmem %s151_s25, 16  ;;  %s175_s29 = int_to_ptr.vmem [resolvable:$true] %s174_s29 }
 0x121   :  { %p7723_p5 = scmp.ne.s32.totalorder %s151_s25, %s7722_s14  ;;  %s7726_s17 = scalar_lea.vmem %s151_s25, 32 }
 0x122   :  { %p7727_p6 = scmp.lt.s32.totalorder %s151_s25, %s151_s25  ;;  %p7728_p7 = scmp.lt.s32.totalorder %s7726_s17, %s7722_s14 }
 0x124   :  { %475 = dma.hbm_to_vmem [thread:$0]  %s9439_s19, 16, %s473_s23, [#allocation49]  }
 0x125   :  { %p7729_p8 = por %p7728_p7, %p7727_p6 }
 0x127   :  { %p7730_p9 = pnand %p7729_p8, %p7723_p5 }
 0x129   :  { %7733 = shalt.err (!%p7730_p9)
}
 0x12a   :  { %s9440_s9 = sld [smem:[#allocation75_spill]]  ;;  %s7742_s28 = scalar_lea.vmem %s175_s29, 16 }
 0x12b   :  { %p7743_p10 = scmp.ne.s32.totalorder %s175_s29, %s7742_s28  ;;  %s7746_s1 = scalar_lea.vmem %s175_s29, 32 }
 0x12c   :  { %p7747_p11 = scmp.lt.s32.totalorder %s175_s29, %s175_s29  ;;  %p7748_p12 = scmp.lt.s32.totalorder %s7746_s1, %s7742_s28 }
 0x12e   :  { %p7749_p13 = por %p7748_p12, %p7747_p11 }
 0x130   :  { %153 = dma.hbm_to_vmem [thread:$0]  %s9440_s9, 16, %s151_s25, [#allocation4]  }
 0x131   :  { %p7750_p0 = pnand %p7749_p13, %p7743_p10 }
 0x133   :  { %7753 = shalt.err (!%p7750_p0)
}
 0x134   :  { %s9441_s13 = sld [smem:[#allocation78_spill]]  ;;  %s8185_s7 = smov [#allocation11]  }
 0x135   :  { %s198_s6 = sshll.u32 %s8185_s7, 4  ;;  %s8186_s10 = smov [#allocation14]   ;;  %s199_s6 = int_to_ptr.vmem [resolvable:$true] %s198_s6 }
 0x136   :  { %s219_s20 = sshll.u32 %s8186_s10, 4  ;;  %s7762_s11 = scalar_lea.vmem %s199_s6, 16  ;;  %s220_s20 = int_to_ptr.vmem [resolvable:$true] %s219_s20 }
 0x137   :  { %p7763_p1 = scmp.ne.s32.totalorder %s199_s6, %s7762_s11  ;;  %s7766_s5 = scalar_lea.vmem %s199_s6, 32 }
 0x138   :  { %p7767_p2 = scmp.lt.s32.totalorder %s199_s6, %s199_s6  ;;  %p7768_p3 = scmp.lt.s32.totalorder %s7766_s5, %s7762_s11 }
 0x13a   :  { %177 = dma.hbm_to_vmem [thread:$0]  %s9441_s13, 16, %s175_s29, [#allocation7]  }
 0x13b   :  { %p7769_p4 = por %p7768_p3, %p7767_p2 }
 0x13d   :  { %p7770_p5 = pnand %p7769_p4, %p7763_p1 }
 0x13f   :  { %7773 = shalt.err (!%p7770_p5)
}
 0x140   :  { %s9442_s30 = sld [smem:[#allocation81_spill]]  ;;  %s7782_s15 = scalar_lea.vmem %s220_s20, 256 }
 0x141   :  { %p7783_p6 = scmp.ne.s32.totalorder %s220_s20, %s7782_s15  ;;  %p7787_p7 = scmp.lt.s32.totalorder %s220_s20, %s220_s20 }
 0x142   :  { %p7788_p8 = scmp.lt.s32.totalorder %s7782_s15, %s7782_s15 }
 0x144   :  { %p7789_p9 = por %p7788_p8, %p7787_p7 }
 0x146   :  { %201 = dma.hbm_to_vmem [thread:$0]  %s9442_s30, 16, %s199_s6, [#allocation10]  }
 0x147   :  { %p7790_p10 = pnand %p7789_p9, %p7783_p6 }
 0x149   :  { %7793 = shalt.err (!%p7790_p10)
}
 0x14a   :  { %s9443_s16 = sld [smem:[#allocation83_spill]]  ;;  %s8187_s18 = smov [#allocation17]  }
 0x14b   :  { %s241_s23 = sshll.u32 %s8187_s18, 4  ;;  %s8188_s4 = smov [#allocation20]   ;;  %s242_s23 = int_to_ptr.vmem [resolvable:$true] %s241_s23 }
 0x14c   :  { %s266_s22 = sshll.u32 %s8188_s4, 4  ;;  %s7802_s27 = scalar_lea.vmem %s242_s23, 256  ;;  %s267_s22 = int_to_ptr.vmem [resolvable:$true] %s266_s22 }
 0x14d   :  { %p7803_p11 = scmp.ne.s32.totalorder %s242_s23, %s7802_s27  ;;  %p7807_p12 = scmp.lt.s32.totalorder %s242_s23, %s242_s23 }
 0x14e   :  { %p7808_p13 = scmp.lt.s32.totalorder %s7802_s27, %s7802_s27 }
 0x150   :  { %225 = dma.hbm_to_vmem [thread:$0]  %s9443_s16, 256, %s220_s20, [#allocation13], %s8177_s21, %s8177_s21, %s8178_s2  }
 0x151   :  { %p7809_p0 = por %p7808_p13, %p7807_p12 }
 0x153   :  { %p7810_p1 = pnand %p7809_p0, %p7803_p11 }
 0x155   :  { %7813 = shalt.err (!%p7810_p1)
}
 0x156   :  { %s9444_s8 = sld [smem:[#allocation84_spill]]  ;;  %s7822_s19 = scalar_lea.vmem %s267_s22, 16 }
 0x157   :  { %p7823_p2 = scmp.ne.s32.totalorder %s267_s22, %s7822_s19  ;;  %s7826_s26 = scalar_lea.vmem %s267_s22, 32 }
 0x158   :  { %p7827_p3 = scmp.lt.s32.totalorder %s267_s22, %s267_s22  ;;  %p7828_p4 = scmp.lt.s32.totalorder %s7826_s26, %s7822_s19 }
 0x15a   :  { %p7829_p5 = por %p7828_p4, %p7827_p3 }
 0x15c   :  { %247 = dma.hbm_to_vmem [thread:$0]  %s9444_s8, 256, %s242_s23, [#allocation16], %s8177_s21, %s8177_s21, %s8178_s2  }
 0x15d   :  { %p7830_p6 = pnand %p7829_p5, %p7823_p2 }
 0x15f   :  { %7833 = shalt.err (!%p7830_p6)
}
 0x160   :  { %s9445_s25 = sld [smem:[#allocation86_spill]]  ;;  %s8189_s0 = smov [#allocation23]  }
 0x161   :  { %s288_s29 = sshll.u32 %s8189_s0, 4  ;;  %s8190_s14 = smov [#allocation26]   ;;  %s289_s29 = int_to_ptr.vmem [resolvable:$true] %s288_s29 }
 0x162   :  { %s308_s17 = sshll.u32 %s8190_s14, 4  ;;  %s7842_s9 = scalar_lea.vmem %s289_s29, 16  ;;  %s309_s17 = int_to_ptr.vmem [resolvable:$true] %s308_s17 }
 0x163   :  { %p7843_p7 = scmp.ne.s32.totalorder %s289_s29, %s7842_s9  ;;  %s7846_s28 = scalar_lea.vmem %s289_s29, 32 }
 0x164   :  { %p7847_p8 = scmp.lt.s32.totalorder %s289_s29, %s289_s29  ;;  %p7848_p9 = scmp.lt.s32.totalorder %s7846_s28, %s7842_s9 }
 0x166   :  { %269 = dma.hbm_to_vmem [thread:$0]  %s9445_s25, 16, %s267_s22, [#allocation19]  }
 0x167   :  { %p7849_p10 = por %p7848_p9, %p7847_p8 }
 0x169   :  { %p7850_p11 = pnand %p7849_p10, %p7843_p7 }
 0x16b   :  { %7853 = shalt.err (!%p7850_p11)
}
 0x16c   :  { %s9446_s1 = sld [smem:[#allocation88_spill]]  ;;  %s7862_s13 = scalar_lea.vmem %s309_s17, 16 }
 0x16d   :  { %p7863_p12 = scmp.ne.s32.totalorder %s309_s17, %s7862_s13  ;;  %s7866_s7 = scalar_lea.vmem %s309_s17, 32 }
 0x16e   :  { %p7867_p13 = scmp.lt.s32.totalorder %s309_s17, %s309_s17  ;;  %p7868_p0 = scmp.lt.s32.totalorder %s7866_s7, %s7862_s13 }
 0x170   :  { %p7869_p1 = por %p7868_p0, %p7867_p13 }
 0x172   :  { %291 = dma.hbm_to_vmem [thread:$0]  %s9446_s1, 16, %s289_s29, [#allocation22]  }
 0x173   :  { %p7870_p2 = pnand %p7869_p1, %p7863_p12 }
 0x175   :  { %7873 = shalt.err (!%p7870_p2)
}
 0x176   :  { %s9447_s6 = sld [smem:[#allocation89_spill]]  ;;  %s8191_s10 = smov [#allocation29]  }
 0x177   :  { %s328_s20 = sshll.u32 %s8191_s10, 4  ;;  %s8192_s11 = smov [#allocation32]   ;;  %s329_s20 = int_to_ptr.vmem [resolvable:$true] %s328_s20 }
 0x178   :  { %s350_s5 = sshll.u32 %s8192_s11, 4  ;;  %s7882_s30 = scalar_lea.vmem %s329_s20, 16  ;;  %s351_s5 = int_to_ptr.vmem [resolvable:$true] %s350_s5 }
 0x179   :  { %p7883_p3 = scmp.ne.s32.totalorder %s329_s20, %s7882_s30  ;;  %s7886_s15 = scalar_lea.vmem %s329_s20, 32 }
 0x17a   :  { %p7887_p4 = scmp.lt.s32.totalorder %s329_s20, %s329_s20  ;;  %p7888_p5 = scmp.lt.s32.totalorder %s7886_s15, %s7882_s30 }
 0x17c   :  { %311 = dma.hbm_to_vmem [thread:$0]  %s9447_s6, 16, %s309_s17, [#allocation25]  }
 0x17d   :  { %p7889_p6 = por %p7888_p5, %p7887_p4 }
 0x17f   :  { %p7890_p7 = pnand %p7889_p6, %p7883_p3 }
 0x181   :  { %7893 = shalt.err (!%p7890_p7)
}
 0x182   :  { %s9448_s16 = sld [smem:[#allocation90_spill]]  ;;  %s7902_s18 = scalar_lea.vmem %s351_s5, 16 }
 0x183   :  { %p7903_p8 = scmp.ne.s32.totalorder %s351_s5, %s7902_s18  ;;  %s7906_s23 = scalar_lea.vmem %s351_s5, 32 }
 0x184   :  { %p7907_p9 = scmp.lt.s32.totalorder %s351_s5, %s351_s5  ;;  %p7908_p10 = scmp.lt.s32.totalorder %s7906_s23, %s7902_s18 }
 0x186   :  { %p7909_p11 = por %p7908_p10, %p7907_p9 }
 0x188   :  { %331 = dma.hbm_to_vmem [thread:$0]  %s9448_s16, 16, %s329_s20, [#allocation28]  }
 0x189   :  { %p7910_p12 = pnand %p7909_p11, %p7903_p8 }
 0x18b   :  { %7913 = shalt.err (!%p7910_p12)
}
 0x18c   :  { %s9449_s4 = sld [smem:[#allocation92_spill]]  ;;  %s8193_s22 = smov [#allocation35]  }
 0x18d   :  { %s372_s27 = sshll.u32 %s8193_s22, 4  ;;  %s8194_s8 = smov [#allocation38]   ;;  %s373_s27 = int_to_ptr.vmem [resolvable:$true] %s372_s27 }
 0x18e   :  { %s394_s19 = sshll.u32 %s8194_s8, 4  ;;  %s7922_s26 = scalar_lea.vmem %s373_s27, 16  ;;  %s395_s19 = int_to_ptr.vmem [resolvable:$true] %s394_s19 }
 0x18f   :  { %p7923_p13 = scmp.ne.s32.totalorder %s373_s27, %s7922_s26  ;;  %s7926_s25 = scalar_lea.vmem %s373_s27, 32 }
 0x190   :  { %p7927_p0 = scmp.lt.s32.totalorder %s373_s27, %s373_s27  ;;  %p7928_p1 = scmp.lt.s32.totalorder %s7926_s25, %s7922_s26 }
 0x192   :  { %353 = dma.hbm_to_vmem [thread:$0]  %s9449_s4, 16, %s351_s5, [#allocation31]  }
 0x193   :  { %p7929_p2 = por %p7928_p1, %p7927_p0 }
 0x195   :  { %p7930_p3 = pnand %p7929_p2, %p7923_p13 }
 0x197   :  { %7933 = shalt.err (!%p7930_p3)
}
 0x198   :  { %s9450_s0 = sld [smem:[#allocation93_spill]]  ;;  %s7942_s29 = scalar_lea.vmem %s395_s19, 16 }
 0x199   :  { %p7943_p4 = scmp.ne.s32.totalorder %s395_s19, %s7942_s29  ;;  %s7946_s14 = scalar_lea.vmem %s395_s19, 32 }
 0x19a   :  { %p7947_p5 = scmp.lt.s32.totalorder %s395_s19, %s395_s19  ;;  %p7948_p6 = scmp.lt.s32.totalorder %s7946_s14, %s7942_s29 }
 0x19c   :  { %p7949_p7 = por %p7948_p6, %p7947_p5 }
 0x19e   :  { %375 = dma.hbm_to_vmem [thread:$0]  %s9450_s0, 16, %s373_s27, [#allocation34]  }
 0x19f   :  { %p7950_p8 = pnand %p7949_p7, %p7943_p4 }
 0x1a1   :  { %7953 = shalt.err (!%p7950_p8)
}
 0x1a2   :  { %s9451_s17 = sld [smem:[#allocation94_spill]]  ;;  %s8195_s9 = smov [#allocation41]  }
 0x1a3   :  { %s416_s28 = sshll.u32 %s8195_s9, 4  ;;  %s8196_s1 = smov [#allocation44]   ;;  %s417_s28 = int_to_ptr.vmem [resolvable:$true] %s416_s28 }
 0x1a4   :  { %s437_s13 = sshll.u32 %s8196_s1, 4  ;;  %s7962_s7 = scalar_lea.vmem %s417_s28, 16  ;;  %s438_s13 = int_to_ptr.vmem [resolvable:$true] %s437_s13 }
 0x1a5   :  { %p7963_p9 = scmp.ne.s32.totalorder %s417_s28, %s7962_s7  ;;  %s7966_s6 = scalar_lea.vmem %s417_s28, 32 }
 0x1a6   :  { %p7967_p10 = scmp.lt.s32.totalorder %s417_s28, %s417_s28  ;;  %p7968_p11 = scmp.lt.s32.totalorder %s7966_s6, %s7962_s7 }
 0x1a8   :  { %397 = dma.hbm_to_vmem [thread:$0]  %s9451_s17, 16, %s395_s19, [#allocation37]  }
 0x1a9   :  { %p7969_p12 = por %p7968_p11, %p7967_p10 }
 0x1ab   :  { %p7970_p13 = pnand %p7969_p12, %p7963_p9 }
 0x1ad   :  { %7973 = shalt.err (!%p7970_p13)
}
 0x1ae   :  { %s9452_s10 = sld [smem:[#allocation95_spill]]  ;;  %s7982_s20 = scalar_lea.vmem %s438_s13, 256 }
 0x1af   :  { %p7983_p0 = scmp.ne.s32.totalorder %s438_s13, %s7982_s20  ;;  %p7987_p1 = scmp.lt.s32.totalorder %s438_s13, %s438_s13 }
 0x1b0   :  { %p7988_p2 = scmp.lt.s32.totalorder %s7982_s20, %s7982_s20 }
 0x1b2   :  { %p7989_p3 = por %p7988_p2, %p7987_p1 }
 0x1b4   :  { %419 = dma.hbm_to_vmem [thread:$0]  %s9452_s10, 16, %s417_s28, [#allocation40]  }
 0x1b5   :  { %p7990_p4 = pnand %p7989_p3, %p7983_p0 }
 0x1b7   :  { %7993 = shalt.err (!%p7990_p4)
}
 0x1b8   :  { %s9453_s11 = sld [smem:[#allocation97_spill]]  ;;  %s8197_s5 = smov [#allocation47]  }
 0x1b9   :  { %s459_s30 = sshll.u32 %s8197_s5, 4  ;;  %s8198_s15 = smov [#allocation50]   ;;  %s460_s30 = int_to_ptr.vmem [resolvable:$true] %s459_s30 }
 0x1ba   :  { %s481_s16 = sshll.u32 %s8198_s15, 4  ;;  %s8002_s18 = scalar_lea.vmem %s460_s30, 256  ;;  %s482_s16 = int_to_ptr.vmem [resolvable:$true] %s481_s16 }
 0x1bb   :  { %p8003_p5 = scmp.ne.s32.totalorder %s460_s30, %s8002_s18  ;;  %p8007_p6 = scmp.lt.s32.totalorder %s460_s30, %s460_s30 }
 0x1bc   :  { %p8008_p7 = scmp.lt.s32.totalorder %s8002_s18, %s8002_s18 }
 0x1be   :  { %443 = dma.hbm_to_vmem [thread:$0]  %s9453_s11, 256, %s438_s13, [#allocation43], %s8177_s21, %s8177_s21, %s8178_s2  }
 0x1bf   :  { %p8009_p8 = por %p8008_p7, %p8007_p6 }
 0x1c1   :  { %p8010_p9 = pnand %p8009_p8, %p8003_p5 }
 0x1c3   :  { %8013 = shalt.err (!%p8010_p9)
}
 0x1c4   :  { %s9454_s23 = sld [smem:[#allocation98_spill]]  ;;  %s8022_s4 = scalar_lea.vmem %s482_s16, 256 }
 0x1c5   :  { %p8023_p10 = scmp.ne.s32.totalorder %s482_s16, %s8022_s4  ;;  %p8027_p11 = scmp.lt.s32.totalorder %s482_s16, %s482_s16 }
 0x1c6   :  { %p8028_p12 = scmp.lt.s32.totalorder %s8022_s4, %s8022_s4 }
 0x1c8   :  { %p8029_p13 = por %p8028_p12, %p8027_p11 }
 0x1ca   :  { %465 = dma.hbm_to_vmem [thread:$0]  %s9454_s23, 256, %s460_s30, [#allocation46], %s8177_s21, %s8177_s21, %s8178_s2  }
 0x1cb   :  { %p8030_p0 = pnand %p8029_p13, %p8023_p10 }
 0x1cd   :  { %8033 = shalt.err (!%p8030_p0)
}
 0x1ce   :  { %s9455_s22 = sld [smem:[#allocation100_spill]]  ;;  %s8199_s27 = smov [#allocation51]  }
 0x1cf   :  { %s494_s8 = sshll.u32 %s8199_s27, 4  ;;  %s495_s8 = int_to_ptr.vmem [resolvable:$true] %s494_s8 }
 0x1d0   :  { %s8042_s19 = scalar_lea.vmem %s495_s8, 16  ;;  %s8046_s26 = scalar_lea.vmem %s495_s8, 32 }
 0x1d1   :  { %p8043_p1 = scmp.ne.s32.totalorder %s495_s8, %s8042_s19  ;;  %p8047_p2 = scmp.lt.s32.totalorder %s495_s8, %s495_s8 }
 0x1d2   :  { %p8048_p3 = scmp.lt.s32.totalorder %s8046_s26, %s8042_s19 }
 0x1d4   :  { %487 = dma.hbm_to_vmem [thread:$0]  %s9455_s22, 256, %s482_s16, [#allocation49], %s8177_s21, %s8177_s21, %s8178_s2  }
 0x1d5   :  { %p8049_p4 = por %p8048_p3, %p8047_p2 }
 0x1d7   :  { %p8050_p5 = pnand %p8049_p4, %p8043_p1 }
 0x1d9   :  { %8053 = shalt.err (!%p8050_p5)
}
 0x1da   :  { %s9456_s25 = sld [smem:[#allocation101_spill]] }
 0x1e0   :  { %497 = dma.hbm_to_vmem [thread:$0]  %s9456_s25, 16, %s495_s8, [#allocation52]  }
 0x1e1   :  { %8074 = dma.done.wait [#allocation4], 16  }
 0x1e2   :  { %8075 = vsyncadd [#allocation4], 4294967280 }
 0x1e3   :  { %8076 = dma.done.wait [#allocation7], 32  }
 0x1e4   :  { %8077 = vsyncadd [#allocation7], 4294967264 }
 0x1e5   :  { %8078 = dma.done.wait [#allocation10], 32  }
 0x1e6   :  { %8079 = vsyncadd [#allocation10], 4294967264 }
 0x1e7   :  { %8080 = dma.done.wait [#allocation13], 272  }
 0x1e8   :  { %8081 = vsyncadd [#allocation13], 4294967024 }
 0x1e9   :  { %8082 = dma.done.wait [#allocation16], 272  }
 0x1ea   :  { %8083 = vsyncadd [#allocation16], 4294967024 }
 0x1eb   :  { %8084 = dma.done.wait [#allocation19], 32  }
 0x1ec   :  { %8085 = vsyncadd [#allocation19], 4294967264 }
 0x1ed   :  { %8086 = dma.done.wait [#allocation22], 32  }
 0x1ee   :  { %8087 = vsyncadd [#allocation22], 4294967264 }
 0x1ef   :  { %8088 = dma.done.wait [#allocation25], 32  }
 0x1f0   :  { %8089 = vsyncadd [#allocation25], 4294967264 }
 0x1f1   :  { %8090 = dma.done.wait [#allocation28], 32  }
 0x1f2   :  { %8091 = vsyncadd [#allocation28], 4294967264 }
 0x1f3   :  { %8092 = dma.done.wait [#allocation31], 32  }
 0x1f4   :  { %8093 = vsyncadd [#allocation31], 4294967264 }
 0x1f5   :  { %8094 = dma.done.wait [#allocation34], 272  }
 0x1f6   :  { %8095 = vsyncadd [#allocation34], 4294967024 }
 0x1f7   :  { %8096 = dma.done.wait [#allocation37], 272  }
 0x1f8   :  { %8097 = vsyncadd [#allocation37], 4294967024 }
 0x1f9   :  { %8098 = dma.done.wait [#allocation40], 272  }
 0x1fa   :  { %8099 = vsyncadd [#allocation40], 4294967024 }
 0x1fb   :  { %8100 = dma.done.wait [#allocation43], 272  }
 0x1fc   :  { %8101 = vsyncadd [#allocation43], 4294967024 }
 0x1fd   :  { %8102 = dma.done.wait [#allocation46], 272  }
 0x1fe   :  { %8103 = vsyncadd [#allocation46], 4294967024 }
 0x1ff   :  { %8104 = dma.done.wait [#allocation49], 272  }
 0x200   :  { %8105 = vsyncadd [#allocation49], 4294967024 }
 0x201   :  { %8106 = dma.done.wait [#allocation52], 16  }
 0x202   :  { %8107 = vsyncadd [#allocation52], 4294967280  ;;  %s9457_s21 = sld [smem:[#allocation74_spill]]  ;;  %v8200_v1 = vmov 0.0   ;;  %vm8201_vm0 = vmmov 0   ;;  %vm649_vm1 = vcmask 261120  }
 0x203   :  { %s9458_s2 = sld [smem:[#allocation72_spill]]  ;;  %6480 = vmatprep.subr.bf16.mxu1 %v8200_v1  ;;  %6484 = vmatprep.mubr.msk.bf16.mxu1 %vm8201_vm0, %v8200_v1  ;;  %v6104_v16 = vld [vmem:[#allocation3] ss:$0 sm:$0xff]  ;;  %v6108_v17 = vld [vmem:[#allocation6] ss:$0 sm:$0xff]  ;;  %vm827_vm2 = vcmask 64512  }
 0x204   :  { %s9459_s0 = sld [smem:[#allocation76_spill]]  ;;  %6510 = vmatprep.subr.bf16.mxu0 %v8200_v1  ;;  %6512 = vmatprep.mubr.msk.bf16.mxu0 %vm8201_vm0, %v8200_v1  ;;  %s8202_s14 = smov 112   ;;  %v6112_v35 = vld [vmem:[#allocation8] ss:$0 sm:$0xff]  ;;  %vm889_vm3 = vcmask 1043456   ;;  %vm1279_vm4 = vcmask 130048  }
 0x205   :  { %s9460_s29 = sld [smem:[#allocation77_spill]]  ;;  %s8203_s17 = smov 120   ;;  %vm1281_vm5 = vcmask 195584   ;;  %vm6012_vm6 = vcmask 1041409   ;;  %vm6015_vm7 = vcmask 58368  }
 0x206   :  { %s8204_s9 = smov 104   ;;  %s9461_s28 = sld [smem:[#allocation79_spill]] }
 0x207   :  { %s8205_s1 = smov 8   ;;  %s8206_s13 = smov 16  }
 0x208   :  { %v7210_v2 = vld [vmem:[%s9457_s21 + $0x8] sm:$0xff]   ;;  %v7211_v3 = vld [vmem:[%s9457_s21] sm:$0xff]   ;;  %s8207_s7 = smov 24   ;;  %s9462_s6 = sld [smem:[#allocation82_spill]] }
 0x209   :  { %6481 = vmatpush3.bf16.msra.mxu1 %v7210_v2  ;;  %v8563_v4 = vld [vmem:[%s9458_s2] sm:$0xff]  ;;  %v8566_v5 = vld [vmem:[%s9458_s2 + $0x8] sm:$0xff]  ;;  %s9463_s10 = sld [smem:[#allocation73_spill]] }
 0x20a   :  { %6482 = vmatprep.subr.bf16.mxu1 %v8200_v1  ;;  %v7212_v6 = vld [vmem:[%s9459_s0 + $0x8] sm:$0xff]   ;;  %v625_v7 = vpack.c.bf16 %v8566_v5, %v8563_v4  ;;  %v7213_v8 = vld [vmem:[%s9459_s0] sm:$0xff]   ;;  %s9464_s20 = sld [smem:[#allocation80_spill]] }
 0x20b   :  { %v7214_v9 = vld [vmem:[%s9460_s29 + $0x8] sm:$0xff]   ;;  %v7215_v10 = vld [vmem:[%s9460_s29] sm:$0xff]   ;;  %s9465_s11 = sld [smem:[#allocation85_spill]] }
 0x20c   :  { %s9466_s5 = sld [smem:[#allocation87_spill]] }
 0x20d   :  { %6483 = vmatpush3.bf16.msra.mxu1 %v7211_v3  ;;  %s9467_s30 = sld [smem:[#allocation91_spill]] }
 0x20e   :  { %6488 = vmatprep.subr.bf16.mxu1 %v8200_v1  ;;  %s9468_s15 = sld [smem:[#allocation96_spill]] }
 0x20f   :  { %s9469_s16 = sld [smem:[#allocation106_spill]] }
 0x210   :  { %6485 = vmatmul.mubr.msk.bf16.vlgmr.msra.gmra.mxu1 %vm649_vm1, %v625_v7  ;;  %s9470_s18 = sld [smem:[#allocation107_spill]] }
 0x211   :  { %6489 = vmatpush3.bf16.msra.mxu1 %v7212_v6  ;;  %6492 = vmatprep.mubr.msk.bf16.mxu1 %vm8201_vm0, %v8200_v1  ;;  %s9471_s23 = sld [smem:[#allocation102_spill]] }
 0x212   :  { %6490 = vmatprep.subr.bf16.mxu1 %v8200_v1  ;;  %s9472_s4 = sld [smem:[#allocation104_spill]] }
 0x213   :  { %s9473_s22 = sld [smem:[#allocation108_spill]] }
 0x214   :  { %s9474_s27 = sld [smem:[#allocation109_spill]] }
 0x215   :  { %6491 = vmatpush3.bf16.msra.mxu1 %v7213_v8  ;;  %s9475_s8 = sld [smem:[#allocation103_spill]] }
 0x216   :  { %6496 = vmatprep.subr.bf16.mxu1 %v8200_v1  ;;  %s9476_s19 = sld [smem:[#allocation105_spill]] }
 0x217   :  { %s9477_s26 = sld [smem:[#allocation110_spill]] }
 0x218   :  { %6493 = vmatmul.mubr.msk.bf16.vlgmr.msra.gmra.mxu1 %vm649_vm1, %v625_v7 }
 0x219   :  { %6500 = vmatprep.mubr.msk.bf16.mxu1 %vm8201_vm0, %v8200_v1  ;;  %6497 = vmatpush3.bf16.msra.mxu1 %v7214_v9 }
 0x21a   :  { %6498 = vmatprep.subr.bf16.mxu1 %v8200_v1 }
 0x21d   :  { %6499 = vmatpush3.bf16.msra.mxu1 %v7215_v10 }
 0x21e   :  { %6504 = vmatprep.subr.bf16.mxu1 %v8200_v1 }
 0x220   :  { %6501 = vmatmul.mubr.msk.bf16.vlgmr.msra.gmra.mxu1 %vm649_vm1, %v625_v7 }
 0x221   :  { %6506 = vmatprep.mubr.msk.bf16.mxu1 %vm8201_vm0, %v8200_v1 }
 0x2d0   :  { %v687_v11 = vpop.f32.mrf.mxu1 }
 0x2d1   :  { %v688_v21 = vadd.f32 %v6104_v16, %v687_v11 }
 0x2d2   :  { %v6486_v12 = vpop.f32.mrf.mxu1 }
 0x2d3   :  { %v694_v27 = vmul.f32 0.35355338, %v688_v21 }
 0x2d4   :  { %v690_v13 = vpop.f32.mrf.mxu1 }
 0x2d5   :  { %v691_v19 = vadd.f32 %v6104_v16, %v690_v13 }
 0x2d6   :  { %v6487_v14 = vpop.f32.mrf.mxu1 }
 0x2d7   :  { %v695_v25 = vmul.f32 0.35355338, %v691_v19 }
 0x2d8   :  { %v753_v15 = vpop.f32.mrf.mxu1 }
 0x2d9   :  { %v754_v22 = vadd.f32 %v6108_v17, %v753_v15  ;;  %v824_v29 = vpack.c.bf16 %v695_v25, %v694_v27 }
 0x2da   :  { %v6494_v18 = vpop.f32.mrf.mxu1 }
 0x2db   :  { %v1283_v30 = vrot.slane %v824_v29, 4 }
 0x2dc   :  { %v756_v20 = vpop.f32.mrf.mxu1 }
 0x2dd   :  { %v757_v23 = vadd.f32 %v6108_v17, %v756_v20 }
 0x2de   :  { %v6495_v24 = vpop.f32.mrf.mxu1 }
 0x2df   :  { %v825_v26 = vpack.c.bf16 %v757_v23, %v754_v22 }
 0x2e0   :  { %v817_v32 = vpop.f32.mrf.mxu1 }
 0x2e1   :  { %1048 = vrot.lane.b32.xlu1 %v825_v26, %s8202_s14  ;;  %937 = vrot.lane.b32.xlu0 %v825_v26, %s8203_s17  ;;  %v832_v28 = vsel %vm827_vm2, %v825_v26, 0  ;;  %v1284_v31 = vrot.slane %v825_v26, 4  ;;  %v818_v37 = vadd.f32 %v6112_v35, %v817_v32 }
 0x2e2   :  { %6505 = vmatpush3.bf16.xpose.msra.mxu1 %v832_v28  ;;  %v6502_v33 = vpop.f32.mrf.mxu1 }
 0x2e3   :  { %6516 = vmatprep.subr.bf16.mxu1 %v8200_v1  ;;  %v1289_v50 = vsel %vm827_vm2, %v1284_v31, 0 }
 0x2e4   :  { %v820_v34 = vpop.f32.mrf.mxu1 }
 0x2e5   :  { %1046 = vrot.lane.b32.xlu1 %v824_v29, %s8202_s14  ;;  %934 = vrot.lane.b32.xlu0 %v824_v29, %s8203_s17  ;;  %v821_v38 = vadd.f32 %v6112_v35, %v820_v34 }
 0x2e6   :  { %v6503_v36 = vpop.f32.mrf.mxu1 }
 0x2e7   :  { %v8606_v39 = vpack.c.bf16 %v821_v38, %v818_v37 }
 0x2e9   :  { %1156 = vrot.lane.b32.xlu1 %v824_v29, %s8204_s9  ;;  %1158 = vrot.lane.b32.xlu0 %v825_v26, %s8204_s9  ;;  %v891_v40 = vsel %vm889_vm3, %v8606_v39, 0 }
 0x2ea   :  { %6507 = vmatmul.mubr.msk.bf16.vlgmr.msra.gmra.mxu1 %vm827_vm2, %v824_v29  ;;  %6511 = vmatpush3.bf16.msra.mxu0 %v891_v40 }
 0x2eb   :  { %6518 = vmatprep.mubr.msk.bf16.mxu1 %vm8201_vm0, %v8200_v1  ;;  %6522 = vmatprep.subr.bf16.mxu0 %v8200_v1 }
 0x2ed   :  { %1390 = vrot.lane.b32.xlu1 %v1283_v30, %s8203_s17  ;;  %1392 = vrot.lane.b32.xlu0 %v1284_v31, %s8203_s17 }
 0x2f1   :  { %1500 = vrot.lane.b32.xlu1 %v1283_v30, %s8202_s14  ;;  %1502 = vrot.lane.b32.xlu0 %v1284_v31, %s8202_s14 }
 0x2f5   :  { %1610 = vrot.lane.b32.xlu1 %v1283_v30, %s8204_s9  ;;  %1612 = vrot.lane.b32.xlu0 %v1284_v31, %s8204_s9 }
 0x353   :  { %v938_v41 = vpop.permute.xlu0 %937  ;;  %v1049_v43 = vpop.permute.xlu1 %1048 }
 0x354   :  { %v943_v42 = vsel %vm827_vm2, %v938_v41, 0  ;;  %v1054_v45 = vsel %vm827_vm2, %v1049_v43, 0 }
 0x355   :  { %6517 = vmatpush3.bf16.xpose.msra.mxu1 %v943_v42 }
 0x356   :  { %6528 = vmatprep.subr.bf16.mxu1 %v8200_v1 }
 0x357   :  { %v935_v44 = vpop.permute.xlu0 %934  ;;  %v1047_v47 = vpop.permute.xlu1 %1046 }
 0x35b   :  { %v1159_v46 = vpop.permute.xlu0 %1158  ;;  %v1157_v49 = vpop.permute.xlu1 %1156 }
 0x35c   :  { %6519 = vmatmul.mubr.msk.bf16.vlgmr.msra.gmra.mxu1 %vm827_vm2, %v935_v44  ;;  %v1164_v48 = vsel %vm827_vm2, %v1159_v46, 0 }
 0x35d   :  { %6529 = vmatpush3.bf16.xpose.msra.mxu1 %v1054_v45  ;;  %6530 = vmatprep.mubr.msk.bf16.mxu1 %vm8201_vm0, %v8200_v1 }
 0x35e   :  { %6540 = vmatprep.subr.bf16.mxu1 %v8200_v1 }
 0x35f   :  { %v1393_v51 = vpop.permute.xlu0 %1392  ;;  %v1391_v54 = vpop.permute.xlu1 %1390 }
 0x360   :  { %v1398_v52 = vsel %vm827_vm2, %v1393_v51, 0 }
 0x363   :  { %v1503_v53 = vpop.permute.xlu0 %1502  ;;  %v1501_v57 = vpop.permute.xlu1 %1500 }
 0x364   :  { %6531 = vmatmul.mubr.msk.bf16.vlgmr.msra.gmra.mxu1 %vm827_vm2, %v1047_v47  ;;  %v1508_v55 = vsel %vm827_vm2, %v1503_v53, 0 }
 0x365   :  { %6541 = vmatpush3.bf16.xpose.msra.mxu1 %v1164_v48  ;;  %6542 = vmatprep.mubr.msk.bf16.mxu1 %vm8201_vm0, %v8200_v1 }
 0x366   :  { %6552 = vmatprep.subr.bf16.mxu1 %v8200_v1 }
 0x367   :  { %v1613_v56 = vpop.permute.xlu0 %1612  ;;  %v1611_v59 = vpop.permute.xlu1 %1610 }
 0x368   :  { %v1618_v58 = vsel %vm827_vm2, %v1613_v56, 0 }
 0x36c   :  { %6543 = vmatmul.mubr.msk.bf16.vlgmr.msra.gmra.mxu1 %vm827_vm2, %v1157_v49 }
 0x36d   :  { %6553 = vmatpush3.bf16.xpose.msra.mxu1 %v1289_v50  ;;  %6554 = vmatprep.mubr.msk.bf16.mxu1 %vm8201_vm0, %v8200_v1 }
 0x36e   :  { %6564 = vmatprep.subr.bf16.mxu1 %v8200_v1 }
 0x374   :  { %6555 = vmatmul.mubr.msk.bf16.vlgmr.msra.gmra.mxu1 %vm827_vm2, %v1283_v30 }
 0x375   :  { %6565 = vmatpush3.bf16.xpose.msra.mxu1 %v1398_v52  ;;  %6566 = vmatprep.mubr.msk.bf16.mxu1 %vm8201_vm0, %v8200_v1 }
 0x376   :  { %6576 = vmatprep.subr.bf16.mxu1 %v8200_v1 }
 0x37c   :  { %6567 = vmatmul.mubr.msk.bf16.vlgmr.msra.gmra.mxu1 %vm827_vm2, %v1391_v54 }
 0x37d   :  { %6577 = vmatpush3.bf16.xpose.msra.mxu1 %v1508_v55  ;;  %6578 = vmatprep.mubr.msk.bf16.mxu1 %vm8201_vm0, %v8200_v1 }
 0x37e   :  { %6588 = vmatprep.subr.bf16.mxu1 %v8200_v1 }
 0x384   :  { %6579 = vmatmul.mubr.msk.bf16.vlgmr.msra.gmra.mxu1 %vm827_vm2, %v1501_v57 }
 0x385   :  { %6589 = vmatpush3.bf16.xpose.msra.mxu1 %v1618_v58  ;;  %6590 = vmatprep.mubr.msk.bf16.mxu1 %vm8201_vm0, %v8200_v1 }
 0x386   :  { %6600 = vmatprep.subr.bf16.mxu1 %v8200_v1 }
 0x38c   :  { %6591 = vmatmul.mubr.msk.bf16.vlgmr.msra.gmra.mxu1 %vm827_vm2, %v1611_v59 }
 0x38d   :  { %6604 = vmatprep.mubr.msk.bf16.mxu1 %vm8201_vm0, %v8200_v1 }
 0x3aa   :  { %v868_v60 = vpop.f32.mrf.mxu1 }
 0x3ab   :  { %v874_v61 = vsel %vm827_vm2, %v868_v60, -inf }
 0x3ac   :  { %875 = vmax.xlane.f32.xlu0 %v874_v61  ;;  %v6508_v62 = vpop.f32.mrf.mxu1 }
 0x3ae   :  { %v871_v63 = vpop.f32.mrf.mxu1 }
 0x3b0   :  { %v6509_v0 = vpop.f32.mrf.mxu1 }
 0x41c   :  { %v979_v2 = vpop.f32.mrf.mxu1 }
 0x41d   :  { %v985_v3 = vsel %vm827_vm2, %v979_v2, -inf }
 0x41e   :  { %986 = vmax.xlane.f32.xlu1 %v985_v3  ;;  %v6520_v6 = vpop.f32.mrf.mxu1 }
 0x420   :  { %v982_v7 = vpop.f32.mrf.mxu1 }
 0x422   :  { %v6521_v8 = vpop.f32.mrf.mxu1 }
 0x424   :  { %v1090_v9 = vpop.f32.mrf.mxu1 }
 0x425   :  { %v1096_v10 = vsel %vm827_vm2, %v1090_v9, -inf }
 0x426   :  { %1097 = vmax.xlane.f32.xlu0 %v1096_v10  ;;  %v6532_v11 = vpop.f32.mrf.mxu1 }
 0x428   :  { %v1093_v12 = vpop.f32.mrf.mxu1 }
 0x42a   :  { %v6533_v13 = vpop.f32.mrf.mxu1 }
 0x42c   :  { %v1200_v14 = vpop.f32.mrf.mxu1 }
 0x42d   :  { %v1206_v15 = vsel %vm827_vm2, %v1200_v14, -inf }
 0x42e   :  { %1207 = vmax.xlane.f32.xlu0 %v1206_v15  ;;  %v6544_v16 = vpop.f32.mrf.mxu1 }
 0x430   :  { %v1203_v17 = vpop.f32.mrf.mxu1 }
 0x432   :  { %v6545_v18 = vpop.f32.mrf.mxu1 }
 0x434   :  { %v8650_v19 = vpop.f32.mrf.mxu1 }
 0x435   :  { %v876_v20 = vpop.xlane.xlu0 %875  ;;  %v1331_v21 = vsel %vm827_vm2, %v8650_v19, -inf }
 0x436   :  { %v877_v22 = vsub.f32 %v868_v60, %v876_v20  ;;  %1332 = vmax.xlane.f32.xlu1 %v1331_v21  ;;  %v6556_v23 = vpop.f32.mrf.mxu1 }
 0x437   :  { %v1343_v23 = vrot.slane %v8606_v39, 4 }
 0x438   :  { %v878_v24 = vmul.f32 1.442695, %v877_v22  ;;  %v1328_v25 = vpop.f32.mrf.mxu1 }
 0x43a   :  { %7262 = vpow2.f32 %v878_v24  ;;  %v6557_v26 = vpop.f32.mrf.mxu1 }
 0x43c   :  { %v1434_v27 = vpop.f32.mrf.mxu1 }
 0x43d   :  { %v1440_v28 = vsel %vm827_vm2, %v1434_v27, -inf }
 0x43e   :  { %1441 = vmax.xlane.f32.xlu0 %v1440_v28  ;;  %v6568_v29 = vpop.f32.mrf.mxu1 }
 0x440   :  { %v1437_v30 = vpop.f32.mrf.mxu1 }
 0x442   :  { %v6569_v31 = vpop.f32.mrf.mxu1 }
 0x444   :  { %v1544_v32 = vpop.f32.mrf.mxu1 }
 0x445   :  { %v1550_v33 = vsel %vm827_vm2, %v1544_v32, -inf }
 0x446   :  { %1551 = vmax.xlane.f32.xlu1 %v1550_v33  ;;  %v6580_v34 = vpop.f32.mrf.mxu1 }
 0x447   :  { %v7263_v35 = vpop.eup %7262 }
 0x448   :  { %v1547_v36 = vpop.f32.mrf.mxu1  ;;  %v880_v37 = vsel %vm827_vm2, %v7263_v35, 0.0 }
 0x44a   :  { %881 = vadd.xlane.f32.xlu1 %v880_v37  ;;  %v6581_v38 = vpop.f32.mrf.mxu1 }
 0x44c   :  { %v1654_v40 = vpop.f32.mrf.mxu1 }
 0x44d   :  { %v1660_v41 = vsel %vm827_vm2, %v1654_v40, -inf }
 0x44e   :  { %1661 = vmax.xlane.f32.xlu0 %v1660_v41  ;;  %v6592_v42 = vpop.f32.mrf.mxu1 }
 0x44f   :  { %v1348_v42 = vsel %vm889_vm3, %v1343_v23, 0 }
 0x450   :  { %v1657_v43 = vpop.f32.mrf.mxu1 }
 0x452   :  { %v6593_v44 = vpop.f32.mrf.mxu1 }
 0x4a7   :  { %v987_v45 = vpop.xlane.xlu1 %986 }
 0x4a8   :  { %v988_v46 = vsub.f32 %v979_v2, %v987_v45 }
 0x4aa   :  { %v989_v47 = vmul.f32 1.442695, %v988_v46 }
 0x4ac   :  { %7264 = vpow2.f32 %v989_v47 }
 0x4af   :  { %v1098_v48 = vpop.xlane.xlu0 %1097 }
 0x4b0   :  { %v1099_v49 = vsub.f32 %v1090_v9, %v1098_v48 }
 0x4b2   :  { %v1100_v50 = vmul.f32 1.442695, %v1099_v49 }
 0x4b4   :  { %7266 = vpow2.f32 %v1100_v50 }
 0x4b7   :  { %v1208_v51 = vpop.xlane.xlu0 %1207 }
 0x4b8   :  { %v1209_v52 = vsub.f32 %v1200_v14, %v1208_v51 }
 0x4b9   :  { %v7265_v53 = vpop.eup %7264 }
 0x4ba   :  { %v1210_v54 = vmul.f32 1.442695, %v1209_v52  ;;  %v991_v55 = vsel %vm827_vm2, %v7265_v53, 0.0 }
 0x4bb   :  { %992 = vadd.xlane.f32.xlu0 %v991_v55 }
 0x4bc   :  { %7268 = vpow2.f32 %v1210_v54 }
 0x4bf   :  { %v1333_v60 = vpop.xlane.xlu1 %1332 }
 0x4c0   :  { %v1334_v0 = vsub.f32 %v8650_v19, %v1333_v60 }
 0x4c1   :  { %v8659_v56 = vpop.eup %7266 }
 0x4c2   :  { %v1102_v57 = vsel %vm827_vm2, %v8659_v56, 0.0  ;;  %v1335_v8 = vmul.f32 1.442695, %v1334_v0 }
 0x4c3   :  { %1103 = vadd.xlane.f32.xlu1 %v1102_v57 }
 0x4c7   :  { %v1442_v2 = vpop.xlane.xlu0 %1441 }
 0x4c8   :  { %v1443_v7 = vsub.f32 %v1434_v27, %v1442_v2 }
 0x4c9   :  { %v8663_v58 = vpop.eup %7268 }
 0x4ca   :  { %v1212_v59 = vsel %vm827_vm2, %v8663_v58, 0.0  ;;  %v1444_v11 = vmul.f32 1.442695, %v1443_v7 }
 0x4cb   :  { %1213 = vadd.xlane.f32.xlu0 %v1212_v59 }
 0x4cf   :  { %v1552_v61 = vpop.xlane.xlu1 %1551 }
 0x4d0   :  { %v1553_v9 = vsub.f32 %v1544_v32, %v1552_v61 }
 0x4d2   :  { %v1554_v12 = vmul.f32 1.442695, %v1553_v9 }
 0x4d3   :  { %v882_v62 = vpop.xlane.xlu1 %881 }
 0x4d4   :  { %1108 = vrot.lane.b32.xlu1 %v8606_v39, %s8202_s14  ;;  %7270 = vrcp.f32 %v882_v62 }
 0x4d5   :  { %7272 = vpow2.f32 %v1335_v8 }
 0x4d6   :  { %7274 = vpow2.f32 %v1444_v11 }
 0x4d7   :  { %v1662_v10 = vpop.xlane.xlu0 %1661  ;;  %7276 = vpow2.f32 %v1554_v12 }
 0x4d8   :  { %1218 = vrot.lane.b32.xlu1 %v8606_v39, %s8204_s9  ;;  %v1663_v13 = vsub.f32 %v1654_v40, %v1662_v10 }
 0x4da   :  { %v1664_v14 = vmul.f32 1.442695, %v1663_v13 }
 0x4dc   :  { %7278 = vpow2.f32 %v1664_v14 }
 0x4e1   :  { %998 = vrot.lane.b32.xlu0 %v8606_v39, %s8203_s17  ;;  %v7271_v63 = vpop.eup %7270 }
 0x4e2   :  { %v884_v3 = vmul.f32 %v7271_v63, %v7263_v35  ;;  %v7273_v15 = vpop.eup %7272 }
 0x4e3   :  { %v8677_v16 = vpop.eup %7274  ;;  %v1337_v17 = vsel %vm827_vm2, %v7273_v15, 0.0 }
 0x4e4   :  { %v885_v6 = vpack.c.bf16 %v884_v3, %v884_v3  ;;  %v8680_v18 = vpop.eup %7276  ;;  %v1446_v19 = vsel %vm827_vm2, %v8677_v16, 0.0 }
 0x4e5   :  { %v1556_v20 = vsel %vm827_vm2, %v8680_v18, 0.0 }
 0x4e6   :  { %6513 = vmatmul.mubr.msk.bf16.vlgmr.msra.gmra.mxu0 %vm827_vm2, %v885_v6 }
 0x4e7   :  { %6524 = vmatprep.mubr.msk.bf16.mxu0 %vm8201_vm0, %v8200_v1 }
 0x4e9   :  { %v8686_v21 = vpop.eup %7278 }
 0x4ea   :  { %v1666_v22 = vsel %vm827_vm2, %v8686_v21, 0.0 }
 0x4fc   :  { %1338 = vadd.xlane.f32.xlu1 %v1337_v17 }
 0x500   :  { %1447 = vadd.xlane.f32.xlu1 %v1446_v19  ;;  %1557 = vadd.xlane.f32.xlu0 %v1556_v20 }
 0x504   :  { %1667 = vadd.xlane.f32.xlu1 %v1666_v22 }
 0x515   :  { %1562 = vrot.lane.b32.xlu1 %v1343_v23, %s8202_s14 }
 0x516   :  { %1452 = vrot.lane.b32.xlu0 %v1343_v23, %s8203_s17 }
 0x51a   :  { %1672 = vrot.lane.b32.xlu0 %v1343_v23, %s8204_s9 }
 0x544   :  { %v993_v24 = vpop.xlane.xlu0 %992 }
 0x545   :  { %7280 = vrcp.f32 %v993_v24 }
 0x54c   :  { %v1104_v25 = vpop.xlane.xlu1 %1103 }
 0x54d   :  { %7282 = vrcp.f32 %v1104_v25  ;;  %v7216_v25 = vld [vmem:[%s9461_s28 + $0x8] sm:$0xff]  }
 0x54e   :  { %6601 = vmatpush3.bf16.msra.mxu1 %v7216_v25 }
 0x54f   :  { %6602 = vmatprep.subr.bf16.mxu1 %v8200_v1 }
 0x550   :  { %v1109_v31 = vpop.permute.xlu1 %1108 }
 0x551   :  { %v1114_v33 = vsel %vm889_vm3, %v1109_v31, 0 }
 0x552   :  { %v7281_v26 = vpop.eup %7280 }
 0x553   :  { %v995_v28 = vmul.f32 %v7281_v26, %v7265_v53 }
 0x554   :  { %v1214_v27 = vpop.xlane.xlu0 %1213  ;;  %v1219_v35 = vpop.permute.xlu1 %1218 }
 0x555   :  { %7284 = vrcp.f32 %v1214_v27  ;;  %v996_v39 = vpack.c.bf16 %v995_v28, %v995_v28  ;;  %v1224_v38 = vsel %vm889_vm3, %v1219_v35, 0 }
 0x558   :  { %v999_v29 = vpop.permute.xlu0 %998 }
 0x559   :  { %v1004_v30 = vsel %vm889_vm3, %v999_v29, 0 }
 0x55a   :  { %6523 = vmatpush3.bf16.msra.mxu0 %v1004_v30  ;;  %v7283_v32 = vpop.eup %7282  ;;  %v7217_v30 = vld [vmem:[%s9461_s28] sm:$0xff]  }
 0x55b   :  { %6534 = vmatprep.subr.bf16.mxu0 %v8200_v1  ;;  %v1106_v34 = vmul.f32 %v7283_v32, %v8659_v56  ;;  %6603 = vmatpush3.bf16.msra.mxu1 %v7217_v30 }
 0x55d   :  { %6525 = vmatmul.mubr.msk.bf16.vlgmr.msra.gmra.mxu0 %vm827_vm2, %v996_v39  ;;  %v1107_v36 = vpack.c.bf16 %v1106_v34, %v1106_v34 }
 0x55e   :  { %6535 = vmatpush3.bf16.msra.mxu0 %v1114_v33  ;;  %6536 = vmatprep.mubr.msk.bf16.mxu0 %vm8201_vm0, %v8200_v1 }
 0x55f   :  { %6546 = vmatprep.subr.bf16.mxu0 %v8200_v1 }
 0x562   :  { %v7285_v37 = vpop.eup %7284 }
 0x563   :  { %v1216_v40 = vmul.f32 %v7285_v37, %v8663_v58 }
 0x565   :  { %6537 = vmatmul.mubr.msk.bf16.vlgmr.msra.gmra.mxu0 %vm827_vm2, %v1107_v36  ;;  %v1217_v41 = vpack.c.bf16 %v1216_v40, %v1216_v40 }
 0x566   :  { %6547 = vmatpush3.bf16.msra.mxu0 %v1224_v38  ;;  %6548 = vmatprep.mubr.msk.bf16.mxu0 %vm8201_vm0, %v8200_v1 }
 0x567   :  { %6558 = vmatprep.subr.bf16.mxu0 %v8200_v1 }
 0x56d   :  { %6549 = vmatmul.mubr.msk.bf16.vlgmr.msra.gmra.mxu0 %vm827_vm2, %v1217_v41 }
 0x56e   :  { %6559 = vmatpush3.bf16.msra.mxu0 %v1348_v42  ;;  %6560 = vmatprep.mubr.msk.bf16.mxu0 %vm8201_vm0, %v8200_v1 }
 0x56f   :  { %6570 = vmatprep.subr.bf16.mxu0 %v8200_v1 }
 0x585   :  { %v1339_v43 = vpop.xlane.xlu1 %1338 }
 0x586   :  { %7286 = vrcp.f32 %v1339_v43 }
 0x589   :  { %v1448_v44 = vpop.xlane.xlu1 %1447  ;;  %v1558_v45 = vpop.xlane.xlu0 %1557 }
 0x58a   :  { %7288 = vrcp.f32 %v1448_v44 }
 0x58b   :  { %7290 = vrcp.f32 %v1558_v45 }
 0x58d   :  { %v1453_v48 = vpop.permute.xlu0 %1452  ;;  %v1668_v51 = vpop.xlane.xlu1 %1667 }
 0x58e   :  { %v1458_v52 = vsel %vm889_vm3, %v1453_v48, 0  ;;  %7292 = vrcp.f32 %v1668_v51 }
 0x591   :  { %v1563_v54 = vpop.permute.xlu1 %1562  ;;  %v1673_v59 = vpop.permute.xlu0 %1672 }
 0x592   :  { %v1568_v57 = vsel %vm889_vm3, %v1563_v54, 0  ;;  %v1678_v63 = vsel %vm889_vm3, %v1673_v59, 0 }
 0x593   :  { %v7287_v46 = vpop.eup %7286 }
 0x594   :  { %v1341_v47 = vmul.f32 %v7287_v46, %v7273_v15 }
 0x596   :  { %v1342_v49 = vpack.c.bf16 %v1341_v47, %v1341_v47 }
 0x597   :  { %v7289_v50 = vpop.eup %7288 }
 0x598   :  { %6561 = vmatmul.mubr.msk.bf16.vlgmr.msra.gmra.mxu0 %vm827_vm2, %v1342_v49  ;;  %v1450_v53 = vmul.f32 %v7289_v50, %v8677_v16  ;;  %v7291_v56 = vpop.eup %7290 }
 0x599   :  { %6571 = vmatpush3.bf16.msra.mxu0 %v1458_v52  ;;  %6572 = vmatprep.mubr.msk.bf16.mxu0 %vm8201_vm0, %v8200_v1  ;;  %v1560_v58 = vmul.f32 %v7291_v56, %v8680_v18 }
 0x59a   :  { %6582 = vmatprep.subr.bf16.mxu0 %v8200_v1  ;;  %v1451_v55 = vpack.c.bf16 %v1450_v53, %v1450_v53 }
 0x59b   :  { %v1561_v60 = vpack.c.bf16 %v1560_v58, %v1560_v58  ;;  %v7293_v61 = vpop.eup %7292 }
 0x59c   :  { %v1670_v2 = vmul.f32 %v7293_v61, %v8686_v21 }
 0x59e   :  { %v1671_v7 = vpack.c.bf16 %v1670_v2, %v1670_v2 }
 0x5a0   :  { %6573 = vmatmul.mubr.msk.bf16.vlgmr.msra.gmra.mxu0 %vm827_vm2, %v1451_v55 }
 0x5a1   :  { %6583 = vmatpush3.bf16.msra.mxu0 %v1568_v57  ;;  %6584 = vmatprep.mubr.msk.bf16.mxu0 %vm8201_vm0, %v8200_v1  ;;  %v6132_v57 = vld [vmem:[#allocation9] ss:$0 sm:$0xff] }
 0x5a2   :  { %6594 = vmatprep.subr.bf16.mxu0 %v8200_v1 }
 0x5a6   :  { %v8725_v62 = vpop.f32.mrf.mxu0 }
 0x5a8   :  { %6585 = vmatmul.mubr.msk.bf16.vlgmr.msra.gmra.mxu0 %vm827_vm2, %v1561_v60  ;;  %v6514_v0 = vpop.f32.mrf.mxu0 }
 0x5a9   :  { %6595 = vmatpush3.bf16.msra.mxu0 %v1678_v63  ;;  %6596 = vmatprep.mubr.msk.bf16.mxu0 %vm8201_vm0, %v8200_v1 }
 0x5aa   :  { %6608 = vmatprep.subr.bf16.mxu0 %v8200_v1  ;;  %v930_v3 = vpop.f32.mrf.mxu0 }
 0x5ac   :  { %v6515_v6 = vpop.f32.mrf.mxu0 }
 0x5b0   :  { %6597 = vmatmul.mubr.msk.bf16.vlgmr.msra.gmra.mxu0 %vm827_vm2, %v1671_v7 }
 0x5b1   :  { %6612 = vmatprep.mubr.msk.bf16.mxu0 %vm8201_vm0, %v8200_v1 }
 0x61d   :  { %v1040_v8 = vpop.f32.mrf.mxu0 }
 0x61f   :  { %v6526_v9 = vpop.f32.mrf.mxu0 }
 0x621   :  { %v1043_v10 = vpop.f32.mrf.mxu0 }
 0x623   :  { %v6527_v11 = vpop.f32.mrf.mxu0 }
 0x625   :  { %v1150_v12 = vpop.f32.mrf.mxu0 }
 0x627   :  { %v6538_v13 = vpop.f32.mrf.mxu0 }
 0x629   :  { %v1153_v14 = vpop.f32.mrf.mxu0 }
 0x62b   :  { %v6539_v15 = vpop.f32.mrf.mxu0 }
 0x62c   :  { %v7218_v15 = vld [vmem:[%s9462_s6 + $0x8] sm:$0xff]  }
 0x62d   :  { %v1260_v16 = vpop.f32.mrf.mxu0  ;;  %6616 = vmatprep.subr.bf16.mxu1 %v7218_v15 }
 0x62f   :  { %v6550_v17 = vpop.f32.mrf.mxu0 }
 0x630   :  { %v621_v17 = vld [vmem:[%s9463_s10] sm:$0xff] }
 0x631   :  { %v1263_v18 = vpop.f32.mrf.mxu0 }
 0x632   :  { %v622_v18 = vld [vmem:[%s9463_s10 + $0x8] sm:$0xff] }
 0x633   :  { %v6551_v19 = vpop.f32.mrf.mxu0 }
 0x634   :  { %v8760_v19 = vpack.c.bf16 %v622_v18, %v621_v17 }
 0x658   :  { %v1384_v20 = vpop.f32.mrf.mxu0 }
 0x65a   :  { %v6562_v21 = vpop.f32.mrf.mxu0 }
 0x65b   :  { %v624_v21 = vld [vmem:[%s9463_s10 + $0x18] sm:$0xff] }
 0x65c   :  { %v1387_v22 = vpop.f32.mrf.mxu0 }
 0x65e   :  { %v6563_v23 = vpop.f32.mrf.mxu0 }
 0x65f   :  { %v7220_v23 = vld [vmem:[%s9464_s20 + $0x8] sm:$0xff]  }
 0x660   :  { %v1494_v24 = vpop.f32.mrf.mxu0  ;;  %6609 = vmatpush3.bf16.msra.mxu0 %v7220_v23 }
 0x661   :  { %v7148_v26 = vpack.i.bf16 %v1494_v24, %v1040_v8  ;;  %v7221_v24 = vld [vmem:[%s9464_s20] sm:$0xff]   ;;  %6610 = vmatprep.subr.bf16.mxu0 %v8200_v1 }
 0x662   :  { %v6574_v27 = vpop.f32.mrf.mxu0 }
 0x663   :  { %7149 = vrot.lane.b32.xlu0 %v7148_v26, %s8205_s1 }
 0x664   :  { %v1497_v28 = vpop.f32.mrf.mxu0  ;;  %6611 = vmatpush3.bf16.msra.mxu0 %v7221_v24 }
 0x666   :  { %v6575_v29 = vpop.f32.mrf.mxu0 }
 0x668   :  { %v1604_v31 = vpop.f32.mrf.mxu0 }
 0x669   :  { %v7153_v39 = vpack.i.bf16 %v1604_v31, %v1150_v12 }
 0x66a   :  { %v6586_v32 = vpop.f32.mrf.mxu0 }
 0x66b   :  { %7154 = vrot.lane.b32.xlu1 %v7153_v39, %s8206_s13  ;;  %v6136_v32 = vld [vmem:[#allocation23] ss:$0 sm:$0xff] }
 0x66c   :  { %v1607_v33 = vpop.f32.mrf.mxu0 }
 0x66e   :  { %v6587_v34 = vpop.f32.mrf.mxu0 }
 0x670   :  { %v1714_v35 = vpop.f32.mrf.mxu0 }
 0x671   :  { %v7158_v36 = vpack.i.bf16 %v1714_v35, %v1260_v16  ;;  %v7219_v16 = vld [vmem:[%s9462_s6] sm:$0xff]  }
 0x672   :  { %v6598_v37 = vpop.f32.mrf.mxu0 }
 0x673   :  { %7159 = vrot.lane.b32.xlu0 %v7158_v36, %s8207_s7  ;;  %v6137_v36 = vld [vmem:[#allocation24] ss:$0 sm:$0xff] }
 0x674   :  { %v1717_v38 = vpop.f32.mrf.mxu0 }
 0x676   :  { %v6599_v40 = vpop.f32.mrf.mxu0 }
 0x6d5   :  { %v7150_v41 = vpop.permute.xlu0 %7149 }
 0x6d6   :  { %v7152_v43 = vunpack.i.h.bf16 %v7150_v41  ;;  %v7151_v44 = vunpack.i.l.bf16 %v7150_v41 }
 0x6d8   :  { %v1732_v48 = vsel %vm827_vm2, %v1384_v20, %v7152_v43  ;;  %v1278_v49 = vsel %vm827_vm2, %v8725_v62, %v7151_v44  ;;  %v623_v20 = vld [vmem:[%s9463_s10 + $0x10] sm:$0xff] }
 0x6d9   :  { %v8764_v22 = vpack.c.bf16 %v624_v21, %v623_v20 }
 0x6dd   :  { %v7155_v42 = vpop.permute.xlu1 %7154 }
 0x6de   :  { %v7157_v45 = vunpack.i.h.bf16 %v7155_v42  ;;  %v7156_v46 = vunpack.i.l.bf16 %v7155_v42  ;;  %v6142_v42 = vld [vmem:[#allocation12] ss:$0 sm:$0xff] }
 0x6e0   :  { %v1280_v52 = vsel %vm1279_vm4, %v1278_v49, %v7156_v46  ;;  %v1733_v53 = vsel %vm1279_vm4, %v1732_v48, %v7157_v45 }
 0x6e5   :  { %v7160_v47 = vpop.permute.xlu0 %7159 }
 0x6e6   :  { %v7162_v50 = vunpack.i.h.bf16 %v7160_v47  ;;  %v7161_v51 = vunpack.i.l.bf16 %v7160_v47 }
 0x6e8   :  { %v1282_v54 = vsel %vm1281_vm5, %v1280_v52, %v7161_v51  ;;  %v1734_v55 = vsel %vm1281_vm5, %v1733_v53, %v7162_v50 }
 0x6e9   :  { %v1735_v56 = vpack.c.bf16 %v1734_v55, %v1282_v54  ;;  %v6138_v54 = vld [vmem:[#allocation11] ss:$0 sm:$0xff] }
 0x6eb   :  { %6605 = vmatmul.mubr.msk.bf16.vlgmr.msra.gmra.mxu1 %vm649_vm1, %v1735_v56 }
 0x6ec   :  { %6617 = vmatpush3.bf16.msra.mxu1 %v7218_v15  ;;  %6620 = vmatprep.mubr.msk.bf16.mxu1 %vm649_vm1, %v8760_v19 }
 0x6ed   :  { %6618 = vmatprep.subr.bf16.mxu1 %v7219_v16 }
 0x6f0   :  { %6619 = vmatpush3.bf16.msra.mxu1 %v7219_v16 }
 0x6f1   :  { %6632 = vmatprep.subr.bf16.mxu1 %v8200_v1 }
 0x6f3   :  { %6621 = vmatmul.mubr.msk.bf16.vlgmr.msra.gmra.mxu1 %vm649_vm1, %v8764_v22 }
 0x6f4   :  { %6634 = vmatprep.mubr.msk.bf16.mxu1 %vm8201_vm0, %v8200_v1 }
 0x7ab   :  { %v1796_v58 = vpop.f32.mrf.mxu1 }
 0x7ac   :  { %v1797_v59 = vadd.f32 %v6132_v57, %v1796_v58 }
 0x7ad   :  { %v6606_v60 = vpop.f32.mrf.mxu1 }
 0x7ae   :  { %v1803_v61 = vadd.f32 %v1797_v59, %v8563_v4 }
 0x7af   :  { %v1799_v62 = vpop.f32.mrf.mxu1 }
 0x7b0   :  { %v1800_v63 = vadd.f32 %v6132_v57, %v1799_v62  ;;  %v1805_v0 = vsel %vm649_vm1, %v1803_v61, 0.0 }
 0x7b1   :  { %1806 = vadd.xlane.f32.xlu1 %v1805_v0  ;;  %v6607_v2 = vpop.f32.mrf.mxu1 }
 0x7b2   :  { %v1804_v3 = vadd.f32 %v1800_v63, %v8566_v5 }
 0x7b3   :  { %v6622_v43 = vpop.f32.mrf.mxu1 }
 0x7b4   :  { %v1808_v6 = vsel %vm649_vm1, %v1804_v3, 0.0  ;;  %v1994_v44 = vadd.f32 %v6622_v43, %v6142_v42 }
 0x7b5   :  { %1809 = vadd.xlane.f32.xlu0 %v1808_v6  ;;  %v1985_v45 = vpop.f32.mrf.mxu1  ;;  %v7222_v6 = vld [vmem:[#allocation14 + $0x8] sm:$0xff]  }
 0x7b6   :  { %v1986_v47 = vadd.f32 %v6142_v42, %v1985_v45  ;;  %6624 = vmatprep.subr.bf16.mxu0 %v7222_v6 }
 0x7b7   :  { %v6623_v46 = vpop.f32.mrf.mxu1 }
 0x7b8   :  { %v1997_v48 = vadd.f32 %v6623_v46, %v6142_v42 }
 0x7b9   :  { %v1988_v49 = vpop.f32.mrf.mxu1 }
 0x7ba   :  { %v2074_v50 = vpack.c.bf16 %v1997_v48, %v1994_v44  ;;  %v1989_v51 = vadd.f32 %v6142_v42, %v1988_v49 }
 0x7bc   :  { %v2073_v52 = vpack.c.bf16 %v1989_v51, %v1986_v47 }
 0x7be   :  { %v2081_v53 = vsel %vm827_vm2, %v2073_v52, 0 }
 0x7bf   :  { %6633 = vmatpush3.bf16.xpose.msra.mxu1 %v2081_v53 }
 0x7c0   :  { %6644 = vmatprep.subr.bf16.mxu1 %v8200_v1 }
 0x83a   :  { %v1807_v7 = vpop.xlane.xlu1 %1806 }
 0x83b   :  { %v1812_v8 = vmul.f32 0.03125, %v1807_v7  ;;  %v7223_v7 = vld [vmem:[#allocation14] sm:$0xff]  }
 0x83d   :  { %v1814_v9 = vsub.f32 %v1803_v61, %v1812_v8 }
 0x83e   :  { %v1810_v10 = vpop.xlane.xlu0 %1809 }
 0x83f   :  { %v1813_v4 = vmul.f32 0.03125, %v1810_v10  ;;  %v1816_v11 = vmul.f32 %v1814_v9, %v1814_v9 }
 0x841   :  { %v1815_v12 = vsub.f32 %v1804_v3, %v1813_v4  ;;  %v1818_v13 = vsel %vm649_vm1, %v1816_v11, 0.0 }
 0x842   :  { %1819 = vadd.xlane.f32.xlu0 %v1818_v13 }
 0x843   :  { %v1817_v14 = vmul.f32 %v1815_v12, %v1815_v12 }
 0x845   :  { %v1821_v5 = vsel %vm649_vm1, %v1817_v14, 0.0  ;;  %v2525_v14 = vsel %vm827_vm2, %v2074_v50, 0 }
 0x846   :  { %1822 = vadd.xlane.f32.xlu1 %v1821_v5 }
 0x858   :  { %2182 = vrot.lane.b32.xlu0 %v2073_v52, %s8203_s17 }
 0x8cb   :  { %v1820_v25 = vpop.xlane.xlu0 %1819 }
 0x8cc   :  { %v1824_v26 = vmul.f32 0.03125, %v1820_v25 }
 0x8ce   :  { %v1826_v27 = vadd.f32 1e-05, %v1824_v26 }
 0x8cf   :  { %v1823_v28 = vpop.xlane.xlu1 %1822  ;;  %v2183_v63 = vpop.permute.xlu0 %2182 }
 0x8d0   :  { %7294 = vrsqrt.f32 %v1826_v27  ;;  %v1825_v29 = vmul.f32 0.03125, %v1823_v28  ;;  %v2188_v2 = vsel %vm827_vm2, %v2183_v63, 0 }
 0x8d2   :  { %v1827_v30 = vadd.f32 1e-05, %v1825_v29 }
 0x8d4   :  { %7296 = vrsqrt.f32 %v1827_v30 }
 0x8dd   :  { %v7295_v31 = vpop.eup %7294 }
 0x8de   :  { %v1830_v39 = vmul.f32 %v7295_v31, %v1814_v9  ;;  %v6147_v31 = vld [vmem:[#allocation15] ss:$0 sm:$0xff] }
 0x8e0   :  { %v1839_v35 = vmul.f32 %v6136_v32, %v1830_v39 }
 0x8e1   :  { %v7297_v33 = vpop.eup %7296 }
 0x8e2   :  { %v1831_v34 = vmul.f32 %v7297_v33, %v1815_v12  ;;  %v8776_v38 = vadd.f32 %v6137_v36, %v1839_v35 }
 0x8e4   :  { %v1840_v37 = vmul.f32 %v6136_v32, %v1831_v34 }
 0x8e6   :  { %v8778_v40 = vadd.f32 %v6137_v36, %v1840_v37 }
 0x8e8   :  { %v1850_v41 = vpack.c.bf16 %v8778_v40, %v8776_v38 }
 0x8ea   :  { %6613 = vmatmul.mubr.msk.bf16.vlgmr.msra.gmra.mxu0 %vm649_vm1, %v1850_v41 }
 0x8eb   :  { %6628 = vmatprep.mubr.msk.bf16.mxu0 %vm649_vm1, %v8760_v19  ;;  %6625 = vmatpush3.bf16.msra.mxu0 %v7222_v6 }
 0x8ec   :  { %6626 = vmatprep.subr.bf16.mxu0 %v7223_v7 }
 0x8ef   :  { %6627 = vmatpush3.bf16.msra.mxu0 %v7223_v7 }
 0x8f0   :  { %6638 = vmatprep.subr.bf16.mxu0 %v8200_v1 }
 0x8f2   :  { %6629 = vmatmul.mubr.msk.bf16.vlgmr.msra.gmra.mxu0 %vm649_vm1, %v8764_v22 }
 0x8f3   :  { %6640 = vmatprep.mubr.msk.bf16.mxu0 %vm8201_vm0, %v8200_v1 }
 0x9aa   :  { %v1911_v55 = vpop.f32.mrf.mxu0 }
 0x9ab   :  { %v1912_v57 = vadd.f32 %v6138_v54, %v1911_v55 }
 0x9ac   :  { %v6614_v56 = vpop.f32.mrf.mxu0 }
 0x9ad   :  { %v1918_v61 = vmul.f32 0.35355338, %v1912_v57 }
 0x9ae   :  { %v1914_v58 = vpop.f32.mrf.mxu0 }
 0x9af   :  { %v1915_v59 = vadd.f32 %v6138_v54, %v1914_v58 }
 0x9b0   :  { %v6615_v60 = vpop.f32.mrf.mxu0 }
 0x9b1   :  { %v1919_v62 = vmul.f32 0.35355338, %v1915_v59 }
 0x9b2   :  { %v6630_v30 = vpop.f32.mrf.mxu0 }
 0x9b3   :  { %v2072_v0 = vpack.c.bf16 %v1919_v62, %v1918_v61  ;;  %v2066_v39 = vadd.f32 %v6630_v30, %v6147_v31 }
 0x9b4   :  { %v2057_v32 = vpop.f32.mrf.mxu0 }
 0x9b5   :  { %2179 = vrot.lane.b32.xlu1 %v2072_v0, %s8203_s17  ;;  %2289 = vrot.lane.b32.xlu0 %v2072_v0, %s8202_s14  ;;  %v2520_v3 = vrot.slane %v2072_v0, 4  ;;  %v2058_v34 = vadd.f32 %v6147_v31, %v2057_v32 }
 0x9b6   :  { %6635 = vmatmul.mubr.msk.bf16.vlgmr.msra.gmra.mxu1 %vm827_vm2, %v2072_v0  ;;  %v6631_v33 = vpop.f32.mrf.mxu0 }
 0x9b7   :  { %6645 = vmatpush3.bf16.xpose.msra.mxu1 %v2188_v2  ;;  %6646 = vmatprep.mubr.msk.bf16.mxu1 %vm8201_vm0, %v8200_v1  ;;  %v2069_v35 = vadd.f32 %v6631_v33, %v6147_v31 }
 0x9b8   :  { %6656 = vmatprep.subr.bf16.mxu1 %v8200_v1  ;;  %v2060_v36 = vpop.f32.mrf.mxu0 }
 0x9b9   :  { %2291 = vrot.lane.b32.xlu1 %v2073_v52, %s8202_s14  ;;  %2397 = vrot.lane.b32.xlu0 %v2072_v0, %s8204_s9  ;;  %v8843_v37 = vpack.c.bf16 %v2069_v35, %v2066_v39  ;;  %v2061_v41 = vadd.f32 %v6147_v31, %v2060_v36 }
 0x9bb   :  { %v8845_v42 = vpack.c.bf16 %v2061_v41, %v2058_v34 }
 0x9bd   :  { %2399 = vrot.lane.b32.xlu1 %v2073_v52, %s8204_s9  ;;  %2622 = vrot.lane.b32.xlu0 %v2520_v3, %s8203_s17 }
 0x9be   :  { %6639 = vmatpush3.bf16.msra.mxu0 %v8845_v42 }
 0x9bf   :  { %6650 = vmatprep.subr.bf16.mxu0 %v8200_v1 }
 0x9c1   :  { %2625 = vrot.lane.b32.xlu1 %v2074_v50, %s8203_s17  ;;  %2732 = vrot.lane.b32.xlu0 %v2520_v3, %s8202_s14 }
 0x9c5   :  { %2734 = vrot.lane.b32.xlu1 %v2074_v50, %s8202_s14  ;;  %2840 = vrot.lane.b32.xlu0 %v2520_v3, %s8204_s9 }
 0x9c9   :  { %2842 = vrot.lane.b32.xlu1 %v2074_v50, %s8204_s9 }
 0xa27   :  { %v2180_v8 = vpop.permute.xlu1 %2179  ;;  %v2290_v11 = vpop.permute.xlu0 %2289 }
 0xa28   :  { %6647 = vmatmul.mubr.msk.bf16.vlgmr.msra.gmra.mxu1 %vm827_vm2, %v2180_v8 }
 0xa29   :  { %6658 = vmatprep.mubr.msk.bf16.mxu1 %vm8201_vm0, %v8200_v1 }
 0xa2b   :  { %v2292_v9 = vpop.permute.xlu1 %2291  ;;  %v2398_v13 = vpop.permute.xlu0 %2397 }
 0xa2c   :  { %v2297_v10 = vsel %vm827_vm2, %v2292_v9, 0 }
 0xa2d   :  { %6657 = vmatpush3.bf16.xpose.msra.mxu1 %v2297_v10 }
 0xa2e   :  { %6668 = vmatprep.subr.bf16.mxu1 %v8200_v1 }
 0xa2f   :  { %v2400_v4 = vpop.permute.xlu1 %2399  ;;  %v2623_v17 = vpop.permute.xlu0 %2622 }
 0xa30   :  { %v2405_v12 = vsel %vm827_vm2, %v2400_v4, 0 }
 0xa33   :  { %v2626_v5 = vpop.permute.xlu1 %2625  ;;  %v2733_v21 = vpop.permute.xlu0 %2732 }
 0xa34   :  { %6659 = vmatmul.mubr.msk.bf16.vlgmr.msra.gmra.mxu1 %vm827_vm2, %v2290_v11  ;;  %v2631_v15 = vsel %vm827_vm2, %v2626_v5, 0 }
 0xa35   :  { %6669 = vmatpush3.bf16.xpose.msra.mxu1 %v2405_v12  ;;  %6670 = vmatprep.mubr.msk.bf16.mxu1 %vm8201_vm0, %v8200_v1 }
 0xa36   :  { %6680 = vmatprep.subr.bf16.mxu1 %v8200_v1 }
 0xa37   :  { %v2735_v16 = vpop.permute.xlu1 %2734  ;;  %v2841_v24 = vpop.permute.xlu0 %2840 }
 0xa38   :  { %v2740_v18 = vsel %vm827_vm2, %v2735_v16, 0 }
 0xa3b   :  { %v2843_v20 = vpop.permute.xlu1 %2842 }
 0xa3c   :  { %6671 = vmatmul.mubr.msk.bf16.vlgmr.msra.gmra.mxu1 %vm827_vm2, %v2398_v13  ;;  %v2848_v23 = vsel %vm827_vm2, %v2843_v20, 0 }
 0xa3d   :  { %6681 = vmatpush3.bf16.xpose.msra.mxu1 %v2525_v14  ;;  %6682 = vmatprep.mubr.msk.bf16.mxu1 %vm8201_vm0, %v8200_v1 }
 0xa3e   :  { %6692 = vmatprep.subr.bf16.mxu1 %v8200_v1 }
 0xa44   :  { %6683 = vmatmul.mubr.msk.bf16.vlgmr.msra.gmra.mxu1 %vm827_vm2, %v2520_v3 }
 0xa45   :  { %6693 = vmatpush3.bf16.xpose.msra.mxu1 %v2631_v15  ;;  %6694 = vmatprep.mubr.msk.bf16.mxu1 %vm8201_vm0, %v8200_v1 }
 0xa46   :  { %6704 = vmatprep.subr.bf16.mxu1 %v8200_v1 }
 0xa4c   :  { %6695 = vmatmul.mubr.msk.bf16.vlgmr.msra.gmra.mxu1 %vm827_vm2, %v2623_v17 }
 0xa4d   :  { %6705 = vmatpush3.bf16.xpose.msra.mxu1 %v2740_v18  ;;  %6706 = vmatprep.mubr.msk.bf16.mxu1 %vm8201_vm0, %v8200_v1 }
 0xa4e   :  { %6716 = vmatprep.subr.bf16.mxu1 %v8200_v1 }
 0xa54   :  { %6707 = vmatmul.mubr.msk.bf16.vlgmr.msra.gmra.mxu1 %vm827_vm2, %v2733_v21 }
 0xa55   :  { %6717 = vmatpush3.bf16.xpose.msra.mxu1 %v2848_v23  ;;  %6718 = vmatprep.mubr.msk.bf16.mxu1 %vm8201_vm0, %v8200_v1 }
 0xa56   :  { %6728 = vmatprep.subr.bf16.mxu1 %v8200_v1 }
 0xa5c   :  { %6719 = vmatmul.mubr.msk.bf16.vlgmr.msra.gmra.mxu1 %vm827_vm2, %v2841_v24 }
 0xa5d   :  { %6732 = vmatprep.mubr.msk.bf16.mxu1 %vm8201_vm0, %v8200_v1 }
 0xa76   :  { %v2117_v25 = vpop.f32.mrf.mxu1 }
 0xa77   :  { %v2123_v26 = vsel %vm1279_vm4, %v2117_v25, -inf }
 0xa78   :  { %2124 = vmax.xlane.f32.xlu1 %v2123_v26  ;;  %v6636_v27 = vpop.f32.mrf.mxu1 }
 0xa7a   :  { %v2120_v28 = vpop.f32.mrf.mxu1 }
 0xa7c   :  { %v6637_v29 = vpop.f32.mrf.mxu1 }
 0xae8   :  { %v2224_v43 = vpop.f32.mrf.mxu1 }
 0xae9   :  { %v2230_v44 = vsel %vm1279_vm4, %v2224_v43, -inf }
 0xaea   :  { %2231 = vmax.xlane.f32.xlu0 %v2230_v44  ;;  %v6648_v45 = vpop.f32.mrf.mxu1 }
 0xaec   :  { %v2227_v46 = vpop.f32.mrf.mxu1 }
 0xaee   :  { %v6649_v47 = vpop.f32.mrf.mxu1 }
 0xaf4   :  { %v2333_v48 = vpop.f32.mrf.mxu1 }
 0xaf5   :  { %v2339_v49 = vsel %vm1279_vm4, %v2333_v48, -inf }
 0xaf6   :  { %2340 = vmax.xlane.f32.xlu0 %v2339_v49  ;;  %v6660_v50 = vpop.f32.mrf.mxu1 }
 0xaf8   :  { %v2336_v51 = vpop.f32.mrf.mxu1 }
 0xafa   :  { %v6661_v52 = vpop.f32.mrf.mxu1 }
 0xafc   :  { %v2441_v53 = vpop.f32.mrf.mxu1 }
 0xafd   :  { %v2447_v54 = vsel %vm1279_vm4, %v2441_v53, -inf }
 0xafe   :  { %2448 = vmax.xlane.f32.xlu1 %v2447_v54  ;;  %v6672_v55 = vpop.f32.mrf.mxu1 }
 0xb00   :  { %v2444_v56 = vpop.f32.mrf.mxu1 }
 0xb01   :  { %v2125_v57 = vpop.xlane.xlu1 %2124 }
 0xb02   :  { %v2126_v58 = vsub.f32 %v2117_v25, %v2125_v57  ;;  %v6673_v59 = vpop.f32.mrf.mxu1 }
 0xb04   :  { %v2561_v60 = vpop.f32.mrf.mxu1  ;;  %v2127_v61 = vmul.f32 1.442695, %v2126_v58 }
 0xb05   :  { %v2567_v62 = vsel %vm1279_vm4, %v2561_v60, -inf }
 0xb06   :  { %2568 = vmax.xlane.f32.xlu0 %v2567_v62  ;;  %v6684_v63 = vpop.f32.mrf.mxu1  ;;  %7298 = vpow2.f32 %v2127_v61 }
 0xb08   :  { %v2564_v0 = vpop.f32.mrf.mxu1 }
 0xb0a   :  { %v6685_v2 = vpop.f32.mrf.mxu1 }
 0xb0c   :  { %v8853_v3 = vpop.f32.mrf.mxu1 }
 0xb0d   :  { %v2673_v6 = vsel %vm1279_vm4, %v8853_v3, -inf }
 0xb0e   :  { %2674 = vmax.xlane.f32.xlu1 %v2673_v6  ;;  %v6696_v7 = vpop.f32.mrf.mxu1 }
 0xb10   :  { %v2670_v8 = vpop.f32.mrf.mxu1 }
 0xb12   :  { %v6697_v9 = vpop.f32.mrf.mxu1 }
 0xb13   :  { %v7299_v11 = vpop.eup %7298 }
 0xb14   :  { %v2776_v10 = vpop.f32.mrf.mxu1  ;;  %v2129_v14 = vsel %vm1279_vm4, %v7299_v11, 0.0 }
 0xb15   :  { %v2782_v4 = vsel %vm1279_vm4, %v2776_v10, -inf }
 0xb16   :  { %2783 = vmax.xlane.f32.xlu0 %v2782_v4  ;;  %v6708_v12 = vpop.f32.mrf.mxu1 }
 0xb18   :  { %v2779_v13 = vpop.f32.mrf.mxu1 }
 0xb1a   :  { %2130 = vadd.xlane.f32.xlu0 %v2129_v14  ;;  %v6709_v5 = vpop.f32.mrf.mxu1 }
 0xb1c   :  { %v2884_v15 = vpop.f32.mrf.mxu1 }
 0xb1d   :  { %v2890_v16 = vsel %vm1279_vm4, %v2884_v15, -inf }
 0xb1e   :  { %2891 = vmax.xlane.f32.xlu1 %v2890_v16  ;;  %v6720_v17 = vpop.f32.mrf.mxu1 }
 0xb20   :  { %v2887_v18 = vpop.f32.mrf.mxu1 }
 0xb22   :  { %v6721_v20 = vpop.f32.mrf.mxu1 }
 0xb2f   :  { %2243 = vrot.lane.b32.xlu1 %v8845_v42, %s8203_s17 }
 0xb30   :  { %2351 = vrot.lane.b32.xlu0 %v8845_v42, %s8202_s14 }
 0xb73   :  { %v2232_v21 = vpop.xlane.xlu0 %2231 }
 0xb74   :  { %v2233_v23 = vsub.f32 %v2224_v43, %v2232_v21 }
 0xb76   :  { %v2234_v24 = vmul.f32 1.442695, %v2233_v23 }
 0xb78   :  { %7300 = vpow2.f32 %v2234_v24 }
 0xb7f   :  { %v2341_v25 = vpop.xlane.xlu0 %2340 }
 0xb80   :  { %v2342_v26 = vsub.f32 %v2333_v48, %v2341_v25 }
 0xb82   :  { %v2343_v27 = vmul.f32 1.442695, %v2342_v26 }
 0xb84   :  { %7302 = vpow2.f32 %v2343_v27 }
 0xb85   :  { %v7301_v28 = vpop.eup %7300 }
 0xb86   :  { %v2236_v29 = vsel %vm1279_vm4, %v7301_v28, 0.0 }
 0xb87   :  { %v2449_v30 = vpop.xlane.xlu1 %2448  ;;  %2237 = vadd.xlane.f32.xlu1 %v2236_v29 }
 0xb88   :  { %v2450_v31 = vsub.f32 %v2441_v53, %v2449_v30 }
 0xb8a   :  { %v2451_v39 = vmul.f32 1.442695, %v2450_v31 }
 0xb8c   :  { %7304 = vpow2.f32 %v2451_v39 }
 0xb8f   :  { %v2569_v32 = vpop.xlane.xlu0 %2568 }
 0xb90   :  { %v2570_v33 = vsub.f32 %v2561_v60, %v2569_v32 }
 0xb91   :  { %v7303_v34 = vpop.eup %7302 }
 0xb92   :  { %v2571_v35 = vmul.f32 1.442695, %v2570_v33  ;;  %v2345_v36 = vsel %vm1279_vm4, %v7303_v34, 0.0 }
 0xb93   :  { %2346 = vadd.xlane.f32.xlu0 %v2345_v36 }
 0xb94   :  { %7306 = vpow2.f32 %v2571_v35 }
 0xb97   :  { %v2675_v48 = vpop.xlane.xlu1 %2674 }
 0xb98   :  { %v2676_v56 = vsub.f32 %v8853_v3, %v2675_v48 }
 0xb99   :  { %v8866_v41 = vpop.eup %7304 }
 0xb9a   :  { %v2453_v43 = vsel %vm1279_vm4, %v8866_v41, 0.0  ;;  %v2677_v57 = vmul.f32 1.442695, %v2676_v56 }
 0xb9b   :  { %2454 = vadd.xlane.f32.xlu1 %v2453_v43 }
 0xb9f   :  { %v2784_v44 = vpop.xlane.xlu0 %2783 }
 0xba0   :  { %v2785_v54 = vsub.f32 %v2776_v10, %v2784_v44 }
 0xba1   :  { %v8870_v45 = vpop.eup %7306 }
 0xba2   :  { %v2573_v46 = vsel %vm1279_vm4, %v8870_v45, 0.0  ;;  %v2786_v55 = vmul.f32 1.442695, %v2785_v54 }
 0xba3   :  { %2574 = vadd.xlane.f32.xlu0 %v2573_v46  ;;  %v2131_v47 = vpop.xlane.xlu0 %2130 }
 0xba4   :  { %7308 = vrcp.f32 %v2131_v47 }
 0xba5   :  { %7310 = vpow2.f32 %v2786_v55 }
 0xba6   :  { %7312 = vpow2.f32 %v2677_v57 }
 0xba7   :  { %v2892_v49 = vpop.xlane.xlu1 %2891  ;;  %v2352_v3 = vpop.permute.xlu0 %2351 }
 0xba8   :  { %v2893_v58 = vsub.f32 %v2884_v15, %v2892_v49 }
 0xbaa   :  { %v2894_v59 = vmul.f32 1.442695, %v2893_v58 }
 0xbab   :  { %v2244_v53 = vpop.permute.xlu1 %2243 }
 0xbac   :  { %2686 = vrot.lane.b32.xlu1 %v8843_v37, %s8203_s17  ;;  %7314 = vpow2.f32 %v2894_v59 }
 0xbb1   :  { %v7309_v50 = vpop.eup %7308 }
 0xbb2   :  { %v2133_v51 = vmul.f32 %v7309_v50, %v7299_v11  ;;  %v8883_v60 = vpop.eup %7310 }
 0xbb3   :  { %v2788_v61 = vsel %vm1279_vm4, %v8883_v60, 0.0  ;;  %v7313_v62 = vpop.eup %7312 }
 0xbb4   :  { %v2134_v52 = vpack.c.bf16 %v2133_v51, %v2133_v51 }
 0xbb6   :  { %6641 = vmatmul.mubr.msk.bf16.vlgmr.msra.gmra.mxu0 %vm1279_vm4, %v2134_v52 }
 0xbb7   :  { %6651 = vmatpush3.bf16.msra.mxu0 %v2244_v53  ;;  %6652 = vmatprep.mubr.msk.bf16.mxu0 %vm8201_vm0, %v8200_v1 }
 0xbb8   :  { %6662 = vmatprep.subr.bf16.mxu0 %v8200_v1 }
 0xbb9   :  { %2459 = vrot.lane.b32.xlu0 %v8845_v42, %s8204_s9  ;;  %v2679_v42 = vsel %vm1279_vm4, %v7313_v62, 0.0  ;;  %v8888_v63 = vpop.eup %7314 }
 0xbba   :  { %v2896_v0 = vsel %vm1279_vm4, %v8888_v63, 0.0 }
 0xbd0   :  { %2789 = vadd.xlane.f32.xlu1 %v2788_v61  ;;  %v7224_v61 = vld [vmem:[#allocation17 + $0x8] sm:$0xff]  }
 0xbd1   :  { %6729 = vmatpush3.bf16.msra.mxu1 %v7224_v61 }
 0xbd2   :  { %6730 = vmatprep.subr.bf16.mxu1 %v8200_v1 }
 0xbd8   :  { %2680 = vadd.xlane.f32.xlu0 %v2679_v42 }
 0xbdc   :  { %2897 = vadd.xlane.f32.xlu0 %v2896_v0 }
 0xbe1   :  { %2902 = vrot.lane.b32.xlu1 %v8843_v37, %s8204_s9 }
 0xbf2   :  { %2794 = vrot.lane.b32.xlu0 %v8843_v37, %s8202_s14 }
 0xc10   :  { %v2238_v2 = vpop.xlane.xlu1 %2237 }
 0xc11   :  { %7316 = vrcp.f32 %v2238_v2  ;;  %v7225_v2 = vld [vmem:[#allocation17] sm:$0xff]  }
 0xc12   :  { %6731 = vmatpush3.bf16.msra.mxu1 %v7225_v2 }
 0xc13   :  { %6744 = vmatprep.subr.bf16.mxu1 %v8200_v1 }
 0xc1c   :  { %v2347_v6 = vpop.xlane.xlu0 %2346 }
 0xc1d   :  { %7318 = vrcp.f32 %v2347_v6 }
 0xc1e   :  { %v7317_v7 = vpop.eup %7316 }
 0xc1f   :  { %v2240_v8 = vmul.f32 %v7317_v7, %v7301_v28 }
 0xc21   :  { %v2241_v9 = vpack.c.bf16 %v2240_v8, %v2240_v8 }
 0xc23   :  { %6653 = vmatmul.mubr.msk.bf16.vlgmr.msra.gmra.mxu0 %vm1279_vm4, %v2241_v9 }
 0xc24   :  { %6663 = vmatpush3.bf16.msra.mxu0 %v2352_v3  ;;  %v2455_v10 = vpop.xlane.xlu1 %2454  ;;  %6664 = vmatprep.mubr.msk.bf16.mxu0 %vm8201_vm0, %v8200_v1 }
 0xc25   :  { %7320 = vrcp.f32 %v2455_v10  ;;  %6674 = vmatprep.subr.bf16.mxu0 %v8200_v1 }
 0xc28   :  { %v2687_v21 = vpop.permute.xlu1 %2686 }
 0xc2a   :  { %v7319_v4 = vpop.eup %7318 }
 0xc2b   :  { %v2349_v11 = vmul.f32 %v7319_v4, %v7303_v34 }
 0xc2c   :  { %v2575_v12 = vpop.xlane.xlu0 %2574 }
 0xc2d   :  { %7322 = vrcp.f32 %v2575_v12  ;;  %v2350_v13 = vpack.c.bf16 %v2349_v11, %v2349_v11 }
 0xc2f   :  { %6665 = vmatmul.mubr.msk.bf16.vlgmr.msra.gmra.mxu0 %vm1279_vm4, %v2350_v13 }
 0xc30   :  { %v2460_v14 = vpop.permute.xlu0 %2459  ;;  %6676 = vmatprep.mubr.msk.bf16.mxu0 %vm8201_vm0, %v8200_v1 }
 0xc31   :  { %6675 = vmatpush3.bf16.msra.mxu0 %v2460_v14 }
 0xc32   :  { %v7321_v5 = vpop.eup %7320  ;;  %6686 = vmatprep.subr.bf16.mxu0 %v8200_v1 }
 0xc33   :  { %v2457_v15 = vmul.f32 %v7321_v5, %v8866_v41 }
 0xc35   :  { %v2458_v16 = vpack.c.bf16 %v2457_v15, %v2457_v15 }
 0xc37   :  { %6677 = vmatmul.mubr.msk.bf16.vlgmr.msra.gmra.mxu0 %vm1279_vm4, %v2458_v16 }
 0xc38   :  { %6687 = vmatpush3.bf16.msra.mxu0 %v8843_v37  ;;  %6688 = vmatprep.mubr.msk.bf16.mxu0 %vm8201_vm0, %v8200_v1 }
 0xc39   :  { %6698 = vmatprep.subr.bf16.mxu0 %v8200_v1 }
 0xc3a   :  { %v7323_v17 = vpop.eup %7322 }
 0xc3b   :  { %v2577_v18 = vmul.f32 %v7323_v17, %v8870_v45 }
 0xc3d   :  { %v2578_v20 = vpack.c.bf16 %v2577_v18, %v2577_v18 }
 0xc3f   :  { %6689 = vmatmul.mubr.msk.bf16.vlgmr.msra.gmra.mxu0 %vm1279_vm4, %v2578_v20 }
 0xc40   :  { %6699 = vmatpush3.bf16.msra.mxu0 %v2687_v21  ;;  %6700 = vmatprep.mubr.msk.bf16.mxu0 %vm8201_vm0, %v8200_v1 }
 0xc41   :  { %6710 = vmatprep.subr.bf16.mxu0 %v8200_v1 }
 0xc59   :  { %v2790_v37 = vpop.xlane.xlu1 %2789 }
 0xc5d   :  { %v2903_v35 = vpop.permute.xlu1 %2902 }
 0xc61   :  { %v2681_v23 = vpop.xlane.xlu0 %2680 }
 0xc62   :  { %7324 = vrcp.f32 %v2681_v23 }
 0xc63   :  { %7326 = vrcp.f32 %v2790_v37 }
 0xc65   :  { %v2898_v24 = vpop.xlane.xlu0 %2897 }
 0xc66   :  { %7328 = vrcp.f32 %v2898_v24 }
 0xc69   :  { %v2795_v29 = vpop.permute.xlu0 %2794 }
 0xc6f   :  { %v7325_v25 = vpop.eup %7324 }
 0xc70   :  { %v2683_v26 = vmul.f32 %v7325_v25, %v7313_v62  ;;  %v7327_v28 = vpop.eup %7326 }
 0xc71   :  { %v2792_v30 = vmul.f32 %v7327_v28, %v8883_v60 }
 0xc72   :  { %v2684_v27 = vpack.c.bf16 %v2683_v26, %v2683_v26 }
 0xc73   :  { %v2793_v32 = vpack.c.bf16 %v2792_v30, %v2792_v30  ;;  %v7329_v33 = vpop.eup %7328  ;;  %v6168_v30 = vld [vmem:[#allocation18] ss:$0 sm:$0xff] }
 0xc74   :  { %6701 = vmatmul.mubr.msk.bf16.vlgmr.msra.gmra.mxu0 %vm1279_vm4, %v2684_v27  ;;  %v2900_v41 = vmul.f32 %v7329_v33, %v8888_v63 }
 0xc75   :  { %6711 = vmatpush3.bf16.msra.mxu0 %v2795_v29  ;;  %6712 = vmatprep.mubr.msk.bf16.mxu0 %vm8201_vm0, %v8200_v1 }
 0xc76   :  { %6722 = vmatprep.subr.bf16.mxu0 %v8200_v1  ;;  %v8920_v31 = vpop.f32.mrf.mxu0  ;;  %v2901_v43 = vpack.c.bf16 %v2900_v41, %v2900_v41 }
 0xc78   :  { %v6642_v39 = vpop.f32.mrf.mxu0 }
 0xc7a   :  { %v2175_v34 = vpop.f32.mrf.mxu0 }
 0xc7c   :  { %6713 = vmatmul.mubr.msk.bf16.vlgmr.msra.gmra.mxu0 %vm1279_vm4, %v2793_v32  ;;  %v6643_v36 = vpop.f32.mrf.mxu0 }
 0xc7d   :  { %6723 = vmatpush3.bf16.msra.mxu0 %v2903_v35  ;;  %6724 = vmatprep.mubr.msk.bf16.mxu0 %vm8201_vm0, %v8200_v1 }
 0xc7e   :  { %6736 = vmatprep.subr.bf16.mxu0 %v8200_v1 }
 0xc84   :  { %6725 = vmatmul.mubr.msk.bf16.vlgmr.msra.gmra.mxu0 %vm1279_vm4, %v2901_v43 }
 0xc85   :  { %6740 = vmatprep.mubr.msk.bf16.mxu0 %vm8201_vm0, %v8200_v1 }
 0xce3   :  { %v2283_v44 = vpop.f32.mrf.mxu0 }
 0xce5   :  { %v6654_v45 = vpop.f32.mrf.mxu0 }
 0xce7   :  { %v2286_v46 = vpop.f32.mrf.mxu0 }
 0xce9   :  { %v6655_v47 = vpop.f32.mrf.mxu0 }
 0xcef   :  { %v2391_v48 = vpop.f32.mrf.mxu0 }
 0xcf1   :  { %v6666_v49 = vpop.f32.mrf.mxu0 }
 0xcf3   :  { %v2394_v50 = vpop.f32.mrf.mxu0 }
 0xcf5   :  { %v6667_v51 = vpop.f32.mrf.mxu0 }
 0xcf7   :  { %v2499_v52 = vpop.f32.mrf.mxu0 }
 0xcf9   :  { %v6678_v53 = vpop.f32.mrf.mxu0 }
 0xcfa   :  { %v7226_v53 = vld [vmem:[%s9465_s11 + $0x8] sm:$0xff]  }
 0xcfb   :  { %v2502_v54 = vpop.f32.mrf.mxu0  ;;  %6737 = vmatpush3.bf16.msra.mxu0 %v7226_v53 }
 0xcfc   :  { %v7227_v54 = vld [vmem:[%s9465_s11] sm:$0xff]   ;;  %6738 = vmatprep.subr.bf16.mxu0 %v8200_v1 }
 0xcfd   :  { %v6679_v55 = vpop.f32.mrf.mxu0 }
 0xcfe   :  { %v7228_v55 = vld [vmem:[%s9466_s5 + $0x38] sm:$0xff]  }
 0xcff   :  { %v2616_v56 = vpop.f32.mrf.mxu0  ;;  %6739 = vmatpush3.bf16.msra.mxu0 %v7227_v54 }
 0xd00   :  { %6764 = vmatprep.subr.bf16.mxu0 %v8200_v1 }
 0xd01   :  { %v6690_v57 = vpop.f32.mrf.mxu0 }
 0xd02   :  { %v7230_v57 = vld [vmem:[%s9466_s5 + $0x28] sm:$0xff]  }
 0xd03   :  { %v2619_v58 = vpop.f32.mrf.mxu0 }
 0xd04   :  { %v7231_v58 = vld [vmem:[%s9466_s5 + $0x20] sm:$0xff]  }
 0xd05   :  { %v6691_v59 = vpop.f32.mrf.mxu0 }
 0xd06   :  { %v7232_v59 = vld [vmem:[%s9466_s5 + $0x18] sm:$0xff]  }
 0xd34   :  { %v2726_v60 = vpop.f32.mrf.mxu0 }
 0xd35   :  { %v7163_v62 = vpack.i.bf16 %v2726_v60, %v2283_v44 }
 0xd36   :  { %v6702_v42 = vpop.f32.mrf.mxu0 }
 0xd37   :  { %7164 = vrot.lane.b32.xlu1 %v7163_v62, %s8205_s1 }
 0xd38   :  { %v2729_v63 = vpop.f32.mrf.mxu0 }
 0xd3a   :  { %v6703_v0 = vpop.f32.mrf.mxu0 }
 0xd3c   :  { %v2834_v3 = vpop.f32.mrf.mxu0 }
 0xd3d   :  { %v7168_v6 = vpack.i.bf16 %v2834_v3, %v2391_v48 }
 0xd3e   :  { %v6714_v7 = vpop.f32.mrf.mxu0 }
 0xd3f   :  { %7169 = vrot.lane.b32.xlu1 %v7168_v6, %s8206_s13  ;;  %v6172_v6 = vld [vmem:[#allocation26] ss:$0 sm:$0xff] }
 0xd40   :  { %v2837_v8 = vpop.f32.mrf.mxu0 }
 0xd42   :  { %v6715_v9 = vpop.f32.mrf.mxu0 }
 0xd44   :  { %v2942_v10 = vpop.f32.mrf.mxu0 }
 0xd45   :  { %v7173_v4 = vpack.i.bf16 %v2942_v10, %v2499_v52  ;;  %v6173_v10 = vld [vmem:[#allocation27] ss:$0 sm:$0xff] }
 0xd46   :  { %v6726_v11 = vpop.f32.mrf.mxu0 }
 0xd47   :  { %7174 = vrot.lane.b32.xlu1 %v7173_v4, %s8207_s7 }
 0xd48   :  { %v2945_v12 = vpop.f32.mrf.mxu0 }
 0xd4a   :  { %v6727_v13 = vpop.f32.mrf.mxu0 }
 0xda9   :  { %v7165_v14 = vpop.permute.xlu1 %7164 }
 0xdaa   :  { %v7167_v15 = vunpack.i.h.bf16 %v7165_v14  ;;  %v7166_v16 = vunpack.i.l.bf16 %v7165_v14  ;;  %v7233_v14 = vld [vmem:[%s9466_s5 + $0x10] sm:$0xff]  }
 0xdac   :  { %v2960_v21 = vsel %vm827_vm2, %v2616_v56, %v7167_v15  ;;  %v2517_v23 = vsel %vm827_vm2, %v8920_v31, %v7166_v16  ;;  %v7229_v56 = vld [vmem:[%s9466_s5 + $0x30] sm:$0xff]   ;;  %v7235_v15 = vld [vmem:[%s9466_s5] sm:$0xff]  }
 0xdad   :  { %v6174_v16 = vld [vmem:[#allocation20] ss:$0 sm:$0xff] }
 0xdb1   :  { %v7170_v5 = vpop.permute.xlu1 %7169 }
 0xdb2   :  { %v7172_v17 = vunpack.i.h.bf16 %v7170_v5  ;;  %v7171_v18 = vunpack.i.l.bf16 %v7170_v5  ;;  %v7234_v5 = vld [vmem:[%s9466_s5 + $0x8] sm:$0xff]  }
 0xdb4   :  { %v2518_v25 = vsel %vm1279_vm4, %v2517_v23, %v7171_v18  ;;  %v2961_v26 = vsel %vm1279_vm4, %v2960_v21, %v7172_v17 }
 0xdb9   :  { %v7175_v20 = vpop.permute.xlu1 %7174 }
 0xdba   :  { %v7177_v37 = vunpack.i.h.bf16 %v7175_v20  ;;  %v7176_v24 = vunpack.i.l.bf16 %v7175_v20 }
 0xdbc   :  { %v2519_v27 = vsel %vm1281_vm5, %v2518_v25, %v7176_v24  ;;  %v2962_v28 = vsel %vm1281_vm5, %v2961_v26, %v7177_v37 }
 0xdbd   :  { %v2963_v29 = vpack.c.bf16 %v2962_v28, %v2519_v27  ;;  %v6178_v27 = vld [vmem:[#allocation21] ss:$0 sm:$0xff] }
 0xdbf   :  { %6733 = vmatmul.mubr.msk.bf16.vlgmr.msra.gmra.mxu1 %vm649_vm1, %v2963_v29 }
 0xdc0   :  { %6760 = vmatprep.mubr.msk.bf16.mxu1 %vm8201_vm0, %v8200_v1  ;;  %6745 = vmatpush3.bf16.msra.mxu1 %v7228_v55 }
 0xdc1   :  { %6746 = vmatprep.subr.bf16.mxu1 %v8200_v1 }
 0xdc4   :  { %6747 = vmatpush3.bf16.msra.mxu1 %v7229_v56 }
 0xdc5   :  { %6748 = vmatprep.subr.bf16.mxu1 %v8200_v1 }
 0xdc8   :  { %6749 = vmatpush3.bf16.msra.mxu1 %v7230_v57 }
 0xdc9   :  { %6750 = vmatprep.subr.bf16.mxu1 %v8200_v1 }
 0xdcc   :  { %6751 = vmatpush3.bf16.msra.mxu1 %v7231_v58 }
 0xdcd   :  { %6752 = vmatprep.subr.bf16.mxu1 %v8200_v1 }
 0xdd0   :  { %6753 = vmatpush3.bf16.msra.mxu1 %v7232_v59 }
 0xdd1   :  { %6754 = vmatprep.subr.bf16.mxu1 %v8200_v1 }
 0xdd4   :  { %6755 = vmatpush3.bf16.msra.mxu1 %v7233_v14 }
 0xdd5   :  { %6756 = vmatprep.subr.bf16.mxu1 %v8200_v1 }
 0xdd8   :  { %6757 = vmatpush3.bf16.msra.mxu1 %v7234_v5 }
 0xdd9   :  { %6758 = vmatprep.subr.bf16.mxu1 %v8200_v1 }
 0xddc   :  { %6759 = vmatpush3.bf16.msra.mxu1 %v7235_v15 }
 0xddd   :  { %6794 = vmatprep.subr.bf16.mxu1 %v8200_v1 }
 0xe7f   :  { %v3024_v39 = vpop.f32.mrf.mxu1 }
 0xe80   :  { %v3025_v32 = vadd.f32 %v6168_v30, %v3024_v39 }
 0xe81   :  { %v6734_v31 = vpop.f32.mrf.mxu1 }
 0xe82   :  { %v3031_v33 = vadd.f32 %v3025_v32, %v8776_v38 }
 0xe83   :  { %v3027_v34 = vpop.f32.mrf.mxu1 }
 0xe84   :  { %v3028_v35 = vadd.f32 %v6168_v30, %v3027_v34  ;;  %v3033_v36 = vsel %vm649_vm1, %v3031_v33, 0.0 }
 0xe85   :  { %3034 = vadd.xlane.f32.xlu0 %v3033_v36  ;;  %v6735_v41 = vpop.f32.mrf.mxu1 }
 0xe86   :  { %v3032_v43 = vadd.f32 %v3028_v35, %v8778_v40 }
 0xe88   :  { %v3036_v44 = vsel %vm649_vm1, %v3032_v43, 0.0 }
 0xe89   :  { %3037 = vadd.xlane.f32.xlu1 %v3036_v44 }
 0xf0e   :  { %v3035_v45 = vpop.xlane.xlu0 %3034 }
 0xf0f   :  { %v3039_v46 = vmul.f32 0.03125, %v3035_v45 }
 0xf11   :  { %v3041_v47 = vsub.f32 %v3031_v33, %v3039_v46 }
 0xf12   :  { %v3038_v48 = vpop.xlane.xlu1 %3037 }
 0xf13   :  { %v3040_v49 = vmul.f32 0.03125, %v3038_v48  ;;  %v3043_v38 = vmul.f32 %v3041_v47, %v3041_v47 }
 0xf15   :  { %v3042_v50 = vsub.f32 %v3032_v43, %v3040_v49  ;;  %v3045_v51 = vsel %vm649_vm1, %v3043_v38, 0.0 }
 0xf16   :  { %3046 = vadd.xlane.f32.xlu0 %v3045_v51  ;;  %v7236_v51 = vld [vmem:[%s9467_s30 + $0x8] sm:$0xff]  }
 0xf17   :  { %v3044_v52 = vmul.f32 %v3042_v50, %v3042_v50 }
 0xf19   :  { %v3048_v40 = vsel %vm649_vm1, %v3044_v52, 0.0  ;;  %v7237_v52 = vld [vmem:[%s9467_s30] sm:$0xff]  }
 0xf1a   :  { %3049 = vadd.xlane.f32.xlu0 %v3048_v40 }
 0xf9f   :  { %v3047_v60 = vpop.xlane.xlu0 %3046 }
 0xfa0   :  { %v3051_v61 = vmul.f32 0.03125, %v3047_v60  ;;  %v6187_v60 = vld [vmem:[#allocation29] ss:$0 sm:$0xff] }
 0xfa2   :  { %v3053_v62 = vadd.f32 1e-05, %v3051_v61 }
 0xfa3   :  { %v3050_v42 = vpop.xlane.xlu0 %3049 }
 0xfa4   :  { %7330 = vrsqrt.f32 %v3053_v62  ;;  %v3052_v63 = vmul.f32 0.03125, %v3050_v42 }
 0xfa6   :  { %v3054_v0 = vadd.f32 1e-05, %v3052_v63  ;;  %v6188_v63 = vld [vmem:[#allocation30] ss:$0 sm:$0xff] }
 0xfa8   :  { %7332 = vrsqrt.f32 %v3054_v0 }
 0xfb1   :  { %v7331_v2 = vpop.eup %7330 }
 0xfb2   :  { %v3057_v3 = vmul.f32 %v7331_v2, %v3041_v47 }
 0xfb4   :  { %v3066_v9 = vmul.f32 %v6172_v6, %v3057_v3 }
 0xfb5   :  { %v7333_v7 = vpop.eup %7332 }
 0xfb6   :  { %v3058_v8 = vmul.f32 %v7333_v7, %v3042_v50  ;;  %v3075_v11 = vadd.f32 %v6173_v10, %v3066_v9  ;;  %v7240_v9 = vld [vmem:[#allocation36 + $0x8] sm:$0xff]  }
 0xfb8   :  { %v3067_v4 = vmul.f32 %v6172_v6, %v3058_v8  ;;  %v7238_v6 = vld [vmem:[#allocation33 + $0x8] sm:$0xff]   ;;  %v7239_v8 = vld [vmem:[#allocation33] sm:$0xff]  }
 0xfba   :  { %v3076_v12 = vadd.f32 %v6173_v10, %v3067_v4  ;;  %v7241_v10 = vld [vmem:[#allocation36] sm:$0xff]   ;;  %v6189_v4 = vld [vmem:[#allocation32] ss:$0 sm:$0xff] }
 0xfbc   :  { %v3077_v13 = vpack.c.bf16 %v3076_v12, %v3075_v11 }
 0xfbe   :  { %6741 = vmatmul.mubr.msk.bf16.vlgmr.msra.gmra.mxu0 %vm649_vm1, %v3077_v13 }
 0xfbf   :  { %6768 = vmatprep.mubr.msk.bf16.mxu0 %vm8201_vm0, %v8200_v1  ;;  %6765 = vmatpush3.bf16.msra.mxu0 %v7236_v51 }
 0xfc0   :  { %6766 = vmatprep.subr.bf16.mxu0 %v8200_v1 }
 0xfc3   :  { %6767 = vmatpush3.bf16.msra.mxu0 %v7237_v52 }
 0xfc4   :  { %6772 = vmatprep.subr.bf16.mxu0 %v8200_v1 }
0x107e   :  { %v3138_v17 = vpop.f32.mrf.mxu0 }
0x107f   :  { %v3139_v20 = vadd.f32 %v6174_v16, %v3138_v17 }
0x1080   :  { %v6742_v18 = vpop.f32.mrf.mxu0 }
0x1081   :  { %v3145_v24 = vmax.f32 %v3139_v20, 0.0 }
0x1082   :  { %v3141_v21 = vpop.f32.mrf.mxu0 }
0x1083   :  { %v3142_v23 = vadd.f32 %v6174_v16, %v3141_v21  ;;  %v6193_v21 = vld [vmem:[#allocation35] ss:$0 sm:$0xff] }
0x1084   :  { %v6743_v37 = vpop.f32.mrf.mxu0 }
0x1085   :  { %v3146_v25 = vmax.f32 %v3142_v23, 0.0 }
0x1087   :  { %v3147_v26 = vpack.c.bf16 %v3146_v25, %v3145_v24 }
0x1089   :  { %6761 = vmatmul.mubr.bf16.vlgmr.msra.gmra.mxu1 %v3147_v26 }
0x108a   :  { %6796 = vmatprep.mubr.msk.bf16.mxu1 %vm8201_vm0, %v8200_v1 }
0x1149   :  { %v3253_v28 = vpop.f32.mrf.mxu1 }
0x114a   :  { %v3254_v29 = vadd.f32 %v6178_v27, %v3253_v28 }
0x114b   :  { %v6762_v30 = vpop.f32.mrf.mxu1 }
0x114c   :  { %v3260_v39 = vadd.f32 %v3254_v29, %v3075_v11  ;;  %v6197_v30 = vld [vmem:[#allocation38] ss:$0 sm:$0xff] }
0x114d   :  { %v3256_v32 = vpop.f32.mrf.mxu1 }
0x114e   :  { %v3257_v31 = vadd.f32 %v6178_v27, %v3256_v32  ;;  %v3262_v33 = vsel %vm649_vm1, %v3260_v39, 0.0 }
0x114f   :  { %3263 = vadd.xlane.f32.xlu1 %v3262_v33  ;;  %v6763_v34 = vpop.f32.mrf.mxu1 }
0x1150   :  { %v3261_v35 = vadd.f32 %v3257_v31, %v3076_v12 }
0x1152   :  { %v3265_v36 = vsel %vm649_vm1, %v3261_v35, 0.0 }
0x1153   :  { %3266 = vadd.xlane.f32.xlu0 %v3265_v36 }
0x11d8   :  { %v3264_v41 = vpop.xlane.xlu1 %3263 }
0x11d9   :  { %v3268_v43 = vmul.f32 0.03125, %v3264_v41 }
0x11db   :  { %v3270_v44 = vsub.f32 %v3260_v39, %v3268_v43 }
0x11dc   :  { %v3267_v45 = vpop.xlane.xlu0 %3266 }
0x11dd   :  { %v3269_v46 = vmul.f32 0.03125, %v3267_v45  ;;  %v3272_v47 = vmul.f32 %v3270_v44, %v3270_v44 }
0x11df   :  { %v3271_v48 = vsub.f32 %v3261_v35, %v3269_v46  ;;  %v3274_v49 = vsel %vm649_vm1, %v3272_v47, 0.0 }
0x11e0   :  { %3275 = vadd.xlane.f32.xlu1 %v3274_v49 }
0x11e1   :  { %v3273_v38 = vmul.f32 %v3271_v48, %v3271_v48 }
0x11e3   :  { %v3277_v50 = vsel %vm649_vm1, %v3273_v38, 0.0 }
0x11e4   :  { %3278 = vadd.xlane.f32.xlu0 %v3277_v50 }
0x1269   :  { %v3276_v40 = vpop.xlane.xlu1 %3275 }
0x126a   :  { %v3280_v53 = vmul.f32 0.03125, %v3276_v40 }
0x126c   :  { %v3282_v54 = vadd.f32 1e-05, %v3280_v53 }
0x126d   :  { %v3279_v55 = vpop.xlane.xlu0 %3278 }
0x126e   :  { %7334 = vrsqrt.f32 %v3282_v54  ;;  %v3281_v56 = vmul.f32 0.03125, %v3279_v55 }
0x1270   :  { %v3283_v57 = vadd.f32 1e-05, %v3281_v56 }
0x1272   :  { %7336 = vrsqrt.f32 %v3283_v57 }
0x127b   :  { %v7335_v58 = vpop.eup %7334 }
0x127c   :  { %v3286_v59 = vmul.f32 %v7335_v58, %v3270_v44 }
0x127e   :  { %v3295_v42 = vmul.f32 %v6187_v60, %v3286_v59 }
0x127f   :  { %v7337_v61 = vpop.eup %7336 }
0x1280   :  { %v3287_v62 = vmul.f32 %v7337_v61, %v3271_v48  ;;  %v8984_v2 = vadd.f32 %v6188_v63, %v3295_v42 }
0x1282   :  { %v3296_v0 = vmul.f32 %v6187_v60, %v3287_v62 }
0x1284   :  { %v8986_v3 = vadd.f32 %v6188_v63, %v3296_v0 }
0x1286   :  { %v3306_v7 = vpack.c.bf16 %v8986_v3, %v8984_v2 }
0x1288   :  { %6769 = vmatmul.mubr.msk.bf16.vlgmr.msra.gmra.mxu0 %vm649_vm1, %v3306_v7 }
0x1289   :  { %6773 = vmatpush3.bf16.msra.mxu0 %v7238_v6  ;;  %6776 = vmatprep.mubr.msk.bf16.mxu0 %vm8201_vm0, %v8200_v1 }
0x128a   :  { %6774 = vmatprep.subr.bf16.mxu0 %v8200_v1 }
0x128d   :  { %6775 = vmatpush3.bf16.msra.mxu0 %v7239_v8 }
0x128e   :  { %6780 = vmatprep.subr.bf16.mxu0 %v8200_v1 }
0x1290   :  { %6777 = vmatmul.mubr.msk.bf16.vlgmr.msra.gmra.mxu0 %vm649_vm1, %v3306_v7 }
0x1291   :  { %6781 = vmatpush3.bf16.msra.mxu0 %v7240_v9  ;;  %6784 = vmatprep.mubr.msk.bf16.mxu0 %vm8201_vm0, %v8200_v1 }
0x1292   :  { %6782 = vmatprep.subr.bf16.mxu0 %v8200_v1 }
0x1295   :  { %6783 = vmatpush3.bf16.msra.mxu0 %v7241_v10 }
0x1296   :  { %6788 = vmatprep.subr.bf16.mxu0 %v8200_v1 }
0x1298   :  { %6785 = vmatmul.mubr.msk.bf16.vlgmr.msra.gmra.mxu0 %vm649_vm1, %v3306_v7 }
0x1299   :  { %6790 = vmatprep.mubr.msk.bf16.mxu0 %vm8201_vm0, %v8200_v1 }
0x1348   :  { %v3367_v11 = vpop.f32.mrf.mxu0 }
0x1349   :  { %v3368_v13 = vadd.f32 %v6189_v4, %v3367_v11 }
0x134a   :  { %v6770_v12 = vpop.f32.mrf.mxu0 }
0x134b   :  { %v3374_v16 = vmul.f32 0.35355338, %v3368_v13 }
0x134c   :  { %v3370_v14 = vpop.f32.mrf.mxu0 }
0x134d   :  { %v3371_v5 = vadd.f32 %v6189_v4, %v3370_v14 }
0x134e   :  { %v6771_v15 = vpop.f32.mrf.mxu0 }
0x134f   :  { %v3375_v17 = vmul.f32 0.35355338, %v3371_v5 }
0x1350   :  { %v3433_v18 = vpop.f32.mrf.mxu0 }
0x1351   :  { %v3504_v20 = vpack.c.bf16 %v3375_v17, %v3374_v16  ;;  %v3434_v24 = vadd.f32 %v6193_v21, %v3433_v18 }
0x1352   :  { %v6778_v23 = vpop.f32.mrf.mxu0 }
0x1353   :  { %3612 = vrot.lane.b32.xlu0 %v3504_v20, %s8203_s17  ;;  %v3959_v43 = vrot.slane %v3504_v20, 4 }
0x1354   :  { %v3436_v37 = vpop.f32.mrf.mxu0 }
0x1355   :  { %v3437_v25 = vadd.f32 %v6193_v21, %v3436_v37 }
0x1356   :  { %v6779_v26 = vpop.f32.mrf.mxu0 }
0x1357   :  { %v3505_v27 = vpack.c.bf16 %v3437_v25, %v3434_v24 }
0x1358   :  { %v3497_v28 = vpop.f32.mrf.mxu0 }
0x1359   :  { %3836 = vrot.lane.b32.xlu0 %v3505_v27, %s8204_s9  ;;  %3615 = vrot.lane.b32.xlu1 %v3505_v27, %s8203_s17  ;;  %v3511_v29 = vsel %vm827_vm2, %v3505_v27, 0  ;;  %v3960_v32 = vrot.slane %v3505_v27, 4  ;;  %v3498_v33 = vadd.f32 %v6197_v30, %v3497_v28 }
0x135a   :  { %v6786_v39 = vpop.f32.mrf.mxu0  ;;  %6789 = vmatpush3.bf16.xpose.msra.mxu0 %v3511_v29 }
0x135b   :  { %6800 = vmatprep.subr.bf16.mxu0 %v8200_v1  ;;  %v3965_v52 = vsel %vm827_vm2, %v3960_v32, 0 }
0x135c   :  { %v3500_v31 = vpop.f32.mrf.mxu0 }
0x135d   :  { %v3501_v34 = vadd.f32 %v6197_v30, %v3500_v31  ;;  %3726 = vrot.lane.b32.xlu1 %v3505_v27, %s8202_s14  ;;  %4068 = vrot.lane.b32.xlu0 %v3960_v32, %s8203_s17 }
0x135e   :  { %v6787_v35 = vpop.f32.mrf.mxu0 }
0x135f   :  { %v9010_v36 = vpack.c.bf16 %v3501_v34, %v3498_v33 }
0x1361   :  { %3724 = vrot.lane.b32.xlu1 %v3504_v20, %s8202_s14  ;;  %4178 = vrot.lane.b32.xlu0 %v3960_v32, %s8202_s14  ;;  %v3569_v41 = vsel %vm889_vm3, %v9010_v36, 0 }
0x1362   :  { %6791 = vmatmul.mubr.msk.bf16.vlgmr.msra.gmra.mxu0 %vm827_vm2, %v3504_v20  ;;  %6795 = vmatpush3.bf16.msra.mxu1 %v3569_v41 }
0x1363   :  { %6802 = vmatprep.mubr.msk.bf16.mxu0 %vm8201_vm0, %v8200_v1  ;;  %6806 = vmatprep.subr.bf16.mxu1 %v8200_v1 }
0x1365   :  { %3834 = vrot.lane.b32.xlu1 %v3504_v20, %s8204_s9  ;;  %4288 = vrot.lane.b32.xlu0 %v3960_v32, %s8204_s9 }
0x1369   :  { %4066 = vrot.lane.b32.xlu1 %v3959_v43, %s8203_s17 }
0x136d   :  { %4176 = vrot.lane.b32.xlu1 %v3959_v43, %s8202_s14 }
0x1371   :  { %4286 = vrot.lane.b32.xlu1 %v3959_v43, %s8204_s9 }
0x13c5   :  { %v3613_v47 = vpop.permute.xlu0 %3612 }
0x13cb   :  { %v3616_v44 = vpop.permute.xlu1 %3615  ;;  %v3837_v49 = vpop.permute.xlu0 %3836 }
0x13cc   :  { %v3621_v45 = vsel %vm827_vm2, %v3616_v44, 0  ;;  %v3842_v50 = vsel %vm827_vm2, %v3837_v49, 0 }
0x13cd   :  { %6801 = vmatpush3.bf16.xpose.msra.mxu0 %v3621_v45 }
0x13ce   :  { %6812 = vmatprep.subr.bf16.mxu0 %v8200_v1 }
0x13cf   :  { %v3727_v46 = vpop.permute.xlu1 %3726  ;;  %v4069_v40 = vpop.permute.xlu0 %4068 }
0x13d0   :  { %v3732_v48 = vsel %vm827_vm2, %v3727_v46, 0  ;;  %v4074_v53 = vsel %vm827_vm2, %v4069_v40, 0 }
0x13d3   :  { %v3725_v38 = vpop.permute.xlu1 %3724  ;;  %v4179_v54 = vpop.permute.xlu0 %4178 }
0x13d4   :  { %6803 = vmatmul.mubr.msk.bf16.vlgmr.msra.gmra.mxu0 %vm827_vm2, %v3613_v47  ;;  %v4184_v56 = vsel %vm827_vm2, %v4179_v54, 0 }
0x13d5   :  { %6813 = vmatpush3.bf16.xpose.msra.mxu0 %v3732_v48  ;;  %6814 = vmatprep.mubr.msk.bf16.mxu0 %vm8201_vm0, %v8200_v1 }
0x13d6   :  { %6824 = vmatprep.subr.bf16.mxu0 %v8200_v1 }
0x13d7   :  { %v3835_v51 = vpop.permute.xlu1 %3834  ;;  %v4289_v57 = vpop.permute.xlu0 %4288 }
0x13d8   :  { %v4294_v59 = vsel %vm827_vm2, %v4289_v57, 0 }
0x13db   :  { %v4067_v55 = vpop.permute.xlu1 %4066 }
0x13dc   :  { %6815 = vmatmul.mubr.msk.bf16.vlgmr.msra.gmra.mxu0 %vm827_vm2, %v3725_v38 }
0x13dd   :  { %6825 = vmatpush3.bf16.xpose.msra.mxu0 %v3842_v50  ;;  %6826 = vmatprep.mubr.msk.bf16.mxu0 %vm8201_vm0, %v8200_v1 }
0x13de   :  { %6836 = vmatprep.subr.bf16.mxu0 %v8200_v1 }
0x13df   :  { %v4177_v58 = vpop.permute.xlu1 %4176 }
0x13e3   :  { %v4287_v60 = vpop.permute.xlu1 %4286 }
0x13e4   :  { %6827 = vmatmul.mubr.msk.bf16.vlgmr.msra.gmra.mxu0 %vm827_vm2, %v3835_v51 }
0x13e5   :  { %6837 = vmatpush3.bf16.xpose.msra.mxu0 %v3965_v52  ;;  %6838 = vmatprep.mubr.msk.bf16.mxu0 %vm8201_vm0, %v8200_v1 }
0x13e6   :  { %6848 = vmatprep.subr.bf16.mxu0 %v8200_v1 }
0x13ec   :  { %6839 = vmatmul.mubr.msk.bf16.vlgmr.msra.gmra.mxu0 %vm827_vm2, %v3959_v43 }
0x13ed   :  { %6849 = vmatpush3.bf16.xpose.msra.mxu0 %v4074_v53  ;;  %6850 = vmatprep.mubr.msk.bf16.mxu0 %vm8201_vm0, %v8200_v1 }
0x13ee   :  { %6860 = vmatprep.subr.bf16.mxu0 %v8200_v1 }
0x13f4   :  { %6851 = vmatmul.mubr.msk.bf16.vlgmr.msra.gmra.mxu0 %vm827_vm2, %v4067_v55 }
0x13f5   :  { %6861 = vmatpush3.bf16.xpose.msra.mxu0 %v4184_v56  ;;  %6862 = vmatprep.mubr.msk.bf16.mxu0 %vm8201_vm0, %v8200_v1 }
0x13f6   :  { %6872 = vmatprep.subr.bf16.mxu0 %v8200_v1 }
0x13fc   :  { %6863 = vmatmul.mubr.msk.bf16.vlgmr.msra.gmra.mxu0 %vm827_vm2, %v4177_v58 }
0x13fd   :  { %6873 = vmatpush3.bf16.xpose.msra.mxu0 %v4294_v59  ;;  %6874 = vmatprep.mubr.msk.bf16.mxu0 %vm8201_vm0, %v8200_v1 }
0x13fe   :  { %6884 = vmatprep.subr.bf16.mxu0 %v8200_v1 }
0x1404   :  { %6875 = vmatmul.mubr.msk.bf16.vlgmr.msra.gmra.mxu0 %vm827_vm2, %v4287_v60 }
0x1405   :  { %6888 = vmatprep.mubr.msk.bf16.mxu0 %vm8201_vm0, %v8200_v1 }
0x1422   :  { %v3547_v61 = vpop.f32.mrf.mxu0 }
0x1423   :  { %v3553_v62 = vsel %vm827_vm2, %v3547_v61, -inf }
0x1424   :  { %3554 = vmax.xlane.f32.xlu0 %v3553_v62  ;;  %v6792_v42 = vpop.f32.mrf.mxu0 }
0x1426   :  { %v3550_v63 = vpop.f32.mrf.mxu0 }
0x1428   :  { %v6793_v0 = vpop.f32.mrf.mxu0 }
0x1494   :  { %v3657_v6 = vpop.f32.mrf.mxu0 }
0x1495   :  { %v3663_v7 = vsel %vm827_vm2, %v3657_v6, -inf }
0x1496   :  { %3664 = vmax.xlane.f32.xlu1 %v3663_v7  ;;  %v6804_v8 = vpop.f32.mrf.mxu0 }
0x1498   :  { %v3660_v9 = vpop.f32.mrf.mxu0 }
0x149a   :  { %v6805_v10 = vpop.f32.mrf.mxu0 }
0x149c   :  { %v3768_v4 = vpop.f32.mrf.mxu0 }
0x149d   :  { %v3774_v11 = vsel %vm827_vm2, %v3768_v4, -inf }
0x149e   :  { %3775 = vmax.xlane.f32.xlu0 %v3774_v11  ;;  %v6816_v12 = vpop.f32.mrf.mxu0 }
0x14a0   :  { %v3771_v13 = vpop.f32.mrf.mxu0 }
0x14a2   :  { %v6817_v14 = vpop.f32.mrf.mxu0 }
0x14a4   :  { %v3878_v5 = vpop.f32.mrf.mxu0 }
0x14a5   :  { %v3884_v15 = vsel %vm827_vm2, %v3878_v5, -inf }
0x14a6   :  { %3885 = vmax.xlane.f32.xlu0 %v3884_v15  ;;  %v6828_v16 = vpop.f32.mrf.mxu0 }
0x14a8   :  { %v3881_v17 = vpop.f32.mrf.mxu0 }
0x14aa   :  { %v6829_v18 = vpop.f32.mrf.mxu0 }
0x14ac   :  { %v9064_v20 = vpop.f32.mrf.mxu0 }
0x14ad   :  { %v3555_v21 = vpop.xlane.xlu0 %3554  ;;  %v4007_v23 = vsel %vm827_vm2, %v9064_v20, -inf }
0x14ae   :  { %v3556_v37 = vsub.f32 %v3547_v61, %v3555_v21  ;;  %4008 = vmax.xlane.f32.xlu1 %v4007_v23  ;;  %v6840_v24 = vpop.f32.mrf.mxu0 }
0x14b0   :  { %v3557_v25 = vmul.f32 1.442695, %v3556_v37  ;;  %v4004_v26 = vpop.f32.mrf.mxu0 }
0x14b1   :  { %v4019_v26 = vrot.slane %v9010_v36, 4 }
0x14b2   :  { %7338 = vpow2.f32 %v3557_v25  ;;  %v6841_v27 = vpop.f32.mrf.mxu0 }
0x14b4   :  { %v4110_v28 = vpop.f32.mrf.mxu0 }
0x14b5   :  { %v4116_v29 = vsel %vm827_vm2, %v4110_v28, -inf }
0x14b6   :  { %4117 = vmax.xlane.f32.xlu0 %v4116_v29  ;;  %v6852_v30 = vpop.f32.mrf.mxu0 }
0x14b8   :  { %v4113_v39 = vpop.f32.mrf.mxu0 }
0x14ba   :  { %v6853_v32 = vpop.f32.mrf.mxu0 }
0x14bc   :  { %v4220_v31 = vpop.f32.mrf.mxu0 }
0x14bd   :  { %v4226_v33 = vsel %vm827_vm2, %v4220_v31, -inf }
0x14be   :  { %4227 = vmax.xlane.f32.xlu1 %v4226_v33  ;;  %v6864_v34 = vpop.f32.mrf.mxu0 }
0x14bf   :  { %v7339_v35 = vpop.eup %7338 }
0x14c0   :  { %v4223_v41 = vpop.f32.mrf.mxu0  ;;  %v3559_v43 = vsel %vm827_vm2, %v7339_v35, 0.0 }
0x14c2   :  { %3560 = vadd.xlane.f32.xlu1 %v3559_v43  ;;  %v6865_v44 = vpop.f32.mrf.mxu0 }
0x14c4   :  { %v4330_v45 = vpop.f32.mrf.mxu0 }
0x14c5   :  { %v4336_v46 = vsel %vm827_vm2, %v4330_v45, -inf }
0x14c6   :  { %4337 = vmax.xlane.f32.xlu0 %v4336_v46  ;;  %v6876_v47 = vpop.f32.mrf.mxu0 }
0x14c8   :  { %v4333_v48 = vpop.f32.mrf.mxu0 }
0x14ca   :  { %v6877_v49 = vpop.f32.mrf.mxu0 }
0x14cb   :  { %v4024_v49 = vsel %vm889_vm3, %v4019_v26, 0 }
0x151f   :  { %v3665_v38 = vpop.xlane.xlu1 %3664 }
0x1520   :  { %v3666_v50 = vsub.f32 %v3657_v6, %v3665_v38 }
0x1522   :  { %v3667_v51 = vmul.f32 1.442695, %v3666_v50 }
0x1524   :  { %7340 = vpow2.f32 %v3667_v51 }
0x1527   :  { %v3776_v52 = vpop.xlane.xlu0 %3775 }
0x1528   :  { %v3777_v40 = vsub.f32 %v3768_v4, %v3776_v52 }
0x152a   :  { %v3778_v53 = vmul.f32 1.442695, %v3777_v40 }
0x152c   :  { %7342 = vpow2.f32 %v3778_v53 }
0x152f   :  { %v3886_v54 = vpop.xlane.xlu0 %3885 }
0x1530   :  { %v3887_v55 = vsub.f32 %v3878_v5, %v3886_v54 }
0x1531   :  { %v7341_v56 = vpop.eup %7340 }
0x1532   :  { %v3888_v57 = vmul.f32 1.442695, %v3887_v55  ;;  %v3669_v58 = vsel %vm827_vm2, %v7341_v56, 0.0 }
0x1533   :  { %3670 = vadd.xlane.f32.xlu0 %v3669_v58 }
0x1534   :  { %7344 = vpow2.f32 %v3888_v57 }
0x1537   :  { %v4009_v42 = vpop.xlane.xlu1 %4008 }
0x1538   :  { %v4010_v7 = vsub.f32 %v9064_v20, %v4009_v42 }
0x1539   :  { %v9073_v59 = vpop.eup %7342 }
0x153a   :  { %v3780_v60 = vsel %vm827_vm2, %v9073_v59, 0.0  ;;  %v4011_v11 = vmul.f32 1.442695, %v4010_v7 }
0x153b   :  { %3781 = vadd.xlane.f32.xlu1 %v3780_v60 }
0x153f   :  { %v4118_v8 = vpop.xlane.xlu0 %4117 }
0x1540   :  { %v4119_v4 = vsub.f32 %v4110_v28, %v4118_v8 }
0x1541   :  { %v9077_v61 = vpop.eup %7344 }
0x1542   :  { %v3890_v62 = vsel %vm827_vm2, %v9077_v61, 0.0  ;;  %v4120_v14 = vmul.f32 1.442695, %v4119_v4 }
0x1543   :  { %3891 = vadd.xlane.f32.xlu0 %v3890_v62 }
0x1547   :  { %v4228_v63 = vpop.xlane.xlu1 %4227 }
0x1548   :  { %v4229_v12 = vsub.f32 %v4220_v31, %v4228_v63 }
0x154a   :  { %v4230_v5 = vmul.f32 1.442695, %v4229_v12 }
0x154b   :  { %v3561_v0 = vpop.xlane.xlu1 %3560 }
0x154c   :  { %3786 = vrot.lane.b32.xlu1 %v9010_v36, %s8202_s14  ;;  %7346 = vrcp.f32 %v3561_v0 }
0x154d   :  { %7348 = vpow2.f32 %v4011_v11 }
0x154e   :  { %7350 = vpow2.f32 %v4120_v14 }
0x154f   :  { %v4338_v13 = vpop.xlane.xlu0 %4337  ;;  %7352 = vpow2.f32 %v4230_v5 }
0x1550   :  { %3896 = vrot.lane.b32.xlu1 %v9010_v36, %s8204_s9  ;;  %v4339_v15 = vsub.f32 %v4330_v45, %v4338_v13 }
0x1552   :  { %v4340_v16 = vmul.f32 1.442695, %v4339_v15 }
0x1554   :  { %7354 = vpow2.f32 %v4340_v16 }
0x1559   :  { %3676 = vrot.lane.b32.xlu0 %v9010_v36, %s8203_s17  ;;  %v7347_v6 = vpop.eup %7346 }
0x155a   :  { %v3563_v9 = vmul.f32 %v7347_v6, %v7339_v35  ;;  %v7349_v17 = vpop.eup %7348 }
0x155b   :  { %v9091_v18 = vpop.eup %7350  ;;  %v4013_v20 = vsel %vm827_vm2, %v7349_v17, 0.0 }
0x155c   :  { %v3564_v10 = vpack.c.bf16 %v3563_v9, %v3563_v9  ;;  %v9094_v21 = vpop.eup %7352  ;;  %v4122_v23 = vsel %vm827_vm2, %v9091_v18, 0.0 }
0x155d   :  { %v4232_v37 = vsel %vm827_vm2, %v9094_v21, 0.0 }
0x155e   :  { %6797 = vmatmul.mubr.msk.bf16.vlgmr.msra.gmra.mxu1 %vm827_vm2, %v3564_v10 }
0x155f   :  { %6808 = vmatprep.mubr.msk.bf16.mxu1 %vm8201_vm0, %v8200_v1 }
0x1561   :  { %v9100_v24 = vpop.eup %7354 }
0x1562   :  { %v4342_v25 = vsel %vm827_vm2, %v9100_v24, 0.0 }
0x1574   :  { %4014 = vadd.xlane.f32.xlu1 %v4013_v20 }
0x1578   :  { %4123 = vadd.xlane.f32.xlu1 %v4122_v23  ;;  %4233 = vadd.xlane.f32.xlu0 %v4232_v37 }
0x157c   :  { %4343 = vadd.xlane.f32.xlu1 %v4342_v25 }
0x158d   :  { %4238 = vrot.lane.b32.xlu1 %v4019_v26, %s8202_s14 }
0x158e   :  { %4128 = vrot.lane.b32.xlu0 %v4019_v26, %s8203_s17 }
0x1592   :  { %4348 = vrot.lane.b32.xlu0 %v4019_v26, %s8204_s9 }
0x15bc   :  { %v3671_v27 = vpop.xlane.xlu0 %3670 }
0x15bd   :  { %7356 = vrcp.f32 %v3671_v27 }
0x15c4   :  { %v3782_v28 = vpop.xlane.xlu1 %3781 }
0x15c5   :  { %7358 = vrcp.f32 %v3782_v28 }
0x15c8   :  { %v3787_v33 = vpop.permute.xlu1 %3786 }
0x15c9   :  { %v3792_v35 = vsel %vm889_vm3, %v3787_v33, 0 }
0x15ca   :  { %v7357_v29 = vpop.eup %7356 }
0x15cb   :  { %v3673_v39 = vmul.f32 %v7357_v29, %v7341_v56 }
0x15cc   :  { %v3892_v30 = vpop.xlane.xlu0 %3891  ;;  %v3897_v43 = vpop.permute.xlu1 %3896 }
0x15cd   :  { %7360 = vrcp.f32 %v3892_v30  ;;  %v3674_v36 = vpack.c.bf16 %v3673_v39, %v3673_v39  ;;  %v3902_v46 = vsel %vm889_vm3, %v3897_v43, 0  ;;  %v7242_v30 = vld [vmem:[#allocation39 + $0x8] sm:$0xff]  }
0x15ce   :  { %6885 = vmatpush3.bf16.msra.mxu0 %v7242_v30 }
0x15cf   :  { %6886 = vmatprep.subr.bf16.mxu0 %v8200_v1 }
0x15d0   :  { %v3677_v32 = vpop.permute.xlu0 %3676 }
0x15d1   :  { %v3682_v31 = vsel %vm889_vm3, %v3677_v32, 0 }
0x15d2   :  { %6807 = vmatpush3.bf16.msra.mxu1 %v3682_v31  ;;  %v7359_v34 = vpop.eup %7358 }
0x15d3   :  { %6818 = vmatprep.subr.bf16.mxu1 %v8200_v1  ;;  %v3784_v41 = vmul.f32 %v7359_v34, %v9073_v59 }
0x15d5   :  { %6809 = vmatmul.mubr.msk.bf16.vlgmr.msra.gmra.mxu1 %vm827_vm2, %v3674_v36  ;;  %v3785_v44 = vpack.c.bf16 %v3784_v41, %v3784_v41  ;;  %v7243_v36 = vld [vmem:[#allocation39] sm:$0xff]  }
0x15d6   :  { %6819 = vmatpush3.bf16.msra.mxu1 %v3792_v35  ;;  %6820 = vmatprep.mubr.msk.bf16.mxu1 %vm8201_vm0, %v8200_v1 }
0x15d7   :  { %6830 = vmatprep.subr.bf16.mxu1 %v8200_v1  ;;  %6887 = vmatpush3.bf16.msra.mxu0 %v7243_v36 }
0x15da   :  { %v7361_v45 = vpop.eup %7360 }
0x15db   :  { %v3894_v47 = vmul.f32 %v7361_v45, %v9077_v61 }
0x15dd   :  { %6821 = vmatmul.mubr.msk.bf16.vlgmr.msra.gmra.mxu1 %vm827_vm2, %v3785_v44  ;;  %v3895_v48 = vpack.c.bf16 %v3894_v47, %v3894_v47 }
0x15de   :  { %6831 = vmatpush3.bf16.msra.mxu1 %v3902_v46  ;;  %6832 = vmatprep.mubr.msk.bf16.mxu1 %vm8201_vm0, %v8200_v1 }
0x15df   :  { %6842 = vmatprep.subr.bf16.mxu1 %v8200_v1 }
0x15e5   :  { %6833 = vmatmul.mubr.msk.bf16.vlgmr.msra.gmra.mxu1 %vm827_vm2, %v3895_v48 }
0x15e6   :  { %6843 = vmatpush3.bf16.msra.mxu1 %v4024_v49  ;;  %6844 = vmatprep.mubr.msk.bf16.mxu1 %vm8201_vm0, %v8200_v1 }
0x15e7   :  { %6854 = vmatprep.subr.bf16.mxu1 %v8200_v1 }
0x15fd   :  { %v4015_v38 = vpop.xlane.xlu1 %4014 }
0x15fe   :  { %7362 = vrcp.f32 %v4015_v38 }
0x1601   :  { %v4124_v50 = vpop.xlane.xlu1 %4123  ;;  %v4234_v51 = vpop.xlane.xlu0 %4233 }
0x1602   :  { %7364 = vrcp.f32 %v4124_v50 }
0x1603   :  { %7366 = vrcp.f32 %v4234_v51 }
0x1605   :  { %v4129_v53 = vpop.permute.xlu0 %4128  ;;  %v4344_v56 = vpop.xlane.xlu1 %4343 }
0x1606   :  { %v4134_v57 = vsel %vm889_vm3, %v4129_v53, 0  ;;  %7368 = vrcp.f32 %v4344_v56 }
0x1609   :  { %v4239_v59 = vpop.permute.xlu1 %4238  ;;  %v4349_v63 = vpop.permute.xlu0 %4348 }
0x160a   :  { %v4244_v62 = vsel %vm889_vm3, %v4239_v59, 0  ;;  %v4354_v8 = vsel %vm889_vm3, %v4349_v63, 0  ;;  %v6217_v63 = vld [vmem:[#allocation41] ss:$0 sm:$0xff] }
0x160b   :  { %v7363_v52 = vpop.eup %7362 }
0x160c   :  { %v4017_v40 = vmul.f32 %v7363_v52, %v7349_v17 }
0x160e   :  { %v4018_v54 = vpack.c.bf16 %v4017_v40, %v4017_v40 }
0x160f   :  { %v7365_v55 = vpop.eup %7364 }
0x1610   :  { %6845 = vmatmul.mubr.msk.bf16.vlgmr.msra.gmra.mxu1 %vm827_vm2, %v4018_v54  ;;  %v4126_v58 = vmul.f32 %v7365_v55, %v9091_v18  ;;  %v7367_v61 = vpop.eup %7366 }
0x1611   :  { %6855 = vmatpush3.bf16.msra.mxu1 %v4134_v57  ;;  %6856 = vmatprep.mubr.msk.bf16.mxu1 %vm8201_vm0, %v8200_v1  ;;  %v4236_v42 = vmul.f32 %v7367_v61, %v9094_v21 }
0x1612   :  { %6866 = vmatprep.subr.bf16.mxu1 %v8200_v1  ;;  %v4127_v60 = vpack.c.bf16 %v4126_v58, %v4126_v58 }
0x1613   :  { %v4237_v0 = vpack.c.bf16 %v4236_v42, %v4236_v42  ;;  %v7369_v6 = vpop.eup %7368 }
0x1614   :  { %v4346_v10 = vmul.f32 %v7369_v6, %v9100_v24 }
0x1616   :  { %v4347_v12 = vpack.c.bf16 %v4346_v10, %v4346_v10 }
0x1618   :  { %6857 = vmatmul.mubr.msk.bf16.vlgmr.msra.gmra.mxu1 %vm827_vm2, %v4127_v60 }
0x1619   :  { %6867 = vmatpush3.bf16.msra.mxu1 %v4244_v62  ;;  %6868 = vmatprep.mubr.msk.bf16.mxu1 %vm8201_vm0, %v8200_v1 }
0x161a   :  { %6878 = vmatprep.subr.bf16.mxu1 %v8200_v1 }
0x161e   :  { %v3605_v7 = vpop.f32.mrf.mxu1 }
0x1620   :  { %6869 = vmatmul.mubr.msk.bf16.vlgmr.msra.gmra.mxu1 %vm827_vm2, %v4237_v0  ;;  %v6798_v9 = vpop.f32.mrf.mxu1 }
0x1621   :  { %6879 = vmatpush3.bf16.msra.mxu1 %v4354_v8  ;;  %6880 = vmatprep.mubr.msk.bf16.mxu1 %vm8201_vm0, %v8200_v1 }
0x1622   :  { %6892 = vmatprep.subr.bf16.mxu1 %v8200_v1  ;;  %v3608_v4 = vpop.f32.mrf.mxu1 }
0x1624   :  { %v6799_v11 = vpop.f32.mrf.mxu1 }
0x1628   :  { %6881 = vmatmul.mubr.msk.bf16.vlgmr.msra.gmra.mxu1 %vm827_vm2, %v4347_v12 }
0x1629   :  { %6896 = vmatprep.mubr.msk.bf16.mxu1 %vm8201_vm0, %v8200_v1 }
0x1695   :  { %v3718_v13 = vpop.f32.mrf.mxu1 }
0x1697   :  { %v6810_v14 = vpop.f32.mrf.mxu1 }
0x1699   :  { %v3721_v5 = vpop.f32.mrf.mxu1 }
0x169b   :  { %v6811_v15 = vpop.f32.mrf.mxu1 }
0x169d   :  { %v3828_v16 = vpop.f32.mrf.mxu1 }
0x169f   :  { %v6822_v17 = vpop.f32.mrf.mxu1 }
0x16a1   :  { %v3831_v18 = vpop.f32.mrf.mxu1 }
0x16a3   :  { %v6823_v20 = vpop.f32.mrf.mxu1 }
0x16a5   :  { %v3938_v21 = vpop.f32.mrf.mxu1 }
0x16a7   :  { %v6834_v23 = vpop.f32.mrf.mxu1 }
0x16a9   :  { %v3941_v37 = vpop.f32.mrf.mxu1 }
0x16aa   :  { %v7245_v37 = vld [vmem:[#allocation44] sm:$0xff]  }
0x16ab   :  { %v6835_v24 = vpop.f32.mrf.mxu1 }
0x16ac   :  { %v7246_v24 = vld [vmem:[%s9468_s15 + $0x8] sm:$0xff]  }
0x16ad   :  { %6893 = vmatpush3.bf16.msra.mxu1 %v7246_v24 }
0x16ae   :  { %6894 = vmatprep.subr.bf16.mxu1 %v8200_v1 }
0x16d0   :  { %v4060_v25 = vpop.f32.mrf.mxu1 }
0x16d2   :  { %v6846_v26 = vpop.f32.mrf.mxu1 }
0x16d4   :  { %v4063_v27 = vpop.f32.mrf.mxu1 }
0x16d6   :  { %v6847_v28 = vpop.f32.mrf.mxu1 }
0x16d8   :  { %v4170_v29 = vpop.f32.mrf.mxu1 }
0x16d9   :  { %v7178_v39 = vpack.i.bf16 %v4170_v29, %v3718_v13 }
0x16da   :  { %v6858_v32 = vpop.f32.mrf.mxu1 }
0x16db   :  { %7179 = vrot.lane.b32.xlu0 %v7178_v39, %s8205_s1 }
0x16dc   :  { %v4173_v31 = vpop.f32.mrf.mxu1 }
0x16de   :  { %v6859_v33 = vpop.f32.mrf.mxu1 }
0x16df   :  { %v6221_v33 = vld [vmem:[%s9469_s16] ss:$0 sm:$0xff] }
0x16e0   :  { %v4280_v34 = vpop.f32.mrf.mxu1 }
0x16e1   :  { %v7183_v35 = vpack.i.bf16 %v4280_v34, %v3828_v16 }
0x16e2   :  { %v6870_v41 = vpop.f32.mrf.mxu1 }
0x16e3   :  { %7184 = vrot.lane.b32.xlu1 %v7183_v35, %s8206_s13  ;;  %v6222_v41 = vld [vmem:[%s9470_s18] ss:$0 sm:$0xff] }
0x16e4   :  { %v4283_v43 = vpop.f32.mrf.mxu1 }
0x16e6   :  { %v6871_v44 = vpop.f32.mrf.mxu1 }
0x16e8   :  { %v4390_v45 = vpop.f32.mrf.mxu1 }
0x16e9   :  { %v7188_v46 = vpack.i.bf16 %v4390_v45, %v3938_v21 }
0x16ea   :  { %v6882_v47 = vpop.f32.mrf.mxu1 }
0x16eb   :  { %7189 = vrot.lane.b32.xlu0 %v7188_v46, %s8207_s7  ;;  %v6227_v47 = vld [vmem:[#allocation45] ss:$0 sm:$0xff] }
0x16ec   :  { %v4393_v48 = vpop.f32.mrf.mxu1 }
0x16ee   :  { %v6883_v49 = vpop.f32.mrf.mxu1 }
0x174d   :  { %v7180_v38 = vpop.permute.xlu0 %7179 }
0x174e   :  { %v7182_v51 = vunpack.i.h.bf16 %v7180_v38  ;;  %v7181_v52 = vunpack.i.l.bf16 %v7180_v38 }
0x1750   :  { %v4408_v55 = vsel %vm827_vm2, %v4060_v25, %v7182_v51  ;;  %v3956_v56 = vsel %vm827_vm2, %v3605_v7, %v7181_v52  ;;  %v7247_v25 = vld [vmem:[%s9468_s15] sm:$0xff]  }
0x1751   :  { %6895 = vmatpush3.bf16.msra.mxu1 %v7247_v25 }
0x1755   :  { %v7185_v50 = vpop.permute.xlu1 %7184 }
0x1756   :  { %v7187_v40 = vunpack.i.h.bf16 %v7185_v50  ;;  %v7186_v53 = vunpack.i.l.bf16 %v7185_v50 }
0x1758   :  { %v4409_v59 = vsel %vm1279_vm4, %v4408_v55, %v7187_v40  ;;  %v3957_v60 = vsel %vm1279_vm4, %v3956_v56, %v7186_v53 }
0x175d   :  { %v7190_v54 = vpop.permute.xlu0 %7189 }
0x175e   :  { %v7192_v57 = vunpack.i.h.bf16 %v7190_v54  ;;  %v7191_v58 = vunpack.i.l.bf16 %v7190_v54 }
0x1760   :  { %v4410_v61 = vsel %vm1281_vm5, %v4409_v59, %v7192_v57  ;;  %v3958_v62 = vsel %vm1281_vm5, %v3957_v60, %v7191_v58  ;;  %v6223_v57 = vld [vmem:[#allocation42] ss:$0 sm:$0xff] }
0x1761   :  { %v4411_v42 = vpack.c.bf16 %v4410_v61, %v3958_v62 }
0x1763   :  { %6889 = vmatmul.mubr.msk.bf16.vlgmr.msra.gmra.mxu0 %vm649_vm1, %v4411_v42 }
0x1764   :  { %6904 = vmatprep.mubr.msk.bf16.mxu0 %vm649_vm1, %v8760_v19 }
0x1823   :  { %v4472_v0 = vpop.f32.mrf.mxu0 }
0x1824   :  { %v4473_v6 = vadd.f32 %v6217_v63, %v4472_v0 }
0x1825   :  { %v6890_v7 = vpop.f32.mrf.mxu0 }
0x1826   :  { %v4479_v8 = vadd.f32 %v4473_v6, %v8984_v2 }
0x1827   :  { %v4475_v9 = vpop.f32.mrf.mxu0 }
0x1828   :  { %v4476_v10 = vadd.f32 %v6217_v63, %v4475_v9  ;;  %v4481_v4 = vsel %vm649_vm1, %v4479_v8, 0.0  ;;  %v7248_v9 = vld [vmem:[#allocation47 + $0x8] sm:$0xff]  }
0x1829   :  { %4482 = vadd.xlane.f32.xlu1 %v4481_v4  ;;  %v6891_v11 = vpop.f32.mrf.mxu0  ;;  %6908 = vmatprep.subr.bf16.mxu1 %v7248_v9 }
0x182a   :  { %v4480_v12 = vadd.f32 %v4476_v10, %v8986_v3  ;;  %v7244_v3 = vld [vmem:[#allocation44 + $0x8] sm:$0xff]   ;;  %v7249_v10 = vld [vmem:[#allocation47] sm:$0xff]  }
0x182b   :  { %6900 = vmatprep.subr.bf16.mxu0 %v7244_v3 }
0x182c   :  { %v4484_v13 = vsel %vm649_vm1, %v4480_v12, 0.0  ;;  %6901 = vmatpush3.bf16.msra.mxu0 %v7244_v3 }
0x182d   :  { %4485 = vadd.xlane.f32.xlu0 %v4484_v13  ;;  %6902 = vmatprep.subr.bf16.mxu0 %v7245_v37 }
0x1830   :  { %6903 = vmatpush3.bf16.msra.mxu0 %v7245_v37 }
0x1831   :  { %6916 = vmatprep.subr.bf16.mxu0 %v8200_v1 }
0x1833   :  { %6905 = vmatmul.mubr.msk.bf16.vlgmr.msra.gmra.mxu0 %vm649_vm1, %v8764_v22 }
0x1834   :  { %6918 = vmatprep.mubr.msk.bf16.mxu0 %vm8201_vm0, %v8200_v1 }
0x18b2   :  { %v4483_v14 = vpop.xlane.xlu1 %4482 }
0x18b3   :  { %v4487_v5 = vmul.f32 0.03125, %v4483_v14 }
0x18b5   :  { %v4489_v15 = vsub.f32 %v4479_v8, %v4487_v5 }
0x18b6   :  { %v4486_v16 = vpop.xlane.xlu0 %4485 }
0x18b7   :  { %v4488_v17 = vmul.f32 0.03125, %v4486_v16  ;;  %v4491_v18 = vmul.f32 %v4489_v15, %v4489_v15 }
0x18b9   :  { %v4490_v20 = vsub.f32 %v4480_v12, %v4488_v17  ;;  %v4493_v2 = vsel %vm649_vm1, %v4491_v18, 0.0 }
0x18ba   :  { %4494 = vadd.xlane.f32.xlu0 %v4493_v2 }
0x18bb   :  { %v4492_v21 = vmul.f32 %v4490_v20, %v4490_v20 }
0x18bd   :  { %v4496_v23 = vsel %vm649_vm1, %v4492_v21, 0.0 }
0x18be   :  { %4497 = vadd.xlane.f32.xlu1 %v4496_v23 }
0x18f3   :  { %v6906_v48 = vpop.f32.mrf.mxu0 }
0x18f4   :  { %v4661_v49 = vadd.f32 %v6906_v48, %v6227_v47 }
0x18f5   :  { %v4652_v38 = vpop.f32.mrf.mxu0 }
0x18f6   :  { %v4653_v51 = vadd.f32 %v6227_v47, %v4652_v38 }
0x18f7   :  { %v6907_v50 = vpop.f32.mrf.mxu0 }
0x18f8   :  { %v4664_v52 = vadd.f32 %v6907_v50, %v6227_v47 }
0x18f9   :  { %v4655_v40 = vpop.f32.mrf.mxu0 }
0x18fa   :  { %v4741_v53 = vpack.c.bf16 %v4664_v52, %v4661_v49  ;;  %v4656_v54 = vadd.f32 %v6227_v47, %v4655_v40 }
0x18fc   :  { %v4740_v55 = vpack.c.bf16 %v4656_v54, %v4653_v51 }
0x18fe   :  { %4849 = vrot.lane.b32.xlu0 %v4740_v55, %s8203_s17  ;;  %v4748_v56 = vsel %vm827_vm2, %v4740_v55, 0 }
0x18ff   :  { %6917 = vmatpush3.bf16.xpose.msra.mxu0 %v4748_v56 }
0x1900   :  { %6928 = vmatprep.subr.bf16.mxu0 %v8200_v1 }
0x1943   :  { %v4495_v26 = vpop.xlane.xlu0 %4494 }
0x1944   :  { %v4499_v27 = vmul.f32 0.03125, %v4495_v26 }
0x1946   :  { %v4501_v28 = vadd.f32 1e-05, %v4499_v27 }
0x1947   :  { %v4498_v29 = vpop.xlane.xlu1 %4497 }
0x1948   :  { %7370 = vrsqrt.f32 %v4501_v28  ;;  %v4500_v30 = vmul.f32 0.03125, %v4498_v29 }
0x194a   :  { %v4502_v39 = vadd.f32 1e-05, %v4500_v30  ;;  %v6232_v30 = vld [vmem:[#allocation48] ss:$0 sm:$0xff] }
0x194c   :  { %7372 = vrsqrt.f32 %v4502_v39 }
0x1955   :  { %v7371_v32 = vpop.eup %7370 }
0x1956   :  { %v4505_v31 = vmul.f32 %v7371_v32, %v4489_v15  ;;  %v5192_v15 = vsel %vm827_vm2, %v4741_v53, 0 }
0x1958   :  { %v4514_v34 = vmul.f32 %v6221_v33, %v4505_v31 }
0x1959   :  { %v7373_v36 = vpop.eup %7372 }
0x195a   :  { %v4506_v35 = vmul.f32 %v7373_v36, %v4490_v20  ;;  %v9177_v44 = vadd.f32 %v6222_v41, %v4514_v34 }
0x195c   :  { %v4515_v43 = vmul.f32 %v6221_v33, %v4506_v35 }
0x195e   :  { %v9179_v45 = vadd.f32 %v6222_v41, %v4515_v43 }
0x1960   :  { %v4525_v46 = vpack.c.bf16 %v9179_v45, %v9177_v44 }
0x1962   :  { %6897 = vmatmul.mubr.msk.bf16.vlgmr.msra.gmra.mxu1 %vm649_vm1, %v4525_v46 }
0x1963   :  { %6912 = vmatprep.mubr.msk.bf16.mxu1 %vm649_vm1, %v8760_v19  ;;  %6909 = vmatpush3.bf16.msra.mxu1 %v7248_v9 }
0x1964   :  { %6910 = vmatprep.subr.bf16.mxu1 %v7249_v10 }
0x1967   :  { %6911 = vmatpush3.bf16.msra.mxu1 %v7249_v10 }
0x1968   :  { %6922 = vmatprep.subr.bf16.mxu1 %v8200_v1 }
0x196a   :  { %6913 = vmatmul.mubr.msk.bf16.vlgmr.msra.gmra.mxu1 %vm649_vm1, %v8764_v22 }
0x196b   :  { %6924 = vmatprep.mubr.msk.bf16.mxu1 %vm8201_vm0, %v8200_v1 }
0x1970   :  { %v4850_v0 = vpop.permute.xlu0 %4849 }
0x1971   :  { %v4855_v7 = vsel %vm827_vm2, %v4850_v0, 0 }
0x1a22   :  { %v4586_v19 = vpop.f32.mrf.mxu1 }
0x1a23   :  { %v4587_v59 = vadd.f32 %v6223_v57, %v4586_v19 }
0x1a24   :  { %v6898_v58 = vpop.f32.mrf.mxu1 }
0x1a25   :  { %v4593_v42 = vmul.f32 0.35355338, %v4587_v59 }
0x1a26   :  { %v4589_v60 = vpop.f32.mrf.mxu1 }
0x1a27   :  { %v4590_v61 = vadd.f32 %v6223_v57, %v4589_v60 }
0x1a28   :  { %v6899_v62 = vpop.f32.mrf.mxu1 }
0x1a29   :  { %v4594_v63 = vmul.f32 0.35355338, %v4590_v61 }
0x1a2a   :  { %v6914_v29 = vpop.f32.mrf.mxu1 }
0x1a2b   :  { %v4739_v6 = vpack.c.bf16 %v4594_v63, %v4593_v42  ;;  %v4733_v39 = vadd.f32 %v6914_v29, %v6232_v30 }
0x1a2c   :  { %v4724_v32 = vpop.f32.mrf.mxu1 }
0x1a2d   :  { %4956 = vrot.lane.b32.xlu0 %v4739_v6, %s8202_s14  ;;  %4846 = vrot.lane.b32.xlu1 %v4739_v6, %s8203_s17  ;;  %v5187_v8 = vrot.slane %v4739_v6, 4  ;;  %v4725_v33 = vadd.f32 %v6232_v30, %v4724_v32 }
0x1a2e   :  { %6919 = vmatmul.mubr.msk.bf16.vlgmr.msra.gmra.mxu0 %vm827_vm2, %v4739_v6  ;;  %v6915_v31 = vpop.f32.mrf.mxu1 }
0x1a2f   :  { %6929 = vmatpush3.bf16.xpose.msra.mxu0 %v4855_v7  ;;  %6930 = vmatprep.mubr.msk.bf16.mxu0 %vm8201_vm0, %v8200_v1  ;;  %v4736_v36 = vadd.f32 %v6915_v31, %v6232_v30 }
0x1a30   :  { %6940 = vmatprep.subr.bf16.mxu0 %v8200_v1  ;;  %v4727_v34 = vpop.f32.mrf.mxu1 }
0x1a31   :  { %5064 = vrot.lane.b32.xlu0 %v4739_v6, %s8204_s9  ;;  %4958 = vrot.lane.b32.xlu1 %v4740_v55, %s8202_s14  ;;  %v9244_v35 = vpack.c.bf16 %v4736_v36, %v4733_v39  ;;  %v4728_v41 = vadd.f32 %v6232_v30, %v4727_v34 }
0x1a33   :  { %v9246_v43 = vpack.c.bf16 %v4728_v41, %v4725_v33 }
0x1a35   :  { %5066 = vrot.lane.b32.xlu1 %v4740_v55, %s8204_s9  ;;  %5289 = vrot.lane.b32.xlu0 %v5187_v8, %s8203_s17 }
0x1a36   :  { %6923 = vmatpush3.bf16.msra.mxu1 %v9246_v43 }
0x1a37   :  { %6934 = vmatprep.subr.bf16.mxu1 %v8200_v1 }
0x1a39   :  { %5292 = vrot.lane.b32.xlu1 %v4741_v53, %s8203_s17  ;;  %5399 = vrot.lane.b32.xlu0 %v5187_v8, %s8202_s14 }
0x1a3d   :  { %5401 = vrot.lane.b32.xlu1 %v4741_v53, %s8202_s14  ;;  %5507 = vrot.lane.b32.xlu0 %v5187_v8, %s8204_s9 }
0x1a41   :  { %5509 = vrot.lane.b32.xlu1 %v4741_v53, %s8204_s9 }
0x1a9f   :  { %v4847_v4 = vpop.permute.xlu1 %4846  ;;  %v4957_v14 = vpop.permute.xlu0 %4956 }
0x1aa0   :  { %6931 = vmatmul.mubr.msk.bf16.vlgmr.msra.gmra.mxu0 %vm827_vm2, %v4847_v4 }
0x1aa1   :  { %6942 = vmatprep.mubr.msk.bf16.mxu0 %vm8201_vm0, %v8200_v1 }
0x1aa3   :  { %v4959_v11 = vpop.permute.xlu1 %4958  ;;  %v5065_v22 = vpop.permute.xlu0 %5064 }
0x1aa4   :  { %v4964_v12 = vsel %vm827_vm2, %v4959_v11, 0 }
0x1aa5   :  { %6941 = vmatpush3.bf16.xpose.msra.mxu0 %v4964_v12 }
0x1aa6   :  { %6952 = vmatprep.subr.bf16.mxu0 %v8200_v1 }
0x1aa7   :  { %v5067_v13 = vpop.permute.xlu1 %5066  ;;  %v5290_v20 = vpop.permute.xlu0 %5289 }
0x1aa8   :  { %v5072_v5 = vsel %vm827_vm2, %v5067_v13, 0 }
0x1aab   :  { %v5293_v16 = vpop.permute.xlu1 %5292  ;;  %v5400_v23 = vpop.permute.xlu0 %5399 }
0x1aac   :  { %6943 = vmatmul.mubr.msk.bf16.vlgmr.msra.gmra.mxu0 %vm827_vm2, %v4957_v14  ;;  %v5298_v17 = vsel %vm827_vm2, %v5293_v16, 0 }
0x1aad   :  { %6953 = vmatpush3.bf16.xpose.msra.mxu0 %v5072_v5  ;;  %6954 = vmatprep.mubr.msk.bf16.mxu0 %vm8201_vm0, %v8200_v1 }
0x1aae   :  { %6964 = vmatprep.subr.bf16.mxu0 %v8200_v1 }
0x1aaf   :  { %v5402_v18 = vpop.permute.xlu1 %5401  ;;  %v5508_v37 = vpop.permute.xlu0 %5507 }
0x1ab0   :  { %v5407_v2 = vsel %vm827_vm2, %v5402_v18, 0 }
0x1ab3   :  { %v5510_v21 = vpop.permute.xlu1 %5509 }
0x1ab4   :  { %6955 = vmatmul.mubr.msk.bf16.vlgmr.msra.gmra.mxu0 %vm827_vm2, %v5065_v22  ;;  %v5515_v3 = vsel %vm827_vm2, %v5510_v21, 0 }
0x1ab5   :  { %6965 = vmatpush3.bf16.xpose.msra.mxu0 %v5192_v15  ;;  %6966 = vmatprep.mubr.msk.bf16.mxu0 %vm8201_vm0, %v8200_v1 }
0x1ab6   :  { %6976 = vmatprep.subr.bf16.mxu0 %v8200_v1 }
0x1abc   :  { %6967 = vmatmul.mubr.msk.bf16.vlgmr.msra.gmra.mxu0 %vm827_vm2, %v5187_v8 }
0x1abd   :  { %6977 = vmatpush3.bf16.xpose.msra.mxu0 %v5298_v17  ;;  %6978 = vmatprep.mubr.msk.bf16.mxu0 %vm8201_vm0, %v8200_v1 }
0x1abe   :  { %6988 = vmatprep.subr.bf16.mxu0 %v8200_v1 }
0x1ac4   :  { %6979 = vmatmul.mubr.msk.bf16.vlgmr.msra.gmra.mxu0 %vm827_vm2, %v5290_v20 }
0x1ac5   :  { %6989 = vmatpush3.bf16.xpose.msra.mxu0 %v5407_v2  ;;  %6990 = vmatprep.mubr.msk.bf16.mxu0 %vm8201_vm0, %v8200_v1 }
0x1ac6   :  { %7000 = vmatprep.subr.bf16.mxu0 %v8200_v1 }
0x1acc   :  { %6991 = vmatmul.mubr.msk.bf16.vlgmr.msra.gmra.mxu0 %vm827_vm2, %v5400_v23 }
0x1acd   :  { %7001 = vmatpush3.bf16.xpose.msra.mxu0 %v5515_v3  ;;  %7002 = vmatprep.mubr.msk.bf16.mxu0 %vm8201_vm0, %v8200_v1 }
0x1ace   :  { %7012 = vmatprep.subr.bf16.mxu0 %v8200_v1 }
0x1ad4   :  { %7003 = vmatmul.mubr.msk.bf16.vlgmr.msra.gmra.mxu0 %vm827_vm2, %v5508_v37 }
0x1ad5   :  { %7016 = vmatprep.mubr.msk.bf16.mxu0 %vm8201_vm0, %v8200_v1 }
0x1aee   :  { %v4784_v24 = vpop.f32.mrf.mxu0 }
0x1aef   :  { %v4790_v25 = vsel %vm1279_vm4, %v4784_v24, -inf }
0x1af0   :  { %4791 = vmax.xlane.f32.xlu1 %v4790_v25  ;;  %v6920_v26 = vpop.f32.mrf.mxu0 }
0x1af2   :  { %v4787_v27 = vpop.f32.mrf.mxu0 }
0x1af4   :  { %v6921_v28 = vpop.f32.mrf.mxu0 }
0x1b60   :  { %v4891_v46 = vpop.f32.mrf.mxu0 }
0x1b61   :  { %v4897_v47 = vsel %vm1279_vm4, %v4891_v46, -inf }
0x1b62   :  { %4898 = vmax.xlane.f32.xlu0 %v4897_v47  ;;  %v6932_v48 = vpop.f32.mrf.mxu0 }
0x1b64   :  { %v4894_v49 = vpop.f32.mrf.mxu0 }
0x1b66   :  { %v6933_v38 = vpop.f32.mrf.mxu0 }
0x1b6c   :  { %v5000_v50 = vpop.f32.mrf.mxu0 }
0x1b6d   :  { %v5006_v51 = vsel %vm1279_vm4, %v5000_v50, -inf }
0x1b6e   :  { %5007 = vmax.xlane.f32.xlu0 %v5006_v51  ;;  %v6944_v52 = vpop.f32.mrf.mxu0 }
0x1b70   :  { %v5003_v40 = vpop.f32.mrf.mxu0 }
0x1b72   :  { %v6945_v53 = vpop.f32.mrf.mxu0 }
0x1b74   :  { %v5108_v54 = vpop.f32.mrf.mxu0 }
0x1b75   :  { %v5114_v55 = vsel %vm1279_vm4, %v5108_v54, -inf }
0x1b76   :  { %5115 = vmax.xlane.f32.xlu1 %v5114_v55  ;;  %v6956_v56 = vpop.f32.mrf.mxu0 }
0x1b78   :  { %v5111_v57 = vpop.f32.mrf.mxu0 }
0x1b79   :  { %v4792_v19 = vpop.xlane.xlu1 %4791 }
0x1b7a   :  { %v4793_v58 = vsub.f32 %v4784_v24, %v4792_v19  ;;  %v6957_v59 = vpop.f32.mrf.mxu0 }
0x1b7c   :  { %v5228_v60 = vpop.f32.mrf.mxu0  ;;  %v4794_v61 = vmul.f32 1.442695, %v4793_v58 }
0x1b7d   :  { %v5234_v62 = vsel %vm1279_vm4, %v5228_v60, -inf }
0x1b7e   :  { %5235 = vmax.xlane.f32.xlu0 %v5234_v62  ;;  %v6968_v42 = vpop.f32.mrf.mxu0  ;;  %7374 = vpow2.f32 %v4794_v61 }
0x1b80   :  { %v5231_v63 = vpop.f32.mrf.mxu0 }
0x1b82   :  { %v6969_v0 = vpop.f32.mrf.mxu0 }
0x1b84   :  { %v9254_v6 = vpop.f32.mrf.mxu0 }
0x1b85   :  { %v5340_v7 = vsel %vm1279_vm4, %v9254_v6, -inf }
0x1b86   :  { %5341 = vmax.xlane.f32.xlu1 %v5340_v7  ;;  %v6980_v8 = vpop.f32.mrf.mxu0 }
0x1b88   :  { %v5337_v9 = vpop.f32.mrf.mxu0 }
0x1b8a   :  { %v6981_v10 = vpop.f32.mrf.mxu0 }
0x1b8b   :  { %v7375_v12 = vpop.eup %7374 }
0x1b8c   :  { %v5443_v4 = vpop.f32.mrf.mxu0  ;;  %v4796_v5 = vsel %vm1279_vm4, %v7375_v12, 0.0 }
0x1b8d   :  { %v5449_v11 = vsel %vm1279_vm4, %v5443_v4, -inf }
0x1b8e   :  { %5450 = vmax.xlane.f32.xlu0 %v5449_v11  ;;  %v6992_v13 = vpop.f32.mrf.mxu0 }
0x1b90   :  { %v5446_v14 = vpop.f32.mrf.mxu0 }
0x1b92   :  { %4797 = vadd.xlane.f32.xlu0 %v4796_v5  ;;  %v6993_v22 = vpop.f32.mrf.mxu0 }
0x1b94   :  { %v5551_v15 = vpop.f32.mrf.mxu0 }
0x1b95   :  { %v5557_v16 = vsel %vm1279_vm4, %v5551_v15, -inf }
0x1b96   :  { %5558 = vmax.xlane.f32.xlu1 %v5557_v16  ;;  %v7004_v17 = vpop.f32.mrf.mxu0 }
0x1b98   :  { %v5554_v18 = vpop.f32.mrf.mxu0 }
0x1b9a   :  { %v7005_v20 = vpop.f32.mrf.mxu0 }
0x1ba7   :  { %4910 = vrot.lane.b32.xlu1 %v9246_v43, %s8203_s17 }
0x1ba8   :  { %5018 = vrot.lane.b32.xlu0 %v9246_v43, %s8202_s14 }
0x1beb   :  { %v4899_v2 = vpop.xlane.xlu0 %4898 }
0x1bec   :  { %v4900_v21 = vsub.f32 %v4891_v46, %v4899_v2 }
0x1bee   :  { %v4901_v23 = vmul.f32 1.442695, %v4900_v21 }
0x1bf0   :  { %7376 = vpow2.f32 %v4901_v23 }
0x1bf7   :  { %v5008_v3 = vpop.xlane.xlu0 %5007 }
0x1bf8   :  { %v5009_v37 = vsub.f32 %v5000_v50, %v5008_v3 }
0x1bfa   :  { %v5010_v24 = vmul.f32 1.442695, %v5009_v37 }
0x1bfc   :  { %7378 = vpow2.f32 %v5010_v24 }
0x1bfd   :  { %v7377_v25 = vpop.eup %7376 }
0x1bfe   :  { %v4903_v26 = vsel %vm1279_vm4, %v7377_v25, 0.0 }
0x1bff   :  { %v5116_v27 = vpop.xlane.xlu1 %5115  ;;  %4904 = vadd.xlane.f32.xlu1 %v4903_v26 }
0x1c00   :  { %v5117_v28 = vsub.f32 %v5108_v54, %v5116_v27 }
0x1c02   :  { %v5118_v29 = vmul.f32 1.442695, %v5117_v28 }
0x1c04   :  { %7380 = vpow2.f32 %v5118_v29 }
0x1c07   :  { %v5236_v30 = vpop.xlane.xlu0 %5235 }
0x1c08   :  { %v5237_v39 = vsub.f32 %v5228_v60, %v5236_v30 }
0x1c09   :  { %v7379_v32 = vpop.eup %7378 }
0x1c0a   :  { %v5238_v31 = vmul.f32 1.442695, %v5237_v39  ;;  %v5012_v33 = vsel %vm1279_vm4, %v7379_v32, 0.0 }
0x1c0b   :  { %5013 = vadd.xlane.f32.xlu0 %v5012_v33 }
0x1c0c   :  { %7382 = vpow2.f32 %v5238_v31 }
0x1c0f   :  { %v5342_v49 = vpop.xlane.xlu1 %5341 }
0x1c10   :  { %v5343_v55 = vsub.f32 %v9254_v6, %v5342_v49 }
0x1c11   :  { %v9267_v36 = vpop.eup %7380 }
0x1c12   :  { %v5120_v34 = vsel %vm1279_vm4, %v9267_v36, 0.0  ;;  %v5344_v56 = vmul.f32 1.442695, %v5343_v55 }
0x1c13   :  { %5121 = vadd.xlane.f32.xlu1 %v5120_v34 }
0x1c17   :  { %v5451_v41 = vpop.xlane.xlu0 %5450 }
0x1c18   :  { %v5452_v53 = vsub.f32 %v5443_v4, %v5451_v41 }
0x1c19   :  { %v9271_v46 = vpop.eup %7382 }
0x1c1a   :  { %v5240_v47 = vsel %vm1279_vm4, %v9271_v46, 0.0  ;;  %v5453_v54 = vmul.f32 1.442695, %v5452_v53 }
0x1c1b   :  { %v4798_v48 = vpop.xlane.xlu0 %4797  ;;  %5241 = vadd.xlane.f32.xlu0 %v5240_v47 }
0x1c1c   :  { %7384 = vrcp.f32 %v4798_v48 }
0x1c1d   :  { %7386 = vpow2.f32 %v5453_v54 }
0x1c1e   :  { %7388 = vpow2.f32 %v5344_v56 }
0x1c1f   :  { %v5559_v38 = vpop.xlane.xlu1 %5558  ;;  %v5019_v63 = vpop.permute.xlu0 %5018 }
0x1c20   :  { %v5560_v57 = vsub.f32 %v5551_v15, %v5559_v38 }
0x1c22   :  { %v5561_v19 = vmul.f32 1.442695, %v5560_v57 }
0x1c23   :  { %v4911_v40 = vpop.permute.xlu1 %4910 }
0x1c24   :  { %5353 = vrot.lane.b32.xlu1 %v9244_v35, %s8203_s17  ;;  %7390 = vpow2.f32 %v5561_v19  ;;  %v7250_v19 = vld [vmem:[#allocation50 + $0x8] sm:$0xff]  }
0x1c25   :  { %7013 = vmatpush3.bf16.msra.mxu0 %v7250_v19 }
0x1c26   :  { %7014 = vmatprep.subr.bf16.mxu0 %v8200_v1 }
0x1c29   :  { %v7385_v50 = vpop.eup %7384 }
0x1c2a   :  { %v4800_v51 = vmul.f32 %v7385_v50, %v7375_v12  ;;  %v9284_v58 = vpop.eup %7386 }
0x1c2b   :  { %v5455_v59 = vsel %vm1279_vm4, %v9284_v58, 0.0  ;;  %v7389_v60 = vpop.eup %7388 }
0x1c2c   :  { %v4801_v52 = vpack.c.bf16 %v4800_v51, %v4800_v51 }
0x1c2e   :  { %6925 = vmatmul.mubr.msk.bf16.vlgmr.msra.gmra.mxu1 %vm1279_vm4, %v4801_v52 }
0x1c2f   :  { %6935 = vmatpush3.bf16.msra.mxu1 %v4911_v40  ;;  %6936 = vmatprep.mubr.msk.bf16.mxu1 %vm8201_vm0, %v8200_v1 }
0x1c30   :  { %6946 = vmatprep.subr.bf16.mxu1 %v8200_v1 }
0x1c31   :  { %5126 = vrot.lane.b32.xlu0 %v9246_v43, %s8204_s9  ;;  %v5346_v43 = vsel %vm1279_vm4, %v7389_v60, 0.0  ;;  %v9289_v61 = vpop.eup %7390 }
0x1c32   :  { %v5563_v62 = vsel %vm1279_vm4, %v9289_v61, 0.0 }
0x1c48   :  { %5456 = vadd.xlane.f32.xlu1 %v5455_v59 }
0x1c50   :  { %5347 = vadd.xlane.f32.xlu0 %v5346_v43 }
0x1c54   :  { %5564 = vadd.xlane.f32.xlu0 %v5563_v62 }
0x1c59   :  { %5569 = vrot.lane.b32.xlu1 %v9244_v35, %s8204_s9 }
0x1c6a   :  { %5461 = vrot.lane.b32.xlu0 %v9244_v35, %s8202_s14 }
0x1c88   :  { %v4905_v42 = vpop.xlane.xlu1 %4904 }
0x1c89   :  { %7392 = vrcp.f32 %v4905_v42 }
0x1c94   :  { %v5014_v0 = vpop.xlane.xlu0 %5013 }
0x1c95   :  { %7394 = vrcp.f32 %v5014_v0 }
0x1c96   :  { %v7393_v6 = vpop.eup %7392 }
0x1c97   :  { %v4907_v7 = vmul.f32 %v7393_v6, %v7377_v25 }
0x1c99   :  { %v4908_v8 = vpack.c.bf16 %v4907_v7, %v4907_v7 }
0x1c9b   :  { %6937 = vmatmul.mubr.msk.bf16.vlgmr.msra.gmra.mxu1 %vm1279_vm4, %v4908_v8 }
0x1c9c   :  { %6947 = vmatpush3.bf16.msra.mxu1 %v5019_v63  ;;  %v5122_v9 = vpop.xlane.xlu1 %5121  ;;  %6948 = vmatprep.mubr.msk.bf16.mxu1 %vm8201_vm0, %v8200_v1 }
0x1c9d   :  { %7396 = vrcp.f32 %v5122_v9  ;;  %6958 = vmatprep.subr.bf16.mxu1 %v8200_v1 }
0x1ca0   :  { %v5354_v18 = vpop.permute.xlu1 %5353 }
0x1ca2   :  { %v7395_v10 = vpop.eup %7394 }
0x1ca3   :  { %v5016_v4 = vmul.f32 %v7395_v10, %v7379_v32 }
0x1ca4   :  { %v5242_v11 = vpop.xlane.xlu0 %5241 }
0x1ca5   :  { %v5017_v12 = vpack.c.bf16 %v5016_v4, %v5016_v4  ;;  %7398 = vrcp.f32 %v5242_v11 }
0x1ca7   :  { %6949 = vmatmul.mubr.msk.bf16.vlgmr.msra.gmra.mxu1 %vm1279_vm4, %v5017_v12 }
0x1ca8   :  { %v5127_v13 = vpop.permute.xlu0 %5126  ;;  %6960 = vmatprep.mubr.msk.bf16.mxu1 %vm8201_vm0, %v8200_v1 }
0x1ca9   :  { %6959 = vmatpush3.bf16.msra.mxu1 %v5127_v13 }
0x1caa   :  { %v7397_v14 = vpop.eup %7396  ;;  %6970 = vmatprep.subr.bf16.mxu1 %v8200_v1 }
0x1cab   :  { %v5124_v5 = vmul.f32 %v7397_v14, %v9267_v36 }
0x1cad   :  { %v5125_v22 = vpack.c.bf16 %v5124_v5, %v5124_v5 }
0x1caf   :  { %6961 = vmatmul.mubr.msk.bf16.vlgmr.msra.gmra.mxu1 %vm1279_vm4, %v5125_v22 }
0x1cb0   :  { %6971 = vmatpush3.bf16.msra.mxu1 %v9244_v35  ;;  %6972 = vmatprep.mubr.msk.bf16.mxu1 %vm8201_vm0, %v8200_v1 }
0x1cb1   :  { %6982 = vmatprep.subr.bf16.mxu1 %v8200_v1 }
0x1cb2   :  { %v7399_v15 = vpop.eup %7398 }
0x1cb3   :  { %v5244_v16 = vmul.f32 %v7399_v15, %v9271_v46 }
0x1cb5   :  { %v5245_v17 = vpack.c.bf16 %v5244_v16, %v5244_v16 }
0x1cb7   :  { %6973 = vmatmul.mubr.msk.bf16.vlgmr.msra.gmra.mxu1 %vm1279_vm4, %v5245_v17 }
0x1cb8   :  { %6983 = vmatpush3.bf16.msra.mxu1 %v5354_v18  ;;  %6984 = vmatprep.mubr.msk.bf16.mxu1 %vm8201_vm0, %v8200_v1 }
0x1cb9   :  { %6994 = vmatprep.subr.bf16.mxu1 %v8200_v1 }
0x1cd1   :  { %v5457_v35 = vpop.xlane.xlu1 %5456 }
0x1cd5   :  { %v5570_v39 = vpop.permute.xlu1 %5569 }
0x1cd9   :  { %v5348_v20 = vpop.xlane.xlu0 %5347 }
0x1cda   :  { %7400 = vrcp.f32 %v5348_v20 }
0x1cdb   :  { %7402 = vrcp.f32 %v5457_v35 }
0x1cdd   :  { %v5565_v2 = vpop.xlane.xlu0 %5564 }
0x1cde   :  { %7404 = vrcp.f32 %v5565_v2 }
0x1ce1   :  { %v5462_v24 = vpop.permute.xlu0 %5461 }
0x1ce7   :  { %v7401_v21 = vpop.eup %7400 }
0x1ce8   :  { %v5350_v23 = vmul.f32 %v7401_v21, %v7389_v60  ;;  %v7403_v37 = vpop.eup %7402 }
0x1ce9   :  { %v5459_v25 = vmul.f32 %v7403_v37, %v9284_v58  ;;  %v6253_v37 = vld [vmem:[#allocation51] ss:$0 sm:$0xff] }
0x1cea   :  { %v5351_v3 = vpack.c.bf16 %v5350_v23, %v5350_v23 }
0x1ceb   :  { %v5460_v28 = vpack.c.bf16 %v5459_v25, %v5459_v25  ;;  %v7405_v29 = vpop.eup %7404 }
0x1cec   :  { %6985 = vmatmul.mubr.msk.bf16.vlgmr.msra.gmra.mxu1 %vm1279_vm4, %v5351_v3  ;;  %v5567_v31 = vmul.f32 %v7405_v29, %v9289_v61  ;;  %v7251_v61 = vld [vmem:[#allocation50] sm:$0xff]  }
0x1ced   :  { %6995 = vmatpush3.bf16.msra.mxu1 %v5462_v24  ;;  %6996 = vmatprep.mubr.msk.bf16.mxu1 %vm8201_vm0, %v8200_v1 }
0x1cee   :  { %7006 = vmatprep.subr.bf16.mxu1 %v8200_v1  ;;  %v9321_v26 = vpop.f32.mrf.mxu1  ;;  %v5568_v33 = vpack.c.bf16 %v5567_v31, %v5567_v31  ;;  %7015 = vmatpush3.bf16.msra.mxu0 %v7251_v61  ;;  %v6257_v61 = vld [vmem:[%s9473_s22] ss:$0 sm:$0xff] }
0x1cef   :  { %7028 = vmatprep.subr.bf16.mxu0 %v8200_v1 }
0x1cf0   :  { %v6926_v27 = vpop.f32.mrf.mxu1 }
0x1cf2   :  { %v4842_v30 = vpop.f32.mrf.mxu1 }
0x1cf4   :  { %6997 = vmatmul.mubr.msk.bf16.vlgmr.msra.gmra.mxu1 %vm1279_vm4, %v5460_v28  ;;  %v6927_v32 = vpop.f32.mrf.mxu1 }
0x1cf5   :  { %7007 = vmatpush3.bf16.msra.mxu1 %v5570_v39  ;;  %7008 = vmatprep.mubr.msk.bf16.mxu1 %vm8201_vm0, %v8200_v1 }
0x1cf6   :  { %7020 = vmatprep.subr.bf16.mxu1 %v8200_v1 }
0x1cfc   :  { %7009 = vmatmul.mubr.msk.bf16.vlgmr.msra.gmra.mxu1 %vm1279_vm4, %v5568_v33 }
0x1cfd   :  { %7024 = vmatprep.mubr.msk.bf16.mxu1 %vm8201_vm0, %v8200_v1 }
0x1d5b   :  { %v4950_v36 = vpop.f32.mrf.mxu1 }
0x1d5d   :  { %v6938_v34 = vpop.f32.mrf.mxu1 }
0x1d5f   :  { %v4953_v41 = vpop.f32.mrf.mxu1 }
0x1d61   :  { %v6939_v46 = vpop.f32.mrf.mxu1 }
0x1d67   :  { %v5058_v47 = vpop.f32.mrf.mxu1 }
0x1d69   :  { %v6950_v48 = vpop.f32.mrf.mxu1 }
0x1d6b   :  { %v5061_v49 = vpop.f32.mrf.mxu1 }
0x1d6d   :  { %v6951_v38 = vpop.f32.mrf.mxu1 }
0x1d6e   :  { %v7252_v38 = vld [vmem:[%s9471_s23 + $0x8] sm:$0xff]  }
0x1d6f   :  { %v5166_v50 = vpop.f32.mrf.mxu1  ;;  %7021 = vmatpush3.bf16.msra.mxu1 %v7252_v38 }
0x1d70   :  { %7022 = vmatprep.subr.bf16.mxu1 %v8200_v1 }
0x1d71   :  { %v6962_v51 = vpop.f32.mrf.mxu1 }
0x1d72   :  { %v7254_v51 = vld [vmem:[%s9472_s4 + $0x38] sm:$0xff]  }
0x1d73   :  { %v5169_v52 = vpop.f32.mrf.mxu1 }
0x1d74   :  { %v7255_v52 = vld [vmem:[%s9472_s4 + $0x30] sm:$0xff]  }
0x1d75   :  { %v6963_v40 = vpop.f32.mrf.mxu1 }
0x1d76   :  { %v7256_v40 = vld [vmem:[%s9472_s4 + $0x28] sm:$0xff]  }
0x1d77   :  { %v5283_v53 = vpop.f32.mrf.mxu1 }
0x1d79   :  { %v6974_v54 = vpop.f32.mrf.mxu1 }
0x1d7a   :  { %v7258_v54 = vld [vmem:[%s9472_s4 + $0x18] sm:$0xff]  }
0x1d7b   :  { %v5286_v55 = vpop.f32.mrf.mxu1 }
0x1d7d   :  { %v6975_v56 = vpop.f32.mrf.mxu1 }
0x1dac   :  { %v5393_v57 = vpop.f32.mrf.mxu1 }
0x1dad   :  { %v7193_v58 = vpack.i.bf16 %v5393_v57, %v4950_v36 }
0x1dae   :  { %v6986_v59 = vpop.f32.mrf.mxu1 }
0x1daf   :  { %7194 = vrot.lane.b32.xlu1 %v7193_v58, %s8205_s1 }
0x1db0   :  { %v5396_v60 = vpop.f32.mrf.mxu1 }
0x1db2   :  { %v6987_v43 = vpop.f32.mrf.mxu1 }
0x1db4   :  { %v5501_v62 = vpop.f32.mrf.mxu1 }
0x1db5   :  { %v7198_v42 = vpack.i.bf16 %v5501_v62, %v5058_v47 }
0x1db6   :  { %v6998_v63 = vpop.f32.mrf.mxu1 }
0x1db7   :  { %7199 = vrot.lane.b32.xlu1 %v7198_v42, %s8206_s13 }
0x1db8   :  { %v5504_v0 = vpop.f32.mrf.mxu1 }
0x1db9   :  { %v6258_v0 = vld [vmem:[%s9474_s27] ss:$0 sm:$0xff] }
0x1dba   :  { %v6999_v6 = vpop.f32.mrf.mxu1 }
0x1dbc   :  { %v5609_v7 = vpop.f32.mrf.mxu1 }
0x1dbd   :  { %v7203_v8 = vpack.i.bf16 %v5609_v7, %v5166_v50  ;;  %v7253_v50 = vld [vmem:[%s9471_s23] sm:$0xff]  }
0x1dbe   :  { %v7010_v9 = vpop.f32.mrf.mxu1  ;;  %7023 = vmatpush3.bf16.msra.mxu1 %v7253_v50 }
0x1dbf   :  { %7204 = vrot.lane.b32.xlu1 %v7203_v8, %s8207_s7 }
0x1dc0   :  { %v5612_v10 = vpop.f32.mrf.mxu1 }
0x1dc1   :  { %v7259_v10 = vld [vmem:[%s9472_s4 + $0x10] sm:$0xff]  }
0x1dc2   :  { %v7011_v4 = vpop.f32.mrf.mxu1 }
0x1dc3   :  { %v7260_v4 = vld [vmem:[%s9472_s4 + $0x8] sm:$0xff]  }
0x1e21   :  { %v7195_v11 = vpop.permute.xlu1 %7194 }
0x1e22   :  { %v7197_v13 = vunpack.i.h.bf16 %v7195_v11  ;;  %v7196_v14 = vunpack.i.l.bf16 %v7195_v11  ;;  %v7261_v11 = vld [vmem:[%s9472_s4] sm:$0xff]  }
0x1e24   :  { %v5627_v16 = vsel %vm827_vm2, %v5283_v53, %v7197_v13  ;;  %v5184_v17 = vsel %vm827_vm2, %v9321_v26, %v7196_v14  ;;  %v7257_v53 = vld [vmem:[%s9472_s4 + $0x20] sm:$0xff]  }
0x1e29   :  { %v7200_v12 = vpop.permute.xlu1 %7199 }
0x1e2a   :  { %v7202_v5 = vunpack.i.h.bf16 %v7200_v12  ;;  %v7201_v22 = vunpack.i.l.bf16 %v7200_v12  ;;  %v6259_v12 = vld [vmem:[%s9475_s8] ss:$0 sm:$0xff] }
0x1e2c   :  { %v5628_v35 = vsel %vm1279_vm4, %v5627_v16, %v7202_v5  ;;  %v5185_v2 = vsel %vm1279_vm4, %v5184_v17, %v7201_v22 }
0x1e31   :  { %v7205_v15 = vpop.permute.xlu1 %7204 }
0x1e32   :  { %v7207_v18 = vunpack.i.h.bf16 %v7205_v15  ;;  %v7206_v20 = vunpack.i.l.bf16 %v7205_v15 }
0x1e34   :  { %v5629_v21 = vsel %vm1281_vm5, %v5628_v35, %v7207_v18  ;;  %v5186_v23 = vsel %vm1281_vm5, %v5185_v2, %v7206_v20  ;;  %v6263_v35 = vld [vmem:[%s9476_s19] ss:$0 sm:$0xff] }
0x1e35   :  { %v5630_v3 = vpack.c.bf16 %v5629_v21, %v5186_v23 }
0x1e37   :  { %7017 = vmatmul.mubr.msk.bf16.vlgmr.msra.gmra.mxu0 %vm649_vm1, %v5630_v3 }
0x1e38   :  { %7044 = vmatprep.mubr.msk.bf16.mxu0 %vm8201_vm0, %v8200_v1  ;;  %7029 = vmatpush3.bf16.msra.mxu0 %v7254_v51  ;;  %v6272_v51 = vld [vmem:[%s9477_s26] ss:$0 sm:$0xff] }
0x1e39   :  { %7030 = vmatprep.subr.bf16.mxu0 %v8200_v1 }
0x1e3c   :  { %7031 = vmatpush3.bf16.msra.mxu0 %v7255_v52 }
0x1e3d   :  { %7032 = vmatprep.subr.bf16.mxu0 %v8200_v1 }
0x1e40   :  { %7033 = vmatpush3.bf16.msra.mxu0 %v7256_v40  ;;  %v6273_v40 = vld [vmem:[%s8483_s3] ss:$0 sm:$0xff]  ;;  %s8209_s3 = smov [#allocation53]  }
0x1e41   :  { %7034 = vmatprep.subr.bf16.mxu0 %v8200_v1 }
0x1e44   :  { %7035 = vmatpush3.bf16.msra.mxu0 %v7257_v53 }
0x1e45   :  { %7036 = vmatprep.subr.bf16.mxu0 %v8200_v1 }
0x1e48   :  { %7037 = vmatpush3.bf16.msra.mxu0 %v7258_v54 }
0x1e49   :  { %7038 = vmatprep.subr.bf16.mxu0 %v8200_v1 }
0x1e4c   :  { %7039 = vmatpush3.bf16.msra.mxu0 %v7259_v10 }
0x1e4d   :  { %7040 = vmatprep.subr.bf16.mxu0 %v8200_v1 }
0x1e50   :  { %7041 = vmatpush3.bf16.msra.mxu0 %v7260_v4 }
0x1e51   :  { %7042 = vmatprep.subr.bf16.mxu0 %v8200_v1 }
0x1e54   :  { %7043 = vmatpush3.bf16.msra.mxu0 %v7261_v11 }
0x1ef7   :  { %v5691_v24 = vpop.f32.mrf.mxu0 }
0x1ef8   :  { %v5692_v25 = vadd.f32 %v6253_v37, %v5691_v24 }
0x1ef9   :  { %v7018_v26 = vpop.f32.mrf.mxu0 }
0x1efa   :  { %v5698_v27 = vadd.f32 %v5692_v25, %v9177_v44 }
0x1efb   :  { %v5694_v28 = vpop.f32.mrf.mxu0 }
0x1efc   :  { %v5695_v29 = vadd.f32 %v6253_v37, %v5694_v28  ;;  %v5700_v30 = vsel %vm649_vm1, %v5698_v27, 0.0 }
0x1efd   :  { %5701 = vadd.xlane.f32.xlu0 %v5700_v30  ;;  %v7019_v39 = vpop.f32.mrf.mxu0 }
0x1efe   :  { %v5699_v32 = vadd.f32 %v5695_v29, %v9179_v45 }
0x1f00   :  { %v5703_v31 = vsel %vm649_vm1, %v5699_v32, 0.0 }
0x1f01   :  { %5704 = vadd.xlane.f32.xlu1 %v5703_v31 }
0x1f86   :  { %v5702_v33 = vpop.xlane.xlu0 %5701 }
0x1f87   :  { %v5706_v36 = vmul.f32 0.03125, %v5702_v33 }
0x1f89   :  { %v5708_v34 = vsub.f32 %v5698_v27, %v5706_v36 }
0x1f8a   :  { %v5705_v41 = vpop.xlane.xlu1 %5704 }
0x1f8b   :  { %v5707_v44 = vmul.f32 0.03125, %v5705_v41  ;;  %v5710_v46 = vmul.f32 %v5708_v34, %v5708_v34 }
0x1f8d   :  { %v5709_v47 = vsub.f32 %v5699_v32, %v5707_v44  ;;  %v5712_v48 = vsel %vm649_vm1, %v5710_v46, 0.0  ;;  %v8208_v44 = vmov 0  }
0x1f8e   :  { %5713 = vadd.xlane.f32.xlu0 %v5712_v48  ;;  %7208 = vset.pattern.permute.xlu1 %v8208_v44 }
0x1f8f   :  { %v5711_v49 = vmul.f32 %v5709_v47, %v5709_v47  ;;  %7209 = vset.pattern.permute.xlu0 %v8208_v44 }
0x1f91   :  { %v5715_v45 = vsel %vm649_vm1, %v5711_v49, 0.0 }
0x1f92   :  { %5716 = vadd.xlane.f32.xlu0 %v5715_v45 }
0x2017   :  { %v5714_v55 = vpop.xlane.xlu0 %5713 }
0x2018   :  { %v5718_v56 = vmul.f32 0.03125, %v5714_v55  ;;  %v6274_v55 = vld [vmem:[%s8488_s24] ss:$0 sm:$0xff]  ;;  %s6023_s24 = sshll.u32 %s8209_s3, 4  ;;  %s6024_s24 = int_to_ptr.vmem [resolvable:$true] %s6023_s24 }
0x2019   :  { %s8054_s25 = scalar_lea.vmem %s6024_s24, 32  ;;  %p8059_p7 = scmp.lt.s32.totalorder %s6024_s24, %s6024_s24 }
0x201a   :  { %v5720_v57 = vadd.f32 1e-05, %v5718_v56  ;;  %p8055_p6 = scmp.ne.s32.totalorder %s6024_s24, %s8054_s25  ;;  %p8060_p8 = scmp.lt.s32.totalorder %s8054_s25, %s8054_s25 }
0x201b   :  { %v5717_v19 = vpop.xlane.xlu0 %5716 }
0x201c   :  { %7406 = vrsqrt.f32 %v5720_v57  ;;  %v5719_v58 = vmul.f32 0.03125, %v5717_v19  ;;  %p8061_p9 = por %p8060_p8, %p8059_p7 }
0x201e   :  { %v5721_v59 = vadd.f32 1e-05, %v5719_v58  ;;  %p8062_p10 = pnand %p8061_p9, %p8055_p6 }
0x2020   :  { %7408 = vrsqrt.f32 %v5721_v59 }
0x2029   :  { %v7407_v60 = vpop.eup %7406 }
0x202a   :  { %v5724_v43 = vmul.f32 %v7407_v60, %v5708_v34 }
0x202c   :  { %v5733_v42 = vmul.f32 %v6257_v61, %v5724_v43 }
0x202d   :  { %v7409_v62 = vpop.eup %7408 }
0x202e   :  { %v5725_v63 = vmul.f32 %v7409_v62, %v5709_v47  ;;  %v5742_v7 = vadd.f32 %v6258_v0, %v5733_v42  ;;  %v6275_v62 = vld [vmem:[#allocation2] ss:$0 sm:$0xff]  ;;  %v6002_v42 = vlaneseq }
0x2030   :  { %v5734_v6 = vmul.f32 %v6257_v61, %v5725_v63  ;;  %v6003_v63 = vand.u32 127, %v6002_v42 }
0x2032   :  { %v5743_v8 = vadd.f32 %v6258_v0, %v5734_v6  ;;  %v6005_v0 = vshrl.u32 %v6002_v42, 7 }
0x2034   :  { %v5744_v9 = vpack.c.bf16 %v5743_v8, %v5742_v7 }
0x2036   :  { %7025 = vmatmul.mubr.msk.bf16.vlgmr.msra.gmra.mxu1 %vm649_vm1, %v5744_v9 }
0x20f6   :  { %v5805_v13 = vpop.f32.mrf.mxu1 }
0x20f7   :  { %v5806_v5 = vadd.f32 %v6259_v12, %v5805_v13 }
0x20f8   :  { %v7026_v14 = vpop.f32.mrf.mxu1 }
0x20f9   :  { %v5812_v17 = vmax.f32 %v5806_v5, 0.0 }
0x20fa   :  { %v5808_v22 = vpop.f32.mrf.mxu1 }
0x20fb   :  { %v5809_v15 = vadd.f32 %v6259_v12, %v5808_v22 }
0x20fc   :  { %v7027_v16 = vpop.f32.mrf.mxu1 }
0x20fd   :  { %v5813_v18 = vmax.f32 %v5809_v15, 0.0 }
0x20ff   :  { %v5814_v20 = vpack.c.bf16 %v5813_v18, %v5812_v17 }
0x2101   :  { %7045 = vmatmul.mubr.bf16.vlgmr.msra.gmra.mxu0 %v5814_v20 }
0x21c1   :  { %v5920_v2 = vpop.f32.mrf.mxu0 }
0x21c2   :  { %v5921_v21 = vadd.f32 %v6263_v35, %v5920_v2 }
0x21c3   :  { %v7046_v23 = vpop.f32.mrf.mxu0 }
0x21c4   :  { %v5927_v3 = vadd.f32 %v5921_v21, %v5742_v7  ;;  %v6006_v7 = vsub.s32 %v6003_v63, %v6005_v0 }
0x21c5   :  { %v5923_v37 = vpop.f32.mrf.mxu0 }
0x21c6   :  { %v5924_v1 = vadd.f32 %v6263_v35, %v5923_v37  ;;  %v5929_v24 = vsel %vm649_vm1, %v5927_v3, 0.0 }
0x21c7   :  { %5930 = vadd.xlane.f32.xlu1 %v5929_v24  ;;  %v7047_v25 = vpop.f32.mrf.mxu0 }
0x21c8   :  { %v5928_v26 = vadd.f32 %v5924_v1, %v5743_v8 }
0x21ca   :  { %v5932_v27 = vsel %vm649_vm1, %v5928_v26, 0.0 }
0x21cb   :  { %5933 = vadd.xlane.f32.xlu0 %v5932_v27 }
0x2250   :  { %v5931_v28 = vpop.xlane.xlu1 %5930 }
0x2251   :  { %v5935_v29 = vmul.f32 0.03125, %v5931_v28 }
0x2253   :  { %v5937_v30 = vsub.f32 %v5927_v3, %v5935_v29 }
0x2254   :  { %v5934_v39 = vpop.xlane.xlu0 %5933 }
0x2255   :  { %v5936_v32 = vmul.f32 0.03125, %v5934_v39  ;;  %v5939_v31 = vmul.f32 %v5937_v30, %v5937_v30 }
0x2257   :  { %v5938_v33 = vsub.f32 %v5928_v26, %v5936_v32  ;;  %v5941_v36 = vsel %vm649_vm1, %v5939_v31, 0.0 }
0x2258   :  { %5942 = vadd.xlane.f32.xlu1 %v5941_v36 }
0x2259   :  { %v5940_v34 = vmul.f32 %v5938_v33, %v5938_v33 }
0x225b   :  { %v5944_v41 = vsel %vm649_vm1, %v5940_v34, 0.0 }
0x225c   :  { %5945 = vadd.xlane.f32.xlu0 %v5944_v41 }
0x22e1   :  { %v5943_v46 = vpop.xlane.xlu1 %5942 }
0x22e2   :  { %v5947_v47 = vmul.f32 0.03125, %v5943_v46 }
0x22e4   :  { %v5949_v48 = vadd.f32 1e-05, %v5947_v47 }
0x22e5   :  { %v5946_v49 = vpop.xlane.xlu0 %5945 }
0x22e6   :  { %7410 = vrsqrt.f32 %v5949_v48  ;;  %v5948_v45 = vmul.f32 0.03125, %v5946_v49 }
0x22e8   :  { %v5950_v38 = vadd.f32 1e-05, %v5948_v45 }
0x22ea   :  { %7412 = vrsqrt.f32 %v5950_v38 }
0x22f3   :  { %v7411_v50 = vpop.eup %7410 }
0x22f4   :  { %v5953_v52 = vmul.f32 %v7411_v50, %v5937_v30 }
0x22f6   :  { %v5962_v53 = vmul.f32 %v6272_v51, %v5953_v52 }
0x22f7   :  { %v7413_v54 = vpop.eup %7412 }
0x22f8   :  { %v5971_v56 = vadd.f32 %v6273_v40, %v5962_v53  ;;  %v5954_v57 = vmul.f32 %v7413_v54, %v5938_v33 }
0x22fa   :  { %v5980_v19 = vmul.f32 %v6274_v55, %v5971_v56  ;;  %v5963_v58 = vmul.f32 %v6272_v51, %v5954_v57 }
0x22fc   :  { %v5982_v59 = vsel %vm649_vm1, %v5980_v19, 0.0  ;;  %v5972_v60 = vadd.f32 %v6273_v40, %v5963_v58 }
0x22fd   :  { %5983 = vadd.xlane.f32.xlu1 %v5982_v59 }
0x22fe   :  { %v5981_v43 = vmul.f32 %v6274_v55, %v5972_v60 }
0x2300   :  { %v5985_v61 = vsel %vm649_vm1, %v5981_v43, 0.0 }
0x2301   :  { %5986 = vadd.xlane.f32.xlu0 %v5985_v61 }
0x230e   :  { %5995 = vperm.xlu1 %7208, %v6275_v62  }
0x2386   :  { %v5984_v6 = vpop.xlane.xlu1 %5983 }
0x238a   :  { %v5996_v8 = vpop.permute.xlu1 %5995  ;;  %v5987_v9 = vpop.xlane.xlu0 %5986 }
0x238b   :  { %v5998_v10 = vadd.f32 %v5996_v8, %v5984_v6  ;;  %v5999_v4 = vadd.f32 %v5996_v8, %v5987_v9 }
0x238d   :  { %v6007_v11 = vrot.slane %v5998_v10, %v6006_v7  ;;  %v6011_v12 = vrot.slane %v5999_v4, %v6006_v7 }
0x238f   :  { %v6013_v13 = vsel %vm6012_vm6, %v6011_v12, %v6007_v11 }
0x2390   :  { %6016 = vst.msk [vmem:[#allocation53] sm:$0x3] %vm6015_vm7, %v6013_v13 }
0x2391   :  { %8065 = shalt.err (!%p8062_p10)
}
0x2392   :  { %6026 = dma.vmem_to_hbm [thread:$0]  %s6024_s24, 32, %s8496_s12, [#allocation5]  }
0x2393   :  { %8108 = dma.done.wait [#allocation5], 32  }
0x2394   :  { %8109 = vsyncadd [#allocation5], 4294967264 }
0x2395   :  { %6030 = vsyncpa [#allocation4], 1 }
0x2396   :  { %6031 = vsyncpa [#allocation7], 1 }
0x2397   :  { %6032 = vsyncpa [#allocation10], 1 }
0x2398   :  { %6033 = vsyncpa [#allocation13], 1 }
0x2399   :  { %6034 = vsyncpa [#allocation16], 1 }
0x239a   :  { %6035 = vsyncpa [#allocation19], 1 }
0x239b   :  { %6036 = vsyncpa [#allocation22], 1 }
0x239c   :  { %6037 = vsyncpa [#allocation25], 1 }
0x239d   :  { %6038 = vsyncpa [#allocation28], 1 }
0x239e   :  { %6039 = vsyncpa [#allocation31], 1 }
0x239f   :  { %6040 = vsyncpa [#allocation34], 1 }
0x23a0   :  { %6041 = vsyncpa [#allocation37], 1 }
0x23a1   :  { %6042 = vsyncpa [#allocation40], 1 }
0x23a2   :  { %6043 = vsyncpa [#allocation43], 1 }
0x23a3   :  { %6044 = vsyncpa [#allocation46], 1 }
0x23a4   :  { %6045 = vsyncpa [#allocation49], 1 }
0x23a5   :  { %6046 = vsyncpa [#allocation52], 1 }
0x23a6   :  { %6047 = vsyncpa [#allocation5], 1 }

</bundles_post_ra>
